<compile_context>
chip_gen: v5e
topology: v5e:2x2
jax: 0.10.0
libtpu: 0.0.40
codegen_flags: <defaults>
</compile_context>

<pallas_src>
import functools

import jax
import jax.numpy as jnp
from jax import lax
from jax.experimental import pallas as pl
from jax.experimental.pallas import tpu as pltpu

_VMEM_LIMIT = 32 * 1024 * 1024  # explicit scoped-VMEM budget (safe on v5e/v6e/v7x)


# ---------------------------------------------------------------------------
# Single fused ESIM forward kernel.
# ---------------------------------------------------------------------------
def _esim_kernel(x12_ref, xm_ref, lm_ref, rm_ref, m1_ref, m2_ref,
                 wti_ref, bti_ref, wcmp_ref, bcmp_ref,
                 wtc_ref, btc_ref, wa1_ref, ba1_ref, wa2_ref, ba2_ref,
                 out_ref, h_scr, c_scr, inp_scr, *, B, S1, S2):
    """Fused ESIM forward.

      x12_ref : (S, 2B, D) f32   embeddings, both sentences concat along batch
      xm_ref  : (S, 2B)    f32   step masks (lane-dense)
      lm_ref  : (S, S, 2B) f32   left-child masks (child dim in sublanes)
      rm_ref  : (S, S, 2B) f32   right-child masks
      m1_ref  : (B, 1, S)  f32   sentence-1 mask, batch-major for attention
      m2_ref  : (B, 1, S)  f32   sentence-2 mask
      w*_ref  :                  packed weights (matmul operands in bf16)
      out_ref : (B, C)     f32   logits
      h_scr/c_scr/inp_scr : (S, 2B, D) f32 VMEM scratch (tree states, compare out)
    """
    S, B2, D = h_scr.shape

    # ---- shared BinaryTreeLSTM recurrence (state resident in VMEM scratch) ----
    def run_tree(x_ref, w_ref, b_ref):
        h_scr[...] = jnp.zeros_like(h_scr)
        c_scr[...] = jnp.zeros_like(c_scr)

        def step_fn(t, carry):
            xt = x_ref[t]                                   # (2B, D)
            m = jnp.expand_dims(xm_ref[t], -1)              # (2B, 1)
            lm = jnp.expand_dims(lm_ref[t], -1)             # (S, 2B, 1)
            rm = jnp.expand_dims(rm_ref[t], -1)
            h_all = h_scr[...]                              # (S, 2B, D)
            c_all = c_scr[...]

            # child gathers: lh[b,d] = sum_s lmask[t,b,s] * h[s,b,d]
            lh = jnp.sum(lm * h_all, axis=0)                # (2B, D)
            rh = jnp.sum(rm * h_all, axis=0)
            lc = jnp.sum(lm * c_all, axis=0)
            rc = jnp.sum(rm * c_all, axis=0)

            # one fused MXU push: [x_t | lh | rh] @ [Wx5 ; Wlh ; Wrh]
            z = jnp.concatenate([xt, lh, rh], axis=-1).astype(jnp.bfloat16)
            g = jnp.dot(z, w_ref[...],
                        preferred_element_type=jnp.float32) + b_ref[...]

            u = jnp.tanh(g[:, 0:D])
            ig = jax.nn.sigmoid(g[:, D:2 * D])
            lf = jax.nn.sigmoid(g[:, 2 * D:3 * D])
            rf = jax.nn.sigmoid(g[:, 3 * D:4 * D])
            og = jax.nn.sigmoid(g[:, 4 * D:5 * D])

            c_new = ig * u + lf * lc + rf * rc
            h_new = og * jnp.tanh(c_new)

            # Row t is untouched before step t (zero-init), so the reference
            # gating m*new + (1-m)*old reduces to m*new.
            h_scr[t] = m * h_new
            c_scr[t] = m * c_new
            return carry

        lax.fori_loop(0, S, step_fn, 0, unroll=True)

    # ---- stage 1: tree_lstm_intra on the concatenated batch --------------------
    run_tree(x12_ref, wti_ref, bti_ref)

    # ---- stage 2: masked soft alignment + linear_layer_compare (+ReLU) ---------
    # ctx = h * mask is a no-op here: masked-step rows of h are exactly zero.
    s12 = h_scr[...]
    c1 = jnp.transpose(s12[:, :B, :], (1, 0, 2))            # (B, S, D)
    c2 = jnp.transpose(s12[:, B:, :], (1, 0, 2))
    c1l = c1.astype(jnp.bfloat16)
    c2l = c2.astype(jnp.bfloat16)
    m1 = m1_ref[...]                                        # (B, 1, S)
    m2 = m2_ref[...]

    # Score matrix in both orientations -> every softmax reduction is over the
    # lane (last) dim and every context matmul has canonical batched dims.
    wm12 = jnp.einsum('bid,bjd->bij', c1l, c2l,
                      preferred_element_type=jnp.float32)   # (B, S1, S2)
    wm21 = jnp.einsum('bjd,bid->bji', c2l, c1l,
                      preferred_element_type=jnp.float32)   # (B, S2, S1)

    e2 = jnp.exp(wm12 - jnp.max(wm12, axis=-1, keepdims=True)) * m2   # mask over j
    e1 = jnp.exp(wm21 - jnp.max(wm21, axis=-1, keepdims=True)) * m1   # mask over i
    # denominator floor only guards degenerate all-masked rows (reference NaNs there)
    beta = e2 / jnp.maximum(jnp.sum(e2, axis=-1, keepdims=True), 1e-30)     # (B,S1,S2)
    alpha_t = e1 / jnp.maximum(jnp.sum(e1, axis=-1, keepdims=True), 1e-30)  # (B,S2,S1)

    # ctx1_[b,i,d] = sum_j beta[b,i,j] * c2[b,j,d]
    a1 = jnp.einsum('bij,bjd->bid', beta.astype(jnp.bfloat16), c2l,
                    preferred_element_type=jnp.float32)     # (B, S1, D)
    # ctx2_[b,j,d] = sum_i alpha[b,i,j] * c1[b,i,d]   (alpha_t[b,j,i] == alpha[b,i,j])
    a2 = jnp.einsum('bji,bid->bjd', alpha_t.astype(jnp.bfloat16), c1l,
                    preferred_element_type=jnp.float32)     # (B, S2, D)

    def feats(u, v):                                        # (B,S,D)x2 -> (B*S, 4D)
        return jnp.concatenate([u, v, u * v, u - v], axis=-1).reshape(-1, 4 * D)

    f12 = jnp.concatenate([feats(c1, a1), feats(c2, a2)],
                          axis=0).astype(jnp.bfloat16)      # (2*B*S, 4D)
    hc = jnp.dot(f12, wcmp_ref[...],
                 preferred_element_type=jnp.float32) + bcmp_ref[...]
    hc = jnp.maximum(hc, 0.0)                               # ReLU
    r1 = hc[:B * S].reshape(B, S, D)
    r2 = hc[B * S:].reshape(B, S, D)
    inp_scr[...] = jnp.concatenate(
        [jnp.transpose(r1, (1, 0, 2)), jnp.transpose(r2, (1, 0, 2))], axis=1)

    # ---- stage 3: tree_lstm_compare on the compare features --------------------
    run_tree(inp_scr, wtc_ref, btc_ref)

    # ---- stage 4: aggregate: mean/max pooling over time + 2-layer MLP ----------
    v = h_scr[...]                                          # (S, 2B, D)
    v1 = v[:S1, :B, :]                                      # true-length slices
    v2 = v[:S2, B:, :]
    pooled = jnp.concatenate([
        jnp.sum(v1, axis=0) * (1.0 / S1),                   # mean over true S1 steps
        jnp.max(v1, axis=0),
        jnp.sum(v2, axis=0) * (1.0 / S2),
        jnp.max(v2, axis=0),
    ], axis=-1)                                             # (B, 4D)
    ha = jnp.dot(pooled.astype(jnp.bfloat16), wa1_ref[...],
                 preferred_element_type=jnp.float32) + ba1_ref[...]
    ha = jnp.maximum(ha, 0.0)
    out_ref[...] = jnp.dot(ha.astype(jnp.bfloat16), wa2_ref[...],
                           preferred_element_type=jnp.float32) + ba2_ref[...]


# ---------------------------------------------------------------------------
# Parameters (packed for the fused kernel).
# ---------------------------------------------------------------------------
def init_params(key, vocab_size, D, num_classes):
    keys = jax.random.split(key, 8)

    def nrm(k, shape, scale=0.1):
        return (scale * jax.random.normal(k, shape)).astype(jnp.float32)

    def tree_params(k):
        # Reference uses orthogonal init; deterministic Gaussians here keep the
        # packing structure: lf and rf SHARE the same x-projection fx (and bias).
        ks = jax.random.split(k, 10)
        cx, ix, fx, ox = (nrm(ks[i], (D, D)) for i in range(4))
        bcx, bix, bfx, box = (nrm(ks[4 + i], (1, D)) for i in range(4))
        wlh = nrm(ks[8], (D, 5 * D))                 # cols = [ulh, ilh, lflh, rflh, olh]
        wrh = nrm(ks[9], (D, 5 * D))                 # cols = [urh, irh, lfrh, rfrh, orh]
        wx5 = jnp.concatenate([cx, ix, fx, fx, ox], axis=1)    # gate order [u,i,lf,rf,o]
        bx5 = jnp.concatenate([bcx, bix, bfx, bfx, box], axis=1)
        return dict(w=jnp.concatenate([wx5, wlh, wrh], axis=0),  # (3D, 5D)
                    b=bx5)                                        # (1, 5D)

    return dict(
        emb=nrm(keys[0], (vocab_size, D), 1.0),
        tree_intra=tree_params(keys[1]),
        tree_cmp=tree_params(keys[2]),
        w_cmp=nrm(keys[3], (4 * D, D), 0.01),
        b_cmp=jnp.zeros((1, D), jnp.float32),
        w_a1=nrm(keys[4], (4 * D, D), 0.01),
        b_a1=jnp.zeros((1, D), jnp.float32),
        w_a2=nrm(keys[5], (D, num_classes), 0.01),
        b_a2=jnp.zeros((1, num_classes), jnp.float32),
    )


# ---------------------------------------------------------------------------
# ESIM forward (plain-JAX glue: embedding gather, padding, mask transposes).
# ---------------------------------------------------------------------------
def esim_forward(params, x1, x1_mask, x1_left, x1_right,
                 x2, x2_mask, x2_left, x2_right):
    emb = params['emb']
    S1, B = x1.shape
    S2 = x2.shape[0]
    S = max(S1, S2)
    D = emb.shape[1]
    C = params['w_a2'].shape[1]

    # word-embedding lookup (gather) kept in plain JAX glue
    e1 = jnp.take(emb, x1, axis=0)                   # (S1, B, D)
    e2 = jnp.take(emb, x2, axis=0)                   # (S2, B, D)

    def pad_steps(a, s_true):                        # pad leading step dim to S
        a = a.astype(jnp.float32)
        if s_true == S:
            return a
        pad = [(0, S - s_true)] + [(0, 0)] * (a.ndim - 1)
        return jnp.pad(a, pad)

    def prep_child(m, s_true):                       # (S_true,B,S_true) -> (S,S,B)
        m = m.astype(jnp.float32)
        if s_true != S:
            m = jnp.pad(m, ((0, S - s_true), (0, 0), (0, S - s_true)))
        return jnp.transpose(m, (0, 2, 1))           # child dim to sublanes, B lane-dense

    # both sentences share weights -> one concatenated batch through the kernel
    x12 = jnp.concatenate([pad_steps(e1, S1), pad_steps(e2, S2)], axis=1)   # (S, 2B, D)
    m1p = pad_steps(x1_mask, S1)                     # (S, B)
    m2p = pad_steps(x2_mask, S2)
    xm12 = jnp.concatenate([m1p, m2p], axis=1)       # (S, 2B)
    lm12 = jnp.concatenate([prep_child(x1_left, S1), prep_child(x2_left, S2)], axis=2)
    rm12 = jnp.concatenate([prep_child(x1_right, S1), prep_child(x2_right, S2)], axis=2)
    m1b = jnp.transpose(m1p)[:, None, :].astype(jnp.float32)   # (B, 1, S)
    m2b = jnp.transpose(m2p)[:, None, :].astype(jnp.float32)

    ti = params['tree_intra']
    tc = params['tree_cmp']
    kernel = functools.partial(_esim_kernel, B=B, S1=S1, S2=S2)

    return pl.pallas_call(
        kernel,
        out_shape=jax.ShapeDtypeStruct((B, C), jnp.float32),
        scratch_shapes=[pltpu.VMEM((S, 2 * B, D), jnp.float32)] * 3,
        compiler_params=pltpu.CompilerParams(vmem_limit_bytes=_VMEM_LIMIT),
    )(x12, xm12, lm12, rm12, m1b, m2b,
      ti['w'].astype(jnp.bfloat16), ti['b'].astype(jnp.float32),
      params['w_cmp'].astype(jnp.bfloat16), params['b_cmp'].astype(jnp.float32),
      tc['w'].astype(jnp.bfloat16), tc['b'].astype(jnp.float32),
      params['w_a1'].astype(jnp.bfloat16), params['b_a1'].astype(jnp.float32),
      params['w_a2'].astype(jnp.bfloat16), params['b_a2'].astype(jnp.float32))


if __name__ == "__main__":
    B, S1, S2, D, C, V = 2, 8, 8, 32, 3, 50
    key = jax.random.PRNGKey(0)
    kp, k1, k2, k3, k4, k5, k6 = jax.random.split(key, 7)
    params = init_params(kp, V, D, C)

    x1 = jax.random.randint(k1, (S1, B), 0, V)
    x2 = jax.random.randint(k2, (S2, B), 0, V)
    # masks: batch 0 full length, batch 1 shorter
    x1_mask = jnp.ones((S1, B), jnp.float32).at[6:, 1].set(0.0)
    x2_mask = jnp.ones((S2, B), jnp.float32).at[5:, 1].set(0.0)
    x1_left = (jax.random.uniform(k3, (S1, B, S1)) < 0.4).astype(jnp.float32)
    x1_right = (jax.random.uniform(k4, (S1, B, S1)) < 0.4).astype(jnp.float32)
    x2_left = (jax.random.uniform(k5, (S2, B, S2)) < 0.4).astype(jnp.float32)
    x2_right = (jax.random.uniform(k6, (S2, B, S2)) < 0.4).astype(jnp.float32)

    logits = jax.jit(esim_forward)(params, x1, x1_mask, x1_left, x1_right,
                                   x2, x2_mask, x2_left, x2_right)
    jax.block_until_ready(logits)
    assert logits.shape == (B, C) and logits.dtype == jnp.float32
    print("KERNEL_OK")
</pallas_src>

<mosaic_0001>
module attributes {stable_mosaic.version = 11 : i64} {
  func.func @_esim_kernel(%arg0: memref<8x4x32xf32, #tpu.memory_space<vmem>>, %arg1: memref<8x4xf32, #tpu.memory_space<vmem>>, %arg2: memref<8x8x4xf32, #tpu.memory_space<vmem>>, %arg3: memref<8x8x4xf32, #tpu.memory_space<vmem>>, %arg4: memref<2x1x8xf32, #tpu.memory_space<vmem>>, %arg5: memref<2x1x8xf32, #tpu.memory_space<vmem>>, %arg6: memref<96x160xbf16, #tpu.memory_space<vmem>>, %arg7: memref<1x160xf32, #tpu.memory_space<vmem>>, %arg8: memref<128x32xbf16, #tpu.memory_space<vmem>>, %arg9: memref<1x32xf32, #tpu.memory_space<vmem>>, %arg10: memref<96x160xbf16, #tpu.memory_space<vmem>>, %arg11: memref<1x160xf32, #tpu.memory_space<vmem>>, %arg12: memref<128x32xbf16, #tpu.memory_space<vmem>>, %arg13: memref<1x32xf32, #tpu.memory_space<vmem>>, %arg14: memref<32x3xbf16, #tpu.memory_space<vmem>>, %arg15: memref<1x3xf32, #tpu.memory_space<vmem>>, %arg16: memref<2x3xf32, #tpu.memory_space<vmem>>, %arg17: memref<8x4x32xf32, #tpu.memory_space<vmem>>, %arg18: memref<8x4x32xf32, #tpu.memory_space<vmem>>, %arg19: memref<8x4x32xf32, #tpu.memory_space<vmem>>) attributes {dimension_semantics = [], scalar_prefetch = 0 : i64, scratch_operands = 3 : i64, tpu.core_type = #tpu.core_type<tc>} {
    %cst = arith.constant 0.000000e+00 : f32
    %0 = vector.broadcast %cst : f32 to vector<8x4x32xf32>
    %c0 = arith.constant 0 : index
    %c0_0 = arith.constant 0 : index
    %c0_1 = arith.constant 0 : index
    %1 = vector.load %arg17[%c0, %c0_0, %c0_1] : memref<8x4x32xf32, #tpu.memory_space<vmem>>, vector<8x4x32xf32>
    tpu.vector_store %arg17[%c0, %c0_0, %c0_1], %0 {strides = array<i32>} : memref<8x4x32xf32, #tpu.memory_space<vmem>>, vector<8x4x32xf32>,
    %cst_2 = arith.constant 0.000000e+00 : f32
    %2 = vector.broadcast %cst_2 : f32 to vector<8x4x32xf32>
    %c0_3 = arith.constant 0 : index
    %c0_4 = arith.constant 0 : index
    %c0_5 = arith.constant 0 : index
    %3 = vector.load %arg18[%c0_3, %c0_4, %c0_5] : memref<8x4x32xf32, #tpu.memory_space<vmem>>, vector<8x4x32xf32>
    tpu.vector_store %arg18[%c0_3, %c0_4, %c0_5], %2 {strides = array<i32>} : memref<8x4x32xf32, #tpu.memory_space<vmem>>, vector<8x4x32xf32>,
    %c0_i32 = arith.constant 0 : i32
    %4 = arith.index_cast %c0_i32 : i32 to index
    %c0_6 = arith.constant 0 : index
    %c0_7 = arith.constant 0 : index
    %5 = vector.load %arg0[%4, %c0_6, %c0_7] : memref<8x4x32xf32, #tpu.memory_space<vmem>>, vector<1x4x32xf32>
    %6 = vector.shape_cast %5 : vector<1x4x32xf32> to vector<4x32xf32>
    %7 = arith.index_cast %c0_i32 : i32 to index
    %c0_8 = arith.constant 0 : index
    %8 = vector.load %arg1[%7, %c0_8] : memref<8x4xf32, #tpu.memory_space<vmem>>, vector<1x4xf32>
    %9 = vector.shape_cast %8 : vector<1x4xf32> to vector<4xf32>
    %10 = vector.shape_cast %9 : vector<4xf32> to vector<4x1xf32>
    %11 = arith.index_cast %c0_i32 : i32 to index
    %c0_9 = arith.constant 0 : index
    %c0_10 = arith.constant 0 : index
    %12 = vector.load %arg2[%11, %c0_9, %c0_10] : memref<8x8x4xf32, #tpu.memory_space<vmem>>, vector<1x8x4xf32>
    %13 = vector.shape_cast %12 : vector<1x8x4xf32> to vector<8x4xf32>
    %14 = vector.shape_cast %13 : vector<8x4xf32> to vector<8x4x1xf32>
    %15 = arith.index_cast %c0_i32 : i32 to index
    %c0_11 = arith.constant 0 : index
    %c0_12 = arith.constant 0 : index
    %16 = vector.load %arg3[%15, %c0_11, %c0_12] : memref<8x8x4xf32, #tpu.memory_space<vmem>>, vector<1x8x4xf32>
    %17 = vector.shape_cast %16 : vector<1x8x4xf32> to vector<8x4xf32>
    %18 = vector.shape_cast %17 : vector<8x4xf32> to vector<8x4x1xf32>
    %c0_13 = arith.constant 0 : index
    %c0_14 = arith.constant 0 : index
    %c0_15 = arith.constant 0 : index
    %19 = vector.load %arg17[%c0_13, %c0_14, %c0_15] : memref<8x4x32xf32, #tpu.memory_space<vmem>>, vector<8x4x32xf32>
    %c0_16 = arith.constant 0 : index
    %c0_17 = arith.constant 0 : index
    %c0_18 = arith.constant 0 : index
    %20 = vector.load %arg18[%c0_16, %c0_17, %c0_18] : memref<8x4x32xf32, #tpu.memory_space<vmem>>, vector<8x4x32xf32>
    %21 = vector.broadcast %14 : vector<8x4x1xf32> to vector<8x4x32xf32>
    %22 = arith.mulf %21, %19 : vector<8x4x32xf32>
    %cst_19 = arith.constant dense<0.000000e+00> : vector<4x32xf32>
    %23 = vector.multi_reduction <add>, %22, %cst_19 [0] : vector<8x4x32xf32> to vector<4x32xf32>
    %24 = vector.broadcast %18 : vector<8x4x1xf32> to vector<8x4x32xf32>
    %25 = arith.mulf %24, %19 : vector<8x4x32xf32>
    %cst_20 = arith.constant dense<0.000000e+00> : vector<4x32xf32>
    %26 = vector.multi_reduction <add>, %25, %cst_20 [0] : vector<8x4x32xf32> to vector<4x32xf32>
    %27 = vector.broadcast %14 : vector<8x4x1xf32> to vector<8x4x32xf32>
    %28 = arith.mulf %27, %20 : vector<8x4x32xf32>
    %cst_21 = arith.constant dense<0.000000e+00> : vector<4x32xf32>
    %29 = vector.multi_reduction <add>, %28, %cst_21 [0] : vector<8x4x32xf32> to vector<4x32xf32>
    %30 = vector.broadcast %18 : vector<8x4x1xf32> to vector<8x4x32xf32>
    %31 = arith.mulf %30, %20 : vector<8x4x32xf32>
    %cst_22 = arith.constant dense<0.000000e+00> : vector<4x32xf32>
    %32 = vector.multi_reduction <add>, %31, %cst_22 [0] : vector<8x4x32xf32> to vector<4x32xf32>
    %33 = tpu.concatenate %6, %23, %26 in 1 : vector<4x32xf32>, vector<4x32xf32>, vector<4x32xf32> -> vector<4x96xf32>
    %34 = arith.truncf %33 : vector<4x96xf32> to vector<4x96xbf16>
    %c0_23 = arith.constant 0 : index
    %c0_24 = arith.constant 0 : index
    %35 = vector.load %arg6[%c0_23, %c0_24] : memref<96x160xbf16, #tpu.memory_space<vmem>>, vector<96x160xbf16>
    %cst_25 = arith.constant dense<0.000000e+00> : vector<4x160xf32>
    %36 = tpu.matmul %34, %35, %cst_25 {dimension_numbers = #tpu.dot_dimension_numbers<[1], [0], [0], [1], [0, 0, 1, 1], [], []>} : vector<4x96xbf16>, vector<96x160xbf16>, vector<4x160xf32> -> vector<4x160xf32>
    %c0_26 = arith.constant 0 : index
    %c0_27 = arith.constant 0 : index
    %37 = vector.load %arg7[%c0_26, %c0_27] : memref<1x160xf32, #tpu.memory_space<vmem>>, vector<1x160xf32>
    %38 = vector.broadcast %37 : vector<1x160xf32> to vector<4x160xf32>
    %39 = arith.addf %36, %38 : vector<4x160xf32>
    %40 = vector.extract_strided_slice %39 {offsets = [0, 0], sizes = [4, 32], strides = [1, 1]} : vector<4x160xf32> to vector<4x32xf32>
    %41 = math.tanh %40 : vector<4x32xf32>
    %42 = vector.extract_strided_slice %39 {offsets = [0, 32], sizes = [4, 32], strides = [1, 1]} : vector<4x160xf32> to vector<4x32xf32>
    %43 = arith.negf %42 : vector<4x32xf32>
    %44 = math.exp %43 : vector<4x32xf32>
    %cst_28 = arith.constant 1.000000e+00 : f32
    %45 = vector.broadcast %cst_28 : f32 to vector<4x32xf32>
    %46 = arith.addf %45, %44 : vector<4x32xf32>
    %47 = arith.divf %45, %46 : vector<4x32xf32>
    %48 = vector.extract_strided_slice %39 {offsets = [0, 64], sizes = [4, 32], strides = [1, 1]} : vector<4x160xf32> to vector<4x32xf32>
    %49 = arith.negf %48 : vector<4x32xf32>
    %50 = math.exp %49 : vector<4x32xf32>
    %cst_29 = arith.constant 1.000000e+00 : f32
    %51 = vector.broadcast %cst_29 : f32 to vector<4x32xf32>
    %52 = arith.addf %51, %50 : vector<4x32xf32>
    %53 = arith.divf %51, %52 : vector<4x32xf32>
    %54 = vector.extract_strided_slice %39 {offsets = [0, 96], sizes = [4, 32], strides = [1, 1]} : vector<4x160xf32> to vector<4x32xf32>
    %55 = arith.negf %54 : vector<4x32xf32>
    %56 = math.exp %55 : vector<4x32xf32>
    %cst_30 = arith.constant 1.000000e+00 : f32
    %57 = vector.broadcast %cst_30 : f32 to vector<4x32xf32>
    %58 = arith.addf %57, %56 : vector<4x32xf32>
    %59 = arith.divf %57, %58 : vector<4x32xf32>
    %60 = vector.extract_strided_slice %39 {offsets = [0, 128], sizes = [4, 32], strides = [1, 1]} : vector<4x160xf32> to vector<4x32xf32>
    %61 = arith.negf %60 : vector<4x32xf32>
    %62 = math.exp %61 : vector<4x32xf32>
    %cst_31 = arith.constant 1.000000e+00 : f32
    %63 = vector.broadcast %cst_31 : f32 to vector<4x32xf32>
    %64 = arith.addf %63, %62 : vector<4x32xf32>
    %65 = arith.divf %63, %64 : vector<4x32xf32>
    %66 = arith.mulf %47, %41 : vector<4x32xf32>
    %67 = arith.mulf %53, %29 : vector<4x32xf32>
    %68 = arith.addf %66, %67 : vector<4x32xf32>
    %69 = arith.mulf %59, %32 : vector<4x32xf32>
    %70 = arith.addf %68, %69 : vector<4x32xf32>
    %71 = math.tanh %70 : vector<4x32xf32>
    %72 = arith.mulf %65, %71 : vector<4x32xf32>
    %73 = vector.broadcast %10 : vector<4x1xf32> to vector<4x32xf32>
    %74 = arith.mulf %73, %72 : vector<4x32xf32>
    %75 = arith.index_cast %c0_i32 : i32 to index
    %c0_32 = arith.constant 0 : index
    %c0_33 = arith.constant 0 : index
    %76 = vector.load %arg17[%75, %c0_32, %c0_33] : memref<8x4x32xf32, #tpu.memory_space<vmem>>, vector<1x4x32xf32>
    %77 = vector.shape_cast %76 : vector<1x4x32xf32> to vector<4x32xf32>
    %78 = vector.shape_cast %74 : vector<4x32xf32> to vector<1x4x32xf32>
    tpu.vector_store %arg17[%75, %c0_32, %c0_33], %78 {strides = array<i32>} : memref<8x4x32xf32, #tpu.memory_space<vmem>>, vector<1x4x32xf32>,
    %79 = vector.broadcast %10 : vector<4x1xf32> to vector<4x32xf32>
    %80 = arith.mulf %79, %70 : vector<4x32xf32>
    %81 = arith.index_cast %c0_i32 : i32 to index
    %c0_34 = arith.constant 0 : index
    %c0_35 = arith.constant 0 : index
    %82 = vector.load %arg18[%81, %c0_34, %c0_35] : memref<8x4x32xf32, #tpu.memory_space<vmem>>, vector<1x4x32xf32>
    %83 = vector.shape_cast %82 : vector<1x4x32xf32> to vector<4x32xf32>
    %84 = vector.shape_cast %80 : vector<4x32xf32> to vector<1x4x32xf32>
    tpu.vector_store %arg18[%81, %c0_34, %c0_35], %84 {strides = array<i32>} : memref<8x4x32xf32, #tpu.memory_space<vmem>>, vector<1x4x32xf32>,
    %c1_i32 = arith.constant 1 : i32
    %85 = arith.index_cast %c1_i32 : i32 to index
    %c0_36 = arith.constant 0 : index
    %c0_37 = arith.constant 0 : index
    %86 = vector.load %arg0[%85, %c0_36, %c0_37] : memref<8x4x32xf32, #tpu.memory_space<vmem>>, vector<1x4x32xf32>
    %87 = vector.shape_cast %86 : vector<1x4x32xf32> to vector<4x32xf32>
    %88 = arith.index_cast %c1_i32 : i32 to index
    %c0_38 = arith.constant 0 : index
    %89 = vector.load %arg1[%88, %c0_38] : memref<8x4xf32, #tpu.memory_space<vmem>>, vector<1x4xf32>
    %90 = vector.shape_cast %89 : vector<1x4xf32> to vector<4xf32>
    %91 = vector.shape_cast %90 : vector<4xf32> to vector<4x1xf32>
    %92 = arith.index_cast %c1_i32 : i32 to index
    %c0_39 = arith.constant 0 : index
    %c0_40 = arith.constant 0 : index
    %93 = vector.load %arg2[%92, %c0_39, %c0_40] : memref<8x8x4xf32, #tpu.memory_space<vmem>>, vector<1x8x4xf32>
    %94 = vector.shape_cast %93 : vector<1x8x4xf32> to vector<8x4xf32>
    %95 = vector.shape_cast %94 : vector<8x4xf32> to vector<8x4x1xf32>
    %96 = arith.index_cast %c1_i32 : i32 to index
    %c0_41 = arith.constant 0 : index
    %c0_42 = arith.constant 0 : index
    %97 = vector.load %arg3[%96, %c0_41, %c0_42] : memref<8x8x4xf32, #tpu.memory_space<vmem>>, vector<1x8x4xf32>
    %98 = vector.shape_cast %97 : vector<1x8x4xf32> to vector<8x4xf32>
    %99 = vector.shape_cast %98 : vector<8x4xf32> to vector<8x4x1xf32>
    %c0_43 = arith.constant 0 : index
    %c0_44 = arith.constant 0 : index
    %c0_45 = arith.constant 0 : index
    %100 = vector.load %arg17[%c0_43, %c0_44, %c0_45] : memref<8x4x32xf32, #tpu.memory_space<vmem>>, vector<8x4x32xf32>
    %c0_46 = arith.constant 0 : index
    %c0_47 = arith.constant 0 : index
    %c0_48 = arith.constant 0 : index
    %101 = vector.load %arg18[%c0_46, %c0_47, %c0_48] : memref<8x4x32xf32, #tpu.memory_space<vmem>>, vector<8x4x32xf32>
    %102 = vector.broadcast %95 : vector<8x4x1xf32> to vector<8x4x32xf32>
    %103 = arith.mulf %102, %100 : vector<8x4x32xf32>
    %cst_49 = arith.constant dense<0.000000e+00> : vector<4x32xf32>
    %104 = vector.multi_reduction <add>, %103, %cst_49 [0] : vector<8x4x32xf32> to vector<4x32xf32>
    %105 = vector.broadcast %99 : vector<8x4x1xf32> to vector<8x4x32xf32>
    %106 = arith.mulf %105, %100 : vector<8x4x32xf32>
    %cst_50 = arith.constant dense<0.000000e+00> : vector<4x32xf32>
    %107 = vector.multi_reduction <add>, %106, %cst_50 [0] : vector<8x4x32xf32> to vector<4x32xf32>
    %108 = vector.broadcast %95 : vector<8x4x1xf32> to vector<8x4x32xf32>
    %109 = arith.mulf %108, %101 : vector<8x4x32xf32>
    %cst_51 = arith.constant dense<0.000000e+00> : vector<4x32xf32>
    %110 = vector.multi_reduction <add>, %109, %cst_51 [0] : vector<8x4x32xf32> to vector<4x32xf32>
    %111 = vector.broadcast %99 : vector<8x4x1xf32> to vector<8x4x32xf32>
    %112 = arith.mulf %111, %101 : vector<8x4x32xf32>
    %cst_52 = arith.constant dense<0.000000e+00> : vector<4x32xf32>
    %113 = vector.multi_reduction <add>, %112, %cst_52 [0] : vector<8x4x32xf32> to vector<4x32xf32>
    %114 = tpu.concatenate %87, %104, %107 in 1 : vector<4x32xf32>, vector<4x32xf32>, vector<4x32xf32> -> vector<4x96xf32>
    %115 = arith.truncf %114 : vector<4x96xf32> to vector<4x96xbf16>
    %c0_53 = arith.constant 0 : index
    %c0_54 = arith.constant 0 : index
    %116 = vector.load %arg6[%c0_53, %c0_54] : memref<96x160xbf16, #tpu.memory_space<vmem>>, vector<96x160xbf16>
    %cst_55 = arith.constant dense<0.000000e+00> : vector<4x160xf32>
    %117 = tpu.matmul %115, %116, %cst_55 {dimension_numbers = #tpu.dot_dimension_numbers<[1], [0], [0], [1], [0, 0, 1, 1], [], []>} : vector<4x96xbf16>, vector<96x160xbf16>, vector<4x160xf32> -> vector<4x160xf32>
    %c0_56 = arith.constant 0 : index
    %c0_57 = arith.constant 0 : index
    %118 = vector.load %arg7[%c0_56, %c0_57] : memref<1x160xf32, #tpu.memory_space<vmem>>, vector<1x160xf32>
    %119 = vector.broadcast %118 : vector<1x160xf32> to vector<4x160xf32>
    %120 = arith.addf %117, %119 : vector<4x160xf32>
    %121 = vector.extract_strided_slice %120 {offsets = [0, 0], sizes = [4, 32], strides = [1, 1]} : vector<4x160xf32> to vector<4x32xf32>
    %122 = math.tanh %121 : vector<4x32xf32>
    %123 = vector.extract_strided_slice %120 {offsets = [0, 32], sizes = [4, 32], strides = [1, 1]} : vector<4x160xf32> to vector<4x32xf32>
    %124 = arith.negf %123 : vector<4x32xf32>
    %125 = math.exp %124 : vector<4x32xf32>
    %cst_58 = arith.constant 1.000000e+00 : f32
    %126 = vector.broadcast %cst_58 : f32 to vector<4x32xf32>
    %127 = arith.addf %126, %125 : vector<4x32xf32>
    %128 = arith.divf %126, %127 : vector<4x32xf32>
    %129 = vector.extract_strided_slice %120 {offsets = [0, 64], sizes = [4, 32], strides = [1, 1]} : vector<4x160xf32> to vector<4x32xf32>
    %130 = arith.negf %129 : vector<4x32xf32>
    %131 = math.exp %130 : vector<4x32xf32>
    %cst_59 = arith.constant 1.000000e+00 : f32
    %132 = vector.broadcast %cst_59 : f32 to vector<4x32xf32>
    %133 = arith.addf %132, %131 : vector<4x32xf32>
    %134 = arith.divf %132, %133 : vector<4x32xf32>
    %135 = vector.extract_strided_slice %120 {offsets = [0, 96], sizes = [4, 32], strides = [1, 1]} : vector<4x160xf32> to vector<4x32xf32>
    %136 = arith.negf %135 : vector<4x32xf32>
    %137 = math.exp %136 : vector<4x32xf32>
    %cst_60 = arith.constant 1.000000e+00 : f32
    %138 = vector.broadcast %cst_60 : f32 to vector<4x32xf32>
    %139 = arith.addf %138, %137 : vector<4x32xf32>
    %140 = arith.divf %138, %139 : vector<4x32xf32>
    %141 = vector.extract_strided_slice %120 {offsets = [0, 128], sizes = [4, 32], strides = [1, 1]} : vector<4x160xf32> to vector<4x32xf32>
    %142 = arith.negf %141 : vector<4x32xf32>
    %143 = math.exp %142 : vector<4x32xf32>
    %cst_61 = arith.constant 1.000000e+00 : f32
    %144 = vector.broadcast %cst_61 : f32 to vector<4x32xf32>
    %145 = arith.addf %144, %143 : vector<4x32xf32>
    %146 = arith.divf %144, %145 : vector<4x32xf32>
    %147 = arith.mulf %128, %122 : vector<4x32xf32>
    %148 = arith.mulf %134, %110 : vector<4x32xf32>
    %149 = arith.addf %147, %148 : vector<4x32xf32>
    %150 = arith.mulf %140, %113 : vector<4x32xf32>
    %151 = arith.addf %149, %150 : vector<4x32xf32>
    %152 = math.tanh %151 : vector<4x32xf32>
    %153 = arith.mulf %146, %152 : vector<4x32xf32>
    %154 = vector.broadcast %91 : vector<4x1xf32> to vector<4x32xf32>
    %155 = arith.mulf %154, %153 : vector<4x32xf32>
    %156 = arith.index_cast %c1_i32 : i32 to index
    %c0_62 = arith.constant 0 : index
    %c0_63 = arith.constant 0 : index
    %157 = vector.load %arg17[%156, %c0_62, %c0_63] : memref<8x4x32xf32, #tpu.memory_space<vmem>>, vector<1x4x32xf32>
    %158 = vector.shape_cast %157 : vector<1x4x32xf32> to vector<4x32xf32>
    %159 = vector.shape_cast %155 : vector<4x32xf32> to vector<1x4x32xf32>
    tpu.vector_store %arg17[%156, %c0_62, %c0_63], %159 {strides = array<i32>} : memref<8x4x32xf32, #tpu.memory_space<vmem>>, vector<1x4x32xf32>,
    %160 = vector.broadcast %91 : vector<4x1xf32> to vector<4x32xf32>
    %161 = arith.mulf %160, %151 : vector<4x32xf32>
    %162 = arith.index_cast %c1_i32 : i32 to index
    %c0_64 = arith.constant 0 : index
    %c0_65 = arith.constant 0 : index
    %163 = vector.load %arg18[%162, %c0_64, %c0_65] : memref<8x4x32xf32, #tpu.memory_space<vmem>>, vector<1x4x32xf32>
    %164 = vector.shape_cast %163 : vector<1x4x32xf32> to vector<4x32xf32>
    %165 = vector.shape_cast %161 : vector<4x32xf32> to vector<1x4x32xf32>
    tpu.vector_store %arg18[%162, %c0_64, %c0_65], %165 {strides = array<i32>} : memref<8x4x32xf32, #tpu.memory_space<vmem>>, vector<1x4x32xf32>,
    %c2_i32 = arith.constant 2 : i32
    %166 = arith.index_cast %c2_i32 : i32 to index
    %c0_66 = arith.constant 0 : index
    %c0_67 = arith.constant 0 : index
    %167 = vector.load %arg0[%166, %c0_66, %c0_67] : memref<8x4x32xf32, #tpu.memory_space<vmem>>, vector<1x4x32xf32>
    %168 = vector.shape_cast %167 : vector<1x4x32xf32> to vector<4x32xf32>
    %169 = arith.index_cast %c2_i32 : i32 to index
    %c0_68 = arith.constant 0 : index
    %170 = vector.load %arg1[%169, %c0_68] : memref<8x4xf32, #tpu.memory_space<vmem>>, vector<1x4xf32>
    %171 = vector.shape_cast %170 : vector<1x4xf32> to vector<4xf32>
    %172 = vector.shape_cast %171 : vector<4xf32> to vector<4x1xf32>
    %173 = arith.index_cast %c2_i32 : i32 to index
    %c0_69 = arith.constant 0 : index
    %c0_70 = arith.constant 0 : index
    %174 = vector.load %arg2[%173, %c0_69, %c0_70] : memref<8x8x4xf32, #tpu.memory_space<vmem>>, vector<1x8x4xf32>
    %175 = vector.shape_cast %174 : vector<1x8x4xf32> to vector<8x4xf32>
    %176 = vector.shape_cast %175 : vector<8x4xf32> to vector<8x4x1xf32>
    %177 = arith.index_cast %c2_i32 : i32 to index
    %c0_71 = arith.constant 0 : index
    %c0_72 = arith.constant 0 : index
    %178 = vector.load %arg3[%177, %c0_71, %c0_72] : memref<8x8x4xf32, #tpu.memory_space<vmem>>, vector<1x8x4xf32>
    %179 = vector.shape_cast %178 : vector<1x8x4xf32> to vector<8x4xf32>
    %180 = vector.shape_cast %179 : vector<8x4xf32> to vector<8x4x1xf32>
    %c0_73 = arith.constant 0 : index
    %c0_74 = arith.constant 0 : index
    %c0_75 = arith.constant 0 : index
    %181 = vector.load %arg17[%c0_73, %c0_74, %c0_75] : memref<8x4x32xf32, #tpu.memory_space<vmem>>, vector<8x4x32xf32>
    %c0_76 = arith.constant 0 : index
    %c0_77 = arith.constant 0 : index
    %c0_78 = arith.constant 0 : index
    %182 = vector.load %arg18[%c0_76, %c0_77, %c0_78] : memref<8x4x32xf32, #tpu.memory_space<vmem>>, vector<8x4x32xf32>
    %183 = vector.broadcast %176 : vector<8x4x1xf32> to vector<8x4x32xf32>
    %184 = arith.mulf %183, %181 : vector<8x4x32xf32>
    %cst_79 = arith.constant dense<0.000000e+00> : vector<4x32xf32>
    %185 = vector.multi_reduction <add>, %184, %cst_79 [0] : vector<8x4x32xf32> to vector<4x32xf32>
    %186 = vector.broadcast %180 : vector<8x4x1xf32> to vector<8x4x32xf32>
    %187 = arith.mulf %186, %181 : vector<8x4x32xf32>
    %cst_80 = arith.constant dense<0.000000e+00> : vector<4x32xf32>
    %188 = vector.multi_reduction <add>, %187, %cst_80 [0] : vector<8x4x32xf32> to vector<4x32xf32>
    %189 = vector.broadcast %176 : vector<8x4x1xf32> to vector<8x4x32xf32>
    %190 = arith.mulf %189, %182 : vector<8x4x32xf32>
    %cst_81 = arith.constant dense<0.000000e+00> : vector<4x32xf32>
    %191 = vector.multi_reduction <add>, %190, %cst_81 [0] : vector<8x4x32xf32> to vector<4x32xf32>
    %192 = vector.broadcast %180 : vector<8x4x1xf32> to vector<8x4x32xf32>
    %193 = arith.mulf %192, %182 : vector<8x4x32xf32>
    %cst_82 = arith.constant dense<0.000000e+00> : vector<4x32xf32>
    %194 = vector.multi_reduction <add>, %193, %cst_82 [0] : vector<8x4x32xf32> to vector<4x32xf32>
    %195 = tpu.concatenate %168, %185, %188 in 1 : vector<4x32xf32>, vector<4x32xf32>, vector<4x32xf32> -> vector<4x96xf32>
    %196 = arith.truncf %195 : vector<4x96xf32> to vector<4x96xbf16>
    %c0_83 = arith.constant 0 : index
    %c0_84 = arith.constant 0 : index
    %197 = vector.load %arg6[%c0_83, %c0_84] : memref<96x160xbf16, #tpu.memory_space<vmem>>, vector<96x160xbf16>
    %cst_85 = arith.constant dense<0.000000e+00> : vector<4x160xf32>
    %198 = tpu.matmul %196, %197, %cst_85 {dimension_numbers = #tpu.dot_dimension_numbers<[1], [0], [0], [1], [0, 0, 1, 1], [], []>} : vector<4x96xbf16>, vector<96x160xbf16>, vector<4x160xf32> -> vector<4x160xf32>
    %c0_86 = arith.constant 0 : index
    %c0_87 = arith.constant 0 : index
    %199 = vector.load %arg7[%c0_86, %c0_87] : memref<1x160xf32, #tpu.memory_space<vmem>>, vector<1x160xf32>
    %200 = vector.broadcast %199 : vector<1x160xf32> to vector<4x160xf32>
    %201 = arith.addf %198, %200 : vector<4x160xf32>
    %202 = vector.extract_strided_slice %201 {offsets = [0, 0], sizes = [4, 32], strides = [1, 1]} : vector<4x160xf32> to vector<4x32xf32>
    %203 = math.tanh %202 : vector<4x32xf32>
    %204 = vector.extract_strided_slice %201 {offsets = [0, 32], sizes = [4, 32], strides = [1, 1]} : vector<4x160xf32> to vector<4x32xf32>
    %205 = arith.negf %204 : vector<4x32xf32>
    %206 = math.exp %205 : vector<4x32xf32>
    %cst_88 = arith.constant 1.000000e+00 : f32
    %207 = vector.broadcast %cst_88 : f32 to vector<4x32xf32>
    %208 = arith.addf %207, %206 : vector<4x32xf32>
    %209 = arith.divf %207, %208 : vector<4x32xf32>
    %210 = vector.extract_strided_slice %201 {offsets = [0, 64], sizes = [4, 32], strides = [1, 1]} : vector<4x160xf32> to vector<4x32xf32>
    %211 = arith.negf %210 : vector<4x32xf32>
    %212 = math.exp %211 : vector<4x32xf32>
    %cst_89 = arith.constant 1.000000e+00 : f32
    %213 = vector.broadcast %cst_89 : f32 to vector<4x32xf32>
    %214 = arith.addf %213, %212 : vector<4x32xf32>
    %215 = arith.divf %213, %214 : vector<4x32xf32>
    %216 = vector.extract_strided_slice %201 {offsets = [0, 96], sizes = [4, 32], strides = [1, 1]} : vector<4x160xf32> to vector<4x32xf32>
    %217 = arith.negf %216 : vector<4x32xf32>
    %218 = math.exp %217 : vector<4x32xf32>
    %cst_90 = arith.constant 1.000000e+00 : f32
    %219 = vector.broadcast %cst_90 : f32 to vector<4x32xf32>
    %220 = arith.addf %219, %218 : vector<4x32xf32>
    %221 = arith.divf %219, %220 : vector<4x32xf32>
    %222 = vector.extract_strided_slice %201 {offsets = [0, 128], sizes = [4, 32], strides = [1, 1]} : vector<4x160xf32> to vector<4x32xf32>
    %223 = arith.negf %222 : vector<4x32xf32>
    %224 = math.exp %223 : vector<4x32xf32>
    %cst_91 = arith.constant 1.000000e+00 : f32
    %225 = vector.broadcast %cst_91 : f32 to vector<4x32xf32>
    %226 = arith.addf %225, %224 : vector<4x32xf32>
    %227 = arith.divf %225, %226 : vector<4x32xf32>
    %228 = arith.mulf %209, %203 : vector<4x32xf32>
    %229 = arith.mulf %215, %191 : vector<4x32xf32>
    %230 = arith.addf %228, %229 : vector<4x32xf32>
    %231 = arith.mulf %221, %194 : vector<4x32xf32>
    %232 = arith.addf %230, %231 : vector<4x32xf32>
    %233 = math.tanh %232 : vector<4x32xf32>
    %234 = arith.mulf %227, %233 : vector<4x32xf32>
    %235 = vector.broadcast %172 : vector<4x1xf32> to vector<4x32xf32>
    %236 = arith.mulf %235, %234 : vector<4x32xf32>
    %237 = arith.index_cast %c2_i32 : i32 to index
    %c0_92 = arith.constant 0 : index
    %c0_93 = arith.constant 0 : index
    %238 = vector.load %arg17[%237, %c0_92, %c0_93] : memref<8x4x32xf32, #tpu.memory_space<vmem>>, vector<1x4x32xf32>
    %239 = vector.shape_cast %238 : vector<1x4x32xf32> to vector<4x32xf32>
    %240 = vector.shape_cast %236 : vector<4x32xf32> to vector<1x4x32xf32>
    tpu.vector_store %arg17[%237, %c0_92, %c0_93], %240 {strides = array<i32>} : memref<8x4x32xf32, #tpu.memory_space<vmem>>, vector<1x4x32xf32>,
    %241 = vector.broadcast %172 : vector<4x1xf32> to vector<4x32xf32>
    %242 = arith.mulf %241, %232 : vector<4x32xf32>
    %243 = arith.index_cast %c2_i32 : i32 to index
    %c0_94 = arith.constant 0 : index
    %c0_95 = arith.constant 0 : index
    %244 = vector.load %arg18[%243, %c0_94, %c0_95] : memref<8x4x32xf32, #tpu.memory_space<vmem>>, vector<1x4x32xf32>
    %245 = vector.shape_cast %244 : vector<1x4x32xf32> to vector<4x32xf32>
    %246 = vector.shape_cast %242 : vector<4x32xf32> to vector<1x4x32xf32>
    tpu.vector_store %arg18[%243, %c0_94, %c0_95], %246 {strides = array<i32>} : memref<8x4x32xf32, #tpu.memory_space<vmem>>, vector<1x4x32xf32>,
    %c3_i32 = arith.constant 3 : i32
    %247 = arith.index_cast %c3_i32 : i32 to index
    %c0_96 = arith.constant 0 : index
    %c0_97 = arith.constant 0 : index
    %248 = vector.load %arg0[%247, %c0_96, %c0_97] : memref<8x4x32xf32, #tpu.memory_space<vmem>>, vector<1x4x32xf32>
    %249 = vector.shape_cast %248 : vector<1x4x32xf32> to vector<4x32xf32>
    %250 = arith.index_cast %c3_i32 : i32 to index
    %c0_98 = arith.constant 0 : index
    %251 = vector.load %arg1[%250, %c0_98] : memref<8x4xf32, #tpu.memory_space<vmem>>, vector<1x4xf32>
    %252 = vector.shape_cast %251 : vector<1x4xf32> to vector<4xf32>
    %253 = vector.shape_cast %252 : vector<4xf32> to vector<4x1xf32>
    %254 = arith.index_cast %c3_i32 : i32 to index
    %c0_99 = arith.constant 0 : index
    %c0_100 = arith.constant 0 : index
    %255 = vector.load %arg2[%254, %c0_99, %c0_100] : memref<8x8x4xf32, #tpu.memory_space<vmem>>, vector<1x8x4xf32>
    %256 = vector.shape_cast %255 : vector<1x8x4xf32> to vector<8x4xf32>
    %257 = vector.shape_cast %256 : vector<8x4xf32> to vector<8x4x1xf32>
    %258 = arith.index_cast %c3_i32 : i32 to index
    %c0_101 = arith.constant 0 : index
    %c0_102 = arith.constant 0 : index
    %259 = vector.load %arg3[%258, %c0_101, %c0_102] : memref<8x8x4xf32, #tpu.memory_space<vmem>>, vector<1x8x4xf32>
    %260 = vector.shape_cast %259 : vector<1x8x4xf32> to vector<8x4xf32>
    %261 = vector.shape_cast %260 : vector<8x4xf32> to vector<8x4x1xf32>
    %c0_103 = arith.constant 0 : index
    %c0_104 = arith.constant 0 : index
    %c0_105 = arith.constant 0 : index
    %262 = vector.load %arg17[%c0_103, %c0_104, %c0_105] : memref<8x4x32xf32, #tpu.memory_space<vmem>>, vector<8x4x32xf32>
    %c0_106 = arith.constant 0 : index
    %c0_107 = arith.constant 0 : index
    %c0_108 = arith.constant 0 : index
    %263 = vector.load %arg18[%c0_106, %c0_107, %c0_108] : memref<8x4x32xf32, #tpu.memory_space<vmem>>, vector<8x4x32xf32>
    %264 = vector.broadcast %257 : vector<8x4x1xf32> to vector<8x4x32xf32>
    %265 = arith.mulf %264, %262 : vector<8x4x32xf32>
    %cst_109 = arith.constant dense<0.000000e+00> : vector<4x32xf32>
    %266 = vector.multi_reduction <add>, %265, %cst_109 [0] : vector<8x4x32xf32> to vector<4x32xf32>
    %267 = vector.broadcast %261 : vector<8x4x1xf32> to vector<8x4x32xf32>
    %268 = arith.mulf %267, %262 : vector<8x4x32xf32>
    %cst_110 = arith.constant dense<0.000000e+00> : vector<4x32xf32>
    %269 = vector.multi_reduction <add>, %268, %cst_110 [0] : vector<8x4x32xf32> to vector<4x32xf32>
    %270 = vector.broadcast %257 : vector<8x4x1xf32> to vector<8x4x32xf32>
    %271 = arith.mulf %270, %263 : vector<8x4x32xf32>
    %cst_111 = arith.constant dense<0.000000e+00> : vector<4x32xf32>
    %272 = vector.multi_reduction <add>, %271, %cst_111 [0] : vector<8x4x32xf32> to vector<4x32xf32>
    %273 = vector.broadcast %261 : vector<8x4x1xf32> to vector<8x4x32xf32>
    %274 = arith.mulf %273, %263 : vector<8x4x32xf32>
    %cst_112 = arith.constant dense<0.000000e+00> : vector<4x32xf32>
    %275 = vector.multi_reduction <add>, %274, %cst_112 [0] : vector<8x4x32xf32> to vector<4x32xf32>
    %276 = tpu.concatenate %249, %266, %269 in 1 : vector<4x32xf32>, vector<4x32xf32>, vector<4x32xf32> -> vector<4x96xf32>
    %277 = arith.truncf %276 : vector<4x96xf32> to vector<4x96xbf16>
    %c0_113 = arith.constant 0 : index
    %c0_114 = arith.constant 0 : index
    %278 = vector.load %arg6[%c0_113, %c0_114] : memref<96x160xbf16, #tpu.memory_space<vmem>>, vector<96x160xbf16>
    %cst_115 = arith.constant dense<0.000000e+00> : vector<4x160xf32>
    %279 = tpu.matmul %277, %278, %cst_115 {dimension_numbers = #tpu.dot_dimension_numbers<[1], [0], [0], [1], [0, 0, 1, 1], [], []>} : vector<4x96xbf16>, vector<96x160xbf16>, vector<4x160xf32> -> vector<4x160xf32>
    %c0_116 = arith.constant 0 : index
    %c0_117 = arith.constant 0 : index
    %280 = vector.load %arg7[%c0_116, %c0_117] : memref<1x160xf32, #tpu.memory_space<vmem>>, vector<1x160xf32>
    %281 = vector.broadcast %280 : vector<1x160xf32> to vector<4x160xf32>
    %282 = arith.addf %279, %281 : vector<4x160xf32>
    %283 = vector.extract_strided_slice %282 {offsets = [0, 0], sizes = [4, 32], strides = [1, 1]} : vector<4x160xf32> to vector<4x32xf32>
    %284 = math.tanh %283 : vector<4x32xf32>
    %285 = vector.extract_strided_slice %282 {offsets = [0, 32], sizes = [4, 32], strides = [1, 1]} : vector<4x160xf32> to vector<4x32xf32>
    %286 = arith.negf %285 : vector<4x32xf32>
    %287 = math.exp %286 : vector<4x32xf32>
    %cst_118 = arith.constant 1.000000e+00 : f32
    %288 = vector.broadcast %cst_118 : f32 to vector<4x32xf32>
    %289 = arith.addf %288, %287 : vector<4x32xf32>
    %290 = arith.divf %288, %289 : vector<4x32xf32>
    %291 = vector.extract_strided_slice %282 {offsets = [0, 64], sizes = [4, 32], strides = [1, 1]} : vector<4x160xf32> to vector<4x32xf32>
    %292 = arith.negf %291 : vector<4x32xf32>
    %293 = math.exp %292 : vector<4x32xf32>
    %cst_119 = arith.constant 1.000000e+00 : f32
    %294 = vector.broadcast %cst_119 : f32 to vector<4x32xf32>
    %295 = arith.addf %294, %293 : vector<4x32xf32>
    %296 = arith.divf %294, %295 : vector<4x32xf32>
    %297 = vector.extract_strided_slice %282 {offsets = [0, 96], sizes = [4, 32], strides = [1, 1]} : vector<4x160xf32> to vector<4x32xf32>
    %298 = arith.negf %297 : vector<4x32xf32>
    %299 = math.exp %298 : vector<4x32xf32>
    %cst_120 = arith.constant 1.000000e+00 : f32
    %300 = vector.broadcast %cst_120 : f32 to vector<4x32xf32>
    %301 = arith.addf %300, %299 : vector<4x32xf32>
    %302 = arith.divf %300, %301 : vector<4x32xf32>
    %303 = vector.extract_strided_slice %282 {offsets = [0, 128], sizes = [4, 32], strides = [1, 1]} : vector<4x160xf32> to vector<4x32xf32>
    %304 = arith.negf %303 : vector<4x32xf32>
    %305 = math.exp %304 : vector<4x32xf32>
    %cst_121 = arith.constant 1.000000e+00 : f32
    %306 = vector.broadcast %cst_121 : f32 to vector<4x32xf32>
    %307 = arith.addf %306, %305 : vector<4x32xf32>
    %308 = arith.divf %306, %307 : vector<4x32xf32>
    %309 = arith.mulf %290, %284 : vector<4x32xf32>
    %310 = arith.mulf %296, %272 : vector<4x32xf32>
    %311 = arith.addf %309, %310 : vector<4x32xf32>
    %312 = arith.mulf %302, %275 : vector<4x32xf32>
    %313 = arith.addf %311, %312 : vector<4x32xf32>
    %314 = math.tanh %313 : vector<4x32xf32>
    %315 = arith.mulf %308, %314 : vector<4x32xf32>
    %316 = vector.broadcast %253 : vector<4x1xf32> to vector<4x32xf32>
    %317 = arith.mulf %316, %315 : vector<4x32xf32>
    %318 = arith.index_cast %c3_i32 : i32 to index
    %c0_122 = arith.constant 0 : index
    %c0_123 = arith.constant 0 : index
    %319 = vector.load %arg17[%318, %c0_122, %c0_123] : memref<8x4x32xf32, #tpu.memory_space<vmem>>, vector<1x4x32xf32>
    %320 = vector.shape_cast %319 : vector<1x4x32xf32> to vector<4x32xf32>
    %321 = vector.shape_cast %317 : vector<4x32xf32> to vector<1x4x32xf32>
    tpu.vector_store %arg17[%318, %c0_122, %c0_123], %321 {strides = array<i32>} : memref<8x4x32xf32, #tpu.memory_space<vmem>>, vector<1x4x32xf32>,
    %322 = vector.broadcast %253 : vector<4x1xf32> to vector<4x32xf32>
    %323 = arith.mulf %322, %313 : vector<4x32xf32>
    %324 = arith.index_cast %c3_i32 : i32 to index
    %c0_124 = arith.constant 0 : index
    %c0_125 = arith.constant 0 : index
    %325 = vector.load %arg18[%324, %c0_124, %c0_125] : memref<8x4x32xf32, #tpu.memory_space<vmem>>, vector<1x4x32xf32>
    %326 = vector.shape_cast %325 : vector<1x4x32xf32> to vector<4x32xf32>
    %327 = vector.shape_cast %323 : vector<4x32xf32> to vector<1x4x32xf32>
    tpu.vector_store %arg18[%324, %c0_124, %c0_125], %327 {strides = array<i32>} : memref<8x4x32xf32, #tpu.memory_space<vmem>>, vector<1x4x32xf32>,
    %c4_i32 = arith.constant 4 : i32
    %328 = arith.index_cast %c4_i32 : i32 to index
    %c0_126 = arith.constant 0 : index
    %c0_127 = arith.constant 0 : index
    %329 = vector.load %arg0[%328, %c0_126, %c0_127] : memref<8x4x32xf32, #tpu.memory_space<vmem>>, vector<1x4x32xf32>
    %330 = vector.shape_cast %329 : vector<1x4x32xf32> to vector<4x32xf32>
    %331 = arith.index_cast %c4_i32 : i32 to index
    %c0_128 = arith.constant 0 : index
    %332 = vector.load %arg1[%331, %c0_128] : memref<8x4xf32, #tpu.memory_space<vmem>>, vector<1x4xf32>
    %333 = vector.shape_cast %332 : vector<1x4xf32> to vector<4xf32>
    %334 = vector.shape_cast %333 : vector<4xf32> to vector<4x1xf32>
    %335 = arith.index_cast %c4_i32 : i32 to index
    %c0_129 = arith.constant 0 : index
    %c0_130 = arith.constant 0 : index
    %336 = vector.load %arg2[%335, %c0_129, %c0_130] : memref<8x8x4xf32, #tpu.memory_space<vmem>>, vector<1x8x4xf32>
    %337 = vector.shape_cast %336 : vector<1x8x4xf32> to vector<8x4xf32>
    %338 = vector.shape_cast %337 : vector<8x4xf32> to vector<8x4x1xf32>
    %339 = arith.index_cast %c4_i32 : i32 to index
    %c0_131 = arith.constant 0 : index
    %c0_132 = arith.constant 0 : index
    %340 = vector.load %arg3[%339, %c0_131, %c0_132] : memref<8x8x4xf32, #tpu.memory_space<vmem>>, vector<1x8x4xf32>
    %341 = vector.shape_cast %340 : vector<1x8x4xf32> to vector<8x4xf32>
    %342 = vector.shape_cast %341 : vector<8x4xf32> to vector<8x4x1xf32>
    %c0_133 = arith.constant 0 : index
    %c0_134 = arith.constant 0 : index
    %c0_135 = arith.constant 0 : index
    %343 = vector.load %arg17[%c0_133, %c0_134, %c0_135] : memref<8x4x32xf32, #tpu.memory_space<vmem>>, vector<8x4x32xf32>
    %c0_136 = arith.constant 0 : index
    %c0_137 = arith.constant 0 : index
    %c0_138 = arith.constant 0 : index
    %344 = vector.load %arg18[%c0_136, %c0_137, %c0_138] : memref<8x4x32xf32, #tpu.memory_space<vmem>>, vector<8x4x32xf32>
    %345 = vector.broadcast %338 : vector<8x4x1xf32> to vector<8x4x32xf32>
    %346 = arith.mulf %345, %343 : vector<8x4x32xf32>
    %cst_139 = arith.constant dense<0.000000e+00> : vector<4x32xf32>
    %347 = vector.multi_reduction <add>, %346, %cst_139 [0] : vector<8x4x32xf32> to vector<4x32xf32>
    %348 = vector.broadcast %342 : vector<8x4x1xf32> to vector<8x4x32xf32>
    %349 = arith.mulf %348, %343 : vector<8x4x32xf32>
    %cst_140 = arith.constant dense<0.000000e+00> : vector<4x32xf32>
    %350 = vector.multi_reduction <add>, %349, %cst_140 [0] : vector<8x4x32xf32> to vector<4x32xf32>
    %351 = vector.broadcast %338 : vector<8x4x1xf32> to vector<8x4x32xf32>
    %352 = arith.mulf %351, %344 : vector<8x4x32xf32>
    %cst_141 = arith.constant dense<0.000000e+00> : vector<4x32xf32>
    %353 = vector.multi_reduction <add>, %352, %cst_141 [0] : vector<8x4x32xf32> to vector<4x32xf32>
    %354 = vector.broadcast %342 : vector<8x4x1xf32> to vector<8x4x32xf32>
    %355 = arith.mulf %354, %344 : vector<8x4x32xf32>
    %cst_142 = arith.constant dense<0.000000e+00> : vector<4x32xf32>
    %356 = vector.multi_reduction <add>, %355, %cst_142 [0] : vector<8x4x32xf32> to vector<4x32xf32>
    %357 = tpu.concatenate %330, %347, %350 in 1 : vector<4x32xf32>, vector<4x32xf32>, vector<4x32xf32> -> vector<4x96xf32>
    %358 = arith.truncf %357 : vector<4x96xf32> to vector<4x96xbf16>
    %c0_143 = arith.constant 0 : index
    %c0_144 = arith.constant 0 : index
    %359 = vector.load %arg6[%c0_143, %c0_144] : memref<96x160xbf16, #tpu.memory_space<vmem>>, vector<96x160xbf16>
    %cst_145 = arith.constant dense<0.000000e+00> : vector<4x160xf32>
    %360 = tpu.matmul %358, %359, %cst_145 {dimension_numbers = #tpu.dot_dimension_numbers<[1], [0], [0], [1], [0, 0, 1, 1], [], []>} : vector<4x96xbf16>, vector<96x160xbf16>, vector<4x160xf32> -> vector<4x160xf32>
    %c0_146 = arith.constant 0 : index
    %c0_147 = arith.constant 0 : index
    %361 = vector.load %arg7[%c0_146, %c0_147] : memref<1x160xf32, #tpu.memory_space<vmem>>, vector<1x160xf32>
    %362 = vector.broadcast %361 : vector<1x160xf32> to vector<4x160xf32>
    %363 = arith.addf %360, %362 : vector<4x160xf32>
    %364 = vector.extract_strided_slice %363 {offsets = [0, 0], sizes = [4, 32], strides = [1, 1]} : vector<4x160xf32> to vector<4x32xf32>
    %365 = math.tanh %364 : vector<4x32xf32>
    %366 = vector.extract_strided_slice %363 {offsets = [0, 32], sizes = [4, 32], strides = [1, 1]} : vector<4x160xf32> to vector<4x32xf32>
    %367 = arith.negf %366 : vector<4x32xf32>
    %368 = math.exp %367 : vector<4x32xf32>
    %cst_148 = arith.constant 1.000000e+00 : f32
    %369 = vector.broadcast %cst_148 : f32 to vector<4x32xf32>
    %370 = arith.addf %369, %368 : vector<4x32xf32>
    %371 = arith.divf %369, %370 : vector<4x32xf32>
    %372 = vector.extract_strided_slice %363 {offsets = [0, 64], sizes = [4, 32], strides = [1, 1]} : vector<4x160xf32> to vector<4x32xf32>
    %373 = arith.negf %372 : vector<4x32xf32>
    %374 = math.exp %373 : vector<4x32xf32>
    %cst_149 = arith.constant 1.000000e+00 : f32
    %375 = vector.broadcast %cst_149 : f32 to vector<4x32xf32>
    %376 = arith.addf %375, %374 : vector<4x32xf32>
    %377 = arith.divf %375, %376 : vector<4x32xf32>
    %378 = vector.extract_strided_slice %363 {offsets = [0, 96], sizes = [4, 32], strides = [1, 1]} : vector<4x160xf32> to vector<4x32xf32>
    %379 = arith.negf %378 : vector<4x32xf32>
    %380 = math.exp %379 : vector<4x32xf32>
    %cst_150 = arith.constant 1.000000e+00 : f32
    %381 = vector.broadcast %cst_150 : f32 to vector<4x32xf32>
    %382 = arith.addf %381, %380 : vector<4x32xf32>
    %383 = arith.divf %381, %382 : vector<4x32xf32>
    %384 = vector.extract_strided_slice %363 {offsets = [0, 128], sizes = [4, 32], strides = [1, 1]} : vector<4x160xf32> to vector<4x32xf32>
    %385 = arith.negf %384 : vector<4x32xf32>
    %386 = math.exp %385 : vector<4x32xf32>
    %cst_151 = arith.constant 1.000000e+00 : f32
    %387 = vector.broadcast %cst_151 : f32 to vector<4x32xf32>
    %388 = arith.addf %387, %386 : vector<4x32xf32>
    %389 = arith.divf %387, %388 : vector<4x32xf32>
    %390 = arith.mulf %371, %365 : vector<4x32xf32>
    %391 = arith.mulf %377, %353 : vector<4x32xf32>
    %392 = arith.addf %390, %391 : vector<4x32xf32>
    %393 = arith.mulf %383, %356 : vector<4x32xf32>
    %394 = arith.addf %392, %393 : vector<4x32xf32>
    %395 = math.tanh %394 : vector<4x32xf32>
    %396 = arith.mulf %389, %395 : vector<4x32xf32>
    %397 = vector.broadcast %334 : vector<4x1xf32> to vector<4x32xf32>
    %398 = arith.mulf %397, %396 : vector<4x32xf32>
    %399 = arith.index_cast %c4_i32 : i32 to index
    %c0_152 = arith.constant 0 : index
    %c0_153 = arith.constant 0 : index
    %400 = vector.load %arg17[%399, %c0_152, %c0_153] : memref<8x4x32xf32, #tpu.memory_space<vmem>>, vector<1x4x32xf32>
    %401 = vector.shape_cast %400 : vector<1x4x32xf32> to vector<4x32xf32>
    %402 = vector.shape_cast %398 : vector<4x32xf32> to vector<1x4x32xf32>
    tpu.vector_store %arg17[%399, %c0_152, %c0_153], %402 {strides = array<i32>} : memref<8x4x32xf32, #tpu.memory_space<vmem>>, vector<1x4x32xf32>,
    %403 = vector.broadcast %334 : vector<4x1xf32> to vector<4x32xf32>
    %404 = arith.mulf %403, %394 : vector<4x32xf32>
    %405 = arith.index_cast %c4_i32 : i32 to index
    %c0_154 = arith.constant 0 : index
    %c0_155 = arith.constant 0 : index
    %406 = vector.load %arg18[%405, %c0_154, %c0_155] : memref<8x4x32xf32, #tpu.memory_space<vmem>>, vector<1x4x32xf32>
    %407 = vector.shape_cast %406 : vector<1x4x32xf32> to vector<4x32xf32>
    %408 = vector.shape_cast %404 : vector<4x32xf32> to vector<1x4x32xf32>
    tpu.vector_store %arg18[%405, %c0_154, %c0_155], %408 {strides = array<i32>} : memref<8x4x32xf32, #tpu.memory_space<vmem>>, vector<1x4x32xf32>,
    %c5_i32 = arith.constant 5 : i32
    %409 = arith.index_cast %c5_i32 : i32 to index
    %c0_156 = arith.constant 0 : index
    %c0_157 = arith.constant 0 : index
    %410 = vector.load %arg0[%409, %c0_156, %c0_157] : memref<8x4x32xf32, #tpu.memory_space<vmem>>, vector<1x4x32xf32>
    %411 = vector.shape_cast %410 : vector<1x4x32xf32> to vector<4x32xf32>
    %412 = arith.index_cast %c5_i32 : i32 to index
    %c0_158 = arith.constant 0 : index
    %413 = vector.load %arg1[%412, %c0_158] : memref<8x4xf32, #tpu.memory_space<vmem>>, vector<1x4xf32>
    %414 = vector.shape_cast %413 : vector<1x4xf32> to vector<4xf32>
    %415 = vector.shape_cast %414 : vector<4xf32> to vector<4x1xf32>
    %416 = arith.index_cast %c5_i32 : i32 to index
    %c0_159 = arith.constant 0 : index
    %c0_160 = arith.constant 0 : index
    %417 = vector.load %arg2[%416, %c0_159, %c0_160] : memref<8x8x4xf32, #tpu.memory_space<vmem>>, vector<1x8x4xf32>
    %418 = vector.shape_cast %417 : vector<1x8x4xf32> to vector<8x4xf32>
    %419 = vector.shape_cast %418 : vector<8x4xf32> to vector<8x4x1xf32>
    %420 = arith.index_cast %c5_i32 : i32 to index
    %c0_161 = arith.constant 0 : index
    %c0_162 = arith.constant 0 : index
    %421 = vector.load %arg3[%420, %c0_161, %c0_162] : memref<8x8x4xf32, #tpu.memory_space<vmem>>, vector<1x8x4xf32>
    %422 = vector.shape_cast %421 : vector<1x8x4xf32> to vector<8x4xf32>
    %423 = vector.shape_cast %422 : vector<8x4xf32> to vector<8x4x1xf32>
    %c0_163 = arith.constant 0 : index
    %c0_164 = arith.constant 0 : index
    %c0_165 = arith.constant 0 : index
    %424 = vector.load %arg17[%c0_163, %c0_164, %c0_165] : memref<8x4x32xf32, #tpu.memory_space<vmem>>, vector<8x4x32xf32>
    %c0_166 = arith.constant 0 : index
    %c0_167 = arith.constant 0 : index
    %c0_168 = arith.constant 0 : index
    %425 = vector.load %arg18[%c0_166, %c0_167, %c0_168] : memref<8x4x32xf32, #tpu.memory_space<vmem>>, vector<8x4x32xf32>
    %426 = vector.broadcast %419 : vector<8x4x1xf32> to vector<8x4x32xf32>
    %427 = arith.mulf %426, %424 : vector<8x4x32xf32>
    %cst_169 = arith.constant dense<0.000000e+00> : vector<4x32xf32>
    %428 = vector.multi_reduction <add>, %427, %cst_169 [0] : vector<8x4x32xf32> to vector<4x32xf32>
    %429 = vector.broadcast %423 : vector<8x4x1xf32> to vector<8x4x32xf32>
    %430 = arith.mulf %429, %424 : vector<8x4x32xf32>
    %cst_170 = arith.constant dense<0.000000e+00> : vector<4x32xf32>
    %431 = vector.multi_reduction <add>, %430, %cst_170 [0] : vector<8x4x32xf32> to vector<4x32xf32>
    %432 = vector.broadcast %419 : vector<8x4x1xf32> to vector<8x4x32xf32>
    %433 = arith.mulf %432, %425 : vector<8x4x32xf32>
    %cst_171 = arith.constant dense<0.000000e+00> : vector<4x32xf32>
    %434 = vector.multi_reduction <add>, %433, %cst_171 [0] : vector<8x4x32xf32> to vector<4x32xf32>
    %435 = vector.broadcast %423 : vector<8x4x1xf32> to vector<8x4x32xf32>
    %436 = arith.mulf %435, %425 : vector<8x4x32xf32>
    %cst_172 = arith.constant dense<0.000000e+00> : vector<4x32xf32>
    %437 = vector.multi_reduction <add>, %436, %cst_172 [0] : vector<8x4x32xf32> to vector<4x32xf32>
    %438 = tpu.concatenate %411, %428, %431 in 1 : vector<4x32xf32>, vector<4x32xf32>, vector<4x32xf32> -> vector<4x96xf32>
    %439 = arith.truncf %438 : vector<4x96xf32> to vector<4x96xbf16>
    %c0_173 = arith.constant 0 : index
    %c0_174 = arith.constant 0 : index
    %440 = vector.load %arg6[%c0_173, %c0_174] : memref<96x160xbf16, #tpu.memory_space<vmem>>, vector<96x160xbf16>
    %cst_175 = arith.constant dense<0.000000e+00> : vector<4x160xf32>
    %441 = tpu.matmul %439, %440, %cst_175 {dimension_numbers = #tpu.dot_dimension_numbers<[1], [0], [0], [1], [0, 0, 1, 1], [], []>} : vector<4x96xbf16>, vector<96x160xbf16>, vector<4x160xf32> -> vector<4x160xf32>
    %c0_176 = arith.constant 0 : index
    %c0_177 = arith.constant 0 : index
    %442 = vector.load %arg7[%c0_176, %c0_177] : memref<1x160xf32, #tpu.memory_space<vmem>>, vector<1x160xf32>
    %443 = vector.broadcast %442 : vector<1x160xf32> to vector<4x160xf32>
    %444 = arith.addf %441, %443 : vector<4x160xf32>
    %445 = vector.extract_strided_slice %444 {offsets = [0, 0], sizes = [4, 32], strides = [1, 1]} : vector<4x160xf32> to vector<4x32xf32>
    %446 = math.tanh %445 : vector<4x32xf32>
    %447 = vector.extract_strided_slice %444 {offsets = [0, 32], sizes = [4, 32], strides = [1, 1]} : vector<4x160xf32> to vector<4x32xf32>
    %448 = arith.negf %447 : vector<4x32xf32>
    %449 = math.exp %448 : vector<4x32xf32>
    %cst_178 = arith.constant 1.000000e+00 : f32
    %450 = vector.broadcast %cst_178 : f32 to vector<4x32xf32>
    %451 = arith.addf %450, %449 : vector<4x32xf32>
    %452 = arith.divf %450, %451 : vector<4x32xf32>
    %453 = vector.extract_strided_slice %444 {offsets = [0, 64], sizes = [4, 32], strides = [1, 1]} : vector<4x160xf32> to vector<4x32xf32>
    %454 = arith.negf %453 : vector<4x32xf32>
    %455 = math.exp %454 : vector<4x32xf32>
    %cst_179 = arith.constant 1.000000e+00 : f32
    %456 = vector.broadcast %cst_179 : f32 to vector<4x32xf32>
    %457 = arith.addf %456, %455 : vector<4x32xf32>
    %458 = arith.divf %456, %457 : vector<4x32xf32>
    %459 = vector.extract_strided_slice %444 {offsets = [0, 96], sizes = [4, 32], strides = [1, 1]} : vector<4x160xf32> to vector<4x32xf32>
    %460 = arith.negf %459 : vector<4x32xf32>
    %461 = math.exp %460 : vector<4x32xf32>
    %cst_180 = arith.constant 1.000000e+00 : f32
    %462 = vector.broadcast %cst_180 : f32 to vector<4x32xf32>
    %463 = arith.addf %462, %461 : vector<4x32xf32>
    %464 = arith.divf %462, %463 : vector<4x32xf32>
    %465 = vector.extract_strided_slice %444 {offsets = [0, 128], sizes = [4, 32], strides = [1, 1]} : vector<4x160xf32> to vector<4x32xf32>
    %466 = arith.negf %465 : vector<4x32xf32>
    %467 = math.exp %466 : vector<4x32xf32>
    %cst_181 = arith.constant 1.000000e+00 : f32
    %468 = vector.broadcast %cst_181 : f32 to vector<4x32xf32>
    %469 = arith.addf %468, %467 : vector<4x32xf32>
    %470 = arith.divf %468, %469 : vector<4x32xf32>
    %471 = arith.mulf %452, %446 : vector<4x32xf32>
    %472 = arith.mulf %458, %434 : vector<4x32xf32>
    %473 = arith.addf %471, %472 : vector<4x32xf32>
    %474 = arith.mulf %464, %437 : vector<4x32xf32>
    %475 = arith.addf %473, %474 : vector<4x32xf32>
    %476 = math.tanh %475 : vector<4x32xf32>
    %477 = arith.mulf %470, %476 : vector<4x32xf32>
    %478 = vector.broadcast %415 : vector<4x1xf32> to vector<4x32xf32>
    %479 = arith.mulf %478, %477 : vector<4x32xf32>
    %480 = arith.index_cast %c5_i32 : i32 to index
    %c0_182 = arith.constant 0 : index
    %c0_183 = arith.constant 0 : index
    %481 = vector.load %arg17[%480, %c0_182, %c0_183] : memref<8x4x32xf32, #tpu.memory_space<vmem>>, vector<1x4x32xf32>
    %482 = vector.shape_cast %481 : vector<1x4x32xf32> to vector<4x32xf32>
    %483 = vector.shape_cast %479 : vector<4x32xf32> to vector<1x4x32xf32>
    tpu.vector_store %arg17[%480, %c0_182, %c0_183], %483 {strides = array<i32>} : memref<8x4x32xf32, #tpu.memory_space<vmem>>, vector<1x4x32xf32>,
    %484 = vector.broadcast %415 : vector<4x1xf32> to vector<4x32xf32>
    %485 = arith.mulf %484, %475 : vector<4x32xf32>
    %486 = arith.index_cast %c5_i32 : i32 to index
    %c0_184 = arith.constant 0 : index
    %c0_185 = arith.constant 0 : index
    %487 = vector.load %arg18[%486, %c0_184, %c0_185] : memref<8x4x32xf32, #tpu.memory_space<vmem>>, vector<1x4x32xf32>
    %488 = vector.shape_cast %487 : vector<1x4x32xf32> to vector<4x32xf32>
    %489 = vector.shape_cast %485 : vector<4x32xf32> to vector<1x4x32xf32>
    tpu.vector_store %arg18[%486, %c0_184, %c0_185], %489 {strides = array<i32>} : memref<8x4x32xf32, #tpu.memory_space<vmem>>, vector<1x4x32xf32>,
    %c6_i32 = arith.constant 6 : i32
    %490 = arith.index_cast %c6_i32 : i32 to index
    %c0_186 = arith.constant 0 : index
    %c0_187 = arith.constant 0 : index
    %491 = vector.load %arg0[%490, %c0_186, %c0_187] : memref<8x4x32xf32, #tpu.memory_space<vmem>>, vector<1x4x32xf32>
    %492 = vector.shape_cast %491 : vector<1x4x32xf32> to vector<4x32xf32>
    %493 = arith.index_cast %c6_i32 : i32 to index
    %c0_188 = arith.constant 0 : index
    %494 = vector.load %arg1[%493, %c0_188] : memref<8x4xf32, #tpu.memory_space<vmem>>, vector<1x4xf32>
    %495 = vector.shape_cast %494 : vector<1x4xf32> to vector<4xf32>
    %496 = vector.shape_cast %495 : vector<4xf32> to vector<4x1xf32>
    %497 = arith.index_cast %c6_i32 : i32 to index
    %c0_189 = arith.constant 0 : index
    %c0_190 = arith.constant 0 : index
    %498 = vector.load %arg2[%497, %c0_189, %c0_190] : memref<8x8x4xf32, #tpu.memory_space<vmem>>, vector<1x8x4xf32>
    %499 = vector.shape_cast %498 : vector<1x8x4xf32> to vector<8x4xf32>
    %500 = vector.shape_cast %499 : vector<8x4xf32> to vector<8x4x1xf32>
    %501 = arith.index_cast %c6_i32 : i32 to index
    %c0_191 = arith.constant 0 : index
    %c0_192 = arith.constant 0 : index
    %502 = vector.load %arg3[%501, %c0_191, %c0_192] : memref<8x8x4xf32, #tpu.memory_space<vmem>>, vector<1x8x4xf32>
    %503 = vector.shape_cast %502 : vector<1x8x4xf32> to vector<8x4xf32>
    %504 = vector.shape_cast %503 : vector<8x4xf32> to vector<8x4x1xf32>
    %c0_193 = arith.constant 0 : index
    %c0_194 = arith.constant 0 : index
    %c0_195 = arith.constant 0 : index
    %505 = vector.load %arg17[%c0_193, %c0_194, %c0_195] : memref<8x4x32xf32, #tpu.memory_space<vmem>>, vector<8x4x32xf32>
    %c0_196 = arith.constant 0 : index
    %c0_197 = arith.constant 0 : index
    %c0_198 = arith.constant 0 : index
    %506 = vector.load %arg18[%c0_196, %c0_197, %c0_198] : memref<8x4x32xf32, #tpu.memory_space<vmem>>, vector<8x4x32xf32>
    %507 = vector.broadcast %500 : vector<8x4x1xf32> to vector<8x4x32xf32>
    %508 = arith.mulf %507, %505 : vector<8x4x32xf32>
    %cst_199 = arith.constant dense<0.000000e+00> : vector<4x32xf32>
    %509 = vector.multi_reduction <add>, %508, %cst_199 [0] : vector<8x4x32xf32> to vector<4x32xf32>
    %510 = vector.broadcast %504 : vector<8x4x1xf32> to vector<8x4x32xf32>
    %511 = arith.mulf %510, %505 : vector<8x4x32xf32>
    %cst_200 = arith.constant dense<0.000000e+00> : vector<4x32xf32>
    %512 = vector.multi_reduction <add>, %511, %cst_200 [0] : vector<8x4x32xf32> to vector<4x32xf32>
    %513 = vector.broadcast %500 : vector<8x4x1xf32> to vector<8x4x32xf32>
    %514 = arith.mulf %513, %506 : vector<8x4x32xf32>
    %cst_201 = arith.constant dense<0.000000e+00> : vector<4x32xf32>
    %515 = vector.multi_reduction <add>, %514, %cst_201 [0] : vector<8x4x32xf32> to vector<4x32xf32>
    %516 = vector.broadcast %504 : vector<8x4x1xf32> to vector<8x4x32xf32>
    %517 = arith.mulf %516, %506 : vector<8x4x32xf32>
    %cst_202 = arith.constant dense<0.000000e+00> : vector<4x32xf32>
    %518 = vector.multi_reduction <add>, %517, %cst_202 [0] : vector<8x4x32xf32> to vector<4x32xf32>
    %519 = tpu.concatenate %492, %509, %512 in 1 : vector<4x32xf32>, vector<4x32xf32>, vector<4x32xf32> -> vector<4x96xf32>
    %520 = arith.truncf %519 : vector<4x96xf32> to vector<4x96xbf16>
    %c0_203 = arith.constant 0 : index
    %c0_204 = arith.constant 0 : index
    %521 = vector.load %arg6[%c0_203, %c0_204] : memref<96x160xbf16, #tpu.memory_space<vmem>>, vector<96x160xbf16>
    %cst_205 = arith.constant dense<0.000000e+00> : vector<4x160xf32>
    %522 = tpu.matmul %520, %521, %cst_205 {dimension_numbers = #tpu.dot_dimension_numbers<[1], [0], [0], [1], [0, 0, 1, 1], [], []>} : vector<4x96xbf16>, vector<96x160xbf16>, vector<4x160xf32> -> vector<4x160xf32>
    %c0_206 = arith.constant 0 : index
    %c0_207 = arith.constant 0 : index
    %523 = vector.load %arg7[%c0_206, %c0_207] : memref<1x160xf32, #tpu.memory_space<vmem>>, vector<1x160xf32>
    %524 = vector.broadcast %523 : vector<1x160xf32> to vector<4x160xf32>
    %525 = arith.addf %522, %524 : vector<4x160xf32>
    %526 = vector.extract_strided_slice %525 {offsets = [0, 0], sizes = [4, 32], strides = [1, 1]} : vector<4x160xf32> to vector<4x32xf32>
    %527 = math.tanh %526 : vector<4x32xf32>
    %528 = vector.extract_strided_slice %525 {offsets = [0, 32], sizes = [4, 32], strides = [1, 1]} : vector<4x160xf32> to vector<4x32xf32>
    %529 = arith.negf %528 : vector<4x32xf32>
    %530 = math.exp %529 : vector<4x32xf32>
    %cst_208 = arith.constant 1.000000e+00 : f32
    %531 = vector.broadcast %cst_208 : f32 to vector<4x32xf32>
    %532 = arith.addf %531, %530 : vector<4x32xf32>
    %533 = arith.divf %531, %532 : vector<4x32xf32>
    %534 = vector.extract_strided_slice %525 {offsets = [0, 64], sizes = [4, 32], strides = [1, 1]} : vector<4x160xf32> to vector<4x32xf32>
    %535 = arith.negf %534 : vector<4x32xf32>
    %536 = math.exp %535 : vector<4x32xf32>
    %cst_209 = arith.constant 1.000000e+00 : f32
    %537 = vector.broadcast %cst_209 : f32 to vector<4x32xf32>
    %538 = arith.addf %537, %536 : vector<4x32xf32>
    %539 = arith.divf %537, %538 : vector<4x32xf32>
    %540 = vector.extract_strided_slice %525 {offsets = [0, 96], sizes = [4, 32], strides = [1, 1]} : vector<4x160xf32> to vector<4x32xf32>
    %541 = arith.negf %540 : vector<4x32xf32>
    %542 = math.exp %541 : vector<4x32xf32>
    %cst_210 = arith.constant 1.000000e+00 : f32
    %543 = vector.broadcast %cst_210 : f32 to vector<4x32xf32>
    %544 = arith.addf %543, %542 : vector<4x32xf32>
    %545 = arith.divf %543, %544 : vector<4x32xf32>
    %546 = vector.extract_strided_slice %525 {offsets = [0, 128], sizes = [4, 32], strides = [1, 1]} : vector<4x160xf32> to vector<4x32xf32>
    %547 = arith.negf %546 : vector<4x32xf32>
    %548 = math.exp %547 : vector<4x32xf32>
    %cst_211 = arith.constant 1.000000e+00 : f32
    %549 = vector.broadcast %cst_211 : f32 to vector<4x32xf32>
    %550 = arith.addf %549, %548 : vector<4x32xf32>
    %551 = arith.divf %549, %550 : vector<4x32xf32>
    %552 = arith.mulf %533, %527 : vector<4x32xf32>
    %553 = arith.mulf %539, %515 : vector<4x32xf32>
    %554 = arith.addf %552, %553 : vector<4x32xf32>
    %555 = arith.mulf %545, %518 : vector<4x32xf32>
    %556 = arith.addf %554, %555 : vector<4x32xf32>
    %557 = math.tanh %556 : vector<4x32xf32>
    %558 = arith.mulf %551, %557 : vector<4x32xf32>
    %559 = vector.broadcast %496 : vector<4x1xf32> to vector<4x32xf32>
    %560 = arith.mulf %559, %558 : vector<4x32xf32>
    %561 = arith.index_cast %c6_i32 : i32 to index
    %c0_212 = arith.constant 0 : index
    %c0_213 = arith.constant 0 : index
    %562 = vector.load %arg17[%561, %c0_212, %c0_213] : memref<8x4x32xf32, #tpu.memory_space<vmem>>, vector<1x4x32xf32>
    %563 = vector.shape_cast %562 : vector<1x4x32xf32> to vector<4x32xf32>
    %564 = vector.shape_cast %560 : vector<4x32xf32> to vector<1x4x32xf32>
    tpu.vector_store %arg17[%561, %c0_212, %c0_213], %564 {strides = array<i32>} : memref<8x4x32xf32, #tpu.memory_space<vmem>>, vector<1x4x32xf32>,
    %565 = vector.broadcast %496 : vector<4x1xf32> to vector<4x32xf32>
    %566 = arith.mulf %565, %556 : vector<4x32xf32>
    %567 = arith.index_cast %c6_i32 : i32 to index
    %c0_214 = arith.constant 0 : index
    %c0_215 = arith.constant 0 : index
    %568 = vector.load %arg18[%567, %c0_214, %c0_215] : memref<8x4x32xf32, #tpu.memory_space<vmem>>, vector<1x4x32xf32>
    %569 = vector.shape_cast %568 : vector<1x4x32xf32> to vector<4x32xf32>
    %570 = vector.shape_cast %566 : vector<4x32xf32> to vector<1x4x32xf32>
    tpu.vector_store %arg18[%567, %c0_214, %c0_215], %570 {strides = array<i32>} : memref<8x4x32xf32, #tpu.memory_space<vmem>>, vector<1x4x32xf32>,
    %c7_i32 = arith.constant 7 : i32
    %571 = arith.index_cast %c7_i32 : i32 to index
    %c0_216 = arith.constant 0 : index
    %c0_217 = arith.constant 0 : index
    %572 = vector.load %arg0[%571, %c0_216, %c0_217] : memref<8x4x32xf32, #tpu.memory_space<vmem>>, vector<1x4x32xf32>
    %573 = vector.shape_cast %572 : vector<1x4x32xf32> to vector<4x32xf32>
    %574 = arith.index_cast %c7_i32 : i32 to index
    %c0_218 = arith.constant 0 : index
    %575 = vector.load %arg1[%574, %c0_218] : memref<8x4xf32, #tpu.memory_space<vmem>>, vector<1x4xf32>
    %576 = vector.shape_cast %575 : vector<1x4xf32> to vector<4xf32>
    %577 = vector.shape_cast %576 : vector<4xf32> to vector<4x1xf32>
    %578 = arith.index_cast %c7_i32 : i32 to index
    %c0_219 = arith.constant 0 : index
    %c0_220 = arith.constant 0 : index
    %579 = vector.load %arg2[%578, %c0_219, %c0_220] : memref<8x8x4xf32, #tpu.memory_space<vmem>>, vector<1x8x4xf32>
    %580 = vector.shape_cast %579 : vector<1x8x4xf32> to vector<8x4xf32>
    %581 = vector.shape_cast %580 : vector<8x4xf32> to vector<8x4x1xf32>
    %582 = arith.index_cast %c7_i32 : i32 to index
    %c0_221 = arith.constant 0 : index
    %c0_222 = arith.constant 0 : index
    %583 = vector.load %arg3[%582, %c0_221, %c0_222] : memref<8x8x4xf32, #tpu.memory_space<vmem>>, vector<1x8x4xf32>
    %584 = vector.shape_cast %583 : vector<1x8x4xf32> to vector<8x4xf32>
    %585 = vector.shape_cast %584 : vector<8x4xf32> to vector<8x4x1xf32>
    %c0_223 = arith.constant 0 : index
    %c0_224 = arith.constant 0 : index
    %c0_225 = arith.constant 0 : index
    %586 = vector.load %arg17[%c0_223, %c0_224, %c0_225] : memref<8x4x32xf32, #tpu.memory_space<vmem>>, vector<8x4x32xf32>
    %c0_226 = arith.constant 0 : index
    %c0_227 = arith.constant 0 : index
    %c0_228 = arith.constant 0 : index
    %587 = vector.load %arg18[%c0_226, %c0_227, %c0_228] : memref<8x4x32xf32, #tpu.memory_space<vmem>>, vector<8x4x32xf32>
    %588 = vector.broadcast %581 : vector<8x4x1xf32> to vector<8x4x32xf32>
    %589 = arith.mulf %588, %586 : vector<8x4x32xf32>
    %cst_229 = arith.constant dense<0.000000e+00> : vector<4x32xf32>
    %590 = vector.multi_reduction <add>, %589, %cst_229 [0] : vector<8x4x32xf32> to vector<4x32xf32>
    %591 = vector.broadcast %585 : vector<8x4x1xf32> to vector<8x4x32xf32>
    %592 = arith.mulf %591, %586 : vector<8x4x32xf32>
    %cst_230 = arith.constant dense<0.000000e+00> : vector<4x32xf32>
    %593 = vector.multi_reduction <add>, %592, %cst_230 [0] : vector<8x4x32xf32> to vector<4x32xf32>
    %594 = vector.broadcast %581 : vector<8x4x1xf32> to vector<8x4x32xf32>
    %595 = arith.mulf %594, %587 : vector<8x4x32xf32>
    %cst_231 = arith.constant dense<0.000000e+00> : vector<4x32xf32>
    %596 = vector.multi_reduction <add>, %595, %cst_231 [0] : vector<8x4x32xf32> to vector<4x32xf32>
    %597 = vector.broadcast %585 : vector<8x4x1xf32> to vector<8x4x32xf32>
    %598 = arith.mulf %597, %587 : vector<8x4x32xf32>
    %cst_232 = arith.constant dense<0.000000e+00> : vector<4x32xf32>
    %599 = vector.multi_reduction <add>, %598, %cst_232 [0] : vector<8x4x32xf32> to vector<4x32xf32>
    %600 = tpu.concatenate %573, %590, %593 in 1 : vector<4x32xf32>, vector<4x32xf32>, vector<4x32xf32> -> vector<4x96xf32>
    %601 = arith.truncf %600 : vector<4x96xf32> to vector<4x96xbf16>
    %c0_233 = arith.constant 0 : index
    %c0_234 = arith.constant 0 : index
    %602 = vector.load %arg6[%c0_233, %c0_234] : memref<96x160xbf16, #tpu.memory_space<vmem>>, vector<96x160xbf16>
    %cst_235 = arith.constant dense<0.000000e+00> : vector<4x160xf32>
    %603 = tpu.matmul %601, %602, %cst_235 {dimension_numbers = #tpu.dot_dimension_numbers<[1], [0], [0], [1], [0, 0, 1, 1], [], []>} : vector<4x96xbf16>, vector<96x160xbf16>, vector<4x160xf32> -> vector<4x160xf32>
    %c0_236 = arith.constant 0 : index
    %c0_237 = arith.constant 0 : index
    %604 = vector.load %arg7[%c0_236, %c0_237] : memref<1x160xf32, #tpu.memory_space<vmem>>, vector<1x160xf32>
    %605 = vector.broadcast %604 : vector<1x160xf32> to vector<4x160xf32>
    %606 = arith.addf %603, %605 : vector<4x160xf32>
    %607 = vector.extract_strided_slice %606 {offsets = [0, 0], sizes = [4, 32], strides = [1, 1]} : vector<4x160xf32> to vector<4x32xf32>
    %608 = math.tanh %607 : vector<4x32xf32>
    %609 = vector.extract_strided_slice %606 {offsets = [0, 32], sizes = [4, 32], strides = [1, 1]} : vector<4x160xf32> to vector<4x32xf32>
    %610 = arith.negf %609 : vector<4x32xf32>
    %611 = math.exp %610 : vector<4x32xf32>
    %cst_238 = arith.constant 1.000000e+00 : f32
    %612 = vector.broadcast %cst_238 : f32 to vector<4x32xf32>
    %613 = arith.addf %612, %611 : vector<4x32xf32>
    %614 = arith.divf %612, %613 : vector<4x32xf32>
    %615 = vector.extract_strided_slice %606 {offsets = [0, 64], sizes = [4, 32], strides = [1, 1]} : vector<4x160xf32> to vector<4x32xf32>
    %616 = arith.negf %615 : vector<4x32xf32>
    %617 = math.exp %616 : vector<4x32xf32>
    %cst_239 = arith.constant 1.000000e+00 : f32
    %618 = vector.broadcast %cst_239 : f32 to vector<4x32xf32>
    %619 = arith.addf %618, %617 : vector<4x32xf32>
    %620 = arith.divf %618, %619 : vector<4x32xf32>
    %621 = vector.extract_strided_slice %606 {offsets = [0, 96], sizes = [4, 32], strides = [1, 1]} : vector<4x160xf32> to vector<4x32xf32>
    %622 = arith.negf %621 : vector<4x32xf32>
    %623 = math.exp %622 : vector<4x32xf32>
    %cst_240 = arith.constant 1.000000e+00 : f32
    %624 = vector.broadcast %cst_240 : f32 to vector<4x32xf32>
    %625 = arith.addf %624, %623 : vector<4x32xf32>
    %626 = arith.divf %624, %625 : vector<4x32xf32>
    %627 = vector.extract_strided_slice %606 {offsets = [0, 128], sizes = [4, 32], strides = [1, 1]} : vector<4x160xf32> to vector<4x32xf32>
    %628 = arith.negf %627 : vector<4x32xf32>
    %629 = math.exp %628 : vector<4x32xf32>
    %cst_241 = arith.constant 1.000000e+00 : f32
    %630 = vector.broadcast %cst_241 : f32 to vector<4x32xf32>
    %631 = arith.addf %630, %629 : vector<4x32xf32>
    %632 = arith.divf %630, %631 : vector<4x32xf32>
    %633 = arith.mulf %614, %608 : vector<4x32xf32>
    %634 = arith.mulf %620, %596 : vector<4x32xf32>
    %635 = arith.addf %633, %634 : vector<4x32xf32>
    %636 = arith.mulf %626, %599 : vector<4x32xf32>
    %637 = arith.addf %635, %636 : vector<4x32xf32>
    %638 = math.tanh %637 : vector<4x32xf32>
    %639 = arith.mulf %632, %638 : vector<4x32xf32>
    %640 = vector.broadcast %577 : vector<4x1xf32> to vector<4x32xf32>
    %641 = arith.mulf %640, %639 : vector<4x32xf32>
    %642 = arith.index_cast %c7_i32 : i32 to index
    %c0_242 = arith.constant 0 : index
    %c0_243 = arith.constant 0 : index
    %643 = vector.load %arg17[%642, %c0_242, %c0_243] : memref<8x4x32xf32, #tpu.memory_space<vmem>>, vector<1x4x32xf32>
    %644 = vector.shape_cast %643 : vector<1x4x32xf32> to vector<4x32xf32>
    %645 = vector.shape_cast %641 : vector<4x32xf32> to vector<1x4x32xf32>
    tpu.vector_store %arg17[%642, %c0_242, %c0_243], %645 {strides = array<i32>} : memref<8x4x32xf32, #tpu.memory_space<vmem>>, vector<1x4x32xf32>,
    %646 = vector.broadcast %577 : vector<4x1xf32> to vector<4x32xf32>
    %647 = arith.mulf %646, %637 : vector<4x32xf32>
    %648 = arith.index_cast %c7_i32 : i32 to index
    %c0_244 = arith.constant 0 : index
    %c0_245 = arith.constant 0 : index
    %649 = vector.load %arg18[%648, %c0_244, %c0_245] : memref<8x4x32xf32, #tpu.memory_space<vmem>>, vector<1x4x32xf32>
    %650 = vector.shape_cast %649 : vector<1x4x32xf32> to vector<4x32xf32>
    %651 = vector.shape_cast %647 : vector<4x32xf32> to vector<1x4x32xf32>
    tpu.vector_store %arg18[%648, %c0_244, %c0_245], %651 {strides = array<i32>} : memref<8x4x32xf32, #tpu.memory_space<vmem>>, vector<1x4x32xf32>,
    %c8_i32 = arith.constant 8 : i32
    %c0_246 = arith.constant 0 : index
    %c0_247 = arith.constant 0 : index
    %c0_248 = arith.constant 0 : index
    %652 = vector.load %arg17[%c0_246, %c0_247, %c0_248] : memref<8x4x32xf32, #tpu.memory_space<vmem>>, vector<8x4x32xf32>
    %653 = vector.extract_strided_slice %652 {offsets = [0, 0, 0], sizes = [8, 2, 32], strides = [1, 1, 1]} : vector<8x4x32xf32> to vector<8x2x32xf32>
    %654 = tpu.transpose %653, [1, 0, 2] : vector<8x2x32xf32> -> vector<2x8x32xf32>
    %655 = vector.extract_strided_slice %652 {offsets = [0, 2, 0], sizes = [8, 2, 32], strides = [1, 1, 1]} : vector<8x4x32xf32> to vector<8x2x32xf32>
    %656 = tpu.transpose %655, [1, 0, 2] : vector<8x2x32xf32> -> vector<2x8x32xf32>
    %657 = arith.truncf %654 : vector<2x8x32xf32> to vector<2x8x32xbf16>
    %658 = arith.truncf %656 : vector<2x8x32xf32> to vector<2x8x32xbf16>
    %c0_249 = arith.constant 0 : index
    %c0_250 = arith.constant 0 : index
    %c0_251 = arith.constant 0 : index
    %659 = vector.load %arg4[%c0_249, %c0_250, %c0_251] : memref<2x1x8xf32, #tpu.memory_space<vmem>>, vector<2x1x8xf32>
    %c0_252 = arith.constant 0 : index
    %c0_253 = arith.constant 0 : index
    %c0_254 = arith.constant 0 : index
    %660 = vector.load %arg5[%c0_252, %c0_253, %c0_254] : memref<2x1x8xf32, #tpu.memory_space<vmem>>, vector<2x1x8xf32>
    "tpu.trace_start"() <{level = 10 : i32, message = "bid,bjd->bij"}> : () -> ()
    %cst_255 = arith.constant dense<0.000000e+00> : vector<2x8x8xf32>
    %661 = tpu.matmul %657, %658, %cst_255 {dimension_numbers = #tpu.dot_dimension_numbers<[2], [2], [1], [1], [0, 0, 0, 1, 1, 1], [0], [0]>} : vector<2x8x32xbf16>, vector<2x8x32xbf16>, vector<2x8x8xf32> -> vector<2x8x8xf32>
    "tpu.trace_stop"() : () -> ()
    "tpu.trace_start"() <{level = 10 : i32, message = "bjd,bid->bji"}> : () -> ()
    %cst_256 = arith.constant dense<0.000000e+00> : vector<2x8x8xf32>
    %662 = tpu.matmul %658, %657, %cst_256 {dimension_numbers = #tpu.dot_dimension_numbers<[2], [2], [1], [1], [0, 0, 0, 1, 1, 1], [0], [0]>} : vector<2x8x32xbf16>, vector<2x8x32xbf16>, vector<2x8x8xf32> -> vector<2x8x8xf32>
    "tpu.trace_stop"() : () -> ()
    %cst_257 = arith.constant dense<0xFF800000> : vector<2x8xf32>
    %663 = vector.multi_reduction <maximumf>, %661, %cst_257 [2] : vector<2x8x8xf32> to vector<2x8xf32>
    %664 = vector.shape_cast %663 : vector<2x8xf32> to vector<2x8x1xf32>
    %665 = vector.broadcast %664 : vector<2x8x1xf32> to vector<2x8x8xf32>
    %666 = arith.subf %661, %665 : vector<2x8x8xf32>
    %667 = math.exp %666 : vector<2x8x8xf32>
    %668 = vector.broadcast %660 : vector<2x1x8xf32> to vector<2x8x8xf32>
    %669 = arith.mulf %667, %668 : vector<2x8x8xf32>
    %cst_258 = arith.constant dense<0xFF800000> : vector<2x8xf32>
    %670 = vector.multi_reduction <maximumf>, %662, %cst_258 [2] : vector<2x8x8xf32> to vector<2x8xf32>
    %671 = vector.shape_cast %670 : vector<2x8xf32> to vector<2x8x1xf32>
    %672 = vector.broadcast %671 : vector<2x8x1xf32> to vector<2x8x8xf32>
    %673 = arith.subf %662, %672 : vector<2x8x8xf32>
    %674 = math.exp %673 : vector<2x8x8xf32>
    %675 = vector.broadcast %659 : vector<2x1x8xf32> to vector<2x8x8xf32>
    %676 = arith.mulf %674, %675 : vector<2x8x8xf32>
    %cst_259 = arith.constant dense<0.000000e+00> : vector<2x8xf32>
    %677 = vector.multi_reduction <add>, %669, %cst_259 [2] : vector<2x8x8xf32> to vector<2x8xf32>
    %678 = vector.shape_cast %677 : vector<2x8xf32> to vector<2x8x1xf32>
    %cst_260 = arith.constant 1.000000e-30 : f32
    %679 = vector.broadcast %cst_260 : f32 to vector<2x8x1xf32>
    %680 = arith.maximumf %678, %679 : vector<2x8x1xf32>
    %681 = vector.broadcast %680 : vector<2x8x1xf32> to vector<2x8x8xf32>
    %682 = arith.divf %669, %681 : vector<2x8x8xf32>
    %cst_261 = arith.constant dense<0.000000e+00> : vector<2x8xf32>
    %683 = vector.multi_reduction <add>, %676, %cst_261 [2] : vector<2x8x8xf32> to vector<2x8xf32>
    %684 = vector.shape_cast %683 : vector<2x8xf32> to vector<2x8x1xf32>
    %cst_262 = arith.constant 1.000000e-30 : f32
    %685 = vector.broadcast %cst_262 : f32 to vector<2x8x1xf32>
    %686 = arith.maximumf %684, %685 : vector<2x8x1xf32>
    %687 = vector.broadcast %686 : vector<2x8x1xf32> to vector<2x8x8xf32>
    %688 = arith.divf %676, %687 : vector<2x8x8xf32>
    %689 = arith.truncf %682 : vector<2x8x8xf32> to vector<2x8x8xbf16>
    "tpu.trace_start"() <{level = 10 : i32, message = "bij,bjd->bid"}> : () -> ()
    %cst_263 = arith.constant dense<0.000000e+00> : vector<2x8x32xf32>
    %690 = tpu.matmul %689, %658, %cst_263 {dimension_numbers = #tpu.dot_dimension_numbers<[2], [1], [1], [2], [0, 0, 0, 1, 1, 2], [0], [0]>} : vector<2x8x8xbf16>, vector<2x8x32xbf16>, vector<2x8x32xf32> -> vector<2x8x32xf32>
    "tpu.trace_stop"() : () -> ()
    %691 = arith.truncf %688 : vector<2x8x8xf32> to vector<2x8x8xbf16>
    "tpu.trace_start"() <{level = 10 : i32, message = "bji,bid->bjd"}> : () -> ()
    %cst_264 = arith.constant dense<0.000000e+00> : vector<2x8x32xf32>
    %692 = tpu.matmul %691, %657, %cst_264 {dimension_numbers = #tpu.dot_dimension_numbers<[2], [1], [1], [2], [0, 0, 0, 1, 1, 2], [0], [0]>} : vector<2x8x8xbf16>, vector<2x8x32xbf16>, vector<2x8x32xf32> -> vector<2x8x32xf32>
    "tpu.trace_stop"() : () -> ()
    %693 = arith.mulf %654, %690 : vector<2x8x32xf32>
    %694 = arith.subf %654, %690 : vector<2x8x32xf32>
    %695 = tpu.concatenate %654, %690, %693, %694 in 2 : vector<2x8x32xf32>, vector<2x8x32xf32>, vector<2x8x32xf32>, vector<2x8x32xf32> -> vector<2x8x128xf32>
    %696 = vector.shape_cast %695 : vector<2x8x128xf32> to vector<16x128xf32>
    %697 = arith.mulf %656, %692 : vector<2x8x32xf32>
    %698 = arith.subf %656, %692 : vector<2x8x32xf32>
    %699 = tpu.concatenate %656, %692, %697, %698 in 2 : vector<2x8x32xf32>, vector<2x8x32xf32>, vector<2x8x32xf32>, vector<2x8x32xf32> -> vector<2x8x128xf32>
    %700 = vector.shape_cast %699 : vector<2x8x128xf32> to vector<16x128xf32>
    %701 = tpu.concatenate %696, %700 in 0 : vector<16x128xf32>, vector<16x128xf32> -> vector<32x128xf32>
    %702 = arith.truncf %701 : vector<32x128xf32> to vector<32x128xbf16>
    %c0_265 = arith.constant 0 : index
    %c0_266 = arith.constant 0 : index
    %703 = vector.load %arg8[%c0_265, %c0_266] : memref<128x32xbf16, #tpu.memory_space<vmem>>, vector<128x32xbf16>
    %cst_267 = arith.constant dense<0.000000e+00> : vector<32x32xf32>
    %704 = tpu.matmul %702, %703, %cst_267 {dimension_numbers = #tpu.dot_dimension_numbers<[1], [0], [0], [1], [0, 0, 1, 1], [], []>} : vector<32x128xbf16>, vector<128x32xbf16>, vector<32x32xf32> -> vector<32x32xf32>
    %c0_268 = arith.constant 0 : index
    %c0_269 = arith.constant 0 : index
    %705 = vector.load %arg9[%c0_268, %c0_269] : memref<1x32xf32, #tpu.memory_space<vmem>>, vector<1x32xf32>
    %706 = vector.broadcast %705 : vector<1x32xf32> to vector<32x32xf32>
    %707 = arith.addf %704, %706 : vector<32x32xf32>
    %cst_270 = arith.constant 0.000000e+00 : f32
    %708 = vector.broadcast %cst_270 : f32 to vector<32x32xf32>
    %709 = arith.maximumf %707, %708 : vector<32x32xf32>
    %710 = vector.extract_strided_slice %709 {offsets = [0, 0], sizes = [16, 32], strides = [1, 1]} : vector<32x32xf32> to vector<16x32xf32>
    %711 = vector.shape_cast %710 : vector<16x32xf32> to vector<2x8x32xf32>
    %712 = vector.extract_strided_slice %709 {offsets = [16, 0], sizes = [16, 32], strides = [1, 1]} : vector<32x32xf32> to vector<16x32xf32>
    %713 = vector.shape_cast %712 : vector<16x32xf32> to vector<2x8x32xf32>
    %714 = tpu.transpose %711, [1, 0, 2] : vector<2x8x32xf32> -> vector<8x2x32xf32>
    %715 = tpu.transpose %713, [1, 0, 2] : vector<2x8x32xf32> -> vector<8x2x32xf32>
    %716 = tpu.concatenate %714, %715 in 1 : vector<8x2x32xf32>, vector<8x2x32xf32> -> vector<8x4x32xf32>
    %c0_271 = arith.constant 0 : index
    %c0_272 = arith.constant 0 : index
    %c0_273 = arith.constant 0 : index
    %717 = vector.load %arg19[%c0_271, %c0_272, %c0_273] : memref<8x4x32xf32, #tpu.memory_space<vmem>>, vector<8x4x32xf32>
    tpu.vector_store %arg19[%c0_271, %c0_272, %c0_273], %716 {strides = array<i32>} : memref<8x4x32xf32, #tpu.memory_space<vmem>>, vector<8x4x32xf32>,
    %cst_274 = arith.constant 0.000000e+00 : f32
    %718 = vector.broadcast %cst_274 : f32 to vector<8x4x32xf32>
    %c0_275 = arith.constant 0 : index
    %c0_276 = arith.constant 0 : index
    %c0_277 = arith.constant 0 : index
    %719 = vector.load %arg17[%c0_275, %c0_276, %c0_277] : memref<8x4x32xf32, #tpu.memory_space<vmem>>, vector<8x4x32xf32>
    tpu.vector_store %arg17[%c0_275, %c0_276, %c0_277], %718 {strides = array<i32>} : memref<8x4x32xf32, #tpu.memory_space<vmem>>, vector<8x4x32xf32>,
    %cst_278 = arith.constant 0.000000e+00 : f32
    %720 = vector.broadcast %cst_278 : f32 to vector<8x4x32xf32>
    %c0_279 = arith.constant 0 : index
    %c0_280 = arith.constant 0 : index
    %c0_281 = arith.constant 0 : index
    %721 = vector.load %arg18[%c0_279, %c0_280, %c0_281] : memref<8x4x32xf32, #tpu.memory_space<vmem>>, vector<8x4x32xf32>
    tpu.vector_store %arg18[%c0_279, %c0_280, %c0_281], %720 {strides = array<i32>} : memref<8x4x32xf32, #tpu.memory_space<vmem>>, vector<8x4x32xf32>,
    %c0_i32_282 = arith.constant 0 : i32
    %722 = arith.index_cast %c0_i32_282 : i32 to index
    %c0_283 = arith.constant 0 : index
    %c0_284 = arith.constant 0 : index
    %723 = vector.load %arg19[%722, %c0_283, %c0_284] : memref<8x4x32xf32, #tpu.memory_space<vmem>>, vector<1x4x32xf32>
    %724 = vector.shape_cast %723 : vector<1x4x32xf32> to vector<4x32xf32>
    %725 = arith.index_cast %c0_i32_282 : i32 to index
    %c0_285 = arith.constant 0 : index
    %726 = vector.load %arg1[%725, %c0_285] : memref<8x4xf32, #tpu.memory_space<vmem>>, vector<1x4xf32>
    %727 = vector.shape_cast %726 : vector<1x4xf32> to vector<4xf32>
    %728 = vector.shape_cast %727 : vector<4xf32> to vector<4x1xf32>
    %729 = arith.index_cast %c0_i32_282 : i32 to index
    %c0_286 = arith.constant 0 : index
    %c0_287 = arith.constant 0 : index
    %730 = vector.load %arg2[%729, %c0_286, %c0_287] : memref<8x8x4xf32, #tpu.memory_space<vmem>>, vector<1x8x4xf32>
    %731 = vector.shape_cast %730 : vector<1x8x4xf32> to vector<8x4xf32>
    %732 = vector.shape_cast %731 : vector<8x4xf32> to vector<8x4x1xf32>
    %733 = arith.index_cast %c0_i32_282 : i32 to index
    %c0_288 = arith.constant 0 : index
    %c0_289 = arith.constant 0 : index
    %734 = vector.load %arg3[%733, %c0_288, %c0_289] : memref<8x8x4xf32, #tpu.memory_space<vmem>>, vector<1x8x4xf32>
    %735 = vector.shape_cast %734 : vector<1x8x4xf32> to vector<8x4xf32>
    %736 = vector.shape_cast %735 : vector<8x4xf32> to vector<8x4x1xf32>
    %c0_290 = arith.constant 0 : index
    %c0_291 = arith.constant 0 : index
    %c0_292 = arith.constant 0 : index
    %737 = vector.load %arg17[%c0_290, %c0_291, %c0_292] : memref<8x4x32xf32, #tpu.memory_space<vmem>>, vector<8x4x32xf32>
    %c0_293 = arith.constant 0 : index
    %c0_294 = arith.constant 0 : index
    %c0_295 = arith.constant 0 : index
    %738 = vector.load %arg18[%c0_293, %c0_294, %c0_295] : memref<8x4x32xf32, #tpu.memory_space<vmem>>, vector<8x4x32xf32>
    %739 = vector.broadcast %732 : vector<8x4x1xf32> to vector<8x4x32xf32>
    %740 = arith.mulf %739, %737 : vector<8x4x32xf32>
    %cst_296 = arith.constant dense<0.000000e+00> : vector<4x32xf32>
    %741 = vector.multi_reduction <add>, %740, %cst_296 [0] : vector<8x4x32xf32> to vector<4x32xf32>
    %742 = vector.broadcast %736 : vector<8x4x1xf32> to vector<8x4x32xf32>
    %743 = arith.mulf %742, %737 : vector<8x4x32xf32>
    %cst_297 = arith.constant dense<0.000000e+00> : vector<4x32xf32>
    %744 = vector.multi_reduction <add>, %743, %cst_297 [0] : vector<8x4x32xf32> to vector<4x32xf32>
    %745 = vector.broadcast %732 : vector<8x4x1xf32> to vector<8x4x32xf32>
    %746 = arith.mulf %745, %738 : vector<8x4x32xf32>
    %cst_298 = arith.constant dense<0.000000e+00> : vector<4x32xf32>
    %747 = vector.multi_reduction <add>, %746, %cst_298 [0] : vector<8x4x32xf32> to vector<4x32xf32>
    %748 = vector.broadcast %736 : vector<8x4x1xf32> to vector<8x4x32xf32>
    %749 = arith.mulf %748, %738 : vector<8x4x32xf32>
    %cst_299 = arith.constant dense<0.000000e+00> : vector<4x32xf32>
    %750 = vector.multi_reduction <add>, %749, %cst_299 [0] : vector<8x4x32xf32> to vector<4x32xf32>
    %751 = tpu.concatenate %724, %741, %744 in 1 : vector<4x32xf32>, vector<4x32xf32>, vector<4x32xf32> -> vector<4x96xf32>
    %752 = arith.truncf %751 : vector<4x96xf32> to vector<4x96xbf16>
    %c0_300 = arith.constant 0 : index
    %c0_301 = arith.constant 0 : index
    %753 = vector.load %arg10[%c0_300, %c0_301] : memref<96x160xbf16, #tpu.memory_space<vmem>>, vector<96x160xbf16>
    %cst_302 = arith.constant dense<0.000000e+00> : vector<4x160xf32>
    %754 = tpu.matmul %752, %753, %cst_302 {dimension_numbers = #tpu.dot_dimension_numbers<[1], [0], [0], [1], [0, 0, 1, 1], [], []>} : vector<4x96xbf16>, vector<96x160xbf16>, vector<4x160xf32> -> vector<4x160xf32>
    %c0_303 = arith.constant 0 : index
    %c0_304 = arith.constant 0 : index
    %755 = vector.load %arg11[%c0_303, %c0_304] : memref<1x160xf32, #tpu.memory_space<vmem>>, vector<1x160xf32>
    %756 = vector.broadcast %755 : vector<1x160xf32> to vector<4x160xf32>
    %757 = arith.addf %754, %756 : vector<4x160xf32>
    %758 = vector.extract_strided_slice %757 {offsets = [0, 0], sizes = [4, 32], strides = [1, 1]} : vector<4x160xf32> to vector<4x32xf32>
    %759 = math.tanh %758 : vector<4x32xf32>
    %760 = vector.extract_strided_slice %757 {offsets = [0, 32], sizes = [4, 32], strides = [1, 1]} : vector<4x160xf32> to vector<4x32xf32>
    %761 = arith.negf %760 : vector<4x32xf32>
    %762 = math.exp %761 : vector<4x32xf32>
    %cst_305 = arith.constant 1.000000e+00 : f32
    %763 = vector.broadcast %cst_305 : f32 to vector<4x32xf32>
    %764 = arith.addf %763, %762 : vector<4x32xf32>
    %765 = arith.divf %763, %764 : vector<4x32xf32>
    %766 = vector.extract_strided_slice %757 {offsets = [0, 64], sizes = [4, 32], strides = [1, 1]} : vector<4x160xf32> to vector<4x32xf32>
    %767 = arith.negf %766 : vector<4x32xf32>
    %768 = math.exp %767 : vector<4x32xf32>
    %cst_306 = arith.constant 1.000000e+00 : f32
    %769 = vector.broadcast %cst_306 : f32 to vector<4x32xf32>
    %770 = arith.addf %769, %768 : vector<4x32xf32>
    %771 = arith.divf %769, %770 : vector<4x32xf32>
    %772 = vector.extract_strided_slice %757 {offsets = [0, 96], sizes = [4, 32], strides = [1, 1]} : vector<4x160xf32> to vector<4x32xf32>
    %773 = arith.negf %772 : vector<4x32xf32>
    %774 = math.exp %773 : vector<4x32xf32>
    %cst_307 = arith.constant 1.000000e+00 : f32
    %775 = vector.broadcast %cst_307 : f32 to vector<4x32xf32>
    %776 = arith.addf %775, %774 : vector<4x32xf32>
    %777 = arith.divf %775, %776 : vector<4x32xf32>
    %778 = vector.extract_strided_slice %757 {offsets = [0, 128], sizes = [4, 32], strides = [1, 1]} : vector<4x160xf32> to vector<4x32xf32>
    %779 = arith.negf %778 : vector<4x32xf32>
    %780 = math.exp %779 : vector<4x32xf32>
    %cst_308 = arith.constant 1.000000e+00 : f32
    %781 = vector.broadcast %cst_308 : f32 to vector<4x32xf32>
    %782 = arith.addf %781, %780 : vector<4x32xf32>
    %783 = arith.divf %781, %782 : vector<4x32xf32>
    %784 = arith.mulf %765, %759 : vector<4x32xf32>
    %785 = arith.mulf %771, %747 : vector<4x32xf32>
    %786 = arith.addf %784, %785 : vector<4x32xf32>
    %787 = arith.mulf %777, %750 : vector<4x32xf32>
    %788 = arith.addf %786, %787 : vector<4x32xf32>
    %789 = math.tanh %788 : vector<4x32xf32>
    %790 = arith.mulf %783, %789 : vector<4x32xf32>
    %791 = vector.broadcast %728 : vector<4x1xf32> to vector<4x32xf32>
    %792 = arith.mulf %791, %790 : vector<4x32xf32>
    %793 = arith.index_cast %c0_i32_282 : i32 to index
    %c0_309 = arith.constant 0 : index
    %c0_310 = arith.constant 0 : index
    %794 = vector.load %arg17[%793, %c0_309, %c0_310] : memref<8x4x32xf32, #tpu.memory_space<vmem>>, vector<1x4x32xf32>
    %795 = vector.shape_cast %794 : vector<1x4x32xf32> to vector<4x32xf32>
    %796 = vector.shape_cast %792 : vector<4x32xf32> to vector<1x4x32xf32>
    tpu.vector_store %arg17[%793, %c0_309, %c0_310], %796 {strides = array<i32>} : memref<8x4x32xf32, #tpu.memory_space<vmem>>, vector<1x4x32xf32>,
    %797 = vector.broadcast %728 : vector<4x1xf32> to vector<4x32xf32>
    %798 = arith.mulf %797, %788 : vector<4x32xf32>
    %799 = arith.index_cast %c0_i32_282 : i32 to index
    %c0_311 = arith.constant 0 : index
    %c0_312 = arith.constant 0 : index
    %800 = vector.load %arg18[%799, %c0_311, %c0_312] : memref<8x4x32xf32, #tpu.memory_space<vmem>>, vector<1x4x32xf32>
    %801 = vector.shape_cast %800 : vector<1x4x32xf32> to vector<4x32xf32>
    %802 = vector.shape_cast %798 : vector<4x32xf32> to vector<1x4x32xf32>
    tpu.vector_store %arg18[%799, %c0_311, %c0_312], %802 {strides = array<i32>} : memref<8x4x32xf32, #tpu.memory_space<vmem>>, vector<1x4x32xf32>,
    %c1_i32_313 = arith.constant 1 : i32
    %803 = arith.index_cast %c1_i32_313 : i32 to index
    %c0_314 = arith.constant 0 : index
    %c0_315 = arith.constant 0 : index
    %804 = vector.load %arg19[%803, %c0_314, %c0_315] : memref<8x4x32xf32, #tpu.memory_space<vmem>>, vector<1x4x32xf32>
    %805 = vector.shape_cast %804 : vector<1x4x32xf32> to vector<4x32xf32>
    %806 = arith.index_cast %c1_i32_313 : i32 to index
    %c0_316 = arith.constant 0 : index
    %807 = vector.load %arg1[%806, %c0_316] : memref<8x4xf32, #tpu.memory_space<vmem>>, vector<1x4xf32>
    %808 = vector.shape_cast %807 : vector<1x4xf32> to vector<4xf32>
    %809 = vector.shape_cast %808 : vector<4xf32> to vector<4x1xf32>
    %810 = arith.index_cast %c1_i32_313 : i32 to index
    %c0_317 = arith.constant 0 : index
    %c0_318 = arith.constant 0 : index
    %811 = vector.load %arg2[%810, %c0_317, %c0_318] : memref<8x8x4xf32, #tpu.memory_space<vmem>>, vector<1x8x4xf32>
    %812 = vector.shape_cast %811 : vector<1x8x4xf32> to vector<8x4xf32>
    %813 = vector.shape_cast %812 : vector<8x4xf32> to vector<8x4x1xf32>
    %814 = arith.index_cast %c1_i32_313 : i32 to index
    %c0_319 = arith.constant 0 : index
    %c0_320 = arith.constant 0 : index
    %815 = vector.load %arg3[%814, %c0_319, %c0_320] : memref<8x8x4xf32, #tpu.memory_space<vmem>>, vector<1x8x4xf32>
    %816 = vector.shape_cast %815 : vector<1x8x4xf32> to vector<8x4xf32>
    %817 = vector.shape_cast %816 : vector<8x4xf32> to vector<8x4x1xf32>
    %c0_321 = arith.constant 0 : index
    %c0_322 = arith.constant 0 : index
    %c0_323 = arith.constant 0 : index
    %818 = vector.load %arg17[%c0_321, %c0_322, %c0_323] : memref<8x4x32xf32, #tpu.memory_space<vmem>>, vector<8x4x32xf32>
    %c0_324 = arith.constant 0 : index
    %c0_325 = arith.constant 0 : index
    %c0_326 = arith.constant 0 : index
    %819 = vector.load %arg18[%c0_324, %c0_325, %c0_326] : memref<8x4x32xf32, #tpu.memory_space<vmem>>, vector<8x4x32xf32>
    %820 = vector.broadcast %813 : vector<8x4x1xf32> to vector<8x4x32xf32>
    %821 = arith.mulf %820, %818 : vector<8x4x32xf32>
    %cst_327 = arith.constant dense<0.000000e+00> : vector<4x32xf32>
    %822 = vector.multi_reduction <add>, %821, %cst_327 [0] : vector<8x4x32xf32> to vector<4x32xf32>
    %823 = vector.broadcast %817 : vector<8x4x1xf32> to vector<8x4x32xf32>
    %824 = arith.mulf %823, %818 : vector<8x4x32xf32>
    %cst_328 = arith.constant dense<0.000000e+00> : vector<4x32xf32>
    %825 = vector.multi_reduction <add>, %824, %cst_328 [0] : vector<8x4x32xf32> to vector<4x32xf32>
    %826 = vector.broadcast %813 : vector<8x4x1xf32> to vector<8x4x32xf32>
    %827 = arith.mulf %826, %819 : vector<8x4x32xf32>
    %cst_329 = arith.constant dense<0.000000e+00> : vector<4x32xf32>
    %828 = vector.multi_reduction <add>, %827, %cst_329 [0] : vector<8x4x32xf32> to vector<4x32xf32>
    %829 = vector.broadcast %817 : vector<8x4x1xf32> to vector<8x4x32xf32>
    %830 = arith.mulf %829, %819 : vector<8x4x32xf32>
    %cst_330 = arith.constant dense<0.000000e+00> : vector<4x32xf32>
    %831 = vector.multi_reduction <add>, %830, %cst_330 [0] : vector<8x4x32xf32> to vector<4x32xf32>
    %832 = tpu.concatenate %805, %822, %825 in 1 : vector<4x32xf32>, vector<4x32xf32>, vector<4x32xf32> -> vector<4x96xf32>
    %833 = arith.truncf %832 : vector<4x96xf32> to vector<4x96xbf16>
    %c0_331 = arith.constant 0 : index
    %c0_332 = arith.constant 0 : index
    %834 = vector.load %arg10[%c0_331, %c0_332] : memref<96x160xbf16, #tpu.memory_space<vmem>>, vector<96x160xbf16>
    %cst_333 = arith.constant dense<0.000000e+00> : vector<4x160xf32>
    %835 = tpu.matmul %833, %834, %cst_333 {dimension_numbers = #tpu.dot_dimension_numbers<[1], [0], [0], [1], [0, 0, 1, 1], [], []>} : vector<4x96xbf16>, vector<96x160xbf16>, vector<4x160xf32> -> vector<4x160xf32>
    %c0_334 = arith.constant 0 : index
    %c0_335 = arith.constant 0 : index
    %836 = vector.load %arg11[%c0_334, %c0_335] : memref<1x160xf32, #tpu.memory_space<vmem>>, vector<1x160xf32>
    %837 = vector.broadcast %836 : vector<1x160xf32> to vector<4x160xf32>
    %838 = arith.addf %835, %837 : vector<4x160xf32>
    %839 = vector.extract_strided_slice %838 {offsets = [0, 0], sizes = [4, 32], strides = [1, 1]} : vector<4x160xf32> to vector<4x32xf32>
    %840 = math.tanh %839 : vector<4x32xf32>
    %841 = vector.extract_strided_slice %838 {offsets = [0, 32], sizes = [4, 32], strides = [1, 1]} : vector<4x160xf32> to vector<4x32xf32>
    %842 = arith.negf %841 : vector<4x32xf32>
    %843 = math.exp %842 : vector<4x32xf32>
    %cst_336 = arith.constant 1.000000e+00 : f32
    %844 = vector.broadcast %cst_336 : f32 to vector<4x32xf32>
    %845 = arith.addf %844, %843 : vector<4x32xf32>
    %846 = arith.divf %844, %845 : vector<4x32xf32>
    %847 = vector.extract_strided_slice %838 {offsets = [0, 64], sizes = [4, 32], strides = [1, 1]} : vector<4x160xf32> to vector<4x32xf32>
    %848 = arith.negf %847 : vector<4x32xf32>
    %849 = math.exp %848 : vector<4x32xf32>
    %cst_337 = arith.constant 1.000000e+00 : f32
    %850 = vector.broadcast %cst_337 : f32 to vector<4x32xf32>
    %851 = arith.addf %850, %849 : vector<4x32xf32>
    %852 = arith.divf %850, %851 : vector<4x32xf32>
    %853 = vector.extract_strided_slice %838 {offsets = [0, 96], sizes = [4, 32], strides = [1, 1]} : vector<4x160xf32> to vector<4x32xf32>
    %854 = arith.negf %853 : vector<4x32xf32>
    %855 = math.exp %854 : vector<4x32xf32>
    %cst_338 = arith.constant 1.000000e+00 : f32
    %856 = vector.broadcast %cst_338 : f32 to vector<4x32xf32>
    %857 = arith.addf %856, %855 : vector<4x32xf32>
    %858 = arith.divf %856, %857 : vector<4x32xf32>
    %859 = vector.extract_strided_slice %838 {offsets = [0, 128], sizes = [4, 32], strides = [1, 1]} : vector<4x160xf32> to vector<4x32xf32>
    %860 = arith.negf %859 : vector<4x32xf32>
    %861 = math.exp %860 : vector<4x32xf32>
    %cst_339 = arith.constant 1.000000e+00 : f32
    %862 = vector.broadcast %cst_339 : f32 to vector<4x32xf32>
    %863 = arith.addf %862, %861 : vector<4x32xf32>
    %864 = arith.divf %862, %863 : vector<4x32xf32>
    %865 = arith.mulf %846, %840 : vector<4x32xf32>
    %866 = arith.mulf %852, %828 : vector<4x32xf32>
    %867 = arith.addf %865, %866 : vector<4x32xf32>
    %868 = arith.mulf %858, %831 : vector<4x32xf32>
    %869 = arith.addf %867, %868 : vector<4x32xf32>
    %870 = math.tanh %869 : vector<4x32xf32>
    %871 = arith.mulf %864, %870 : vector<4x32xf32>
    %872 = vector.broadcast %809 : vector<4x1xf32> to vector<4x32xf32>
    %873 = arith.mulf %872, %871 : vector<4x32xf32>
    %874 = arith.index_cast %c1_i32_313 : i32 to index
    %c0_340 = arith.constant 0 : index
    %c0_341 = arith.constant 0 : index
    %875 = vector.load %arg17[%874, %c0_340, %c0_341] : memref<8x4x32xf32, #tpu.memory_space<vmem>>, vector<1x4x32xf32>
    %876 = vector.shape_cast %875 : vector<1x4x32xf32> to vector<4x32xf32>
    %877 = vector.shape_cast %873 : vector<4x32xf32> to vector<1x4x32xf32>
    tpu.vector_store %arg17[%874, %c0_340, %c0_341], %877 {strides = array<i32>} : memref<8x4x32xf32, #tpu.memory_space<vmem>>, vector<1x4x32xf32>,
    %878 = vector.broadcast %809 : vector<4x1xf32> to vector<4x32xf32>
    %879 = arith.mulf %878, %869 : vector<4x32xf32>
    %880 = arith.index_cast %c1_i32_313 : i32 to index
    %c0_342 = arith.constant 0 : index
    %c0_343 = arith.constant 0 : index
    %881 = vector.load %arg18[%880, %c0_342, %c0_343] : memref<8x4x32xf32, #tpu.memory_space<vmem>>, vector<1x4x32xf32>
    %882 = vector.shape_cast %881 : vector<1x4x32xf32> to vector<4x32xf32>
    %883 = vector.shape_cast %879 : vector<4x32xf32> to vector<1x4x32xf32>
    tpu.vector_store %arg18[%880, %c0_342, %c0_343], %883 {strides = array<i32>} : memref<8x4x32xf32, #tpu.memory_space<vmem>>, vector<1x4x32xf32>,
    %c2_i32_344 = arith.constant 2 : i32
    %884 = arith.index_cast %c2_i32_344 : i32 to index
    %c0_345 = arith.constant 0 : index
    %c0_346 = arith.constant 0 : index
    %885 = vector.load %arg19[%884, %c0_345, %c0_346] : memref<8x4x32xf32, #tpu.memory_space<vmem>>, vector<1x4x32xf32>
    %886 = vector.shape_cast %885 : vector<1x4x32xf32> to vector<4x32xf32>
    %887 = arith.index_cast %c2_i32_344 : i32 to index
    %c0_347 = arith.constant 0 : index
    %888 = vector.load %arg1[%887, %c0_347] : memref<8x4xf32, #tpu.memory_space<vmem>>, vector<1x4xf32>
    %889 = vector.shape_cast %888 : vector<1x4xf32> to vector<4xf32>
    %890 = vector.shape_cast %889 : vector<4xf32> to vector<4x1xf32>
    %891 = arith.index_cast %c2_i32_344 : i32 to index
    %c0_348 = arith.constant 0 : index
    %c0_349 = arith.constant 0 : index
    %892 = vector.load %arg2[%891, %c0_348, %c0_349] : memref<8x8x4xf32, #tpu.memory_space<vmem>>, vector<1x8x4xf32>
    %893 = vector.shape_cast %892 : vector<1x8x4xf32> to vector<8x4xf32>
    %894 = vector.shape_cast %893 : vector<8x4xf32> to vector<8x4x1xf32>
    %895 = arith.index_cast %c2_i32_344 : i32 to index
    %c0_350 = arith.constant 0 : index
    %c0_351 = arith.constant 0 : index
    %896 = vector.load %arg3[%895, %c0_350, %c0_351] : memref<8x8x4xf32, #tpu.memory_space<vmem>>, vector<1x8x4xf32>
    %897 = vector.shape_cast %896 : vector<1x8x4xf32> to vector<8x4xf32>
    %898 = vector.shape_cast %897 : vector<8x4xf32> to vector<8x4x1xf32>
    %c0_352 = arith.constant 0 : index
    %c0_353 = arith.constant 0 : index
    %c0_354 = arith.constant 0 : index
    %899 = vector.load %arg17[%c0_352, %c0_353, %c0_354] : memref<8x4x32xf32, #tpu.memory_space<vmem>>, vector<8x4x32xf32>
    %c0_355 = arith.constant 0 : index
    %c0_356 = arith.constant 0 : index
    %c0_357 = arith.constant 0 : index
    %900 = vector.load %arg18[%c0_355, %c0_356, %c0_357] : memref<8x4x32xf32, #tpu.memory_space<vmem>>, vector<8x4x32xf32>
    %901 = vector.broadcast %894 : vector<8x4x1xf32> to vector<8x4x32xf32>
    %902 = arith.mulf %901, %899 : vector<8x4x32xf32>
    %cst_358 = arith.constant dense<0.000000e+00> : vector<4x32xf32>
    %903 = vector.multi_reduction <add>, %902, %cst_358 [0] : vector<8x4x32xf32> to vector<4x32xf32>
    %904 = vector.broadcast %898 : vector<8x4x1xf32> to vector<8x4x32xf32>
    %905 = arith.mulf %904, %899 : vector<8x4x32xf32>
    %cst_359 = arith.constant dense<0.000000e+00> : vector<4x32xf32>
    %906 = vector.multi_reduction <add>, %905, %cst_359 [0] : vector<8x4x32xf32> to vector<4x32xf32>
    %907 = vector.broadcast %894 : vector<8x4x1xf32> to vector<8x4x32xf32>
    %908 = arith.mulf %907, %900 : vector<8x4x32xf32>
    %cst_360 = arith.constant dense<0.000000e+00> : vector<4x32xf32>
    %909 = vector.multi_reduction <add>, %908, %cst_360 [0] : vector<8x4x32xf32> to vector<4x32xf32>
    %910 = vector.broadcast %898 : vector<8x4x1xf32> to vector<8x4x32xf32>
    %911 = arith.mulf %910, %900 : vector<8x4x32xf32>
    %cst_361 = arith.constant dense<0.000000e+00> : vector<4x32xf32>
    %912 = vector.multi_reduction <add>, %911, %cst_361 [0] : vector<8x4x32xf32> to vector<4x32xf32>
    %913 = tpu.concatenate %886, %903, %906 in 1 : vector<4x32xf32>, vector<4x32xf32>, vector<4x32xf32> -> vector<4x96xf32>
    %914 = arith.truncf %913 : vector<4x96xf32> to vector<4x96xbf16>
    %c0_362 = arith.constant 0 : index
    %c0_363 = arith.constant 0 : index
    %915 = vector.load %arg10[%c0_362, %c0_363] : memref<96x160xbf16, #tpu.memory_space<vmem>>, vector<96x160xbf16>
    %cst_364 = arith.constant dense<0.000000e+00> : vector<4x160xf32>
    %916 = tpu.matmul %914, %915, %cst_364 {dimension_numbers = #tpu.dot_dimension_numbers<[1], [0], [0], [1], [0, 0, 1, 1], [], []>} : vector<4x96xbf16>, vector<96x160xbf16>, vector<4x160xf32> -> vector<4x160xf32>
    %c0_365 = arith.constant 0 : index
    %c0_366 = arith.constant 0 : index
    %917 = vector.load %arg11[%c0_365, %c0_366] : memref<1x160xf32, #tpu.memory_space<vmem>>, vector<1x160xf32>
    %918 = vector.broadcast %917 : vector<1x160xf32> to vector<4x160xf32>
    %919 = arith.addf %916, %918 : vector<4x160xf32>
    %920 = vector.extract_strided_slice %919 {offsets = [0, 0], sizes = [4, 32], strides = [1, 1]} : vector<4x160xf32> to vector<4x32xf32>
    %921 = math.tanh %920 : vector<4x32xf32>
    %922 = vector.extract_strided_slice %919 {offsets = [0, 32], sizes = [4, 32], strides = [1, 1]} : vector<4x160xf32> to vector<4x32xf32>
    %923 = arith.negf %922 : vector<4x32xf32>
    %924 = math.exp %923 : vector<4x32xf32>
    %cst_367 = arith.constant 1.000000e+00 : f32
    %925 = vector.broadcast %cst_367 : f32 to vector<4x32xf32>
    %926 = arith.addf %925, %924 : vector<4x32xf32>
    %927 = arith.divf %925, %926 : vector<4x32xf32>
    %928 = vector.extract_strided_slice %919 {offsets = [0, 64], sizes = [4, 32], strides = [1, 1]} : vector<4x160xf32> to vector<4x32xf32>
    %929 = arith.negf %928 : vector<4x32xf32>
    %930 = math.exp %929 : vector<4x32xf32>
    %cst_368 = arith.constant 1.000000e+00 : f32
    %931 = vector.broadcast %cst_368 : f32 to vector<4x32xf32>
    %932 = arith.addf %931, %930 : vector<4x32xf32>
    %933 = arith.divf %931, %932 : vector<4x32xf32>
    %934 = vector.extract_strided_slice %919 {offsets = [0, 96], sizes = [4, 32], strides = [1, 1]} : vector<4x160xf32> to vector<4x32xf32>
    %935 = arith.negf %934 : vector<4x32xf32>
    %936 = math.exp %935 : vector<4x32xf32>
    %cst_369 = arith.constant 1.000000e+00 : f32
    %937 = vector.broadcast %cst_369 : f32 to vector<4x32xf32>
    %938 = arith.addf %937, %936 : vector<4x32xf32>
    %939 = arith.divf %937, %938 : vector<4x32xf32>
    %940 = vector.extract_strided_slice %919 {offsets = [0, 128], sizes = [4, 32], strides = [1, 1]} : vector<4x160xf32> to vector<4x32xf32>
    %941 = arith.negf %940 : vector<4x32xf32>
    %942 = math.exp %941 : vector<4x32xf32>
    %cst_370 = arith.constant 1.000000e+00 : f32
    %943 = vector.broadcast %cst_370 : f32 to vector<4x32xf32>
    %944 = arith.addf %943, %942 : vector<4x32xf32>
    %945 = arith.divf %943, %944 : vector<4x32xf32>
    %946 = arith.mulf %927, %921 : vector<4x32xf32>
    %947 = arith.mulf %933, %909 : vector<4x32xf32>
    %948 = arith.addf %946, %947 : vector<4x32xf32>
    %949 = arith.mulf %939, %912 : vector<4x32xf32>
    %950 = arith.addf %948, %949 : vector<4x32xf32>
    %951 = math.tanh %950 : vector<4x32xf32>
    %952 = arith.mulf %945, %951 : vector<4x32xf32>
    %953 = vector.broadcast %890 : vector<4x1xf32> to vector<4x32xf32>
    %954 = arith.mulf %953, %952 : vector<4x32xf32>
    %955 = arith.index_cast %c2_i32_344 : i32 to index
    %c0_371 = arith.constant 0 : index
    %c0_372 = arith.constant 0 : index
    %956 = vector.load %arg17[%955, %c0_371, %c0_372] : memref<8x4x32xf32, #tpu.memory_space<vmem>>, vector<1x4x32xf32>
    %957 = vector.shape_cast %956 : vector<1x4x32xf32> to vector<4x32xf32>
    %958 = vector.shape_cast %954 : vector<4x32xf32> to vector<1x4x32xf32>
    tpu.vector_store %arg17[%955, %c0_371, %c0_372], %958 {strides = array<i32>} : memref<8x4x32xf32, #tpu.memory_space<vmem>>, vector<1x4x32xf32>,
    %959 = vector.broadcast %890 : vector<4x1xf32> to vector<4x32xf32>
    %960 = arith.mulf %959, %950 : vector<4x32xf32>
    %961 = arith.index_cast %c2_i32_344 : i32 to index
    %c0_373 = arith.constant 0 : index
    %c0_374 = arith.constant 0 : index
    %962 = vector.load %arg18[%961, %c0_373, %c0_374] : memref<8x4x32xf32, #tpu.memory_space<vmem>>, vector<1x4x32xf32>
    %963 = vector.shape_cast %962 : vector<1x4x32xf32> to vector<4x32xf32>
    %964 = vector.shape_cast %960 : vector<4x32xf32> to vector<1x4x32xf32>
    tpu.vector_store %arg18[%961, %c0_373, %c0_374], %964 {strides = array<i32>} : memref<8x4x32xf32, #tpu.memory_space<vmem>>, vector<1x4x32xf32>,
    %c3_i32_375 = arith.constant 3 : i32
    %965 = arith.index_cast %c3_i32_375 : i32 to index
    %c0_376 = arith.constant 0 : index
    %c0_377 = arith.constant 0 : index
    %966 = vector.load %arg19[%965, %c0_376, %c0_377] : memref<8x4x32xf32, #tpu.memory_space<vmem>>, vector<1x4x32xf32>
    %967 = vector.shape_cast %966 : vector<1x4x32xf32> to vector<4x32xf32>
    %968 = arith.index_cast %c3_i32_375 : i32 to index
    %c0_378 = arith.constant 0 : index
    %969 = vector.load %arg1[%968, %c0_378] : memref<8x4xf32, #tpu.memory_space<vmem>>, vector<1x4xf32>
    %970 = vector.shape_cast %969 : vector<1x4xf32> to vector<4xf32>
    %971 = vector.shape_cast %970 : vector<4xf32> to vector<4x1xf32>
    %972 = arith.index_cast %c3_i32_375 : i32 to index
    %c0_379 = arith.constant 0 : index
    %c0_380 = arith.constant 0 : index
    %973 = vector.load %arg2[%972, %c0_379, %c0_380] : memref<8x8x4xf32, #tpu.memory_space<vmem>>, vector<1x8x4xf32>
    %974 = vector.shape_cast %973 : vector<1x8x4xf32> to vector<8x4xf32>
    %975 = vector.shape_cast %974 : vector<8x4xf32> to vector<8x4x1xf32>
    %976 = arith.index_cast %c3_i32_375 : i32 to index
    %c0_381 = arith.constant 0 : index
    %c0_382 = arith.constant 0 : index
    %977 = vector.load %arg3[%976, %c0_381, %c0_382] : memref<8x8x4xf32, #tpu.memory_space<vmem>>, vector<1x8x4xf32>
    %978 = vector.shape_cast %977 : vector<1x8x4xf32> to vector<8x4xf32>
    %979 = vector.shape_cast %978 : vector<8x4xf32> to vector<8x4x1xf32>
    %c0_383 = arith.constant 0 : index
    %c0_384 = arith.constant 0 : index
    %c0_385 = arith.constant 0 : index
    %980 = vector.load %arg17[%c0_383, %c0_384, %c0_385] : memref<8x4x32xf32, #tpu.memory_space<vmem>>, vector<8x4x32xf32>
    %c0_386 = arith.constant 0 : index
    %c0_387 = arith.constant 0 : index
    %c0_388 = arith.constant 0 : index
    %981 = vector.load %arg18[%c0_386, %c0_387, %c0_388] : memref<8x4x32xf32, #tpu.memory_space<vmem>>, vector<8x4x32xf32>
    %982 = vector.broadcast %975 : vector<8x4x1xf32> to vector<8x4x32xf32>
    %983 = arith.mulf %982, %980 : vector<8x4x32xf32>
    %cst_389 = arith.constant dense<0.000000e+00> : vector<4x32xf32>
    %984 = vector.multi_reduction <add>, %983, %cst_389 [0] : vector<8x4x32xf32> to vector<4x32xf32>
    %985 = vector.broadcast %979 : vector<8x4x1xf32> to vector<8x4x32xf32>
    %986 = arith.mulf %985, %980 : vector<8x4x32xf32>
    %cst_390 = arith.constant dense<0.000000e+00> : vector<4x32xf32>
    %987 = vector.multi_reduction <add>, %986, %cst_390 [0] : vector<8x4x32xf32> to vector<4x32xf32>
    %988 = vector.broadcast %975 : vector<8x4x1xf32> to vector<8x4x32xf32>
    %989 = arith.mulf %988, %981 : vector<8x4x32xf32>
    %cst_391 = arith.constant dense<0.000000e+00> : vector<4x32xf32>
    %990 = vector.multi_reduction <add>, %989, %cst_391 [0] : vector<8x4x32xf32> to vector<4x32xf32>
    %991 = vector.broadcast %979 : vector<8x4x1xf32> to vector<8x4x32xf32>
    %992 = arith.mulf %991, %981 : vector<8x4x32xf32>
    %cst_392 = arith.constant dense<0.000000e+00> : vector<4x32xf32>
    %993 = vector.multi_reduction <add>, %992, %cst_392 [0] : vector<8x4x32xf32> to vector<4x32xf32>
    %994 = tpu.concatenate %967, %984, %987 in 1 : vector<4x32xf32>, vector<4x32xf32>, vector<4x32xf32> -> vector<4x96xf32>
    %995 = arith.truncf %994 : vector<4x96xf32> to vector<4x96xbf16>
    %c0_393 = arith.constant 0 : index
    %c0_394 = arith.constant 0 : index
    %996 = vector.load %arg10[%c0_393, %c0_394] : memref<96x160xbf16, #tpu.memory_space<vmem>>, vector<96x160xbf16>
    %cst_395 = arith.constant dense<0.000000e+00> : vector<4x160xf32>
    %997 = tpu.matmul %995, %996, %cst_395 {dimension_numbers = #tpu.dot_dimension_numbers<[1], [0], [0], [1], [0, 0, 1, 1], [], []>} : vector<4x96xbf16>, vector<96x160xbf16>, vector<4x160xf32> -> vector<4x160xf32>
    %c0_396 = arith.constant 0 : index
    %c0_397 = arith.constant 0 : index
    %998 = vector.load %arg11[%c0_396, %c0_397] : memref<1x160xf32, #tpu.memory_space<vmem>>, vector<1x160xf32>
    %999 = vector.broadcast %998 : vector<1x160xf32> to vector<4x160xf32>
    %1000 = arith.addf %997, %999 : vector<4x160xf32>
    %1001 = vector.extract_strided_slice %1000 {offsets = [0, 0], sizes = [4, 32], strides = [1, 1]} : vector<4x160xf32> to vector<4x32xf32>
    %1002 = math.tanh %1001 : vector<4x32xf32>
    %1003 = vector.extract_strided_slice %1000 {offsets = [0, 32], sizes = [4, 32], strides = [1, 1]} : vector<4x160xf32> to vector<4x32xf32>
    %1004 = arith.negf %1003 : vector<4x32xf32>
    %1005 = math.exp %1004 : vector<4x32xf32>
    %cst_398 = arith.constant 1.000000e+00 : f32
    %1006 = vector.broadcast %cst_398 : f32 to vector<4x32xf32>
    %1007 = arith.addf %1006, %1005 : vector<4x32xf32>
    %1008 = arith.divf %1006, %1007 : vector<4x32xf32>
    %1009 = vector.extract_strided_slice %1000 {offsets = [0, 64], sizes = [4, 32], strides = [1, 1]} : vector<4x160xf32> to vector<4x32xf32>
    %1010 = arith.negf %1009 : vector<4x32xf32>
    %1011 = math.exp %1010 : vector<4x32xf32>
    %cst_399 = arith.constant 1.000000e+00 : f32
    %1012 = vector.broadcast %cst_399 : f32 to vector<4x32xf32>
    %1013 = arith.addf %1012, %1011 : vector<4x32xf32>
    %1014 = arith.divf %1012, %1013 : vector<4x32xf32>
    %1015 = vector.extract_strided_slice %1000 {offsets = [0, 96], sizes = [4, 32], strides = [1, 1]} : vector<4x160xf32> to vector<4x32xf32>
    %1016 = arith.negf %1015 : vector<4x32xf32>
    %1017 = math.exp %1016 : vector<4x32xf32>
    %cst_400 = arith.constant 1.000000e+00 : f32
    %1018 = vector.broadcast %cst_400 : f32 to vector<4x32xf32>
    %1019 = arith.addf %1018, %1017 : vector<4x32xf32>
    %1020 = arith.divf %1018, %1019 : vector<4x32xf32>
    %1021 = vector.extract_strided_slice %1000 {offsets = [0, 128], sizes = [4, 32], strides = [1, 1]} : vector<4x160xf32> to vector<4x32xf32>
    %1022 = arith.negf %1021 : vector<4x32xf32>
    %1023 = math.exp %1022 : vector<4x32xf32>
    %cst_401 = arith.constant 1.000000e+00 : f32
    %1024 = vector.broadcast %cst_401 : f32 to vector<4x32xf32>
    %1025 = arith.addf %1024, %1023 : vector<4x32xf32>
    %1026 = arith.divf %1024, %1025 : vector<4x32xf32>
    %1027 = arith.mulf %1008, %1002 : vector<4x32xf32>
    %1028 = arith.mulf %1014, %990 : vector<4x32xf32>
    %1029 = arith.addf %1027, %1028 : vector<4x32xf32>
    %1030 = arith.mulf %1020, %993 : vector<4x32xf32>
    %1031 = arith.addf %1029, %1030 : vector<4x32xf32>
    %1032 = math.tanh %1031 : vector<4x32xf32>
    %1033 = arith.mulf %1026, %1032 : vector<4x32xf32>
    %1034 = vector.broadcast %971 : vector<4x1xf32> to vector<4x32xf32>
    %1035 = arith.mulf %1034, %1033 : vector<4x32xf32>
    %1036 = arith.index_cast %c3_i32_375 : i32 to index
    %c0_402 = arith.constant 0 : index
    %c0_403 = arith.constant 0 : index
    %1037 = vector.load %arg17[%1036, %c0_402, %c0_403] : memref<8x4x32xf32, #tpu.memory_space<vmem>>, vector<1x4x32xf32>
    %1038 = vector.shape_cast %1037 : vector<1x4x32xf32> to vector<4x32xf32>
    %1039 = vector.shape_cast %1035 : vector<4x32xf32> to vector<1x4x32xf32>
    tpu.vector_store %arg17[%1036, %c0_402, %c0_403], %1039 {strides = array<i32>} : memref<8x4x32xf32, #tpu.memory_space<vmem>>, vector<1x4x32xf32>,
    %1040 = vector.broadcast %971 : vector<4x1xf32> to vector<4x32xf32>
    %1041 = arith.mulf %1040, %1031 : vector<4x32xf32>
    %1042 = arith.index_cast %c3_i32_375 : i32 to index
    %c0_404 = arith.constant 0 : index
    %c0_405 = arith.constant 0 : index
    %1043 = vector.load %arg18[%1042, %c0_404, %c0_405] : memref<8x4x32xf32, #tpu.memory_space<vmem>>, vector<1x4x32xf32>
    %1044 = vector.shape_cast %1043 : vector<1x4x32xf32> to vector<4x32xf32>
    %1045 = vector.shape_cast %1041 : vector<4x32xf32> to vector<1x4x32xf32>
    tpu.vector_store %arg18[%1042, %c0_404, %c0_405], %1045 {strides = array<i32>} : memref<8x4x32xf32, #tpu.memory_space<vmem>>, vector<1x4x32xf32>,
    %c4_i32_406 = arith.constant 4 : i32
    %1046 = arith.index_cast %c4_i32_406 : i32 to index
    %c0_407 = arith.constant 0 : index
    %c0_408 = arith.constant 0 : index
    %1047 = vector.load %arg19[%1046, %c0_407, %c0_408] : memref<8x4x32xf32, #tpu.memory_space<vmem>>, vector<1x4x32xf32>
    %1048 = vector.shape_cast %1047 : vector<1x4x32xf32> to vector<4x32xf32>
    %1049 = arith.index_cast %c4_i32_406 : i32 to index
    %c0_409 = arith.constant 0 : index
    %1050 = vector.load %arg1[%1049, %c0_409] : memref<8x4xf32, #tpu.memory_space<vmem>>, vector<1x4xf32>
    %1051 = vector.shape_cast %1050 : vector<1x4xf32> to vector<4xf32>
    %1052 = vector.shape_cast %1051 : vector<4xf32> to vector<4x1xf32>
    %1053 = arith.index_cast %c4_i32_406 : i32 to index
    %c0_410 = arith.constant 0 : index
    %c0_411 = arith.constant 0 : index
    %1054 = vector.load %arg2[%1053, %c0_410, %c0_411] : memref<8x8x4xf32, #tpu.memory_space<vmem>>, vector<1x8x4xf32>
    %1055 = vector.shape_cast %1054 : vector<1x8x4xf32> to vector<8x4xf32>
    %1056 = vector.shape_cast %1055 : vector<8x4xf32> to vector<8x4x1xf32>
    %1057 = arith.index_cast %c4_i32_406 : i32 to index
    %c0_412 = arith.constant 0 : index
    %c0_413 = arith.constant 0 : index
    %1058 = vector.load %arg3[%1057, %c0_412, %c0_413] : memref<8x8x4xf32, #tpu.memory_space<vmem>>, vector<1x8x4xf32>
    %1059 = vector.shape_cast %1058 : vector<1x8x4xf32> to vector<8x4xf32>
    %1060 = vector.shape_cast %1059 : vector<8x4xf32> to vector<8x4x1xf32>
    %c0_414 = arith.constant 0 : index
    %c0_415 = arith.constant 0 : index
    %c0_416 = arith.constant 0 : index
    %1061 = vector.load %arg17[%c0_414, %c0_415, %c0_416] : memref<8x4x32xf32, #tpu.memory_space<vmem>>, vector<8x4x32xf32>
    %c0_417 = arith.constant 0 : index
    %c0_418 = arith.constant 0 : index
    %c0_419 = arith.constant 0 : index
    %1062 = vector.load %arg18[%c0_417, %c0_418, %c0_419] : memref<8x4x32xf32, #tpu.memory_space<vmem>>, vector<8x4x32xf32>
    %1063 = vector.broadcast %1056 : vector<8x4x1xf32> to vector<8x4x32xf32>
    %1064 = arith.mulf %1063, %1061 : vector<8x4x32xf32>
    %cst_420 = arith.constant dense<0.000000e+00> : vector<4x32xf32>
    %1065 = vector.multi_reduction <add>, %1064, %cst_420 [0] : vector<8x4x32xf32> to vector<4x32xf32>
    %1066 = vector.broadcast %1060 : vector<8x4x1xf32> to vector<8x4x32xf32>
    %1067 = arith.mulf %1066, %1061 : vector<8x4x32xf32>
    %cst_421 = arith.constant dense<0.000000e+00> : vector<4x32xf32>
    %1068 = vector.multi_reduction <add>, %1067, %cst_421 [0] : vector<8x4x32xf32> to vector<4x32xf32>
    %1069 = vector.broadcast %1056 : vector<8x4x1xf32> to vector<8x4x32xf32>
    %1070 = arith.mulf %1069, %1062 : vector<8x4x32xf32>
    %cst_422 = arith.constant dense<0.000000e+00> : vector<4x32xf32>
    %1071 = vector.multi_reduction <add>, %1070, %cst_422 [0] : vector<8x4x32xf32> to vector<4x32xf32>
    %1072 = vector.broadcast %1060 : vector<8x4x1xf32> to vector<8x4x32xf32>
    %1073 = arith.mulf %1072, %1062 : vector<8x4x32xf32>
    %cst_423 = arith.constant dense<0.000000e+00> : vector<4x32xf32>
    %1074 = vector.multi_reduction <add>, %1073, %cst_423 [0] : vector<8x4x32xf32> to vector<4x32xf32>
    %1075 = tpu.concatenate %1048, %1065, %1068 in 1 : vector<4x32xf32>, vector<4x32xf32>, vector<4x32xf32> -> vector<4x96xf32>
    %1076 = arith.truncf %1075 : vector<4x96xf32> to vector<4x96xbf16>
    %c0_424 = arith.constant 0 : index
    %c0_425 = arith.constant 0 : index
    %1077 = vector.load %arg10[%c0_424, %c0_425] : memref<96x160xbf16, #tpu.memory_space<vmem>>, vector<96x160xbf16>
    %cst_426 = arith.constant dense<0.000000e+00> : vector<4x160xf32>
    %1078 = tpu.matmul %1076, %1077, %cst_426 {dimension_numbers = #tpu.dot_dimension_numbers<[1], [0], [0], [1], [0, 0, 1, 1], [], []>} : vector<4x96xbf16>, vector<96x160xbf16>, vector<4x160xf32> -> vector<4x160xf32>
    %c0_427 = arith.constant 0 : index
    %c0_428 = arith.constant 0 : index
    %1079 = vector.load %arg11[%c0_427, %c0_428] : memref<1x160xf32, #tpu.memory_space<vmem>>, vector<1x160xf32>
    %1080 = vector.broadcast %1079 : vector<1x160xf32> to vector<4x160xf32>
    %1081 = arith.addf %1078, %1080 : vector<4x160xf32>
    %1082 = vector.extract_strided_slice %1081 {offsets = [0, 0], sizes = [4, 32], strides = [1, 1]} : vector<4x160xf32> to vector<4x32xf32>
    %1083 = math.tanh %1082 : vector<4x32xf32>
    %1084 = vector.extract_strided_slice %1081 {offsets = [0, 32], sizes = [4, 32], strides = [1, 1]} : vector<4x160xf32> to vector<4x32xf32>
    %1085 = arith.negf %1084 : vector<4x32xf32>
    %1086 = math.exp %1085 : vector<4x32xf32>
    %cst_429 = arith.constant 1.000000e+00 : f32
    %1087 = vector.broadcast %cst_429 : f32 to vector<4x32xf32>
    %1088 = arith.addf %1087, %1086 : vector<4x32xf32>
    %1089 = arith.divf %1087, %1088 : vector<4x32xf32>
    %1090 = vector.extract_strided_slice %1081 {offsets = [0, 64], sizes = [4, 32], strides = [1, 1]} : vector<4x160xf32> to vector<4x32xf32>
    %1091 = arith.negf %1090 : vector<4x32xf32>
    %1092 = math.exp %1091 : vector<4x32xf32>
    %cst_430 = arith.constant 1.000000e+00 : f32
    %1093 = vector.broadcast %cst_430 : f32 to vector<4x32xf32>
    %1094 = arith.addf %1093, %1092 : vector<4x32xf32>
    %1095 = arith.divf %1093, %1094 : vector<4x32xf32>
    %1096 = vector.extract_strided_slice %1081 {offsets = [0, 96], sizes = [4, 32], strides = [1, 1]} : vector<4x160xf32> to vector<4x32xf32>
    %1097 = arith.negf %1096 : vector<4x32xf32>
    %1098 = math.exp %1097 : vector<4x32xf32>
    %cst_431 = arith.constant 1.000000e+00 : f32
    %1099 = vector.broadcast %cst_431 : f32 to vector<4x32xf32>
    %1100 = arith.addf %1099, %1098 : vector<4x32xf32>
    %1101 = arith.divf %1099, %1100 : vector<4x32xf32>
    %1102 = vector.extract_strided_slice %1081 {offsets = [0, 128], sizes = [4, 32], strides = [1, 1]} : vector<4x160xf32> to vector<4x32xf32>
    %1103 = arith.negf %1102 : vector<4x32xf32>
    %1104 = math.exp %1103 : vector<4x32xf32>
    %cst_432 = arith.constant 1.000000e+00 : f32
    %1105 = vector.broadcast %cst_432 : f32 to vector<4x32xf32>
    %1106 = arith.addf %1105, %1104 : vector<4x32xf32>
    %1107 = arith.divf %1105, %1106 : vector<4x32xf32>
    %1108 = arith.mulf %1089, %1083 : vector<4x32xf32>
    %1109 = arith.mulf %1095, %1071 : vector<4x32xf32>
    %1110 = arith.addf %1108, %1109 : vector<4x32xf32>
    %1111 = arith.mulf %1101, %1074 : vector<4x32xf32>
    %1112 = arith.addf %1110, %1111 : vector<4x32xf32>
    %1113 = math.tanh %1112 : vector<4x32xf32>
    %1114 = arith.mulf %1107, %1113 : vector<4x32xf32>
    %1115 = vector.broadcast %1052 : vector<4x1xf32> to vector<4x32xf32>
    %1116 = arith.mulf %1115, %1114 : vector<4x32xf32>
    %1117 = arith.index_cast %c4_i32_406 : i32 to index
    %c0_433 = arith.constant 0 : index
    %c0_434 = arith.constant 0 : index
    %1118 = vector.load %arg17[%1117, %c0_433, %c0_434] : memref<8x4x32xf32, #tpu.memory_space<vmem>>, vector<1x4x32xf32>
    %1119 = vector.shape_cast %1118 : vector<1x4x32xf32> to vector<4x32xf32>
    %1120 = vector.shape_cast %1116 : vector<4x32xf32> to vector<1x4x32xf32>
    tpu.vector_store %arg17[%1117, %c0_433, %c0_434], %1120 {strides = array<i32>} : memref<8x4x32xf32, #tpu.memory_space<vmem>>, vector<1x4x32xf32>,
    %1121 = vector.broadcast %1052 : vector<4x1xf32> to vector<4x32xf32>
    %1122 = arith.mulf %1121, %1112 : vector<4x32xf32>
    %1123 = arith.index_cast %c4_i32_406 : i32 to index
    %c0_435 = arith.constant 0 : index
    %c0_436 = arith.constant 0 : index
    %1124 = vector.load %arg18[%1123, %c0_435, %c0_436] : memref<8x4x32xf32, #tpu.memory_space<vmem>>, vector<1x4x32xf32>
    %1125 = vector.shape_cast %1124 : vector<1x4x32xf32> to vector<4x32xf32>
    %1126 = vector.shape_cast %1122 : vector<4x32xf32> to vector<1x4x32xf32>
    tpu.vector_store %arg18[%1123, %c0_435, %c0_436], %1126 {strides = array<i32>} : memref<8x4x32xf32, #tpu.memory_space<vmem>>, vector<1x4x32xf32>,
    %c5_i32_437 = arith.constant 5 : i32
    %1127 = arith.index_cast %c5_i32_437 : i32 to index
    %c0_438 = arith.constant 0 : index
    %c0_439 = arith.constant 0 : index
    %1128 = vector.load %arg19[%1127, %c0_438, %c0_439] : memref<8x4x32xf32, #tpu.memory_space<vmem>>, vector<1x4x32xf32>
    %1129 = vector.shape_cast %1128 : vector<1x4x32xf32> to vector<4x32xf32>
    %1130 = arith.index_cast %c5_i32_437 : i32 to index
    %c0_440 = arith.constant 0 : index
    %1131 = vector.load %arg1[%1130, %c0_440] : memref<8x4xf32, #tpu.memory_space<vmem>>, vector<1x4xf32>
    %1132 = vector.shape_cast %1131 : vector<1x4xf32> to vector<4xf32>
    %1133 = vector.shape_cast %1132 : vector<4xf32> to vector<4x1xf32>
    %1134 = arith.index_cast %c5_i32_437 : i32 to index
    %c0_441 = arith.constant 0 : index
    %c0_442 = arith.constant 0 : index
    %1135 = vector.load %arg2[%1134, %c0_441, %c0_442] : memref<8x8x4xf32, #tpu.memory_space<vmem>>, vector<1x8x4xf32>
    %1136 = vector.shape_cast %1135 : vector<1x8x4xf32> to vector<8x4xf32>
    %1137 = vector.shape_cast %1136 : vector<8x4xf32> to vector<8x4x1xf32>
    %1138 = arith.index_cast %c5_i32_437 : i32 to index
    %c0_443 = arith.constant 0 : index
    %c0_444 = arith.constant 0 : index
    %1139 = vector.load %arg3[%1138, %c0_443, %c0_444] : memref<8x8x4xf32, #tpu.memory_space<vmem>>, vector<1x8x4xf32>
    %1140 = vector.shape_cast %1139 : vector<1x8x4xf32> to vector<8x4xf32>
    %1141 = vector.shape_cast %1140 : vector<8x4xf32> to vector<8x4x1xf32>
    %c0_445 = arith.constant 0 : index
    %c0_446 = arith.constant 0 : index
    %c0_447 = arith.constant 0 : index
    %1142 = vector.load %arg17[%c0_445, %c0_446, %c0_447] : memref<8x4x32xf32, #tpu.memory_space<vmem>>, vector<8x4x32xf32>
    %c0_448 = arith.constant 0 : index
    %c0_449 = arith.constant 0 : index
    %c0_450 = arith.constant 0 : index
    %1143 = vector.load %arg18[%c0_448, %c0_449, %c0_450] : memref<8x4x32xf32, #tpu.memory_space<vmem>>, vector<8x4x32xf32>
    %1144 = vector.broadcast %1137 : vector<8x4x1xf32> to vector<8x4x32xf32>
    %1145 = arith.mulf %1144, %1142 : vector<8x4x32xf32>
    %cst_451 = arith.constant dense<0.000000e+00> : vector<4x32xf32>
    %1146 = vector.multi_reduction <add>, %1145, %cst_451 [0] : vector<8x4x32xf32> to vector<4x32xf32>
    %1147 = vector.broadcast %1141 : vector<8x4x1xf32> to vector<8x4x32xf32>
    %1148 = arith.mulf %1147, %1142 : vector<8x4x32xf32>
    %cst_452 = arith.constant dense<0.000000e+00> : vector<4x32xf32>
    %1149 = vector.multi_reduction <add>, %1148, %cst_452 [0] : vector<8x4x32xf32> to vector<4x32xf32>
    %1150 = vector.broadcast %1137 : vector<8x4x1xf32> to vector<8x4x32xf32>
    %1151 = arith.mulf %1150, %1143 : vector<8x4x32xf32>
    %cst_453 = arith.constant dense<0.000000e+00> : vector<4x32xf32>
    %1152 = vector.multi_reduction <add>, %1151, %cst_453 [0] : vector<8x4x32xf32> to vector<4x32xf32>
    %1153 = vector.broadcast %1141 : vector<8x4x1xf32> to vector<8x4x32xf32>
    %1154 = arith.mulf %1153, %1143 : vector<8x4x32xf32>
    %cst_454 = arith.constant dense<0.000000e+00> : vector<4x32xf32>
    %1155 = vector.multi_reduction <add>, %1154, %cst_454 [0] : vector<8x4x32xf32> to vector<4x32xf32>
    %1156 = tpu.concatenate %1129, %1146, %1149 in 1 : vector<4x32xf32>, vector<4x32xf32>, vector<4x32xf32> -> vector<4x96xf32>
    %1157 = arith.truncf %1156 : vector<4x96xf32> to vector<4x96xbf16>
    %c0_455 = arith.constant 0 : index
    %c0_456 = arith.constant 0 : index
    %1158 = vector.load %arg10[%c0_455, %c0_456] : memref<96x160xbf16, #tpu.memory_space<vmem>>, vector<96x160xbf16>
    %cst_457 = arith.constant dense<0.000000e+00> : vector<4x160xf32>
    %1159 = tpu.matmul %1157, %1158, %cst_457 {dimension_numbers = #tpu.dot_dimension_numbers<[1], [0], [0], [1], [0, 0, 1, 1], [], []>} : vector<4x96xbf16>, vector<96x160xbf16>, vector<4x160xf32> -> vector<4x160xf32>
    %c0_458 = arith.constant 0 : index
    %c0_459 = arith.constant 0 : index
    %1160 = vector.load %arg11[%c0_458, %c0_459] : memref<1x160xf32, #tpu.memory_space<vmem>>, vector<1x160xf32>
    %1161 = vector.broadcast %1160 : vector<1x160xf32> to vector<4x160xf32>
    %1162 = arith.addf %1159, %1161 : vector<4x160xf32>
    %1163 = vector.extract_strided_slice %1162 {offsets = [0, 0], sizes = [4, 32], strides = [1, 1]} : vector<4x160xf32> to vector<4x32xf32>
    %1164 = math.tanh %1163 : vector<4x32xf32>
    %1165 = vector.extract_strided_slice %1162 {offsets = [0, 32], sizes = [4, 32], strides = [1, 1]} : vector<4x160xf32> to vector<4x32xf32>
    %1166 = arith.negf %1165 : vector<4x32xf32>
    %1167 = math.exp %1166 : vector<4x32xf32>
    %cst_460 = arith.constant 1.000000e+00 : f32
    %1168 = vector.broadcast %cst_460 : f32 to vector<4x32xf32>
    %1169 = arith.addf %1168, %1167 : vector<4x32xf32>
    %1170 = arith.divf %1168, %1169 : vector<4x32xf32>
    %1171 = vector.extract_strided_slice %1162 {offsets = [0, 64], sizes = [4, 32], strides = [1, 1]} : vector<4x160xf32> to vector<4x32xf32>
    %1172 = arith.negf %1171 : vector<4x32xf32>
    %1173 = math.exp %1172 : vector<4x32xf32>
    %cst_461 = arith.constant 1.000000e+00 : f32
    %1174 = vector.broadcast %cst_461 : f32 to vector<4x32xf32>
    %1175 = arith.addf %1174, %1173 : vector<4x32xf32>
    %1176 = arith.divf %1174, %1175 : vector<4x32xf32>
    %1177 = vector.extract_strided_slice %1162 {offsets = [0, 96], sizes = [4, 32], strides = [1, 1]} : vector<4x160xf32> to vector<4x32xf32>
    %1178 = arith.negf %1177 : vector<4x32xf32>
    %1179 = math.exp %1178 : vector<4x32xf32>
    %cst_462 = arith.constant 1.000000e+00 : f32
    %1180 = vector.broadcast %cst_462 : f32 to vector<4x32xf32>
    %1181 = arith.addf %1180, %1179 : vector<4x32xf32>
    %1182 = arith.divf %1180, %1181 : vector<4x32xf32>
    %1183 = vector.extract_strided_slice %1162 {offsets = [0, 128], sizes = [4, 32], strides = [1, 1]} : vector<4x160xf32> to vector<4x32xf32>
    %1184 = arith.negf %1183 : vector<4x32xf32>
    %1185 = math.exp %1184 : vector<4x32xf32>
    %cst_463 = arith.constant 1.000000e+00 : f32
    %1186 = vector.broadcast %cst_463 : f32 to vector<4x32xf32>
    %1187 = arith.addf %1186, %1185 : vector<4x32xf32>
    %1188 = arith.divf %1186, %1187 : vector<4x32xf32>
    %1189 = arith.mulf %1170, %1164 : vector<4x32xf32>
    %1190 = arith.mulf %1176, %1152 : vector<4x32xf32>
    %1191 = arith.addf %1189, %1190 : vector<4x32xf32>
    %1192 = arith.mulf %1182, %1155 : vector<4x32xf32>
    %1193 = arith.addf %1191, %1192 : vector<4x32xf32>
    %1194 = math.tanh %1193 : vector<4x32xf32>
    %1195 = arith.mulf %1188, %1194 : vector<4x32xf32>
    %1196 = vector.broadcast %1133 : vector<4x1xf32> to vector<4x32xf32>
    %1197 = arith.mulf %1196, %1195 : vector<4x32xf32>
    %1198 = arith.index_cast %c5_i32_437 : i32 to index
    %c0_464 = arith.constant 0 : index
    %c0_465 = arith.constant 0 : index
    %1199 = vector.load %arg17[%1198, %c0_464, %c0_465] : memref<8x4x32xf32, #tpu.memory_space<vmem>>, vector<1x4x32xf32>
    %1200 = vector.shape_cast %1199 : vector<1x4x32xf32> to vector<4x32xf32>
    %1201 = vector.shape_cast %1197 : vector<4x32xf32> to vector<1x4x32xf32>
    tpu.vector_store %arg17[%1198, %c0_464, %c0_465], %1201 {strides = array<i32>} : memref<8x4x32xf32, #tpu.memory_space<vmem>>, vector<1x4x32xf32>,
    %1202 = vector.broadcast %1133 : vector<4x1xf32> to vector<4x32xf32>
    %1203 = arith.mulf %1202, %1193 : vector<4x32xf32>
    %1204 = arith.index_cast %c5_i32_437 : i32 to index
    %c0_466 = arith.constant 0 : index
    %c0_467 = arith.constant 0 : index
    %1205 = vector.load %arg18[%1204, %c0_466, %c0_467] : memref<8x4x32xf32, #tpu.memory_space<vmem>>, vector<1x4x32xf32>
    %1206 = vector.shape_cast %1205 : vector<1x4x32xf32> to vector<4x32xf32>
    %1207 = vector.shape_cast %1203 : vector<4x32xf32> to vector<1x4x32xf32>
    tpu.vector_store %arg18[%1204, %c0_466, %c0_467], %1207 {strides = array<i32>} : memref<8x4x32xf32, #tpu.memory_space<vmem>>, vector<1x4x32xf32>,
    %c6_i32_468 = arith.constant 6 : i32
    %1208 = arith.index_cast %c6_i32_468 : i32 to index
    %c0_469 = arith.constant 0 : index
    %c0_470 = arith.constant 0 : index
    %1209 = vector.load %arg19[%1208, %c0_469, %c0_470] : memref<8x4x32xf32, #tpu.memory_space<vmem>>, vector<1x4x32xf32>
    %1210 = vector.shape_cast %1209 : vector<1x4x32xf32> to vector<4x32xf32>
    %1211 = arith.index_cast %c6_i32_468 : i32 to index
    %c0_471 = arith.constant 0 : index
    %1212 = vector.load %arg1[%1211, %c0_471] : memref<8x4xf32, #tpu.memory_space<vmem>>, vector<1x4xf32>
    %1213 = vector.shape_cast %1212 : vector<1x4xf32> to vector<4xf32>
    %1214 = vector.shape_cast %1213 : vector<4xf32> to vector<4x1xf32>
    %1215 = arith.index_cast %c6_i32_468 : i32 to index
    %c0_472 = arith.constant 0 : index
    %c0_473 = arith.constant 0 : index
    %1216 = vector.load %arg2[%1215, %c0_472, %c0_473] : memref<8x8x4xf32, #tpu.memory_space<vmem>>, vector<1x8x4xf32>
    %1217 = vector.shape_cast %1216 : vector<1x8x4xf32> to vector<8x4xf32>
    %1218 = vector.shape_cast %1217 : vector<8x4xf32> to vector<8x4x1xf32>
    %1219 = arith.index_cast %c6_i32_468 : i32 to index
    %c0_474 = arith.constant 0 : index
    %c0_475 = arith.constant 0 : index
    %1220 = vector.load %arg3[%1219, %c0_474, %c0_475] : memref<8x8x4xf32, #tpu.memory_space<vmem>>, vector<1x8x4xf32>
    %1221 = vector.shape_cast %1220 : vector<1x8x4xf32> to vector<8x4xf32>
    %1222 = vector.shape_cast %1221 : vector<8x4xf32> to vector<8x4x1xf32>
    %c0_476 = arith.constant 0 : index
    %c0_477 = arith.constant 0 : index
    %c0_478 = arith.constant 0 : index
    %1223 = vector.load %arg17[%c0_476, %c0_477, %c0_478] : memref<8x4x32xf32, #tpu.memory_space<vmem>>, vector<8x4x32xf32>
    %c0_479 = arith.constant 0 : index
    %c0_480 = arith.constant 0 : index
    %c0_481 = arith.constant 0 : index
    %1224 = vector.load %arg18[%c0_479, %c0_480, %c0_481] : memref<8x4x32xf32, #tpu.memory_space<vmem>>, vector<8x4x32xf32>
    %1225 = vector.broadcast %1218 : vector<8x4x1xf32> to vector<8x4x32xf32>
    %1226 = arith.mulf %1225, %1223 : vector<8x4x32xf32>
    %cst_482 = arith.constant dense<0.000000e+00> : vector<4x32xf32>
    %1227 = vector.multi_reduction <add>, %1226, %cst_482 [0] : vector<8x4x32xf32> to vector<4x32xf32>
    %1228 = vector.broadcast %1222 : vector<8x4x1xf32> to vector<8x4x32xf32>
    %1229 = arith.mulf %1228, %1223 : vector<8x4x32xf32>
    %cst_483 = arith.constant dense<0.000000e+00> : vector<4x32xf32>
    %1230 = vector.multi_reduction <add>, %1229, %cst_483 [0] : vector<8x4x32xf32> to vector<4x32xf32>
    %1231 = vector.broadcast %1218 : vector<8x4x1xf32> to vector<8x4x32xf32>
    %1232 = arith.mulf %1231, %1224 : vector<8x4x32xf32>
    %cst_484 = arith.constant dense<0.000000e+00> : vector<4x32xf32>
    %1233 = vector.multi_reduction <add>, %1232, %cst_484 [0] : vector<8x4x32xf32> to vector<4x32xf32>
    %1234 = vector.broadcast %1222 : vector<8x4x1xf32> to vector<8x4x32xf32>
    %1235 = arith.mulf %1234, %1224 : vector<8x4x32xf32>
    %cst_485 = arith.constant dense<0.000000e+00> : vector<4x32xf32>
    %1236 = vector.multi_reduction <add>, %1235, %cst_485 [0] : vector<8x4x32xf32> to vector<4x32xf32>
    %1237 = tpu.concatenate %1210, %1227, %1230 in 1 : vector<4x32xf32>, vector<4x32xf32>, vector<4x32xf32> -> vector<4x96xf32>
    %1238 = arith.truncf %1237 : vector<4x96xf32> to vector<4x96xbf16>
    %c0_486 = arith.constant 0 : index
    %c0_487 = arith.constant 0 : index
    %1239 = vector.load %arg10[%c0_486, %c0_487] : memref<96x160xbf16, #tpu.memory_space<vmem>>, vector<96x160xbf16>
    %cst_488 = arith.constant dense<0.000000e+00> : vector<4x160xf32>
    %1240 = tpu.matmul %1238, %1239, %cst_488 {dimension_numbers = #tpu.dot_dimension_numbers<[1], [0], [0], [1], [0, 0, 1, 1], [], []>} : vector<4x96xbf16>, vector<96x160xbf16>, vector<4x160xf32> -> vector<4x160xf32>
    %c0_489 = arith.constant 0 : index
    %c0_490 = arith.constant 0 : index
    %1241 = vector.load %arg11[%c0_489, %c0_490] : memref<1x160xf32, #tpu.memory_space<vmem>>, vector<1x160xf32>
    %1242 = vector.broadcast %1241 : vector<1x160xf32> to vector<4x160xf32>
    %1243 = arith.addf %1240, %1242 : vector<4x160xf32>
    %1244 = vector.extract_strided_slice %1243 {offsets = [0, 0], sizes = [4, 32], strides = [1, 1]} : vector<4x160xf32> to vector<4x32xf32>
    %1245 = math.tanh %1244 : vector<4x32xf32>
    %1246 = vector.extract_strided_slice %1243 {offsets = [0, 32], sizes = [4, 32], strides = [1, 1]} : vector<4x160xf32> to vector<4x32xf32>
    %1247 = arith.negf %1246 : vector<4x32xf32>
    %1248 = math.exp %1247 : vector<4x32xf32>
    %cst_491 = arith.constant 1.000000e+00 : f32
    %1249 = vector.broadcast %cst_491 : f32 to vector<4x32xf32>
    %1250 = arith.addf %1249, %1248 : vector<4x32xf32>
    %1251 = arith.divf %1249, %1250 : vector<4x32xf32>
    %1252 = vector.extract_strided_slice %1243 {offsets = [0, 64], sizes = [4, 32], strides = [1, 1]} : vector<4x160xf32> to vector<4x32xf32>
    %1253 = arith.negf %1252 : vector<4x32xf32>
    %1254 = math.exp %1253 : vector<4x32xf32>
    %cst_492 = arith.constant 1.000000e+00 : f32
    %1255 = vector.broadcast %cst_492 : f32 to vector<4x32xf32>
    %1256 = arith.addf %1255, %1254 : vector<4x32xf32>
    %1257 = arith.divf %1255, %1256 : vector<4x32xf32>
    %1258 = vector.extract_strided_slice %1243 {offsets = [0, 96], sizes = [4, 32], strides = [1, 1]} : vector<4x160xf32> to vector<4x32xf32>
    %1259 = arith.negf %1258 : vector<4x32xf32>
    %1260 = math.exp %1259 : vector<4x32xf32>
    %cst_493 = arith.constant 1.000000e+00 : f32
    %1261 = vector.broadcast %cst_493 : f32 to vector<4x32xf32>
    %1262 = arith.addf %1261, %1260 : vector<4x32xf32>
    %1263 = arith.divf %1261, %1262 : vector<4x32xf32>
    %1264 = vector.extract_strided_slice %1243 {offsets = [0, 128], sizes = [4, 32], strides = [1, 1]} : vector<4x160xf32> to vector<4x32xf32>
    %1265 = arith.negf %1264 : vector<4x32xf32>
    %1266 = math.exp %1265 : vector<4x32xf32>
    %cst_494 = arith.constant 1.000000e+00 : f32
    %1267 = vector.broadcast %cst_494 : f32 to vector<4x32xf32>
    %1268 = arith.addf %1267, %1266 : vector<4x32xf32>
    %1269 = arith.divf %1267, %1268 : vector<4x32xf32>
    %1270 = arith.mulf %1251, %1245 : vector<4x32xf32>
    %1271 = arith.mulf %1257, %1233 : vector<4x32xf32>
    %1272 = arith.addf %1270, %1271 : vector<4x32xf32>
    %1273 = arith.mulf %1263, %1236 : vector<4x32xf32>
    %1274 = arith.addf %1272, %1273 : vector<4x32xf32>
    %1275 = math.tanh %1274 : vector<4x32xf32>
    %1276 = arith.mulf %1269, %1275 : vector<4x32xf32>
    %1277 = vector.broadcast %1214 : vector<4x1xf32> to vector<4x32xf32>
    %1278 = arith.mulf %1277, %1276 : vector<4x32xf32>
    %1279 = arith.index_cast %c6_i32_468 : i32 to index
    %c0_495 = arith.constant 0 : index
    %c0_496 = arith.constant 0 : index
    %1280 = vector.load %arg17[%1279, %c0_495, %c0_496] : memref<8x4x32xf32, #tpu.memory_space<vmem>>, vector<1x4x32xf32>
    %1281 = vector.shape_cast %1280 : vector<1x4x32xf32> to vector<4x32xf32>
    %1282 = vector.shape_cast %1278 : vector<4x32xf32> to vector<1x4x32xf32>
    tpu.vector_store %arg17[%1279, %c0_495, %c0_496], %1282 {strides = array<i32>} : memref<8x4x32xf32, #tpu.memory_space<vmem>>, vector<1x4x32xf32>,
    %1283 = vector.broadcast %1214 : vector<4x1xf32> to vector<4x32xf32>
    %1284 = arith.mulf %1283, %1274 : vector<4x32xf32>
    %1285 = arith.index_cast %c6_i32_468 : i32 to index
    %c0_497 = arith.constant 0 : index
    %c0_498 = arith.constant 0 : index
    %1286 = vector.load %arg18[%1285, %c0_497, %c0_498] : memref<8x4x32xf32, #tpu.memory_space<vmem>>, vector<1x4x32xf32>
    %1287 = vector.shape_cast %1286 : vector<1x4x32xf32> to vector<4x32xf32>
    %1288 = vector.shape_cast %1284 : vector<4x32xf32> to vector<1x4x32xf32>
    tpu.vector_store %arg18[%1285, %c0_497, %c0_498], %1288 {strides = array<i32>} : memref<8x4x32xf32, #tpu.memory_space<vmem>>, vector<1x4x32xf32>,
    %c7_i32_499 = arith.constant 7 : i32
    %1289 = arith.index_cast %c7_i32_499 : i32 to index
    %c0_500 = arith.constant 0 : index
    %c0_501 = arith.constant 0 : index
    %1290 = vector.load %arg19[%1289, %c0_500, %c0_501] : memref<8x4x32xf32, #tpu.memory_space<vmem>>, vector<1x4x32xf32>
    %1291 = vector.shape_cast %1290 : vector<1x4x32xf32> to vector<4x32xf32>
    %1292 = arith.index_cast %c7_i32_499 : i32 to index
    %c0_502 = arith.constant 0 : index
    %1293 = vector.load %arg1[%1292, %c0_502] : memref<8x4xf32, #tpu.memory_space<vmem>>, vector<1x4xf32>
    %1294 = vector.shape_cast %1293 : vector<1x4xf32> to vector<4xf32>
    %1295 = vector.shape_cast %1294 : vector<4xf32> to vector<4x1xf32>
    %1296 = arith.index_cast %c7_i32_499 : i32 to index
    %c0_503 = arith.constant 0 : index
    %c0_504 = arith.constant 0 : index
    %1297 = vector.load %arg2[%1296, %c0_503, %c0_504] : memref<8x8x4xf32, #tpu.memory_space<vmem>>, vector<1x8x4xf32>
    %1298 = vector.shape_cast %1297 : vector<1x8x4xf32> to vector<8x4xf32>
    %1299 = vector.shape_cast %1298 : vector<8x4xf32> to vector<8x4x1xf32>
    %1300 = arith.index_cast %c7_i32_499 : i32 to index
    %c0_505 = arith.constant 0 : index
    %c0_506 = arith.constant 0 : index
    %1301 = vector.load %arg3[%1300, %c0_505, %c0_506] : memref<8x8x4xf32, #tpu.memory_space<vmem>>, vector<1x8x4xf32>
    %1302 = vector.shape_cast %1301 : vector<1x8x4xf32> to vector<8x4xf32>
    %1303 = vector.shape_cast %1302 : vector<8x4xf32> to vector<8x4x1xf32>
    %c0_507 = arith.constant 0 : index
    %c0_508 = arith.constant 0 : index
    %c0_509 = arith.constant 0 : index
    %1304 = vector.load %arg17[%c0_507, %c0_508, %c0_509] : memref<8x4x32xf32, #tpu.memory_space<vmem>>, vector<8x4x32xf32>
    %c0_510 = arith.constant 0 : index
    %c0_511 = arith.constant 0 : index
    %c0_512 = arith.constant 0 : index
    %1305 = vector.load %arg18[%c0_510, %c0_511, %c0_512] : memref<8x4x32xf32, #tpu.memory_space<vmem>>, vector<8x4x32xf32>
    %1306 = vector.broadcast %1299 : vector<8x4x1xf32> to vector<8x4x32xf32>
    %1307 = arith.mulf %1306, %1304 : vector<8x4x32xf32>
    %cst_513 = arith.constant dense<0.000000e+00> : vector<4x32xf32>
    %1308 = vector.multi_reduction <add>, %1307, %cst_513 [0] : vector<8x4x32xf32> to vector<4x32xf32>
    %1309 = vector.broadcast %1303 : vector<8x4x1xf32> to vector<8x4x32xf32>
    %1310 = arith.mulf %1309, %1304 : vector<8x4x32xf32>
    %cst_514 = arith.constant dense<0.000000e+00> : vector<4x32xf32>
    %1311 = vector.multi_reduction <add>, %1310, %cst_514 [0] : vector<8x4x32xf32> to vector<4x32xf32>
    %1312 = vector.broadcast %1299 : vector<8x4x1xf32> to vector<8x4x32xf32>
    %1313 = arith.mulf %1312, %1305 : vector<8x4x32xf32>
    %cst_515 = arith.constant dense<0.000000e+00> : vector<4x32xf32>
    %1314 = vector.multi_reduction <add>, %1313, %cst_515 [0] : vector<8x4x32xf32> to vector<4x32xf32>
    %1315 = vector.broadcast %1303 : vector<8x4x1xf32> to vector<8x4x32xf32>
    %1316 = arith.mulf %1315, %1305 : vector<8x4x32xf32>
    %cst_516 = arith.constant dense<0.000000e+00> : vector<4x32xf32>
    %1317 = vector.multi_reduction <add>, %1316, %cst_516 [0] : vector<8x4x32xf32> to vector<4x32xf32>
    %1318 = tpu.concatenate %1291, %1308, %1311 in 1 : vector<4x32xf32>, vector<4x32xf32>, vector<4x32xf32> -> vector<4x96xf32>
    %1319 = arith.truncf %1318 : vector<4x96xf32> to vector<4x96xbf16>
    %c0_517 = arith.constant 0 : index
    %c0_518 = arith.constant 0 : index
    %1320 = vector.load %arg10[%c0_517, %c0_518] : memref<96x160xbf16, #tpu.memory_space<vmem>>, vector<96x160xbf16>
    %cst_519 = arith.constant dense<0.000000e+00> : vector<4x160xf32>
    %1321 = tpu.matmul %1319, %1320, %cst_519 {dimension_numbers = #tpu.dot_dimension_numbers<[1], [0], [0], [1], [0, 0, 1, 1], [], []>} : vector<4x96xbf16>, vector<96x160xbf16>, vector<4x160xf32> -> vector<4x160xf32>
    %c0_520 = arith.constant 0 : index
    %c0_521 = arith.constant 0 : index
    %1322 = vector.load %arg11[%c0_520, %c0_521] : memref<1x160xf32, #tpu.memory_space<vmem>>, vector<1x160xf32>
    %1323 = vector.broadcast %1322 : vector<1x160xf32> to vector<4x160xf32>
    %1324 = arith.addf %1321, %1323 : vector<4x160xf32>
    %1325 = vector.extract_strided_slice %1324 {offsets = [0, 0], sizes = [4, 32], strides = [1, 1]} : vector<4x160xf32> to vector<4x32xf32>
    %1326 = math.tanh %1325 : vector<4x32xf32>
    %1327 = vector.extract_strided_slice %1324 {offsets = [0, 32], sizes = [4, 32], strides = [1, 1]} : vector<4x160xf32> to vector<4x32xf32>
    %1328 = arith.negf %1327 : vector<4x32xf32>
    %1329 = math.exp %1328 : vector<4x32xf32>
    %cst_522 = arith.constant 1.000000e+00 : f32
    %1330 = vector.broadcast %cst_522 : f32 to vector<4x32xf32>
    %1331 = arith.addf %1330, %1329 : vector<4x32xf32>
    %1332 = arith.divf %1330, %1331 : vector<4x32xf32>
    %1333 = vector.extract_strided_slice %1324 {offsets = [0, 64], sizes = [4, 32], strides = [1, 1]} : vector<4x160xf32> to vector<4x32xf32>
    %1334 = arith.negf %1333 : vector<4x32xf32>
    %1335 = math.exp %1334 : vector<4x32xf32>
    %cst_523 = arith.constant 1.000000e+00 : f32
    %1336 = vector.broadcast %cst_523 : f32 to vector<4x32xf32>
    %1337 = arith.addf %1336, %1335 : vector<4x32xf32>
    %1338 = arith.divf %1336, %1337 : vector<4x32xf32>
    %1339 = vector.extract_strided_slice %1324 {offsets = [0, 96], sizes = [4, 32], strides = [1, 1]} : vector<4x160xf32> to vector<4x32xf32>
    %1340 = arith.negf %1339 : vector<4x32xf32>
    %1341 = math.exp %1340 : vector<4x32xf32>
    %cst_524 = arith.constant 1.000000e+00 : f32
    %1342 = vector.broadcast %cst_524 : f32 to vector<4x32xf32>
    %1343 = arith.addf %1342, %1341 : vector<4x32xf32>
    %1344 = arith.divf %1342, %1343 : vector<4x32xf32>
    %1345 = vector.extract_strided_slice %1324 {offsets = [0, 128], sizes = [4, 32], strides = [1, 1]} : vector<4x160xf32> to vector<4x32xf32>
    %1346 = arith.negf %1345 : vector<4x32xf32>
    %1347 = math.exp %1346 : vector<4x32xf32>
    %cst_525 = arith.constant 1.000000e+00 : f32
    %1348 = vector.broadcast %cst_525 : f32 to vector<4x32xf32>
    %1349 = arith.addf %1348, %1347 : vector<4x32xf32>
    %1350 = arith.divf %1348, %1349 : vector<4x32xf32>
    %1351 = arith.mulf %1332, %1326 : vector<4x32xf32>
    %1352 = arith.mulf %1338, %1314 : vector<4x32xf32>
    %1353 = arith.addf %1351, %1352 : vector<4x32xf32>
    %1354 = arith.mulf %1344, %1317 : vector<4x32xf32>
    %1355 = arith.addf %1353, %1354 : vector<4x32xf32>
    %1356 = math.tanh %1355 : vector<4x32xf32>
    %1357 = arith.mulf %1350, %1356 : vector<4x32xf32>
    %1358 = vector.broadcast %1295 : vector<4x1xf32> to vector<4x32xf32>
    %1359 = arith.mulf %1358, %1357 : vector<4x32xf32>
    %1360 = arith.index_cast %c7_i32_499 : i32 to index
    %c0_526 = arith.constant 0 : index
    %c0_527 = arith.constant 0 : index
    %1361 = vector.load %arg17[%1360, %c0_526, %c0_527] : memref<8x4x32xf32, #tpu.memory_space<vmem>>, vector<1x4x32xf32>
    %1362 = vector.shape_cast %1361 : vector<1x4x32xf32> to vector<4x32xf32>
    %1363 = vector.shape_cast %1359 : vector<4x32xf32> to vector<1x4x32xf32>
    tpu.vector_store %arg17[%1360, %c0_526, %c0_527], %1363 {strides = array<i32>} : memref<8x4x32xf32, #tpu.memory_space<vmem>>, vector<1x4x32xf32>,
    %1364 = vector.broadcast %1295 : vector<4x1xf32> to vector<4x32xf32>
    %1365 = arith.mulf %1364, %1355 : vector<4x32xf32>
    %1366 = arith.index_cast %c7_i32_499 : i32 to index
    %c0_528 = arith.constant 0 : index
    %c0_529 = arith.constant 0 : index
    %1367 = vector.load %arg18[%1366, %c0_528, %c0_529] : memref<8x4x32xf32, #tpu.memory_space<vmem>>, vector<1x4x32xf32>
    %1368 = vector.shape_cast %1367 : vector<1x4x32xf32> to vector<4x32xf32>
    %1369 = vector.shape_cast %1365 : vector<4x32xf32> to vector<1x4x32xf32>
    tpu.vector_store %arg18[%1366, %c0_528, %c0_529], %1369 {strides = array<i32>} : memref<8x4x32xf32, #tpu.memory_space<vmem>>, vector<1x4x32xf32>,
    %c8_i32_530 = arith.constant 8 : i32
    %c0_531 = arith.constant 0 : index
    %c0_532 = arith.constant 0 : index
    %c0_533 = arith.constant 0 : index
    %1370 = vector.load %arg17[%c0_531, %c0_532, %c0_533] : memref<8x4x32xf32, #tpu.memory_space<vmem>>, vector<8x4x32xf32>
    %1371 = vector.extract_strided_slice %1370 {offsets = [0, 0, 0], sizes = [8, 2, 32], strides = [1, 1, 1]} : vector<8x4x32xf32> to vector<8x2x32xf32>
    %1372 = vector.extract_strided_slice %1370 {offsets = [0, 2, 0], sizes = [8, 2, 32], strides = [1, 1, 1]} : vector<8x4x32xf32> to vector<8x2x32xf32>
    %cst_534 = arith.constant dense<0.000000e+00> : vector<2x32xf32>
    %1373 = vector.multi_reduction <add>, %1371, %cst_534 [0] : vector<8x2x32xf32> to vector<2x32xf32>
    %cst_535 = arith.constant 1.250000e-01 : f32
    %1374 = vector.broadcast %cst_535 : f32 to vector<2x32xf32>
    %1375 = arith.mulf %1373, %1374 : vector<2x32xf32>
    %cst_536 = arith.constant dense<0xFF800000> : vector<2x32xf32>
    %1376 = vector.multi_reduction <maximumf>, %1371, %cst_536 [0] : vector<8x2x32xf32> to vector<2x32xf32>
    %cst_537 = arith.constant dense<0.000000e+00> : vector<2x32xf32>
    %1377 = vector.multi_reduction <add>, %1372, %cst_537 [0] : vector<8x2x32xf32> to vector<2x32xf32>
    %cst_538 = arith.constant 1.250000e-01 : f32
    %1378 = vector.broadcast %cst_538 : f32 to vector<2x32xf32>
    %1379 = arith.mulf %1377, %1378 : vector<2x32xf32>
    %cst_539 = arith.constant dense<0xFF800000> : vector<2x32xf32>
    %1380 = vector.multi_reduction <maximumf>, %1372, %cst_539 [0] : vector<8x2x32xf32> to vector<2x32xf32>
    %1381 = tpu.concatenate %1375, %1376, %1379, %1380 in 1 : vector<2x32xf32>, vector<2x32xf32>, vector<2x32xf32>, vector<2x32xf32> -> vector<2x128xf32>
    %1382 = arith.truncf %1381 : vector<2x128xf32> to vector<2x128xbf16>
    %c0_540 = arith.constant 0 : index
    %c0_541 = arith.constant 0 : index
    %1383 = vector.load %arg12[%c0_540, %c0_541] : memref<128x32xbf16, #tpu.memory_space<vmem>>, vector<128x32xbf16>
    %cst_542 = arith.constant dense<0.000000e+00> : vector<2x32xf32>
    %1384 = tpu.matmul %1382, %1383, %cst_542 {dimension_numbers = #tpu.dot_dimension_numbers<[1], [0], [0], [1], [0, 0, 1, 1], [], []>} : vector<2x128xbf16>, vector<128x32xbf16>, vector<2x32xf32> -> vector<2x32xf32>
    %c0_543 = arith.constant 0 : index
    %c0_544 = arith.constant 0 : index
    %1385 = vector.load %arg13[%c0_543, %c0_544] : memref<1x32xf32, #tpu.memory_space<vmem>>, vector<1x32xf32>
    %1386 = vector.broadcast %1385 : vector<1x32xf32> to vector<2x32xf32>
    %1387 = arith.addf %1384, %1386 : vector<2x32xf32>
    %cst_545 = arith.constant 0.000000e+00 : f32
    %1388 = vector.broadcast %cst_545 : f32 to vector<2x32xf32>
    %1389 = arith.maximumf %1387, %1388 : vector<2x32xf32>
    %1390 = arith.truncf %1389 : vector<2x32xf32> to vector<2x32xbf16>
    %c0_546 = arith.constant 0 : index
    %c0_547 = arith.constant 0 : index
    %1391 = vector.load %arg14[%c0_546, %c0_547] : memref<32x3xbf16, #tpu.memory_space<vmem>>, vector<32x3xbf16>
    %cst_548 = arith.constant dense<0.000000e+00> : vector<2x3xf32>
    %1392 = tpu.matmul %1390, %1391, %cst_548 {dimension_numbers = #tpu.dot_dimension_numbers<[1], [0], [0], [1], [0, 0, 1, 1], [], []>} : vector<2x32xbf16>, vector<32x3xbf16>, vector<2x3xf32> -> vector<2x3xf32>
    %c0_549 = arith.constant 0 : index
    %c0_550 = arith.constant 0 : index
    %1393 = vector.load %arg15[%c0_549, %c0_550] : memref<1x3xf32, #tpu.memory_space<vmem>>, vector<1x3xf32>
    %1394 = vector.broadcast %1393 : vector<1x3xf32> to vector<2x3xf32>
    %1395 = arith.addf %1392, %1394 : vector<2x3xf32>
    %c0_551 = arith.constant 0 : index
    %c0_552 = arith.constant 0 : index
    %1396 = vector.load %arg16[%c0_551, %c0_552] : memref<2x3xf32, #tpu.memory_space<vmem>>, vector<2x3xf32>
    tpu.vector_store %arg16[%c0_551, %c0_552], %1395 {strides = array<i32>} : memref<2x3xf32, #tpu.memory_space<vmem>>, vector<2x3xf32>,
    return
  }
}

</mosaic_0001>

<bundles_post_ra>
// kernel: esim_forward.1
= control target key start
LH: loop header
LB: loop body
LE: loop exit
PB: predicated region body
PF: predicated region fallthrough
CT: control target
= control target key end

     0   :  { %s13079_s0 = inlined_call_operand.vmem [shape: f32[8,4,32], index: 0, kind: input, shape index: {}]   ;;  %s13080_s1 = inlined_call_operand.vmem [shape: f32[8,4], index: 1, kind: input, shape index: {}]   ;;  %s13081_s2 = inlined_call_operand.vmem [shape: f32[8,8,4], index: 2, kind: input, shape index: {}]   ;;  %s13082_s3 = inlined_call_operand.vmem [shape: f32[8,8,4], index: 3, kind: input, shape index: {}]   ;;  %s13083_s4 = inlined_call_operand.vmem [shape: f32[2,1,8], index: 4, kind: input, shape index: {}]   ;;  %s13084_s5 = inlined_call_operand.vmem [shape: f32[2,1,8], index: 5, kind: input, shape index: {}]   ;;  %s13085_s6 = inlined_call_operand.vmem [shape: bf16[96,160], index: 6, kind: input, shape index: {}]   ;;  %s13086_s7 = inlined_call_operand.vmem [shape: f32[1,160], index: 7, kind: input, shape index: {}]   ;;  %s13087_s8 = inlined_call_operand.vmem [shape: bf16[128,32], index: 8, kind: input, shape index: {}]   ;;  %s13088_s9 = inlined_call_operand.vmem [shape: f32[1,32], index: 9, kind: input, shape index: {}]   ;;  %s13089_s10 = inlined_call_operand.vmem [shape: bf16[96,160], index: 10, kind: input, shape index: {}]   ;;  %s13090_s11 = inlined_call_operand.vmem [shape: f32[1,160], index: 11, kind: input, shape index: {}]   ;;  %s13091_s12 = inlined_call_operand.vmem [shape: bf16[128,32], index: 12, kind: input, shape index: {}]   ;;  %s13092_s13 = inlined_call_operand.vmem [shape: f32[1,32], index: 13, kind: input, shape index: {}]   ;;  %s13093_s14 = inlined_call_operand.vmem [shape: bf16[32,3], index: 14, kind: input, shape index: {}]   ;;  %s13094_s15 = inlined_call_operand.vmem [shape: f32[1,3], index: 15, kind: input, shape index: {}]   ;;  %s13095_s16 = inlined_call_operand.hbm [shape: f32[2,3], index: 16, kind: output, shape index: {}]  }
   0x1   :  { %13108 = sst [smem:[#allocation17_spill]] %s13079_s0 }
   0x2   :  { %v75_v0 = vlaneseq  ;;  %v81_v1 = vld [vmem:[%s13081_s2] sm:$0xff] }
   0x3   :  { %v138_v3 = vld [vmem:[%s13082_s3] sm:$0xff]  ;;  %v96_v4 = vperm.slane %v81_v1, 2  ;;  %v82_v6 = vperm.slane %v81_v1, 0 }
   0x4   :  { %v76_v2 = vshrl.u32 %v75_v0, 7  ;;  %v139_v5 = vperm.slane %v138_v3, 0 }
   0x6   :  { %9048 = vset.pattern.permute.xlu2 %v76_v2  ;;  %9047 = vset.pattern.permute.xlu1 %v76_v2 }
   0x7   :  { %9046 = vset.pattern.permute.xlu0 %v76_v2 }
   0x8   :  { %21 = vsyncpa [#allocation6], 0  ;;  %v153_v7 = vperm.slane %v138_v3, 2  ;;  %v146_v8 = vperm.slane %v138_v3, 1  ;;  %v89_v9 = vperm.slane %v81_v1, 1  ;;  %v110_v10 = vperm.slane %v81_v1, 4 }
   0x9   :  { %v160_v11 = vperm.slane %v138_v3, 3  ;;  %v103_v12 = vperm.slane %v81_v1, 3  ;;  %v174_v13 = vperm.slane %v138_v3, 5  ;;  %v117_v14 = vperm.slane %v81_v1, 5  ;;  %v7919_v38 = vld [vmem:[%s13085_s6 + $0x50] sm:$0xf] }
   0xa   :  { %v167_v15 = vperm.slane %v138_v3, 4  ;;  %v131_v16 = vperm.slane %v81_v1, 7  ;;  %v181_v17 = vperm.slane %v138_v3, 6  ;;  %v124_v18 = vperm.slane %v81_v1, 6  ;;  %v8840_v39 = vld [vmem:[%s13085_s6 + $0x54] sm:$0xf0] }
   0xb   :  { %v188_v19 = vperm.slane %v138_v3, 7  ;;  %vm55_vm0 = vcmask 257024   ;;  %v13097_v20 = vmov 0.0   ;;  %v8839_v40 = vld [vmem:[%s13085_s6 + $0x54] sm:$0xf]  ;;  %v7920_v44 = vor.u32 %v8840_v39, %v7919_v38  ;;  %s9342_s18 = smov 64  }
   0xc   :  { %58 = vst.msk [vmem:[#allocation2 + $0x8] sm:$0xf] %vm55_vm0, %v13097_v20  ;;  %v7921_v45 = vld [vmem:[%s13085_s6 + $0x58] sm:$0xf0]  ;;  %s9343_s19 = smov 32   ;;  %s9344_s20 = smov 96  }
   0xd   :  { %66 = vst.msk [vmem:[#allocation3 + $0x8] sm:$0xf] %vm55_vm0, %v13097_v20  ;;  %v7924_v48 = vor.u32 %v8839_v40, %v7921_v45  ;;  %400 = vmatpush.bf16.msra.mxu0 %v7920_v44  ;;  %s13109_s27 = sld [smem:[#allocation17_spill]]  ;;  %vm311_vm1 = vcmask 261120   ;;  %vm313_vm2 = vcmask 523264   ;;  %vm394_vm3 = vcmask 785408  }
   0xe   :  { %101 = vperm.xlu2 %9048, %v96_v4   ;;  %144 = vperm.xlu1 %9047, %v139_v5   ;;  %56 = vst.msk [vmem:[#allocation2] sm:$0xf] %vm55_vm0, %v13097_v20  ;;  %s9347_s29 = smov [#allocation5]  }
   0xf   :  { %87 = vperm.xlu0 %9046, %v82_v6   ;;  %57 = vst.msk [vmem:[#allocation2 + $0x4] sm:$0xf] %vm55_vm0, %v13097_v20  ;;  %413 = vmatpush.bf16.msra.mxu1 %v7924_v48 }
  0x10   :  { %59 = vst.msk [vmem:[#allocation2 + $0xc] sm:$0xf] %vm55_vm0, %v13097_v20 }
  0x11   :  { %60 = vst.msk [vmem:[#allocation2 + $0x10] sm:$0xf] %vm55_vm0, %v13097_v20 }
  0x12   :  { %61 = vst.msk [vmem:[#allocation2 + $0x14] sm:$0xf] %vm55_vm0, %v13097_v20 }
  0x13   :  { %62 = vst.msk [vmem:[#allocation2 + $0x18] sm:$0xf] %vm55_vm0, %v13097_v20  ;;  %v197_v32 = vld [vmem:[#allocation2 + $0x8] sm:$0xf] }
  0x14   :  { %63 = vst.msk [vmem:[#allocation2 + $0x1c] sm:$0xf] %vm55_vm0, %v13097_v20  ;;  %v205_v41 = vld [vmem:[#allocation3 + $0x8] sm:$0xf] }
  0x15   :  { %64 = vst.msk [vmem:[#allocation3] sm:$0xf] %vm55_vm0, %v13097_v20  ;;  %v195_v30 = vld [vmem:[#allocation2] sm:$0xf] }
  0x16   :  { %158 = vperm.xlu2 %9048, %v153_v7   ;;  %151 = vperm.xlu1 %9047, %v146_v8   ;;  %65 = vst.msk [vmem:[#allocation3 + $0x4] sm:$0xf] %vm55_vm0, %v13097_v20  ;;  %v196_v28 = vld [vmem:[#allocation2 + $0x4] sm:$0xf] }
  0x17   :  { %94 = vperm.xlu0 %9046, %v89_v9   ;;  %67 = vst.msk [vmem:[#allocation3 + $0xc] sm:$0xf] %vm55_vm0, %v13097_v20  ;;  %v198_v46 = vld [vmem:[#allocation2 + $0xc] sm:$0xf] }
  0x18   :  { %68 = vst.msk [vmem:[#allocation3 + $0x10] sm:$0xf] %vm55_vm0, %v13097_v20  ;;  %v199_v55 = vld [vmem:[#allocation2 + $0x10] sm:$0xf] }
  0x19   :  { %69 = vst.msk [vmem:[#allocation3 + $0x14] sm:$0xf] %vm55_vm0, %v13097_v20 }
  0x1a   :  { %70 = vst.msk [vmem:[#allocation3 + $0x18] sm:$0xf] %vm55_vm0, %v13097_v20  ;;  %v201_v39 = vld [vmem:[#allocation2 + $0x18] sm:$0xf] }
  0x1b   :  { %71 = vst.msk [vmem:[#allocation3 + $0x1c] sm:$0xf] %vm55_vm0, %v13097_v20 }
  0x1c   :  { %v203_v31 = vld [vmem:[#allocation3] sm:$0xf] }
  0x1d   :  { %v204_v29 = vld [vmem:[#allocation3 + $0x4] sm:$0xf] }
  0x1e   :  { %115 = vperm.xlu2 %9048, %v110_v10   ;;  %165 = vperm.xlu1 %9047, %v160_v11   ;;  %v206_v47 = vld [vmem:[#allocation3 + $0xc] sm:$0xf] }
  0x1f   :  { %108 = vperm.xlu0 %9046, %v103_v12   ;;  %v207_v0 = vld [vmem:[#allocation3 + $0x10] sm:$0xf] }
  0x21   :  { %v209_v40 = vld [vmem:[#allocation3 + $0x18] sm:$0xf] }
  0x26   :  { %179 = vperm.xlu2 %9048, %v174_v13   ;;  %122 = vperm.xlu1 %9047, %v117_v14   ;;  %v200_v13 = vld [vmem:[#allocation2 + $0x14] sm:$0xf] }
  0x27   :  { %172 = vperm.xlu0 %9046, %v167_v15   ;;  %v208_v14 = vld [vmem:[#allocation3 + $0x14] sm:$0xf] }
  0x2e   :  { %136 = vperm.xlu2 %9048, %v131_v16   ;;  %186 = vperm.xlu1 %9047, %v181_v17  }
  0x2f   :  { %129 = vperm.xlu0 %9046, %v124_v18  }
  0x37   :  { %193 = vperm.xlu0 %9046, %v188_v19   ;;  %v9496_v19 = vld [vmem:[#allocation2 + $0x1c] sm:$0xf] }
  0x68   :  { %v102_v21 = vpop.permute.xlu2 %101 }
  0x69   :  { %v213_v49 = vmul.f32 %v197_v32, %v102_v21  ;;  %v259_v52 = vmul.f32 %v205_v41, %v102_v21 }
  0x6b   :  { %v222_v63 = vsel %vm55_vm0, %v213_v49, 0.0  ;;  %v268_v3 = vsel %vm55_vm0, %v259_v52, 0.0 }
  0x70   :  { %v159_v22 = vpop.permute.xlu2 %158 }
  0x71   :  { %v236_v53 = vmul.f32 %v197_v32, %v159_v22  ;;  %v282_v5 = vmul.f32 %v205_v41, %v159_v22 }
  0x73   :  { %v245_v4 = vsel %vm55_vm0, %v236_v53, 0.0 }
  0x78   :  { %v116_v25 = vpop.permute.xlu2 %115 }
  0x79   :  { %v215_v6 = vmul.f32 %v199_v55, %v116_v25  ;;  %v261_v12 = vmul.f32 %v207_v0, %v116_v25 }
  0x7b   :  { %v226_v25 = vsel %vm55_vm0, %v215_v6, 0.0 }
  0x80   :  { %v145_v23 = vpop.permute.xlu1 %144  ;;  %v9480_v42 = vpop.permute.xlu2 %179 }
  0x81   :  { %v88_v24 = vpop.permute.xlu0 %87  ;;  %v234_v60 = vmul.f32 %v195_v30, %v145_v23  ;;  %v280_v8 = vmul.f32 %v203_v31, %v145_v23 }
  0x82   :  { %v211_v36 = vmul.f32 %v195_v30, %v88_v24  ;;  %v257_v43 = vmul.f32 %v203_v31, %v88_v24  ;;  %v210_v31 = vld [vmem:[#allocation3 + $0x1c] sm:$0xf] }
  0x83   :  { %v242_v15 = vsel %vm55_vm0, %v234_v60, 0.0  ;;  %v288_v30 = vsel %vm55_vm0, %v280_v8, 0.0 }
  0x84   :  { %v219_v54 = vsel %vm55_vm0, %v211_v36, 0.0  ;;  %v265_v56 = vsel %vm55_vm0, %v257_v43, 0.0  ;;  %v239_v36 = vmul.f32 %v200_v13, %v9480_v42 }
  0x88   :  { %v152_v26 = vpop.permute.xlu1 %151  ;;  %v137_v18 = vpop.permute.xlu2 %136 }
  0x89   :  { %v95_v27 = vpop.permute.xlu0 %94  ;;  %v235_v57 = vmul.f32 %v196_v28, %v152_v26  ;;  %v281_v1 = vmul.f32 %v204_v29, %v152_v26  ;;  %v291_v26 = vsel %vm55_vm0, %v282_v5, 0.0 }
  0x8a   :  { %v212_v33 = vmul.f32 %v196_v28, %v95_v27  ;;  %v258_v34 = vmul.f32 %v204_v29, %v95_v27 }
  0x8b   :  { %v243_v9 = vsel %vm55_vm0, %v235_v57, 0.0  ;;  %v289_v21 = vsel %vm55_vm0, %v281_v1, 0.0 }
  0x8c   :  { %v220_v50 = vsel %vm55_vm0, %v212_v33, 0.0  ;;  %v266_v51 = vsel %vm55_vm0, %v258_v34, 0.0  ;;  %v244_v27 = vadd.f32 %v243_v9, %v242_v15  ;;  %v272_v34 = vsel %vm55_vm0, %v261_v12, 0.0 }
  0x8d   :  { %v221_v61 = vadd.f32 %v220_v50, %v219_v54  ;;  %v267_v62 = vadd.f32 %v266_v51, %v265_v56  ;;  %v290_v38 = vadd.f32 %v289_v21, %v288_v30  ;;  %v7903_v30 = vld [vmem:[%s13085_s6 + $0x30] sm:$0xf] }
  0x8e   :  { %v246_v48 = vadd.f32 %v245_v4, %v244_v27  ;;  %v7911_v27 = vld [vmem:[%s13085_s6 + $0x40] sm:$0xf] }
  0x8f   :  { %v223_v16 = vadd.f32 %v222_v63, %v221_v61  ;;  %v269_v17 = vadd.f32 %v268_v3, %v267_v62  ;;  %v292_v56 = vadd.f32 %v291_v26, %v290_v38  ;;  %v285_v3 = vmul.f32 %v208_v14, %v9480_v42  ;;  %v7895_v38 = vld [vmem:[%s13085_s6 + $0x20] sm:$0xf] }
  0x90   :  { %v166_v35 = vpop.permute.xlu1 %165 }
  0x91   :  { %v109_v37 = vpop.permute.xlu0 %108  ;;  %v237_v22 = vmul.f32 %v198_v46, %v166_v35  ;;  %v283_v32 = vmul.f32 %v206_v47, %v166_v35 }
  0x92   :  { %v214_v58 = vmul.f32 %v198_v46, %v109_v37  ;;  %v260_v59 = vmul.f32 %v206_v47, %v109_v37  ;;  %v218_v37 = vmul.f32 %v9496_v19, %v137_v18  ;;  %v264_v46 = vmul.f32 %v210_v31, %v137_v18 }
  0x93   :  { %v247_v41 = vsel %vm55_vm0, %v237_v22, 0.0  ;;  %v293_v51 = vsel %vm55_vm0, %v283_v32, 0.0 }
  0x94   :  { %v224_v10 = vsel %vm55_vm0, %v214_v58, 0.0  ;;  %v270_v11 = vsel %vm55_vm0, %v260_v59, 0.0  ;;  %v294_v63 = vadd.f32 %v293_v51, %v292_v56  ;;  %v278_v5 = vsel %vm55_vm0, %v264_v46, 0.0  ;;  %v8832_v46 = vld [vmem:[%s13085_s6 + $0x14] sm:$0xf0] }
  0x95   :  { %v225_v28 = vadd.f32 %v224_v10, %v223_v16  ;;  %v271_v29 = vadd.f32 %v270_v11, %v269_v17  ;;  %v232_v6 = vsel %vm55_vm0, %v218_v37, 0.0  ;;  %v251_v10 = vsel %vm55_vm0, %v239_v36, 0.0  ;;  %v8830_v51 = vld [vmem:[%s13085_s6 + $0x4] sm:$0xf0]  ;;  %v72_v56 = vld [vmem:[%s13109_s27] sm:$0xf] }
  0x97   :  { %v227_v35 = vadd.f32 %v226_v25, %v225_v28  ;;  %v273_v47 = vadd.f32 %v272_v34, %v271_v29  ;;  %v8837_v28 = vld [vmem:[%s13085_s6 + $0x44] sm:$0xf]  ;;  %v7913_v25 = vld [vmem:[%s13085_s6 + $0x48] sm:$0xf0]  ;;  %v7905_v34 = vld [vmem:[%s13085_s6 + $0x38] sm:$0xf0] }
  0x98   :  { %v123_v2 = vpop.permute.xlu1 %122  ;;  %v7916_v32 = vor.u32 %v8837_v28, %v7913_v25 }
  0x99   :  { %v173_v7 = vpop.permute.xlu0 %172  ;;  %v216_v23 = vmul.f32 %v200_v13, %v123_v2  ;;  %v262_v24 = vmul.f32 %v208_v14, %v123_v2  ;;  %v297_v13 = vsel %vm55_vm0, %v285_v3, 0.0 }
  0x9a   :  { %v238_v33 = vmul.f32 %v199_v55, %v173_v7  ;;  %v284_v45 = vmul.f32 %v207_v0, %v173_v7  ;;  %v248_v55 = vadd.f32 %v247_v41, %v246_v48  ;;  %414 = vmatpush.bf16.msra.mxu1 %v7916_v32  ;;  %v7897_v41 = vld [vmem:[%s13085_s6 + $0x28] sm:$0xf0]  ;;  %v8831_v48 = vld [vmem:[%s13085_s6 + $0x14] sm:$0xf] }
  0x9b   :  { %v228_v43 = vsel %vm55_vm0, %v216_v23, 0.0  ;;  %v274_v44 = vsel %vm55_vm0, %v262_v24, 0.0 }
  0x9c   :  { %v249_v52 = vsel %vm55_vm0, %v238_v33, 0.0  ;;  %v229_v57 = vadd.f32 %v228_v43, %v227_v35  ;;  %v275_v58 = vadd.f32 %v274_v44, %v273_v47  ;;  %v295_v59 = vsel %vm55_vm0, %v284_v45, 0.0  ;;  %v8835_v33 = vld [vmem:[%s13085_s6 + $0x34] sm:$0xf]  ;;  %v7887_v45 = vld [vmem:[%s13085_s6 + $0x10] sm:$0xf] }
  0x9d   :  { %v250_v0 = vadd.f32 %v249_v52, %v248_v55  ;;  %v296_v7 = vadd.f32 %v295_v59, %v294_v63  ;;  %v7908_v37 = vor.u32 %v8835_v33, %v7905_v34  ;;  %v7889_v35 = vld [vmem:[%s13085_s6 + $0x18] sm:$0xf0]  ;;  %v7888_v47 = vor.u32 %v8832_v46, %v7887_v45  ;;  %v8829_v52 = vld [vmem:[%s13085_s6 + $0x4] sm:$0xf] }
  0x9f   :  { %v252_v42 = vadd.f32 %v251_v10, %v250_v0  ;;  %v298_v18 = vadd.f32 %v297_v13, %v296_v7  ;;  %415 = vmatpush.bf16.msra.mxu1 %v7908_v37 }
  0xa0   :  { %v187_v49 = vpop.permute.xlu1 %186 }
  0xa1   :  { %v130_v50 = vpop.permute.xlu0 %129  ;;  %v240_v60 = vmul.f32 %v201_v39, %v187_v49  ;;  %v286_v4 = vmul.f32 %v209_v40, %v187_v49  ;;  %v7892_v49 = vor.u32 %v8831_v48, %v7889_v35 }
  0xa2   :  { %v217_v53 = vmul.f32 %v201_v39, %v130_v50  ;;  %v263_v54 = vmul.f32 %v209_v40, %v130_v50  ;;  %v8834_v39 = vld [vmem:[%s13085_s6 + $0x24] sm:$0xf0]  ;;  %v8833_v40 = vld [vmem:[%s13085_s6 + $0x24] sm:$0xf]  ;;  %v7879_v50 = vld [vmem:[%s13085_s6] sm:$0xf] }
  0xa3   :  { %v253_v11 = vsel %vm55_vm0, %v240_v60, 0.0  ;;  %v299_v14 = vsel %vm55_vm0, %v286_v4, 0.0  ;;  %v7896_v43 = vor.u32 %v8834_v39, %v7895_v38  ;;  %v7900_v44 = vor.u32 %v8833_v40, %v7897_v41 }
  0xa4   :  { %v230_v61 = vsel %vm55_vm0, %v217_v53, 0.0  ;;  %v276_v62 = vsel %vm55_vm0, %v263_v54, 0.0  ;;  %v254_v17 = vadd.f32 %v253_v11, %v252_v42  ;;  %v300_v24 = vadd.f32 %v299_v14, %v298_v18  ;;  %v7881_v54 = vld [vmem:[%s13085_s6 + $0x8] sm:$0xf0] }
  0xa5   :  { %v277_v1 = vadd.f32 %v276_v62, %v275_v58  ;;  %v231_v2 = vadd.f32 %v230_v61, %v229_v57  ;;  %416 = vmatpush.bf16.msra.mxu1 %v7900_v44  ;;  %v7880_v53 = vor.u32 %v8830_v51, %v7879_v50  ;;  %v7884_v55 = vor.u32 %v8829_v52, %v7881_v54  ;;  %v9597_v62 = vld [vmem:[%s13086_s7] sm:$0x3] }
  0xa6   :  { %v330_v63 = vperm.slane %v9597_v62, 0  ;;  %v331_v52 = vperm.slane %v9597_v62, 1 }
  0xa7   :  { %v279_v8 = vadd.f32 %v278_v5, %v277_v1  ;;  %v233_v9 = vadd.f32 %v232_v6, %v231_v2 }
  0xa9   :  { %v194_v12 = vpop.permute.xlu0 %193  ;;  %469 = vrot.lane.b32.xlu0 %v279_v8, %s9342_s18  ;;  %304 = vrot.lane.b32.xlu1 %v233_v9, %s9343_s19  ;;  %v9606_v8 = vld [vmem:[%s13081_s2 + $0x8] sm:$0xff] }
  0xaa   :  { %v241_v15 = vmul.f32 %v9496_v19, %v194_v12  ;;  %v287_v16 = vmul.f32 %v210_v31, %v194_v12  ;;  %v8838_v19 = vld [vmem:[%s13085_s6 + $0x44] sm:$0xf0]  ;;  %v8836_v31 = vld [vmem:[%s13085_s6 + $0x34] sm:$0xf0]  ;;  %417 = vmatpush.bf16.msra.mxu1 %v7892_v49  ;;  %v521_v10 = vperm.slane %v9606_v8, 1  ;;  %v528_v42 = vperm.slane %v9606_v8, 2 }
  0xab   :  { %v7912_v29 = vor.u32 %v8838_v19, %v7911_v27  ;;  %v7904_v36 = vor.u32 %v8836_v31, %v7903_v30  ;;  %v9079_v19 = vld [vmem:[%s13080_s1] ss:$0 sm:$0xff]  ;;  %v514_v28 = vperm.slane %v9606_v8, 0  ;;  %v535_v32 = vperm.slane %v9606_v8, 3 }
  0xac   :  { %v255_v21 = vsel %vm55_vm0, %v241_v15, 0.0  ;;  %v301_v22 = vsel %vm55_vm0, %v287_v16, 0.0  ;;  %v542_v33 = vperm.slane %v9606_v8, 4  ;;  %v556_v37 = vperm.slane %v9606_v8, 6 }
  0xad   :  { %v256_v23 = vadd.f32 %v255_v21, %v254_v17  ;;  %v302_v26 = vadd.f32 %v301_v22, %v300_v24  ;;  %401 = vmatpush.bf16.msra.mxu0 %v7912_v29  ;;  %v7931_v29 = vld [vmem:[%s13082_s3 + $0x8] sm:$0xff]  ;;  %v563_v38 = vperm.slane %v9606_v8, 7  ;;  %v549_v50 = vperm.slane %v9606_v8, 5 }
  0xae   :  { %418 = vmatpush.bf16.msra.mxu1 %v7884_v55  ;;  %v572_v25 = vperm.slane %v7931_v29, 0  ;;  %v579_v30 = vperm.slane %v7931_v29, 1  ;;  %v586_v31 = vperm.slane %v7931_v29, 2  ;;  %v600_v34 = vperm.slane %v7931_v29, 4 }
  0xaf   :  { %308 = vrot.lane.b32.xlu2 %v256_v23, %s9342_s18  ;;  %v621_v39 = vperm.slane %v7931_v29, 7  ;;  %v593_v49 = vperm.slane %v7931_v29, 3  ;;  %v614_v51 = vperm.slane %v7931_v29, 6 }
  0xb1   :  { %479 = vrot.lane.b32.xlu1 %v302_v26, %s9344_s20  ;;  %402 = vmatpush.bf16.msra.mxu0 %v7904_v36  ;;  %v607_v36 = vperm.slane %v7931_v29, 5 }
  0xb5   :  { %403 = vmatpush.bf16.msra.mxu0 %v7896_v43 }
  0xb9   :  { %404 = vmatpush.bf16.msra.mxu0 %v7888_v47 }
  0xbd   :  { %405 = vmatpush.bf16.msra.mxu0 %v7880_v53 }
 0x109   :  { %v309_v58 = vpop.permute.xlu2 %308 }
 0x11b   :  { %v305_v57 = vpop.permute.xlu1 %304  ;;  %v470_v22 = vpop.permute.xlu0 %469 }
 0x11c   :  { %v312_v59 = vsel %vm311_vm1, %v72_v56, %v305_v57 }
 0x11d   :  { %v314_v60 = vsel %vm313_vm2, %v312_v59, %v309_v58 }
 0x11e   :  { %v315_v61 = vpack.c.bf16 %v314_v60, %v314_v60 }
 0x120   :  { %7925 = vmatmul.msk.bf16.vlgmr.msra.gmra.mxu0 %vm394_vm3, %v315_v61  ;;  %7926 = vmatmul.msk.bf16.vlgmr.msra.gmra.mxu1 %vm394_vm3, %v315_v61 }
 0x123   :  { %v480_v23 = vpop.permute.xlu1 %479 }
 0x19d   :  { %v407_v0 = vpop.f32.mrf.mxu0  ;;  %v9600_v1 = vpop.f32.mrf.mxu1 }
 0x19e   :  { %v408_v2 = vadd.f32 %v407_v0, %v330_v63  ;;  %v421_v53 = vadd.f32 %v9600_v1, %v331_v52  ;;  %v634_v52 = vld [vmem:[#allocation2 + $0x18] sm:$0xf] }
 0x1a0   :  { %9102 = vtanh.f32 %v408_v2  ;;  %v7927_v3 = vmul.f32 -1.442695, %v408_v2  ;;  %v7928_v54 = vmul.f32 -1.442695, %v421_v53 }
 0x1a2   :  { %9104 = vpow2.f32 %v7927_v3 }
 0x1a5   :  { %v409_v4 = vpop.f32.mrf.mxu0  ;;  %v422_v5 = vpop.f32.mrf.mxu1 }
 0x1a6   :  { %v9103_v6 = vpop.eup %9102 }
 0x1a7   :  { %464 = vrot.lane.b32.xlu2 %v9103_v6, %s9343_s19 }
 0x1a8   :  { %v9105_v7 = vpop.eup %9104 }
 0x1a9   :  { %v428_v9 = vadd.f32 1.0, %v9105_v7 }
 0x1ab   :  { %9106 = vrcp.f32 %v428_v9  ;;  %v440_v14 = vand.u32 2147483648, %v428_v9  ;;  %v438_v16 = vand.u32 2147483647, %v428_v9  ;;  %vm434_vm5 = vweird.f32 %v428_v9 }
 0x1ad   :  { %v441_v18 = vor.u32 1.1754944e-38, %v440_v14  ;;  %vm439_vm7 = vcmp.eq.f32.partialorder %v438_v16, 8.507059e+37  ;;  %v629_v14 = vld [vmem:[#allocation2 + $0x4] sm:$0xf] }
 0x1af   :  { %526 = vperm.xlu2 %9048, %v521_v10  }
 0x1b1   :  { %v9107_v11 = vpop.eup %9106 }
 0x1b2   :  { %v430_v12 = vmul.f32 %v9107_v11, %v428_v9  ;;  %vm435_vm4 = vweird.f32 %v9107_v11 }
 0x1b3   :  { %vm436_vm6 = vmor %vm434_vm5, %vm435_vm4 }
 0x1b4   :  { %v431_v13 = vsub.f32 1.0, %v430_v12 }
 0x1b6   :  { %v432_v15 = vmul.f32 %v9107_v11, %v431_v13 }
 0x1b7   :  { %533 = vperm.xlu2 %9048, %v528_v42  }
 0x1b8   :  { %v433_v17 = vadd.f32 %v9107_v11, %v432_v15 }
 0x1ba   :  { %v437_v21 = vsel %vm436_vm6, %v9107_v11, %v433_v17 }
 0x1bb   :  { %v442_v24 = vsel %vm439_vm7, %v441_v18, %v437_v21  ;;  %v630_v21 = vld [vmem:[#allocation2 + $0x8] sm:$0xf] }
 0x1bc   :  { %v472_v26 = vmul.f32 %v470_v22, %v442_v24  ;;  %v482_v27 = vmul.f32 %v480_v23, %v442_v24  ;;  %v631_v23 = vld [vmem:[#allocation2 + $0xc] sm:$0xf] }
 0x1be   :  { %474 = vrot.lane.b32.xlu0 %v472_v26, %s9344_s20  ;;  %484 = vrot.lane.b32.xlu1 %v482_v27, %s9342_s18  ;;  %v632_v27 = vld [vmem:[#allocation2 + $0x10] sm:$0xf] }
 0x1c6   :  { %79 = vperm.xlu0 %9046, %v9079_v19   ;;  %519 = vperm.xlu1 %9047, %v514_v28  }
 0x1ce   :  { %577 = vperm.xlu0 %9046, %v572_v25   ;;  %584 = vperm.xlu1 %9047, %v579_v30  }
 0x1d6   :  { %591 = vperm.xlu0 %9046, %v586_v31   ;;  %540 = vperm.xlu1 %9047, %v535_v32  }
 0x1de   :  { %547 = vperm.xlu0 %9046, %v542_v33   ;;  %605 = vperm.xlu1 %9047, %v600_v34  }
 0x1e6   :  { %612 = vperm.xlu0 %9046, %v607_v36   ;;  %561 = vperm.xlu1 %9047, %v556_v37  }
 0x1ee   :  { %568 = vperm.xlu0 %9046, %v563_v38   ;;  %626 = vperm.xlu1 %9047, %v621_v39  }
 0x201   :  { %v465_v40 = vpop.permute.xlu2 %464 }
 0x202   :  { %v467_v41 = vmul.f32 %v465_v40, %v442_v24 }
 0x209   :  { %v9634_v63 = vpop.permute.xlu2 %526 }
 0x20a   :  { %v645_v16 = vmul.f32 %v629_v14, %v9634_v63 }
 0x20c   :  { %v653_v24 = vsel %vm55_vm0, %v645_v16, 0.0  ;;  %v637_v16 = vld [vmem:[#allocation3 + $0x4] sm:$0xf] }
 0x211   :  { %v9640_v3 = vpop.permute.xlu2 %533 }
 0x212   :  { %v646_v29 = vmul.f32 %v630_v21, %v9640_v3 }
 0x230   :  { %v475_v43 = vpop.permute.xlu0 %474  ;;  %v485_v45 = vpop.permute.xlu1 %484 }
 0x231   :  { %v477_v44 = vadd.f32 %v475_v43, %v467_v41 }
 0x233   :  { %v487_v46 = vadd.f32 %v485_v45, %v477_v44 }
 0x235   :  { %9108 = vtanh.f32 %v487_v46 }
 0x236   :  { %9110 = vpow2.f32 %v7928_v54 }
 0x238   :  { %v80_v48 = vpop.permute.xlu0 %79  ;;  %v9628_v56 = vpop.permute.xlu1 %519 }
 0x239   :  { %v496_v35 = vmul.f32 %v487_v46, %v80_v48 }
 0x23b   :  { %v9109_v47 = vpop.eup %9108  ;;  %498 = vrot.lane.b32.xlu1 %v496_v35, %s9344_s20  ;;  %v655_v35 = vsel %vm55_vm0, %v646_v29, 0.0 }
 0x23c   :  { %490 = vrot.lane.b32.xlu2 %v9109_v47, %s9344_s20  ;;  %v9111_v55 = vpop.eup %9110 }
 0x23d   :  { %v447_v57 = vadd.f32 1.0, %v9111_v55 }
 0x23f   :  { %9112 = vrcp.f32 %v447_v57  ;;  %v459_v5 = vand.u32 2147483648, %v447_v57  ;;  %vm453_vm9 = vweird.f32 %v447_v57  ;;  %v457_v7 = vand.u32 2147483647, %v447_v57 }
 0x240   :  { %v9630_v58 = vpop.permute.xlu1 %584  ;;  %v9632_v60 = vpop.permute.xlu0 %577 }
 0x241   :  { %v460_v9 = vor.u32 1.1754944e-38, %v459_v5  ;;  %vm458_vm11 = vcmp.eq.f32.partialorder %v457_v7, 8.507059e+37  ;;  %v668_v17 = vmul.f32 %v629_v14, %v9630_v58 }
 0x243   :  { %v676_v26 = vsel %vm55_vm0, %v668_v17, 0.0 }
 0x244   :  { %598 = vperm.xlu2 %9048, %v593_v49  }
 0x245   :  { %v9113_v59 = vpop.eup %9112 }
 0x246   :  { %v449_v61 = vmul.f32 %v9113_v59, %v447_v57  ;;  %vm454_vm8 = vweird.f32 %v9113_v59 }
 0x247   :  { %vm455_vm10 = vmor %vm453_vm9, %vm454_vm8 }
 0x248   :  { %v9636_v0 = vpop.permute.xlu1 %540  ;;  %v450_v62 = vsub.f32 1.0, %v449_v61  ;;  %v9638_v1 = vpop.permute.xlu0 %591  ;;  %v635_v61 = vld [vmem:[#allocation2 + $0x1c] sm:$0xf] }
 0x249   :  { %v669_v25 = vmul.f32 %v630_v21, %v9638_v1  ;;  %v647_v39 = vmul.f32 %v631_v23, %v9636_v0 }
 0x24a   :  { %v451_v2 = vmul.f32 %v9113_v59, %v450_v62 }
 0x24b   :  { %v678_v47 = vsel %vm55_vm0, %v669_v25, 0.0  ;;  %v657_v55 = vsel %vm55_vm0, %v647_v39, 0.0  ;;  %v691_v25 = vmul.f32 %v637_v16, %v9634_v63  ;;  %v640_v63 = vld [vmem:[#allocation3 + $0x10] sm:$0xf] }
 0x24c   :  { %554 = vperm.xlu2 %9048, %v549_v50   ;;  %v452_v4 = vadd.f32 %v9113_v59, %v451_v2 }
 0x24e   :  { %v456_v8 = vsel %vm455_vm10, %v9113_v59, %v452_v4 }
 0x24f   :  { %v461_v11 = vsel %vm458_vm11, %v460_v9, %v456_v8 }
 0x250   :  { %v9642_v6 = vpop.permute.xlu1 %605  ;;  %v9644_v10 = vpop.permute.xlu0 %547 }
 0x251   :  { %v648_v49 = vmul.f32 %v632_v27, %v9644_v10  ;;  %v671_v50 = vmul.f32 %v632_v27, %v9642_v6 }
 0x253   :  { %v659_v5 = vsel %vm55_vm0, %v648_v49, 0.0  ;;  %v682_v7 = vsel %vm55_vm0, %v671_v50, 0.0 }
 0x254   :  { %619 = vperm.xlu2 %9048, %v614_v51   ;;  %v633_v51 = vld [vmem:[#allocation2 + $0x14] sm:$0xf] }
 0x258   :  { %v9646_v15 = vpop.permute.xlu1 %561  ;;  %v9653_v22 = vpop.permute.xlu0 %612 }
 0x259   :  { %v672_v8 = vmul.f32 %v633_v51, %v9653_v22  ;;  %v650_v9 = vmul.f32 %v634_v52, %v9646_v15 }
 0x260   :  { %v9676_v40 = vpop.permute.xlu1 %626  ;;  %v9692_v62 = vpop.permute.xlu0 %568 }
 0x296   :  { %v491_v12 = vpop.permute.xlu2 %490 }
 0x297   :  { %v493_v42 = vmul.f32 %v491_v12, %v461_v11 }
 0x299   :  { %v494_v13 = vmul.f32 %v493_v42, %v80_v48  ;;  %v651_v42 = vmul.f32 %v635_v61, %v9692_v62 }
 0x29b   :  { %495 = vst.msk [vmem:[#allocation2] sm:$0xf] %vm55_vm0, %v494_v13  ;;  %v665_v39 = vsel %vm55_vm0, %v651_v42, 0.0 }
 0x29e   :  { %v9651_v18 = vpop.permute.xlu2 %598 }
 0x29f   :  { %v670_v43 = vmul.f32 %v631_v23, %v9651_v18  ;;  %v684_v23 = vsel %vm55_vm0, %v672_v8, 0.0 }
 0x2a1   :  { %v680_v57 = vsel %vm55_vm0, %v670_v43, 0.0 }
 0x2a2   :  { %v628_v19 = vld [vmem:[#allocation2] sm:$0xf] }
 0x2a3   :  { %v9657_v28 = vld [vmem:[#allocation2] sm:$0xf]  ;;  %v667_v30 = vmul.f32 %v628_v19, %v9632_v60  ;;  %v644_v31 = vmul.f32 %v628_v19, %v9628_v56 }
 0x2a4   :  { %v9663_v32 = vld [vmem:[#allocation2] sm:$0xf] }
 0x2a5   :  { %v9665_v33 = vld [vmem:[#allocation2] sm:$0xf]  ;;  %v675_v41 = vsel %vm55_vm0, %v667_v30, 0.0  ;;  %v652_v44 = vsel %vm55_vm0, %v644_v31, 0.0  ;;  %v714_v30 = vmul.f32 %v637_v16, %v9630_v58 }
 0x2a6   :  { %v9667_v34 = vld [vmem:[#allocation2] sm:$0xf]  ;;  %v677_v45 = vadd.f32 %v676_v26, %v675_v41  ;;  %v9683_v46 = vpop.permute.xlu2 %554  ;;  %v654_v48 = vadd.f32 %v653_v24, %v652_v44  ;;  %v663_v24 = vsel %vm55_vm0, %v650_v9, 0.0  ;;  %v674_v26 = vmul.f32 %v635_v61, %v9676_v40  ;;  %v638_v44 = vld [vmem:[#allocation3 + $0x8] sm:$0xf] }
 0x2a7   :  { %v9669_v36 = vld [vmem:[#allocation2] sm:$0xf]  ;;  %v649_v59 = vmul.f32 %v633_v51, %v9683_v46  ;;  %v722_v49 = vsel %vm55_vm0, %v714_v30, 0.0  ;;  %v692_v58 = vmul.f32 %v638_v44, %v9640_v3  ;;  %v715_v51 = vmul.f32 %v638_v44, %v9638_v1 }
 0x2a8   :  { %v9671_v37 = vld [vmem:[#allocation2] sm:$0xf]  ;;  %v679_v53 = vadd.f32 %v678_v47, %v677_v45  ;;  %v656_v54 = vadd.f32 %v655_v35, %v654_v48  ;;  %v688_v45 = vsel %vm55_vm0, %v674_v26, 0.0  ;;  %v639_v48 = vld [vmem:[#allocation3 + $0xc] sm:$0xf]  ;;  %v699_v47 = vsel %vm55_vm0, %v691_v25, 0.0 }
 0x2a9   :  { %13110 = vst [vmem:[#allocation8_spill] sm:$0xff] %v9671_v37  ;;  %v9673_v38 = vld [vmem:[#allocation2] sm:$0xf]  ;;  %v661_v13 = vsel %vm55_vm0, %v649_v59, 0.0  ;;  %v693_v1 = vmul.f32 %v639_v48, %v9636_v0  ;;  %v716_v3 = vmul.f32 %v639_v48, %v9651_v18  ;;  %v701_v8 = vsel %vm55_vm0, %v692_v58, 0.0 }
 0x2aa   :  { %13111 = vst [vmem:[#allocation9_spill] sm:$0xff] %v9673_v38  ;;  %v681_v2 = vadd.f32 %v680_v57, %v679_v53  ;;  %v658_v4 = vadd.f32 %v657_v55, %v656_v54  ;;  %v724_v9 = vsel %vm55_vm0, %v715_v51, 0.0  ;;  %v717_v0 = vmul.f32 %v640_v63, %v9642_v6  ;;  %v7966_v58 = vld [vmem:[%s13085_s6 + $0x40] sm:$0xf]  ;;  %v8850_v51 = vld [vmem:[%s13085_s6 + $0x44] sm:$0xf0] }
 0x2ab   :  { %4211 = vst.msk [vmem:[#allocation2] sm:$0xf] %vm55_vm0, %v13097_v20  ;;  %v726_v16 = vsel %vm55_vm0, %v716_v3, 0.0  ;;  %v7967_v3 = vor.u32 %v8850_v51, %v7966_v58 }
 0x2ac   :  { %v683_v11 = vadd.f32 %v682_v7, %v681_v2  ;;  %v660_v12 = vadd.f32 %v659_v5, %v658_v4  ;;  %v641_v4 = vld [vmem:[#allocation3 + $0x14] sm:$0xf] }
 0x2ad   :  { %v499_v14 = vpop.permute.xlu1 %498 }
 0x2ae   :  { %v662_v17 = vadd.f32 %v661_v13, %v660_v12  ;;  %501 = vst.msk [vmem:[#allocation3] sm:$0xf] %vm55_vm0, %v499_v14  ;;  %v620_v21 = vpop.permute.xlu2 %619  ;;  %v685_v29 = vadd.f32 %v684_v23, %v683_v11  ;;  %v694_v11 = vmul.f32 %v640_v63, %v9644_v10  ;;  %v642_v12 = vld [vmem:[#allocation3 + $0x18] sm:$0xf]  ;;  %v703_v13 = vsel %vm55_vm0, %v693_v1, 0.0 }
 0x2af   :  { %v673_v27 = vmul.f32 %v634_v52, %v620_v21  ;;  %v718_v14 = vmul.f32 %v641_v4, %v9653_v22  ;;  %v643_v23 = vld [vmem:[#allocation3 + $0x1c] sm:$0xf]  ;;  %v728_v10 = vsel %vm55_vm0, %v717_v0, 0.0  ;;  %v696_v6 = vmul.f32 %v642_v12, %v9646_v15  ;;  %v7968_v1 = vld [vmem:[%s13085_s6 + $0x48] sm:$0xf0] }
 0x2b0   :  { %v664_v19 = vadd.f32 %v663_v24, %v662_v17  ;;  %v695_v17 = vmul.f32 %v641_v4, %v9683_v46  ;;  %v697_v22 = vmul.f32 %v643_v23, %v9692_v62  ;;  %v8852_v62 = vld [vmem:[%s13085_s6 + $0x54] sm:$0xf0]  ;;  %v8846_v0 = vld [vmem:[%s13085_s6 + $0x24] sm:$0xf0] }
 0x2b1   :  { %v686_v31 = vsel %vm55_vm0, %v673_v27, 0.0  ;;  %v705_v27 = vsel %vm55_vm0, %v694_v11, 0.0  ;;  %v730_v30 = vsel %vm55_vm0, %v718_v14, 0.0  ;;  %v8848_v4 = vld [vmem:[%s13085_s6 + $0x34] sm:$0xf0] }
 0x2b2   :  { %v666_v41 = vadd.f32 %v665_v39, %v664_v19  ;;  %v687_v43 = vadd.f32 %v686_v31, %v685_v29  ;;  %v719_v19 = vmul.f32 %v642_v12, %v620_v21  ;;  %v720_v31 = vmul.f32 %v643_v23, %v9676_v40  ;;  %v7974_v40 = vld [vmem:[%s13085_s6 + $0x50] sm:$0xf]  ;;  %v7950_v11 = vld [vmem:[%s13085_s6 + $0x20] sm:$0xf]  ;;  %v8845_v12 = vld [vmem:[%s13085_s6 + $0x24] sm:$0xf] }
 0x2b3   :  { %v707_v46 = vsel %vm55_vm0, %v695_v17, 0.0  ;;  %v711_v21 = vsel %vm55_vm0, %v697_v22, 0.0  ;;  %v7975_v63 = vor.u32 %v8852_v62, %v7974_v40  ;;  %v7942_v14 = vld [vmem:[%s13085_s6 + $0x10] sm:$0xf]  ;;  %v8843_v17 = vld [vmem:[%s13085_s6 + $0x14] sm:$0xf] }
 0x2b4   :  { %737 = vrot.lane.b32.xlu2 %v666_v41, %s9343_s19  ;;  %v689_v35 = vadd.f32 %v688_v45, %v687_v43  ;;  %v709_v43 = vsel %vm55_vm0, %v696_v6, 0.0  ;;  %v732_v44 = vsel %vm55_vm0, %v719_v19, 0.0  ;;  %v734_v15 = vsel %vm55_vm0, %v720_v31, 0.0  ;;  %v8841_v6 = vld [vmem:[%s13085_s6 + $0x4] sm:$0xf] }
 0x2b5   :  { %v636_v50 = vld [vmem:[#allocation3] sm:$0xf]  ;;  %830 = vmatpush.bf16.msra.mxu2 %v7975_v63 }
 0x2b6   :  { %741 = vrot.lane.b32.xlu0 %v689_v35, %s9342_s18  ;;  %v713_v52 = vmul.f32 %v636_v50, %v9632_v60  ;;  %v690_v53 = vmul.f32 %v636_v50, %v9628_v56  ;;  %v9717_v54 = vld [vmem:[#allocation3] sm:$0xf]  ;;  %v7976_v50 = vld [vmem:[%s13085_s6 + $0x58] sm:$0xf0] }
 0x2b7   :  { %v9719_v55 = vld [vmem:[#allocation3] sm:$0xf] }
 0x2b8   :  { %v9721_v57 = vld [vmem:[#allocation3] sm:$0xf]  ;;  %v721_v60 = vsel %vm55_vm0, %v713_v52, 0.0  ;;  %v698_v56 = vsel %vm55_vm0, %v690_v53, 0.0  ;;  %v8849_v53 = vld [vmem:[%s13085_s6 + $0x44] sm:$0xf] }
 0x2b9   :  { %v9723_v59 = vld [vmem:[#allocation3] sm:$0xf]  ;;  %v723_v5 = vadd.f32 %v722_v49, %v721_v60  ;;  %v700_v7 = vadd.f32 %v699_v47, %v698_v56  ;;  %v8851_v49 = vld [vmem:[%s13085_s6 + $0x54] sm:$0xf]  ;;  %v7971_v60 = vor.u32 %v8849_v53, %v7968_v1  ;;  %v7958_v56 = vld [vmem:[%s13085_s6 + $0x30] sm:$0xf]  ;;  %831 = vmatpush.bf16.msra.mxu2 %v7967_v3 }
 0x2ba   :  { %v9725_v61 = vld [vmem:[#allocation3] sm:$0xf]  ;;  %v7979_v52 = vor.u32 %v8851_v49, %v7976_v50  ;;  %v9847_v49 = vld [vmem:[%s13081_s2 + $0x10] sm:$0xff] }
 0x2bb   :  { %v9727_v2 = vld [vmem:[#allocation3] sm:$0xf]  ;;  %v725_v18 = vadd.f32 %v724_v9, %v723_v5  ;;  %v702_v42 = vadd.f32 %v701_v8, %v700_v7  ;;  %v8847_v5 = vld [vmem:[%s13085_s6 + $0x34] sm:$0xf]  ;;  %v7960_v7 = vld [vmem:[%s13085_s6 + $0x38] sm:$0xf0]  ;;  %v7959_v8 = vor.u32 %v8848_v4, %v7958_v56 }
 0x2bc   :  { %13112 = vst [vmem:[#allocation10_spill] sm:$0xff] %v9727_v2  ;;  %843 = vmatpush.bf16.msra.mxu3 %v7979_v52  ;;  %v7963_v9 = vor.u32 %v8847_v5, %v7960_v7  ;;  %v953_v50 = vperm.slane %v9847_v49, 1  ;;  %v960_v52 = vperm.slane %v9847_v49, 2 }
 0x2bd   :  { %4219 = vst.msk [vmem:[#allocation3] sm:$0xf] %vm55_vm0, %v13097_v20  ;;  %v727_v24 = vadd.f32 %v726_v16, %v725_v18  ;;  %v704_v26 = vadd.f32 %v703_v13, %v702_v42  ;;  %v7952_v18 = vld [vmem:[%s13085_s6 + $0x28] sm:$0xf0]  ;;  %832 = vmatpush.bf16.msra.mxu2 %v7959_v8  ;;  %v7951_v42 = vor.u32 %v8846_v0, %v7950_v11  ;;  %v8844_v16 = vld [vmem:[%s13085_s6 + $0x14] sm:$0xf0] }
 0x2be   :  { %v7955_v13 = vor.u32 %v8845_v12, %v7952_v18  ;;  %v7943_v23 = vor.u32 %v8844_v16, %v7942_v14  ;;  %v946_v12 = vperm.slane %v9847_v49, 0  ;;  %v9080_v18 = vld [vmem:[%s13080_s1 + $0x1] ss:$0 sm:$0xff]  ;;  %v967_v16 = vperm.slane %v9847_v49, 3 }
 0x2bf   :  { %v729_v29 = vadd.f32 %v728_v10, %v727_v24  ;;  %v706_v25 = vadd.f32 %v705_v27, %v704_v26  ;;  %v7944_v24 = vld [vmem:[%s13085_s6 + $0x18] sm:$0xf0]  ;;  %v7934_v27 = vld [vmem:[%s13085_s6] sm:$0xf]  ;;  %v8842_v10 = vld [vmem:[%s13085_s6 + $0x4] sm:$0xf0] }
 0x2c0   :  { %844 = vmatpush.bf16.msra.mxu3 %v7971_v60  ;;  %v7947_v26 = vor.u32 %v8843_v17, %v7944_v24  ;;  %v7935_v19 = vor.u32 %v8842_v10, %v7934_v27  ;;  %v974_v24 = vperm.slane %v9847_v49, 4 }
 0x2c1   :  { %v731_v39 = vadd.f32 %v730_v30, %v729_v29  ;;  %v708_v41 = vadd.f32 %v707_v46, %v706_v25  ;;  %833 = vmatpush.bf16.msra.mxu2 %v7951_v42  ;;  %v7936_v29 = vld [vmem:[%s13085_s6 + $0x8] sm:$0xf0]  ;;  %v7929_v30 = vld [vmem:[%s13109_s27 + $0x4] sm:$0xf]  ;;  %v7986_v42 = vld [vmem:[%s13082_s3 + $0x10] sm:$0xff] }
 0x2c2   :  { %v7939_v25 = vor.u32 %v8841_v6, %v7936_v29  ;;  %v1004_v14 = vperm.slane %v7986_v42, 0  ;;  %v1018_v17 = vperm.slane %v7986_v42, 2  ;;  %v1039_v27 = vperm.slane %v7986_v42, 5 }
 0x2c3   :  { %v733_v45 = vadd.f32 %v732_v44, %v731_v39  ;;  %v710_v48 = vadd.f32 %v709_v43, %v708_v41  ;;  %v9838_v43 = vld [vmem:[%s13086_s7] sm:$0x3]  ;;  %v1053_v10 = vperm.slane %v7986_v42, 7  ;;  %v995_v6 = vperm.slane %v9847_v49, 7 }
 0x2c4   :  { %845 = vmatpush.bf16.msra.mxu3 %v7963_v9  ;;  %v761_v44 = vperm.slane %v9838_v43, 0 }
 0x2c5   :  { %v735_v35 = vadd.f32 %v734_v15, %v733_v45  ;;  %v712_v47 = vadd.f32 %v711_v21, %v710_v48  ;;  %834 = vmatpush.bf16.msra.mxu2 %v7943_v23  ;;  %v1032_v23 = vperm.slane %v7986_v42, 4 }
 0x2c7   :  { %909 = vrot.lane.b32.xlu0 %v735_v35, %s9344_s20  ;;  %899 = vrot.lane.b32.xlu2 %v712_v47, %s9342_s18 }
 0x2c8   :  { %846 = vmatpush.bf16.msra.mxu3 %v7955_v13  ;;  %v1011_v13 = vperm.slane %v7986_v42, 1 }
 0x2c9   :  { %835 = vmatpush.bf16.msra.mxu2 %v7935_v19 }
 0x2cc   :  { %847 = vmatpush.bf16.msra.mxu3 %v7947_v26  ;;  %v988_v26 = vperm.slane %v9847_v49, 6 }
 0x2d0   :  { %848 = vmatpush.bf16.msra.mxu3 %v7939_v25 }
 0x30e   :  { %v738_v22 = vpop.permute.xlu2 %737 }
 0x30f   :  { %v744_v31 = vsel %vm311_vm1, %v7929_v30, %v738_v22 }
 0x321   :  { %v900_v7 = vpop.permute.xlu2 %899 }
 0x328   :  { %v742_v46 = vpop.permute.xlu0 %741 }
 0x329   :  { %v745_v39 = vsel %vm313_vm2, %v744_v31, %v742_v46 }
 0x32a   :  { %v746_v41 = vpack.c.bf16 %v745_v39, %v745_v39 }
 0x32c   :  { %7980 = vmatmul.msk.bf16.vlgmr.msra.gmra.mxu2 %vm394_vm3, %v746_v41  ;;  %7981 = vmatmul.msk.bf16.vlgmr.msra.gmra.mxu3 %vm394_vm3, %v746_v41 }
 0x339   :  { %v910_v8 = vpop.permute.xlu0 %909 }
 0x3af   :  { %v837_v45 = vpop.f32.mrf.mxu2  ;;  %v9841_v48 = vpop.f32.mrf.mxu3 }
 0x3b0   :  { %v838_v15 = vadd.f32 %v837_v45, %v761_v44  ;;  %v1025_v44 = vperm.slane %v7986_v42, 3  ;;  %v981_v45 = vperm.slane %v9847_v49, 5 }
 0x3b2   :  { %9114 = vtanh.f32 %v838_v15  ;;  %v7982_v21 = vmul.f32 -1.442695, %v838_v15  ;;  %v1046_v15 = vperm.slane %v7986_v42, 6 }
 0x3b4   :  { %9116 = vpow2.f32 %v7982_v21 }
 0x3b7   :  { %v839_v35 = vpop.f32.mrf.mxu2  ;;  %v852_v47 = vpop.f32.mrf.mxu3 }
 0x3b8   :  { %v9115_v40 = vpop.eup %9114  ;;  %v762_v35 = vperm.slane %v9838_v43, 1 }
 0x3b9   :  { %894 = vrot.lane.b32.xlu1 %v9115_v40, %s9343_s19 }
 0x3ba   :  { %v9117_v62 = vpop.eup %9116  ;;  %v851_v40 = vadd.f32 %v9841_v48, %v762_v35  ;;  %v1064_v35 = vld [vmem:[#allocation2 + $0x10] sm:$0xf] }
 0x3bb   :  { %v858_v63 = vadd.f32 1.0, %v9117_v62 }
 0x3bc   :  { %v7983_v62 = vmul.f32 -1.442695, %v851_v40  ;;  %v1063_v40 = vld [vmem:[#allocation2 + $0xc] sm:$0xf] }
 0x3bd   :  { %9118 = vrcp.f32 %v858_v63  ;;  %v870_v1 = vand.u32 2147483648, %v858_v63  ;;  %v868_v60 = vand.u32 2147483647, %v858_v63  ;;  %vm864_vm13 = vweird.f32 %v858_v63 }
 0x3bf   :  { %v871_v4 = vor.u32 1.1754944e-38, %v870_v1  ;;  %vm869_vm15 = vcmp.eq.f32.partialorder %v868_v60, 8.507059e+37 }
 0x3c1   :  { %958 = vperm.xlu1 %9047, %v953_v50  }
 0x3c3   :  { %v9119_v58 = vpop.eup %9118 }
 0x3c4   :  { %v860_v51 = vmul.f32 %v9119_v58, %v858_v63  ;;  %vm865_vm12 = vweird.f32 %v9119_v58 }
 0x3c5   :  { %vm866_vm14 = vmor %vm864_vm13, %vm865_vm12 }
 0x3c6   :  { %v861_v53 = vsub.f32 1.0, %v860_v51 }
 0x3c8   :  { %v862_v3 = vmul.f32 %v9119_v58, %v861_v53 }
 0x3c9   :  { %965 = vperm.xlu1 %9047, %v960_v52  }
 0x3ca   :  { %v863_v56 = vadd.f32 %v9119_v58, %v862_v3 }
 0x3cc   :  { %v867_v5 = vsel %vm866_vm14, %v9119_v58, %v863_v56 }
 0x3cd   :  { %v872_v9 = vsel %vm869_vm15, %v871_v4, %v867_v5 }
 0x3ce   :  { %v912_v11 = vmul.f32 %v910_v8, %v872_v9  ;;  %v902_v0 = vmul.f32 %v900_v7, %v872_v9 }
 0x3d0   :  { %914 = vrot.lane.b32.xlu0 %v912_v11, %s9342_s18  ;;  %904 = vrot.lane.b32.xlu2 %v902_v0, %s9344_s20 }
 0x3d8   :  { %951 = vperm.xlu0 %9046, %v946_v12   ;;  %510 = vperm.xlu2 %9048, %v9080_v18  }
 0x3e0   :  { %1016 = vperm.xlu0 %9046, %v1011_v13   ;;  %1009 = vperm.xlu2 %9048, %v1004_v14   ;;  %v1062_v14 = vld [vmem:[#allocation2 + $0x8] sm:$0xf] }
 0x3e8   :  { %972 = vperm.xlu0 %9046, %v967_v16   ;;  %1023 = vperm.xlu2 %9048, %v1018_v17   ;;  %v1070_v16 = vld [vmem:[#allocation3 + $0x8] sm:$0xf] }
 0x3f0   :  { %1037 = vperm.xlu0 %9046, %v1032_v23   ;;  %979 = vperm.xlu2 %9048, %v974_v24  }
 0x3f8   :  { %993 = vperm.xlu0 %9046, %v988_v26   ;;  %1044 = vperm.xlu2 %9048, %v1039_v27  }
 0x400   :  { %1058 = vperm.xlu0 %9046, %v1053_v10   ;;  %1000 = vperm.xlu2 %9048, %v995_v6  }
 0x42a   :  { %v905_v19 = vpop.permute.xlu2 %904 }
 0x42b   :  { %v895_v29 = vpop.permute.xlu1 %894 }
 0x42c   :  { %v897_v25 = vmul.f32 %v895_v29, %v872_v9 }
 0x42e   :  { %v907_v30 = vadd.f32 %v905_v19, %v897_v25 }
 0x432   :  { %v511_v46 = vpop.permute.xlu2 %510 }
 0x433   :  { %v959_v3 = vpop.permute.xlu1 %958 }
 0x43a   :  { %v1010_v53 = vpop.permute.xlu2 %1009 }
 0x43b   :  { %v966_v4 = vpop.permute.xlu1 %965  ;;  %v1099_v19 = vmul.f32 %v9657_v28, %v1010_v53  ;;  %v1145_v29 = vmul.f32 %v9717_v54, %v1010_v53 }
 0x43c   :  { %v1078_v25 = vmul.f32 %v1062_v14, %v966_v4 }
 0x442   :  { %v915_v22 = vpop.permute.xlu0 %914  ;;  %v1024_v56 = vpop.permute.xlu2 %1023 }
 0x443   :  { %v917_v31 = vadd.f32 %v915_v22, %v907_v30  ;;  %v1124_v30 = vmul.f32 %v1070_v16, %v966_v4  ;;  %v1147_v4 = vmul.f32 %v1070_v16, %v1024_v56 }
 0x445   :  { %9120 = vtanh.f32 %v917_v31  ;;  %v927_v39 = vmul.f32 %v917_v31, %v511_v46  ;;  %v1101_v31 = vmul.f32 %v1062_v14, %v1024_v56 }
 0x446   :  { %9122 = vpow2.f32 %v7983_v62  ;;  %v1153_v62 = vsel %vm55_vm0, %v1145_v29, 0.0 }
 0x447   :  { %929 = vrot.lane.b32.xlu0 %v927_v39, %s9344_s20 }
 0x44a   :  { %v952_v21 = vpop.permute.xlu0 %951  ;;  %v9880_v12 = vpop.permute.xlu2 %979 }
 0x44b   :  { %v9121_v41 = vpop.eup %9120  ;;  %v1122_v39 = vmul.f32 %v9717_v54, %v952_v21  ;;  %v1110_v54 = vsel %vm55_vm0, %v1101_v31, 0.0 }
 0x44c   :  { %920 = vrot.lane.b32.xlu1 %v9121_v41, %s9344_s20  ;;  %v9123_v50 = vpop.eup %9122 }
 0x44d   :  { %v877_v51 = vadd.f32 1.0, %v9123_v50  ;;  %v1087_v50 = vsel %vm55_vm0, %v1078_v25, 0.0  ;;  %v1130_v53 = vsel %vm55_vm0, %v1122_v39, 0.0 }
 0x44f   :  { %9124 = vrcp.f32 %v877_v51  ;;  %v889_v7 = vand.u32 2147483648, %v877_v51  ;;  %vm883_vm5 = vweird.f32 %v877_v51  ;;  %v887_v9 = vand.u32 2147483647, %v877_v51 }
 0x451   :  { %v890_v0 = vor.u32 1.1754944e-38, %v889_v7  ;;  %vm888_vm7 = vcmp.eq.f32.partialorder %v887_v9, 8.507059e+37 }
 0x452   :  { %v9868_v47 = vpop.permute.xlu0 %1016 }
 0x454   :  { %1030 = vperm.xlu1 %9047, %v1025_v44  }
 0x455   :  { %v9125_v52 = vpop.eup %9124 }
 0x456   :  { %v879_v1 = vmul.f32 %v9125_v52, %v877_v51  ;;  %vm884_vm4 = vweird.f32 %v9125_v52  ;;  %v1133_v51 = vsel %vm55_vm0, %v1124_v30, 0.0 }
 0x457   :  { %vm885_vm6 = vmor %vm883_vm5, %vm884_vm4 }
 0x458   :  { %v880_v43 = vsub.f32 1.0, %v879_v1  ;;  %v1072_v1 = vld [vmem:[#allocation3 + $0x10] sm:$0xf] }
 0x459   :  { %v1126_v31 = vmul.f32 %v1072_v1, %v9880_v12 }
 0x45a   :  { %v9871_v63 = vpop.permute.xlu0 %972  ;;  %v881_v48 = vmul.f32 %v9125_v52, %v880_v43 }
 0x45b   :  { %v1079_v56 = vmul.f32 %v1063_v40, %v9871_v63 }
 0x45c   :  { %986 = vperm.xlu1 %9047, %v981_v45   ;;  %v882_v5 = vadd.f32 %v9125_v52, %v881_v48  ;;  %v9900_v45 = vpop.permute.xlu2 %1044 }
 0x45e   :  { %v886_v11 = vsel %vm885_vm6, %v9125_v52, %v882_v5  ;;  %v1071_v52 = vld [vmem:[#allocation3 + $0xc] sm:$0xf] }
 0x45f   :  { %v891_v18 = vsel %vm888_vm7, %v890_v0, %v886_v11  ;;  %v1080_v0 = vmul.f32 %v1064_v35, %v9880_v12 }
 0x462   :  { %v9873_v58 = vpop.permute.xlu0 %1037 }
 0x464   :  { %1051 = vperm.xlu1 %9047, %v1046_v15   ;;  %v1107_v15 = vsel %vm55_vm0, %v1099_v19, 0.0 }
 0x46a   :  { %v9875_v49 = vpop.permute.xlu0 %993 }
 0x472   :  { %v9877_v60 = vpop.permute.xlu0 %1058 }
 0x4b9   :  { %v930_v8 = vpop.permute.xlu0 %929 }
 0x4ba   :  { %933 = vst.msk [vmem:[#allocation3 + $0x4] sm:$0xf] %vm55_vm0, %v930_v8 }
 0x4be   :  { %v921_v42 = vpop.permute.xlu1 %920 }
 0x4bf   :  { %v923_v13 = vmul.f32 %v921_v42, %v891_v18 }
 0x4c1   :  { %v924_v17 = vmul.f32 %v923_v13, %v511_v46  ;;  %v1069_v23 = vld [vmem:[#allocation3 + $0x4] sm:$0xf]  ;;  %v1076_v46 = vmul.f32 %v9657_v28, %v952_v21 }
 0x4c2   :  { %v9882_v24 = vld [vmem:[#allocation3 + $0x4] sm:$0xf]  ;;  %v1123_v22 = vmul.f32 %v1069_v23, %v959_v3  ;;  %v1146_v41 = vmul.f32 %v1069_v23, %v9868_v47  ;;  %v1125_v23 = vmul.f32 %v1071_v52, %v9871_v63  ;;  %v1089_v63 = vsel %vm55_vm0, %v1079_v56, 0.0 }
 0x4c3   :  { %v9884_v26 = vld [vmem:[#allocation3 + $0x4] sm:$0xf]  ;;  %926 = vst.msk [vmem:[#allocation2 + $0x4] sm:$0xf] %vm55_vm0, %v924_v17  ;;  %v1084_v21 = vsel %vm55_vm0, %v1076_v46, 0.0  ;;  %v1103_v46 = vmul.f32 %v1064_v35, %v9873_v58 }
 0x4c4   :  { %v9886_v27 = vld [vmem:[#allocation3 + $0x4] sm:$0xf]  ;;  %v1131_v28 = vsel %vm55_vm0, %v1123_v22, 0.0  ;;  %v1154_v48 = vsel %vm55_vm0, %v1146_v41, 0.0  ;;  %v1065_v17 = vld [vmem:[#allocation2 + $0x14] sm:$0xf] }
 0x4c5   :  { %v9889_v10 = vld [vmem:[#allocation3 + $0x4] sm:$0xf]  ;;  %v1132_v18 = vadd.f32 %v1131_v28, %v1130_v53  ;;  %v1155_v29 = vadd.f32 %v1154_v48, %v1153_v62  ;;  %v1156_v22 = vsel %vm55_vm0, %v1147_v4, 0.0  ;;  %v1091_v41 = vsel %vm55_vm0, %v1080_v0, 0.0  ;;  %v1001_v62 = vpop.permute.xlu2 %1000  ;;  %v1073_v4 = vld [vmem:[#allocation3 + $0x14] sm:$0xf] }
 0x4c6   :  { %v9891_v6 = vld [vmem:[#allocation3 + $0x4] sm:$0xf]  ;;  %v1031_v44 = vpop.permute.xlu1 %1030  ;;  %v1135_v12 = vsel %vm55_vm0, %v1125_v23, 0.0 }
 0x4c7   :  { %13113 = vst [vmem:[#allocation11_spill] sm:$0xff] %v9891_v6  ;;  %v1148_v39 = vmul.f32 %v1071_v52, %v1031_v44  ;;  %v1157_v35 = vadd.f32 %v1156_v22, %v1155_v29  ;;  %v1074_v29 = vld [vmem:[#allocation3 + $0x18] sm:$0xf] }
 0x4c8   :  { %4220 = vst.msk [vmem:[#allocation3 + $0x4] sm:$0xf] %vm55_vm0, %v13097_v20 }
 0x4ca   :  { %v1061_v43 = vld [vmem:[#allocation2 + $0x4] sm:$0xf] }
 0x4cb   :  { %v1100_v5 = vmul.f32 %v1061_v43, %v9868_v47  ;;  %v1077_v7 = vmul.f32 %v1061_v43, %v959_v3  ;;  %v9912_v8 = vld [vmem:[#allocation2 + $0x4] sm:$0xf]  ;;  %v1102_v3 = vmul.f32 %v1063_v40, %v1031_v44  ;;  %v1066_v40 = vld [vmem:[#allocation2 + $0x18] sm:$0xf]  ;;  %v1134_v43 = vadd.f32 %v1133_v51, %v1132_v18 }
 0x4cc   :  { %v9914_v9 = vld [vmem:[#allocation2 + $0x4] sm:$0xf]  ;;  %v1158_v51 = vsel %vm55_vm0, %v1148_v39, 0.0 }
 0x4cd   :  { %v9916_v11 = vld [vmem:[#allocation2 + $0x4] sm:$0xf]  ;;  %v1108_v47 = vsel %vm55_vm0, %v1100_v5, 0.0  ;;  %v1085_v16 = vsel %vm55_vm0, %v1077_v7, 0.0  ;;  %v1104_v5 = vmul.f32 %v1065_v17, %v9900_v45  ;;  %v1114_v7 = vsel %vm55_vm0, %v1103_v46, 0.0 }
 0x4ce   :  { %v9919_v42 = vld [vmem:[#allocation2 + $0x4] sm:$0xf]  ;;  %v1109_v19 = vadd.f32 %v1108_v47, %v1107_v15  ;;  %v1086_v25 = vadd.f32 %v1085_v16, %v1084_v21  ;;  %v987_v30 = vpop.permute.xlu1 %986  ;;  %v1067_v15 = vld [vmem:[#allocation2 + $0x1c] sm:$0xf]  ;;  %v1112_v21 = vsel %vm55_vm0, %v1102_v3, 0.0  ;;  %v1136_v47 = vadd.f32 %v1135_v12, %v1134_v43 }
 0x4cf   :  { %v9921_v13 = vld [vmem:[#allocation2 + $0x4] sm:$0xf]  ;;  %v1081_v48 = vmul.f32 %v1065_v17, %v987_v30  ;;  %v1083_v0 = vmul.f32 %v1067_v15, %v1001_v62  ;;  %v1137_v3 = vsel %vm55_vm0, %v1126_v31, 0.0  ;;  %v1149_v16 = vmul.f32 %v1072_v1, %v9873_v58 }
 0x4d0   :  { %13114 = vst [vmem:[#allocation12_spill] sm:$0xff] %v9921_v13  ;;  %v9923_v14 = vld [vmem:[#allocation2 + $0x4] sm:$0xf]  ;;  %v1111_v28 = vadd.f32 %v1110_v54, %v1109_v19  ;;  %v1088_v53 = vadd.f32 %v1087_v50, %v1086_v25  ;;  %v1082_v50 = vmul.f32 %v1066_v40, %v9875_v49  ;;  %v1127_v54 = vmul.f32 %v1073_v4, %v987_v30  ;;  %v1506_v13 = vld [vmem:[#allocation3 + $0x18] sm:$0xf] }
 0x4d1   :  { %13115 = vst [vmem:[#allocation13_spill] sm:$0xff] %v9923_v14  ;;  %v1093_v17 = vsel %vm55_vm0, %v1081_v48, 0.0  ;;  %v1116_v23 = vsel %vm55_vm0, %v1104_v5, 0.0  ;;  %v1150_v19 = vmul.f32 %v1073_v4, %v9900_v45  ;;  %v1159_v25 = vadd.f32 %v1158_v51, %v1157_v35 }
 0x4d2   :  { %4212 = vst.msk [vmem:[#allocation2 + $0x4] sm:$0xf] %vm55_vm0, %v13097_v20  ;;  %v1113_v44 = vadd.f32 %v1112_v21, %v1111_v28  ;;  %v1090_v52 = vadd.f32 %v1089_v63, %v1088_v53  ;;  %v1095_v30 = vsel %vm55_vm0, %v1082_v50, 0.0  ;;  %v1106_v39 = vmul.f32 %v1067_v15, %v9877_v60  ;;  %v1075_v21 = vld [vmem:[#allocation3 + $0x1c] sm:$0xf] }
 0x4d3   :  { %v1138_v31 = vadd.f32 %v1137_v3, %v1136_v47  ;;  %v1097_v58 = vsel %vm55_vm0, %v1083_v0, 0.0  ;;  %v1160_v43 = vsel %vm55_vm0, %v1149_v16, 0.0  ;;  %v1128_v45 = vmul.f32 %v1074_v29, %v9875_v49  ;;  %v8864_v16 = vld [vmem:[%s13085_s6 + $0x54] sm:$0xf0] }
 0x4d4   :  { %v1115_v18 = vadd.f32 %v1114_v7, %v1113_v44  ;;  %v1092_v56 = vadd.f32 %v1091_v41, %v1090_v52  ;;  %v1139_v41 = vsel %vm55_vm0, %v1127_v54, 0.0  ;;  %v1161_v48 = vadd.f32 %v1160_v43, %v1159_v25  ;;  %v8858_v43 = vld [vmem:[%s13085_s6 + $0x24] sm:$0xf0] }
 0x4d5   :  { %v1140_v4 = vadd.f32 %v1139_v41, %v1138_v31  ;;  %v1120_v35 = vsel %vm55_vm0, %v1106_v39, 0.0  ;;  %v1162_v44 = vsel %vm55_vm0, %v1150_v19, 0.0  ;;  %v1129_v52 = vmul.f32 %v1075_v21, %v1001_v62  ;;  %v8029_v62 = vld [vmem:[%s13085_s6 + $0x50] sm:$0xf]  ;;  %v8021_v19 = vld [vmem:[%s13085_s6 + $0x40] sm:$0xf] }
 0x4d6   :  { %v1094_v22 = vadd.f32 %v1093_v17, %v1092_v56  ;;  %v1052_v46 = vpop.permute.xlu1 %1051  ;;  %v1117_v1 = vadd.f32 %v1116_v23, %v1115_v18  ;;  %v1141_v7 = vsel %vm55_vm0, %v1128_v45, 0.0  ;;  %v1163_v51 = vadd.f32 %v1162_v44, %v1161_v48  ;;  %v8031_v23 = vld [vmem:[%s13085_s6 + $0x58] sm:$0xf0]  ;;  %v8013_v41 = vld [vmem:[%s13085_s6 + $0x30] sm:$0xf] }
 0x4d7   :  { %v1105_v28 = vmul.f32 %v1066_v40, %v1052_v46  ;;  %v1151_v63 = vmul.f32 %v1074_v29, %v1052_v46  ;;  %v1142_v50 = vadd.f32 %v1141_v7, %v1140_v4  ;;  %v1152_v54 = vmul.f32 %v1075_v21, %v9877_v60  ;;  %v8863_v60 = vld [vmem:[%s13085_s6 + $0x54] sm:$0xf]  ;;  %v8862_v29 = vld [vmem:[%s13085_s6 + $0x44] sm:$0xf0]  ;;  %v8023_v46 = vld [vmem:[%s13085_s6 + $0x48] sm:$0xf0] }
 0x4d8   :  { %v1096_v53 = vadd.f32 %v1095_v30, %v1094_v22  ;;  %v1143_v18 = vsel %vm55_vm0, %v1129_v52, 0.0  ;;  %v8030_v17 = vor.u32 %v8864_v16, %v8029_v62  ;;  %v8034_v25 = vor.u32 %v8863_v60, %v8031_v23  ;;  %v8861_v22 = vld [vmem:[%s13085_s6 + $0x44] sm:$0xf]  ;;  %v8859_v31 = vld [vmem:[%s13085_s6 + $0x34] sm:$0xf] }
 0x4d9   :  { %v1118_v5 = vsel %vm55_vm0, %v1105_v28, 0.0  ;;  %v1164_v49 = vsel %vm55_vm0, %v1151_v63, 0.0  ;;  %v1144_v56 = vadd.f32 %v1143_v18, %v1142_v50  ;;  %v1166_v47 = vsel %vm55_vm0, %v1152_v54, 0.0  ;;  %v8860_v28 = vld [vmem:[%s13085_s6 + $0x34] sm:$0xf0] }
 0x4da   :  { %v1098_v12 = vadd.f32 %v1097_v58, %v1096_v53  ;;  %v1119_v15 = vadd.f32 %v1118_v5, %v1117_v1  ;;  %v1165_v0 = vadd.f32 %v1164_v49, %v1163_v51  ;;  %1262 = vmatpush.bf16.msrb.mxu0 %v8030_v17  ;;  %v8022_v30 = vor.u32 %v8862_v29, %v8021_v19  ;;  %v8015_v58 = vld [vmem:[%s13085_s6 + $0x38] sm:$0xf0]  ;;  %v8005_v1 = vld [vmem:[%s13085_s6 + $0x20] sm:$0xf]  ;;  %v8857_v5 = vld [vmem:[%s13085_s6 + $0x24] sm:$0xf] }
 0x4db   :  { %1275 = vmatpush.bf16.msrb.mxu1 %v8034_v25  ;;  %v8026_v39 = vor.u32 %v8861_v22, %v8023_v46  ;;  %v8014_v53 = vor.u32 %v8860_v28, %v8013_v41  ;;  %v8018_v45 = vor.u32 %v8859_v31, %v8015_v58  ;;  %v8007_v63 = vld [vmem:[%s13085_s6 + $0x28] sm:$0xf0]  ;;  %v8006_v21 = vor.u32 %v8858_v43, %v8005_v1  ;;  %v7997_v4 = vld [vmem:[%s13085_s6 + $0x10] sm:$0xf]  ;;  %v7989_v52 = vld [vmem:[%s13085_s6] sm:$0xf] }
 0x4dc   :  { %1169 = vrot.lane.b32.xlu1 %v1098_v12, %s9343_s19  ;;  %v1121_v40 = vadd.f32 %v1120_v35, %v1119_v15  ;;  %v1167_v3 = vadd.f32 %v1166_v47, %v1165_v0  ;;  %v8010_v48 = vor.u32 %v8857_v5, %v8007_v63  ;;  %v8856_v12 = vld [vmem:[%s13085_s6 + $0x14] sm:$0xf0]  ;;  %v8855_v15 = vld [vmem:[%s13085_s6 + $0x14] sm:$0xf]  ;;  %v7999_v35 = vld [vmem:[%s13085_s6 + $0x18] sm:$0xf0] }
 0x4dd   :  { %v8002_v44 = vor.u32 %v8855_v15, %v7999_v35  ;;  %v8854_v7 = vld [vmem:[%s13085_s6 + $0x4] sm:$0xf0]  ;;  %v8853_v49 = vld [vmem:[%s13085_s6 + $0x4] sm:$0xf]  ;;  %v7991_v51 = vld [vmem:[%s13085_s6 + $0x8] sm:$0xf0] }
 0x4de   :  { %1173 = vrot.lane.b32.xlu2 %v1121_v40, %s9342_s18  ;;  %1263 = vmatpush.bf16.msrb.mxu0 %v8022_v30  ;;  %v7998_v40 = vor.u32 %v8856_v12, %v7997_v4  ;;  %v7990_v50 = vor.u32 %v8854_v7, %v7989_v52  ;;  %v7994_v54 = vor.u32 %v8853_v49, %v7991_v51  ;;  %v7984_v0 = vld [vmem:[%s13109_s27 + $0x8] sm:$0xf]  ;;  %v10047_v16 = vld [vmem:[%s13086_s7] sm:$0x3]  ;;  %v9081_v52 = vld [vmem:[%s13080_s1 + $0x2] ss:$0 sm:$0xff] }
 0x4df   :  { %1276 = vmatpush.bf16.msrb.mxu1 %v8026_v39  ;;  %v1193_v60 = vperm.slane %v10047_v16, 0  ;;  %v10056_v39 = vld [vmem:[%s13081_s2 + $0x18] sm:$0xff] }
 0x4e0   :  { %v1385_v28 = vperm.slane %v10056_v39, 1  ;;  %v1392_v58 = vperm.slane %v10056_v39, 2  ;;  %v8041_v7 = vld [vmem:[%s13082_s3 + $0x18] sm:$0xff]  ;;  %v1399_v51 = vperm.slane %v10056_v39, 3 }
 0x4e1   :  { %v1443_v49 = vperm.slane %v8041_v7, 1 }
 0x4e2   :  { %1264 = vmatpush.bf16.msrb.mxu0 %v8014_v53 }
 0x4e3   :  { %1277 = vmatpush.bf16.msrb.mxu1 %v8018_v45 }
 0x4e4   :  { %1331 = vrot.lane.b32.xlu1 %v1144_v56, %s9342_s18 }
 0x4e6   :  { %1341 = vrot.lane.b32.xlu2 %v1167_v3, %s9344_s20  ;;  %1265 = vmatpush.bf16.msrb.mxu0 %v8006_v21 }
 0x4e7   :  { %1278 = vmatpush.bf16.msrb.mxu1 %v8010_v48 }
 0x4ea   :  { %1266 = vmatpush.bf16.msrb.mxu0 %v7998_v40 }
 0x4eb   :  { %1279 = vmatpush.bf16.msrb.mxu1 %v8002_v44  ;;  %v1378_v44 = vperm.slane %v10056_v39, 0 }
 0x4ee   :  { %1267 = vmatpush.bf16.msrb.mxu0 %v7990_v50  ;;  %v1436_v50 = vperm.slane %v8041_v7, 0 }
 0x4ef   :  { %1280 = vmatpush.bf16.msrb.mxu1 %v7994_v54  ;;  %v1450_v54 = vperm.slane %v8041_v7, 2 }
 0x538   :  { %v1174_v56 = vpop.permute.xlu2 %1173 }
 0x540   :  { %v1342_v4 = vpop.permute.xlu2 %1341 }
 0x54e   :  { %v1170_v18 = vpop.permute.xlu1 %1169 }
 0x54f   :  { %v1176_v47 = vsel %vm311_vm1, %v7984_v0, %v1170_v18  ;;  %v1464_v0 = vperm.slane %v8041_v7, 4  ;;  %v1406_v18 = vperm.slane %v10056_v39, 4 }
 0x550   :  { %v1177_v3 = vsel %vm313_vm2, %v1176_v47, %v1174_v56  ;;  %v1420_v56 = vperm.slane %v10056_v39, 6  ;;  %v1471_v47 = vperm.slane %v8041_v7, 5 }
 0x551   :  { %v1178_v62 = vpack.c.bf16 %v1177_v3, %v1177_v3  ;;  %v1485_v3 = vperm.slane %v8041_v7, 7 }
 0x553   :  { %8035 = vmatmul.msk.bf16.vlgmr.msrb.gmra.mxu0 %vm394_vm3, %v1178_v62  ;;  %8036 = vmatmul.msk.bf16.vlgmr.msrb.gmra.mxu1 %vm394_vm3, %v1178_v62  ;;  %v1427_v62 = vperm.slane %v10056_v39, 7 }
 0x556   :  { %v1332_v12 = vpop.permute.xlu1 %1331 }
 0x5d0   :  { %v1269_v17 = vpop.f32.mrf.mxu0  ;;  %v10050_v23 = vpop.f32.mrf.mxu1 }
 0x5d1   :  { %v1270_v19 = vadd.f32 %v1269_v17, %v1193_v60 }
 0x5d3   :  { %9126 = vtanh.f32 %v1270_v19  ;;  %v8037_v29 = vmul.f32 -1.442695, %v1270_v19 }
 0x5d5   :  { %9128 = vpow2.f32 %v8037_v29 }
 0x5d8   :  { %v1271_v25 = vpop.f32.mrf.mxu0  ;;  %v1284_v22 = vpop.f32.mrf.mxu1 }
 0x5d9   :  { %v9127_v46 = vpop.eup %9126 }
 0x5da   :  { %1326 = vrot.lane.b32.xlu0 %v9127_v46, %s9343_s19 }
 0x5db   :  { %v9129_v30 = vpop.eup %9128 }
 0x5dc   :  { %v1290_v41 = vadd.f32 1.0, %v9129_v30 }
 0x5de   :  { %9130 = vrcp.f32 %v1290_v41  ;;  %v1302_v43 = vand.u32 2147483648, %v1290_v41  ;;  %v1300_v5 = vand.u32 2147483647, %v1290_v41  ;;  %vm1296_vm9 = vweird.f32 %v1290_v41 }
 0x5e0   :  { %v1303_v21 = vor.u32 1.1754944e-38, %v1302_v43  ;;  %vm1301_vm11 = vcmp.eq.f32.partialorder %v1300_v5, 8.507059e+37 }
 0x5e2   :  { %1390 = vperm.xlu0 %9046, %v1385_v28   ;;  %v1457_v28 = vperm.slane %v8041_v7, 3 }
 0x5e4   :  { %v9131_v31 = vpop.eup %9130 }
 0x5e5   :  { %v1292_v53 = vmul.f32 %v9131_v31, %v1290_v41  ;;  %vm1297_vm8 = vweird.f32 %v9131_v31 }
 0x5e6   :  { %vm1298_vm10 = vmor %vm1296_vm9, %vm1297_vm8 }
 0x5e7   :  { %v1293_v1 = vsub.f32 1.0, %v1292_v53  ;;  %v1478_v53 = vperm.slane %v8041_v7, 6 }
 0x5e9   :  { %v1294_v45 = vmul.f32 %v9131_v31, %v1293_v1 }
 0x5ea   :  { %1397 = vperm.xlu0 %9046, %v1392_v58  }
 0x5eb   :  { %v1295_v63 = vadd.f32 %v9131_v31, %v1294_v45  ;;  %v1194_v45 = vperm.slane %v10047_v16, 1 }
 0x5ed   :  { %v1299_v48 = vsel %vm1298_vm10, %v9131_v31, %v1295_v63  ;;  %v1413_v31 = vperm.slane %v10056_v39, 5  ;;  %v1283_v63 = vadd.f32 %v10050_v23, %v1194_v45  ;;  %v1495_v45 = vld [vmem:[#allocation2 + $0xc] sm:$0xf] }
 0x5ee   :  { %v1304_v15 = vsel %vm1301_vm11, %v1303_v21, %v1299_v48 }
 0x5ef   :  { %v1344_v35 = vmul.f32 %v1342_v4, %v1304_v15  ;;  %v1334_v40 = vmul.f32 %v1332_v12, %v1304_v15  ;;  %v8038_v21 = vmul.f32 -1.442695, %v1283_v63  ;;  %v10108_v63 = vld [vmem:[#allocation3 + $0xc] sm:$0xf] }
 0x5f1   :  { %1346 = vrot.lane.b32.xlu2 %v1344_v35, %s9342_s18  ;;  %1336 = vrot.lane.b32.xlu1 %v1334_v40, %s9344_s20 }
 0x5f9   :  { %1383 = vperm.xlu2 %9048, %v1378_v44   ;;  %942 = vperm.xlu1 %9047, %v9081_v52  }
 0x601   :  { %1448 = vperm.xlu2 %9048, %v1443_v49   ;;  %1441 = vperm.xlu1 %9047, %v1436_v50  }
 0x609   :  { %1404 = vperm.xlu2 %9048, %v1399_v51   ;;  %1455 = vperm.xlu1 %9047, %v1450_v54  }
 0x611   :  { %1469 = vperm.xlu2 %9048, %v1464_v0   ;;  %1411 = vperm.xlu1 %9047, %v1406_v18  }
 0x619   :  { %1425 = vperm.xlu2 %9048, %v1420_v56   ;;  %1476 = vperm.xlu1 %9047, %v1471_v47  }
 0x621   :  { %1490 = vperm.xlu2 %9048, %v1485_v3   ;;  %1432 = vperm.xlu1 %9047, %v1427_v62  }
 0x64b   :  { %v1347_v25 = vpop.permute.xlu2 %1346 }
 0x64c   :  { %v1327_v60 = vpop.permute.xlu0 %1326 }
 0x64d   :  { %v1329_v17 = vmul.f32 %v1327_v60, %v1304_v15 }
 0x653   :  { %v1384_v58 = vpop.permute.xlu2 %1383 }
 0x654   :  { %v1391_v16 = vpop.permute.xlu0 %1390 }
 0x65b   :  { %v1449_v1 = vpop.permute.xlu2 %1448 }
 0x65c   :  { %v10099_v18 = vpop.permute.xlu0 %1397 }
 0x663   :  { %v1337_v19 = vpop.permute.xlu1 %1336  ;;  %v1405_v43 = vpop.permute.xlu2 %1404 }
 0x664   :  { %v1339_v29 = vadd.f32 %v1337_v19, %v1329_v17 }
 0x666   :  { %v1349_v22 = vadd.f32 %v1347_v25, %v1339_v29  ;;  %v1508_v25 = vmul.f32 %v9663_v32, %v1384_v58 }
 0x668   :  { %9132 = vtanh.f32 %v1349_v22 }
 0x669   :  { %9134 = vpow2.f32 %v8038_v21  ;;  %v1516_v21 = vsel %vm55_vm0, %v1508_v25, 0.0 }
 0x66b   :  { %v943_v46 = vpop.permute.xlu1 %942  ;;  %v10077_v5 = vpop.permute.xlu2 %1469 }
 0x66c   :  { %v1359_v30 = vmul.f32 %v1349_v22, %v943_v46 }
 0x66e   :  { %v9133_v41 = vpop.eup %9132  ;;  %1361 = vrot.lane.b32.xlu2 %v1359_v30, %s9344_s20  ;;  %v1554_v30 = vmul.f32 %v9719_v55, %v1384_v58 }
 0x66f   :  { %1352 = vrot.lane.b32.xlu0 %v9133_v41, %s9344_s20  ;;  %v9135_v4 = vpop.eup %9134  ;;  %v1509_v41 = vmul.f32 %v9912_v8, %v1391_v16 }
 0x670   :  { %v1309_v39 = vadd.f32 1.0, %v9135_v4  ;;  %v1562_v4 = vsel %vm55_vm0, %v1554_v30, 0.0  ;;  %v8873_v30 = vld [vmem:[%s13085_s6 + $0x44] sm:$0xf] }
 0x672   :  { %9136 = vrcp.f32 %v1309_v39  ;;  %v1321_v47 = vand.u32 2147483648, %v1309_v39  ;;  %vm1315_vm13 = vweird.f32 %v1309_v39  ;;  %v1319_v3 = vand.u32 2147483647, %v1309_v39 }
 0x673   :  { %v10080_v48 = vpop.permute.xlu2 %1425  ;;  %v1442_v40 = vpop.permute.xlu1 %1441 }
 0x674   :  { %v1322_v17 = vor.u32 1.1754944e-38, %v1321_v47  ;;  %vm1320_vm15 = vcmp.eq.f32.partialorder %v1319_v3, 8.507059e+37  ;;  %v8876_v47 = vld [vmem:[%s13085_s6 + $0x54] sm:$0xf0]  ;;  %v8086_v3 = vld [vmem:[%s13085_s6 + $0x58] sm:$0xf0] }
 0x677   :  { %1462 = vperm.xlu0 %9046, %v1457_v28   ;;  %v1555_v28 = vmul.f32 %v9882_v24, %v1391_v16  ;;  %v1531_v16 = vmul.f32 %v9663_v32, %v1442_v40 }
 0x678   :  { %v9137_v35 = vpop.eup %9136 }
 0x679   :  { %v1311_v44 = vmul.f32 %v9137_v35, %v1309_v39  ;;  %vm1316_vm12 = vweird.f32 %v9137_v35  ;;  %v1517_v39 = vsel %vm55_vm0, %v1509_v41, 0.0  ;;  %v1563_v58 = vsel %vm55_vm0, %v1555_v28, 0.0  ;;  %v8078_v41 = vld [vmem:[%s13085_s6 + $0x48] sm:$0xf0] }
 0x67a   :  { %vm1317_vm14 = vmor %vm1315_vm13, %vm1316_vm12 }
 0x67b   :  { %v10082_v12 = vpop.permute.xlu2 %1490  ;;  %v1312_v51 = vsub.f32 1.0, %v1311_v44  ;;  %v10097_v54 = vpop.permute.xlu1 %1455 }
 0x67d   :  { %v1313_v0 = vmul.f32 %v9137_v35, %v1312_v51 }
 0x67f   :  { %1418 = vperm.xlu0 %9046, %v1413_v31   ;;  %v1314_v56 = vadd.f32 %v9137_v35, %v1313_v0  ;;  %v1532_v31 = vmul.f32 %v9912_v8, %v1449_v1  ;;  %v1511_v8 = vmul.f32 %v1495_v45, %v1405_v43 }
 0x681   :  { %v1318_v62 = vsel %vm1317_vm14, %v9137_v35, %v1314_v56  ;;  %v1496_v35 = vld [vmem:[#allocation2 + $0x10] sm:$0xf]  ;;  %v1540_v44 = vsel %vm55_vm0, %v1532_v31, 0.0  ;;  %v1521_v28 = vsel %vm55_vm0, %v1511_v8, 0.0 }
 0x682   :  { %v1323_v19 = vsel %vm1320_vm15, %v1322_v17, %v1318_v62  ;;  %v8084_v56 = vld [vmem:[%s13085_s6 + $0x50] sm:$0xf]  ;;  %v8076_v62 = vld [vmem:[%s13085_s6 + $0x40] sm:$0xf]  ;;  %v8874_v17 = vld [vmem:[%s13085_s6 + $0x44] sm:$0xf0] }
 0x683   :  { %v10101_v60 = vpop.permute.xlu1 %1411 }
 0x687   :  { %1483 = vperm.xlu0 %9046, %v1478_v53  }
 0x68b   :  { %v10119_v51 = vpop.permute.xlu1 %1476 }
 0x6c8   :  { %v1362_v15 = vpop.permute.xlu2 %1361 }
 0x6c9   :  { %1365 = vst.msk [vmem:[#allocation3 + $0x8] sm:$0xf] %vm55_vm0, %v1362_v15  ;;  %v1578_v15 = vmul.f32 %v9882_v24, %v1449_v1  ;;  %v8875_v24 = vld [vmem:[%s13085_s6 + $0x54] sm:$0xf]  ;;  %v1535_v1 = vmul.f32 %v1496_v35, %v10077_v5 }
 0x6cb   :  { %v1546_v8 = vsel %vm55_vm0, %v1535_v1, 0.0  ;;  %v1512_v1 = vmul.f32 %v1496_v35, %v10101_v60 }
 0x6d0   :  { %v10085_v52 = vld [vmem:[#allocation3 + $0x8] sm:$0xf] }
 0x6d1   :  { %v10087_v7 = vld [vmem:[#allocation3 + $0x8] sm:$0xf]  ;;  %v1556_v32 = vmul.f32 %v10085_v52, %v10099_v18 }
 0x6d2   :  { %v10089_v23 = vld [vmem:[#allocation3 + $0x8] sm:$0xf] }
 0x6d3   :  { %v10091_v49 = vld [vmem:[#allocation3 + $0x8] sm:$0xf] }
 0x6d4   :  { %v10093_v50 = vld [vmem:[#allocation3 + $0x8] sm:$0xf] }
 0x6d5   :  { %13116 = vst [vmem:[#allocation14_spill] sm:$0xff] %v10093_v50 }
 0x6d6   :  { %4221 = vst.msk [vmem:[#allocation3 + $0x8] sm:$0xf] %vm55_vm0, %v13097_v20 }
 0x6e1   :  { %v1353_v29 = vpop.permute.xlu0 %1352 }
 0x6e2   :  { %v1355_v22 = vmul.f32 %v1353_v29, %v1323_v19  ;;  %v10143_v19 = vsel %vm55_vm0, %v1578_v15, 0.0  ;;  %v1577_v29 = vmul.f32 %v9719_v55, %v1442_v40  ;;  %v8077_v15 = vor.u32 %v8874_v17, %v8076_v62  ;;  %v1497_v62 = vld [vmem:[#allocation2 + $0x14] sm:$0xf] }
 0x6e3   :  { %v1564_v55 = vadd.f32 %v1563_v58, %v1562_v4  ;;  %v1565_v4 = vsel %vm55_vm0, %v1556_v32, 0.0  ;;  %v8070_v58 = vld [vmem:[%s13085_s6 + $0x38] sm:$0xf0]  ;;  %v8870_v32 = vld [vmem:[%s13085_s6 + $0x24] sm:$0xf0] }
 0x6e4   :  { %v1356_v53 = vmul.f32 %v1355_v22, %v943_v46  ;;  %v1557_v46 = vmul.f32 %v10108_v63, %v1405_v43  ;;  %v8085_v43 = vor.u32 %v8876_v47, %v8084_v56  ;;  %v8089_v22 = vor.u32 %v8875_v24, %v8086_v3  ;;  %v8068_v47 = vld [vmem:[%s13085_s6 + $0x30] sm:$0xf]  ;;  %v8872_v24 = vld [vmem:[%s13085_s6 + $0x34] sm:$0xf0] }
 0x6e5   :  { %v1518_v56 = vadd.f32 %v1517_v39, %v1516_v21  ;;  %v8871_v39 = vld [vmem:[%s13085_s6 + $0x34] sm:$0xf]  ;;  %v1585_v3 = vsel %vm55_vm0, %v1577_v29, 0.0  ;;  %v8069_v35 = vor.u32 %v8872_v24, %v8068_v47  ;;  %v1566_v38 = vadd.f32 %v1565_v4, %v1564_v55 }
 0x6e6   :  { %1358 = vst.msk [vmem:[#allocation2 + $0x8] sm:$0xf] %vm55_vm0, %v1356_v53  ;;  %v1567_v31 = vsel %vm55_vm0, %v1557_v46, 0.0  ;;  %v1539_v53 = vsel %vm55_vm0, %v1531_v16, 0.0  ;;  %1694 = vmatpush.bf16.msrb.mxu2 %v8085_v43  ;;  %1707 = vmatpush.bf16.msrb.mxu3 %v8089_v22  ;;  %v10162_v46 = vld [vmem:[#allocation2 + $0x18] sm:$0xf]  ;;  %v8073_v14 = vor.u32 %v8871_v39, %v8070_v58 }
 0x6e7   :  { %v1541_v43 = vadd.f32 %v1540_v44, %v1539_v53  ;;  %v1504_v22 = vld [vmem:[#allocation3 + $0x10] sm:$0xf]  ;;  %v1579_v44 = vmul.f32 %v10085_v52, %v10097_v54  ;;  %v13119_v55 = vmov 0.0   ;;  %v1505_v24 = vld [vmem:[#allocation3 + $0x14] sm:$0xf]  ;;  %v1523_v4 = vsel %vm55_vm0, %v1512_v1, 0.0 }
 0x6e8   :  { %v1558_v47 = vmul.f32 %v1504_v22, %v10101_v60  ;;  %v1568_v2 = vadd.f32 %v1567_v31, %v1566_v38  ;;  %v1536_v60 = vmul.f32 %v1497_v62, %v10119_v51 }
 0x6e9   :  { %v1463_v0 = vpop.permute.xlu0 %1462  ;;  %v1588_v39 = vsel %vm55_vm0, %v1579_v44, 0.0 }
 0x6ea   :  { %v1534_v25 = vmul.f32 %v1495_v45, %v1463_v0  ;;  %v8081_v45 = vor.u32 %v8873_v30, %v8078_v41  ;;  %1695 = vmatpush.bf16.msrb.mxu2 %v8077_v15  ;;  %v1580_v52 = vmul.f32 %v10108_v63, %v1463_v0  ;;  %v8869_v15 = vld [vmem:[%s13085_s6 + $0x24] sm:$0xf] }
 0x6ec   :  { %v1544_v17 = vsel %vm55_vm0, %v1534_v25, 0.0  ;;  %1708 = vmatpush.bf16.msrb.mxu3 %v8081_v45  ;;  %v1514_v45 = vmul.f32 %v10162_v46, %v10080_v48 }
 0x6ed   :  { %v1494_v40 = vld [vmem:[#allocation2 + $0x8] sm:$0xf] }
 0x6ee   :  { %v1533_v16 = vmul.f32 %v1494_v40, %v10097_v54  ;;  %v1510_v21 = vmul.f32 %v1494_v40, %v10099_v18  ;;  %v8060_v18 = vld [vmem:[%s13085_s6 + $0x20] sm:$0xf]  ;;  %v10186_v41 = vld [vmem:[#allocation2 + $0x8] sm:$0xf]  ;;  %1696 = vmatpush.bf16.msrb.mxu2 %v8069_v35 }
 0x6ef   :  { %v10188_v25 = vld [vmem:[#allocation2 + $0x8] sm:$0xf] }
 0x6f0   :  { %v1542_v30 = vsel %vm55_vm0, %v1533_v16, 0.0  ;;  %v1519_v29 = vsel %vm55_vm0, %v1510_v21, 0.0  ;;  %v10190_v50 = vld [vmem:[#allocation2 + $0x8] sm:$0xf]  ;;  %v1433_v21 = vpop.permute.xlu1 %1432  ;;  %1709 = vmatpush.bf16.msrb.mxu3 %v8073_v14  ;;  %v1560_v14 = vmul.f32 %v1506_v13, %v10080_v48  ;;  %v1582_v48 = vmul.f32 %v1505_v24, %v10119_v51 }
 0x6f1   :  { %v1543_v53 = vadd.f32 %v1542_v30, %v1541_v43  ;;  %v1419_v40 = vpop.permute.xlu0 %1418  ;;  %v1520_v20 = vadd.f32 %v1519_v29, %v1518_v56  ;;  %v10192_v16 = vld [vmem:[#allocation2 + $0x8] sm:$0xf]  ;;  %v8062_v56 = vld [vmem:[%s13085_s6 + $0x28] sm:$0xf0]  ;;  %v8061_v43 = vor.u32 %v8870_v32, %v8060_v18  ;;  %v1587_v30 = vadd.f32 %v10143_v19, %v1585_v3  ;;  %v1499_v29 = vld [vmem:[#allocation2 + $0x1c] sm:$0xf] }
 0x6f2   :  { %13117 = vst [vmem:[#allocation15_spill] sm:$0xff] %v10192_v16  ;;  %v10194_v6 = vld [vmem:[#allocation2 + $0x8] sm:$0xf]  ;;  %v1513_v54 = vmul.f32 %v1497_v62, %v1419_v40  ;;  %v1559_v58 = vmul.f32 %v1505_v24, %v1419_v40  ;;  %v8065_v16 = vor.u32 %v8869_v15, %v8062_v56  ;;  %v1515_v37 = vmul.f32 %v1499_v29, %v1433_v21  ;;  %v1507_v56 = vld [vmem:[#allocation3 + $0x1c] sm:$0xf] }
 0x6f3   :  { %13118 = vst [vmem:[#allocation16_spill] sm:$0xff] %v10194_v6  ;;  %v1545_v63 = vadd.f32 %v1544_v17, %v1543_v53  ;;  %v1522_v0 = vadd.f32 %v1521_v28, %v1520_v20  ;;  %v1590_v20 = vsel %vm55_vm0, %v1580_v52, 0.0  ;;  %v1589_v17 = vadd.f32 %v1588_v39, %v1587_v30  ;;  %1697 = vmatpush.bf16.msrb.mxu2 %v8061_v43 }
 0x6f4   :  { %4213 = vst.msk [vmem:[#allocation2 + $0x8] sm:$0xf] %vm55_vm0, %v13119_v55  ;;  %v1525_v28 = vsel %vm55_vm0, %v1513_v54, 0.0  ;;  %v1581_v18 = vmul.f32 %v1504_v22, %v10077_v5  ;;  %v1527_v19 = vsel %vm55_vm0, %v1514_v45, 0.0  ;;  %v1569_v3 = vsel %vm55_vm0, %v1558_v47, 0.0  ;;  %1710 = vmatpush.bf16.msrb.mxu3 %v8065_v16 }
 0x6f5   :  { %v1524_v6 = vadd.f32 %v1523_v4, %v1522_v0  ;;  %v1547_v1 = vadd.f32 %v1546_v8, %v1545_v63  ;;  %v1571_v38 = vsel %vm55_vm0, %v1559_v58, 0.0  ;;  %v1591_v31 = vadd.f32 %v1590_v20, %v1589_v17  ;;  %v8044_v17 = vld [vmem:[%s13085_s6] sm:$0xf] }
 0x6f6   :  { %v1570_v62 = vadd.f32 %v1569_v3, %v1568_v2  ;;  %v1538_v8 = vmul.f32 %v1499_v29, %v10082_v12  ;;  %v1529_v22 = vsel %vm55_vm0, %v1515_v37, 0.0  ;;  %v1592_v54 = vsel %vm55_vm0, %v1581_v18, 0.0  ;;  %v8052_v29 = vld [vmem:[%s13085_s6 + $0x10] sm:$0xf]  ;;  %v8865_v18 = vld [vmem:[%s13085_s6 + $0x4] sm:$0xf] }
 0x6f7   :  { %v1526_v44 = vadd.f32 %v1525_v28, %v1524_v6  ;;  %v1548_v6 = vsel %vm55_vm0, %v1536_v60, 0.0  ;;  %v1593_v16 = vadd.f32 %v1592_v54, %v1591_v31  ;;  %v1573_v47 = vsel %vm55_vm0, %v1560_v14, 0.0  ;;  %v8868_v60 = vld [vmem:[%s13085_s6 + $0x14] sm:$0xf0]  ;;  %v8054_v28 = vld [vmem:[%s13085_s6 + $0x18] sm:$0xf0] }
 0x6f8   :  { %v1572_v53 = vadd.f32 %v1571_v38, %v1570_v62  ;;  %v1549_v52 = vadd.f32 %v1548_v6, %v1547_v1  ;;  %v1552_v37 = vsel %vm55_vm0, %v1538_v8, 0.0  ;;  %v1594_v4 = vsel %vm55_vm0, %v1582_v48, 0.0  ;;  %v8046_v3 = vld [vmem:[%s13085_s6 + $0x8] sm:$0xf0]  ;;  %v10271_v6 = vld [vmem:[%s13086_s7] sm:$0x3] }
 0x6f9   :  { %v1484_v32 = vpop.permute.xlu0 %1483  ;;  %v1528_v35 = vadd.f32 %v1527_v19, %v1526_v44  ;;  %v1595_v51 = vadd.f32 %v1594_v4, %v1593_v16  ;;  %v8053_v20 = vor.u32 %v8868_v60, %v8052_v29  ;;  %v8866_v44 = vld [vmem:[%s13085_s6 + $0x4] sm:$0xf0]  ;;  %v8049_v38 = vor.u32 %v8865_v18, %v8046_v3  ;;  %v8039_v14 = vld [vmem:[%s13109_s27 + $0xc] sm:$0xf]  ;;  %v9082_v60 = vld [vmem:[%s13080_s1 + $0x3] ss:$0 sm:$0xff] }
 0x6fa   :  { %v1537_v5 = vmul.f32 %v10162_v46, %v1484_v32  ;;  %v1583_v15 = vmul.f32 %v1506_v13, %v1484_v32  ;;  %v1561_v46 = vmul.f32 %v1507_v56, %v1433_v21  ;;  %v1574_v0 = vadd.f32 %v1573_v47, %v1572_v53 }
 0x6fb   :  { %v1530_v40 = vadd.f32 %v1529_v22, %v1528_v35  ;;  %v1584_v13 = vmul.f32 %v1507_v56, %v10082_v12  ;;  %v8867_v12 = vld [vmem:[%s13085_s6 + $0x14] sm:$0xf]  ;;  %1698 = vmatpush.bf16.msrb.mxu2 %v8053_v20  ;;  %v8045_v19 = vor.u32 %v8866_v44, %v8044_v17  ;;  %v10280_v56 = vld [vmem:[%s13081_s2 + $0x20] sm:$0xff] }
 0x6fc   :  { %v1550_v2 = vsel %vm55_vm0, %v1537_v5, 0.0  ;;  %v1596_v39 = vsel %vm55_vm0, %v1583_v15, 0.0  ;;  %v1575_v24 = vsel %vm55_vm0, %v1561_v46, 0.0  ;;  %v8057_v1 = vor.u32 %v8867_v12, %v8054_v28  ;;  %v8096_v20 = vld [vmem:[%s13082_s3 + $0x20] sm:$0xff] }
 0x6fd   :  { %1601 = vrot.lane.b32.xlu0 %v1530_v40, %s9343_s19  ;;  %v1551_v45 = vadd.f32 %v1550_v2, %v1549_v52  ;;  %v1576_v58 = vadd.f32 %v1575_v24, %v1574_v0  ;;  %v1597_v43 = vadd.f32 %v1596_v39, %v1595_v51  ;;  %v1598_v21 = vsel %vm55_vm0, %v1584_v13, 0.0 }
 0x6fe   :  { %1711 = vmatpush.bf16.msrb.mxu3 %v8057_v1  ;;  %v1625_v5 = vperm.slane %v10271_v6, 0  ;;  %v1810_v12 = vperm.slane %v10280_v56, 0  ;;  %v1868_v28 = vperm.slane %v8096_v20, 0  ;;  %v1875_v1 = vperm.slane %v8096_v20, 1 }
 0x6ff   :  { %v1553_v63 = vadd.f32 %v1552_v37, %v1551_v45  ;;  %v1599_v30 = vadd.f32 %v1598_v21, %v1597_v43  ;;  %1699 = vmatpush.bf16.msrb.mxu2 %v8045_v19  ;;  %v1817_v45 = vperm.slane %v10280_v56, 1  ;;  %v1824_v37 = vperm.slane %v10280_v56, 2 }
 0x700   :  { %v1882_v17 = vperm.slane %v8096_v20, 2  ;;  %v1831_v44 = vperm.slane %v10280_v56, 3  ;;  %v1838_v18 = vperm.slane %v10280_v56, 4  ;;  %v1896_v19 = vperm.slane %v8096_v20, 4 }
 0x701   :  { %1605 = vrot.lane.b32.xlu1 %v1553_v63, %s9342_s18  ;;  %v1903_v3 = vperm.slane %v8096_v20, 5 }
 0x702   :  { %1712 = vmatpush.bf16.msrb.mxu3 %v8049_v38  ;;  %v1852_v38 = vperm.slane %v10280_v56, 6 }
 0x705   :  { %1763 = vrot.lane.b32.xlu0 %v1576_v58, %s9342_s18 }
 0x709   :  { %1773 = vrot.lane.b32.xlu1 %v1599_v30, %s9344_s20 }
 0x76f   :  { %v1602_v31 = vpop.permute.xlu0 %1601 }
 0x770   :  { %v1608_v62 = vsel %vm311_vm1, %v8039_v14, %v1602_v31  ;;  %v1859_v14 = vperm.slane %v10280_v56, 7  ;;  %v1917_v31 = vperm.slane %v8096_v20, 7 }
 0x773   :  { %v1606_v32 = vpop.permute.xlu1 %1605 }
 0x774   :  { %v1609_v35 = vsel %vm313_vm2, %v1608_v62, %v1606_v32 }
 0x775   :  { %v1610_v8 = vpack.c.bf16 %v1609_v35, %v1609_v35 }
 0x777   :  { %8090 = vmatmul.msk.bf16.vlgmr.msrb.gmra.mxu2 %vm394_vm3, %v1610_v8  ;;  %8091 = vmatmul.msk.bf16.vlgmr.msrb.gmra.mxu3 %vm394_vm3, %v1610_v8  ;;  %v1764_v58 = vpop.permute.xlu0 %1763 }
 0x77b   :  { %v1774_v43 = vpop.permute.xlu1 %1773 }
 0x7fa   :  { %v1701_v22 = vpop.f32.mrf.mxu2  ;;  %v10274_v53 = vpop.f32.mrf.mxu3 }
 0x7fb   :  { %v1702_v40 = vadd.f32 %v1701_v22, %v1625_v5 }
 0x7fd   :  { %9138 = vtanh.f32 %v1702_v40  ;;  %v8092_v52 = vmul.f32 -1.442695, %v1702_v40 }
 0x7ff   :  { %9140 = vpow2.f32 %v8092_v52 }
 0x802   :  { %v1703_v54 = vpop.f32.mrf.mxu2  ;;  %v1716_v48 = vpop.f32.mrf.mxu3 }
 0x803   :  { %v9139_v2 = vpop.eup %9138  ;;  %v1889_v48 = vperm.slane %v8096_v20, 3 }
 0x804   :  { %1758 = vrot.lane.b32.xlu2 %v9139_v2, %s9343_s19  ;;  %v1845_v2 = vperm.slane %v10280_v56, 5 }
 0x805   :  { %v9141_v15 = vpop.eup %9140 }
 0x806   :  { %v1722_v16 = vadd.f32 1.0, %v9141_v15  ;;  %v1910_v15 = vperm.slane %v8096_v20, 6 }
 0x808   :  { %9142 = vrcp.f32 %v1722_v16  ;;  %v1734_v0 = vand.u32 2147483648, %v1722_v16  ;;  %v1732_v39 = vand.u32 2147483647, %v1722_v16  ;;  %vm1728_vm5 = vweird.f32 %v1722_v16 }
 0x80a   :  { %v1735_v13 = vor.u32 1.1754944e-38, %v1734_v0  ;;  %vm1733_vm7 = vcmp.eq.f32.partialorder %v1732_v39, 8.507059e+37 }
 0x80c   :  { %1822 = vperm.xlu2 %9048, %v1817_v45  }
 0x80e   :  { %v9143_v47 = vpop.eup %9142 }
 0x80f   :  { %v1724_v46 = vmul.f32 %v9143_v47, %v1722_v16  ;;  %vm1729_vm4 = vweird.f32 %v9143_v47  ;;  %v1626_v16 = vperm.slane %v10271_v6, 1 }
 0x810   :  { %vm1730_vm6 = vmor %vm1728_vm5, %vm1729_vm4 }
 0x811   :  { %v1725_v63 = vsub.f32 1.0, %v1724_v46  ;;  %v1715_v45 = vadd.f32 %v10274_v53, %v1626_v16 }
 0x813   :  { %v1726_v4 = vmul.f32 %v9143_v47, %v1725_v63 }
 0x814   :  { %1829 = vperm.xlu2 %9048, %v1824_v37  }
 0x815   :  { %v1727_v51 = vadd.f32 %v9143_v47, %v1726_v4 }
 0x817   :  { %v1731_v24 = vsel %vm1730_vm6, %v9143_v47, %v1727_v51  ;;  %v8093_v47 = vmul.f32 -1.442695, %v1715_v45 }
 0x818   :  { %v1736_v21 = vsel %vm1733_vm7, %v1735_v13, %v1731_v24 }
 0x819   :  { %v1766_v30 = vmul.f32 %v1764_v58, %v1736_v21  ;;  %v1776_v29 = vmul.f32 %v1774_v43, %v1736_v21 }
 0x81b   :  { %1768 = vrot.lane.b32.xlu0 %v1766_v30, %s9344_s20  ;;  %1778 = vrot.lane.b32.xlu1 %v1776_v29, %s9342_s18 }
 0x823   :  { %1374 = vperm.xlu0 %9046, %v9082_v60   ;;  %1815 = vperm.xlu1 %9047, %v1810_v12  }
 0x82b   :  { %1873 = vperm.xlu0 %9046, %v1868_v28   ;;  %1880 = vperm.xlu1 %9047, %v1875_v1  }
 0x833   :  { %1887 = vperm.xlu0 %9046, %v1882_v17   ;;  %1836 = vperm.xlu1 %9047, %v1831_v44  }
 0x83b   :  { %1843 = vperm.xlu0 %9046, %v1838_v18   ;;  %1901 = vperm.xlu1 %9047, %v1896_v19  }
 0x843   :  { %1908 = vperm.xlu0 %9046, %v1903_v3   ;;  %1857 = vperm.xlu1 %9047, %v1852_v38  }
 0x84b   :  { %1864 = vperm.xlu0 %9046, %v1859_v14   ;;  %1922 = vperm.xlu1 %9047, %v1917_v31  }
 0x85e   :  { %v1759_v62 = vpop.permute.xlu2 %1758 }
 0x85f   :  { %v1761_v32 = vmul.f32 %v1759_v62, %v1736_v21 }
 0x866   :  { %v10308_v51 = vpop.permute.xlu2 %1822 }
 0x867   :  { %v1941_v19 = vmul.f32 %v9914_v9, %v10308_v51 }
 0x86e   :  { %v10314_v58 = vpop.permute.xlu2 %1829 }
 0x88d   :  { %v1769_v35 = vpop.permute.xlu0 %1768  ;;  %v1779_v5 = vpop.permute.xlu1 %1778 }
 0x88e   :  { %v1771_v8 = vadd.f32 %v1769_v35, %v1761_v32  ;;  %v1942_v32 = vmul.f32 %v10186_v41, %v10314_v58 }
 0x890   :  { %v1781_v22 = vadd.f32 %v1779_v5, %v1771_v8  ;;  %v1949_v5 = vsel %vm55_vm0, %v1941_v19, 0.0 }
 0x892   :  { %9144 = vtanh.f32 %v1781_v22 }
 0x893   :  { %9146 = vpow2.f32 %v8093_v47 }
 0x895   :  { %v1375_v40 = vpop.permute.xlu0 %1374  ;;  %v10302_v37 = vpop.permute.xlu1 %1815 }
 0x896   :  { %v1791_v52 = vmul.f32 %v1781_v22, %v1375_v40  ;;  %v1940_v44 = vmul.f32 %v9665_v33, %v10302_v37 }
 0x898   :  { %v9145_v54 = vpop.eup %9144  ;;  %1793 = vrot.lane.b32.xlu1 %v1791_v52, %s9344_s20  ;;  %v1948_v14 = vsel %vm55_vm0, %v1940_v44, 0.0 }
 0x899   :  { %1784 = vrot.lane.b32.xlu2 %v9145_v54, %s9344_s20  ;;  %v9147_v46 = vpop.eup %9146  ;;  %v1950_v22 = vadd.f32 %v1949_v5, %v1948_v14 }
 0x89a   :  { %v1741_v63 = vadd.f32 1.0, %v9147_v46 }
 0x89c   :  { %9148 = vrcp.f32 %v1741_v63  ;;  %v1753_v21 = vand.u32 2147483648, %v1741_v63  ;;  %vm1747_vm9 = vweird.f32 %v1741_v63  ;;  %v1751_v29 = vand.u32 2147483647, %v1741_v63 }
 0x89d   :  { %v10304_v0 = vpop.permute.xlu1 %1880  ;;  %v10306_v4 = vpop.permute.xlu0 %1873 }
 0x89e   :  { %v1754_v20 = vor.u32 1.1754944e-38, %v1753_v21  ;;  %vm1752_vm11 = vcmp.eq.f32.partialorder %v1751_v29, 8.507059e+37  ;;  %v1963_v31 = vmul.f32 %v9665_v33, %v10306_v4  ;;  %v1964_v62 = vmul.f32 %v9914_v9, %v10304_v0  ;;  %v1929_v29 = vld [vmem:[#allocation2 + $0x14] sm:$0xf] }
 0x89f   :  { %v1951_v33 = vsel %vm55_vm0, %v1942_v32, 0.0 }
 0x8a0   :  { %v1971_v52 = vsel %vm55_vm0, %v1963_v31, 0.0  ;;  %v1972_v54 = vsel %vm55_vm0, %v1964_v62, 0.0 }
 0x8a1   :  { %1894 = vperm.xlu2 %9048, %v1889_v48  }
 0x8a2   :  { %v9149_v39 = vpop.eup %9148 }
 0x8a3   :  { %v1743_v56 = vmul.f32 %v9149_v39, %v1741_v63  ;;  %vm1748_vm8 = vweird.f32 %v9149_v39  ;;  %v1952_v63 = vadd.f32 %v1951_v33, %v1950_v22 }
 0x8a4   :  { %vm1749_vm10 = vmor %vm1747_vm9, %vm1748_vm8 }
 0x8a5   :  { %v10310_v13 = vpop.permute.xlu1 %1836  ;;  %v1744_v6 = vsub.f32 1.0, %v1743_v56  ;;  %v10312_v24 = vpop.permute.xlu0 %1887  ;;  %v1930_v56 = vld [vmem:[#allocation2 + $0x18] sm:$0xf] }
 0x8a6   :  { %v1965_v35 = vmul.f32 %v10186_v41, %v10312_v24 }
 0x8a7   :  { %v1745_v53 = vmul.f32 %v9149_v39, %v1744_v6 }
 0x8a8   :  { %v1974_v9 = vsel %vm55_vm0, %v1965_v35, 0.0 }
 0x8a9   :  { %1850 = vperm.xlu2 %9048, %v1845_v2   ;;  %v1746_v43 = vadd.f32 %v9149_v39, %v1745_v53 }
 0x8ab   :  { %v1750_v12 = vsel %vm1749_vm10, %v9149_v39, %v1746_v43  ;;  %v1973_v39 = vadd.f32 %v1972_v54, %v1971_v52  ;;  %v1986_v54 = vmul.f32 %v9721_v57, %v10302_v37 }
 0x8ac   :  { %v1755_v28 = vsel %vm1752_vm11, %v1754_v20, %v1750_v12  ;;  %v1931_v12 = vld [vmem:[#allocation2 + $0x1c] sm:$0xf] }
 0x8ad   :  { %v10316_v30 = vpop.permute.xlu1 %1901  ;;  %v10318_v60 = vpop.permute.xlu0 %1843  ;;  %v1975_v21 = vadd.f32 %v1974_v9, %v1973_v39 }
 0x8b1   :  { %1915 = vperm.xlu2 %9048, %v1910_v15  }
 0x8b5   :  { %v10324_v3 = vpop.permute.xlu1 %1857  ;;  %v10327_v38 = vpop.permute.xlu0 %1908 }
 0x8b6   :  { %v1968_v22 = vmul.f32 %v1929_v29, %v10327_v38 }
 0x8b8   :  { %v1980_v37 = vsel %vm55_vm0, %v1968_v22, 0.0 }
 0x8bd   :  { %v10358_v6 = vpop.permute.xlu1 %1922  ;;  %v10362_v20 = vpop.permute.xlu0 %1864 }
 0x8be   :  { %v1947_v62 = vmul.f32 %v1931_v12, %v10362_v20 }
 0x8f3   :  { %v1785_v1 = vpop.permute.xlu2 %1784 }
 0x8f4   :  { %v1787_v17 = vmul.f32 %v1785_v1, %v1755_v28 }
 0x8f6   :  { %v1788_v18 = vmul.f32 %v1787_v17, %v1375_v40  ;;  %v1928_v40 = vld [vmem:[#allocation2 + $0x10] sm:$0xf] }
 0x8f7   :  { %v1944_v15 = vmul.f32 %v1928_v40, %v10318_v60  ;;  %v1967_v44 = vmul.f32 %v1928_v40, %v10316_v30 }
 0x8f8   :  { %1790 = vst.msk [vmem:[#allocation2 + $0xc] sm:$0xf] %vm55_vm0, %v1788_v18  ;;  %v1946_v18 = vmul.f32 %v1930_v56, %v10324_v3 }
 0x8f9   :  { %v1955_v17 = vsel %vm55_vm0, %v1944_v15, 0.0  ;;  %v1978_v5 = vsel %vm55_vm0, %v1967_v44, 0.0  ;;  %v1987_v15 = vmul.f32 %v9884_v26, %v10308_v51  ;;  %v2011_v51 = vmul.f32 %v10087_v7, %v10312_v24 }
 0x8fa   :  { %v1959_v52 = vsel %vm55_vm0, %v1946_v18, 0.0 }
 0x8fb   :  { %v10338_v8 = vpop.permute.xlu2 %1894  ;;  %v2020_v24 = vsel %vm55_vm0, %v2011_v51, 0.0 }
 0x8ff   :  { %v1927_v48 = vld [vmem:[#allocation2 + $0xc] sm:$0xf] }
 0x900   :  { %v10345_v2 = vld [vmem:[#allocation2 + $0xc] sm:$0xf]  ;;  %v1943_v41 = vmul.f32 %v1927_v48, %v10310_v13  ;;  %v1966_v16 = vmul.f32 %v1927_v48, %v10338_v8  ;;  %v1961_v48 = vsel %vm55_vm0, %v1947_v62, 0.0 }
 0x901   :  { %v10350_v45 = vld [vmem:[#allocation2 + $0xc] sm:$0xf] }
 0x902   :  { %v10352_v47 = vld [vmem:[#allocation2 + $0xc] sm:$0xf]  ;;  %v1976_v53 = vsel %vm55_vm0, %v1966_v16, 0.0  ;;  %v1953_v43 = vsel %vm55_vm0, %v1943_v41, 0.0  ;;  %v2009_v41 = vmul.f32 %v9721_v57, %v10306_v4  ;;  %v2010_v16 = vmul.f32 %v9884_v26, %v10304_v0 }
 0x903   :  { %v10354_v46 = vld [vmem:[#allocation2 + $0xc] sm:$0xf]  ;;  %v1851_v28 = vpop.permute.xlu2 %1850  ;;  %v1954_v1 = vadd.f32 %v1953_v43, %v1952_v63  ;;  %v1977_v14 = vadd.f32 %v1976_v53, %v1975_v21  ;;  %v1970_v53 = vmul.f32 %v1931_v12, %v10358_v6  ;;  %v1994_v21 = vsel %vm55_vm0, %v1986_v54, 0.0 }
 0x904   :  { %4214 = vst.msk [vmem:[#allocation2 + $0xc] sm:$0xf] %vm55_vm0, %v13119_v55  ;;  %v1945_v19 = vmul.f32 %v1929_v29, %v1851_v28  ;;  %v1988_v26 = vmul.f32 %v10087_v7, %v10314_v58  ;;  %v1995_v4 = vsel %vm55_vm0, %v1987_v15, 0.0  ;;  %v2017_v29 = vsel %vm55_vm0, %v2009_v41, 0.0  ;;  %v1937_v7 = vld [vmem:[#allocation3 + $0x14] sm:$0xf] }
 0x905   :  { %v1956_v31 = vadd.f32 %v1955_v17, %v1954_v1  ;;  %v1979_v40 = vadd.f32 %v1978_v5, %v1977_v14  ;;  %v2018_v12 = vsel %vm55_vm0, %v2010_v16, 0.0  ;;  %v1996_v1 = vadd.f32 %v1995_v4, %v1994_v21  ;;  %v1936_v17 = vld [vmem:[#allocation3 + $0x10] sm:$0xf] }
 0x906   :  { %v1957_v32 = vsel %vm55_vm0, %v1945_v19, 0.0  ;;  %v1984_v44 = vsel %vm55_vm0, %v1970_v53, 0.0  ;;  %v1997_v19 = vsel %vm55_vm0, %v1988_v26, 0.0  ;;  %v2019_v14 = vadd.f32 %v2018_v12, %v2017_v29 }
 0x907   :  { %v1958_v35 = vadd.f32 %v1957_v32, %v1956_v31  ;;  %v1981_v57 = vadd.f32 %v1980_v37, %v1979_v40  ;;  %v1990_v31 = vmul.f32 %v1936_v17, %v10318_v60  ;;  %v2013_v62 = vmul.f32 %v1936_v17, %v10316_v30  ;;  %v8887_v17 = vld [vmem:[%s13085_s6 + $0x54] sm:$0xf] }
 0x908   :  { %v1998_v54 = vadd.f32 %v1997_v19, %v1996_v1  ;;  %v2021_v40 = vadd.f32 %v2020_v24, %v2019_v14  ;;  %v2014_v30 = vmul.f32 %v1937_v7, %v10327_v38  ;;  %v1991_v60 = vmul.f32 %v1937_v7, %v1851_v28  ;;  %v8141_v24 = vld [vmem:[%s13085_s6 + $0x58] sm:$0xf0]  ;;  %v8886_v19 = vld [vmem:[%s13085_s6 + $0x44] sm:$0xf0]  ;;  %v8885_v7 = vld [vmem:[%s13085_s6 + $0x44] sm:$0xf] }
 0x909   :  { %v1960_v33 = vadd.f32 %v1959_v52, %v1958_v35  ;;  %v2001_v41 = vsel %vm55_vm0, %v1990_v31, 0.0  ;;  %v2024_v16 = vsel %vm55_vm0, %v2013_v62, 0.0  ;;  %v8144_v14 = vor.u32 %v8887_v17, %v8141_v24 }
 0x90a   :  { %v1794_v9 = vpop.permute.xlu1 %1793  ;;  %v2026_v21 = vsel %vm55_vm0, %v2014_v30, 0.0  ;;  %v2003_v51 = vsel %vm55_vm0, %v1991_v60, 0.0  ;;  %v8115_v60 = vld [vmem:[%s13085_s6 + $0x20] sm:$0xf] }
 0x90b   :  { %1797 = vst.msk [vmem:[#allocation3 + $0xc] sm:$0xf] %vm55_vm0, %v1794_v9  ;;  %v1916_v63 = vpop.permute.xlu2 %1915  ;;  %v1962_v39 = vadd.f32 %v1961_v48, %v1960_v33  ;;  %v1938_v33 = vld [vmem:[#allocation3 + $0x18] sm:$0xf]  ;;  %2139 = vmatpush.bf16.msra.mxu1 %v8144_v14 }
 0x90c   :  { %v1969_v43 = vmul.f32 %v1930_v56, %v1916_v63  ;;  %v2015_v37 = vmul.f32 %v1938_v33, %v1916_v63 }
 0x90d   :  { %2033 = vrot.lane.b32.xlu2 %v1962_v39, %s9343_s19  ;;  %v1992_v39 = vmul.f32 %v1938_v33, %v10324_v3 }
 0x90e   :  { %v1982_v0 = vsel %vm55_vm0, %v1969_v43, 0.0  ;;  %v2028_v4 = vsel %vm55_vm0, %v2015_v37, 0.0  ;;  %v8109_v37 = vld [vmem:[%s13085_s6 + $0x18] sm:$0xf0] }
 0x90f   :  { %v1983_v56 = vadd.f32 %v1982_v0, %v1981_v57  ;;  %v2005_v0 = vsel %vm55_vm0, %v1992_v39, 0.0  ;;  %v8879_v39 = vld [vmem:[%s13085_s6 + $0x14] sm:$0xf] }
 0x911   :  { %v1985_v18 = vadd.f32 %v1984_v44, %v1983_v56 }
 0x912   :  { %v1935_v58 = vld [vmem:[#allocation3 + $0xc] sm:$0xf] }
 0x913   :  { %2037 = vrot.lane.b32.xlu0 %v1985_v18, %s9342_s18  ;;  %v2012_v32 = vmul.f32 %v1935_v58, %v10338_v8  ;;  %v1989_v35 = vmul.f32 %v1935_v58, %v10310_v13  ;;  %v10402_v5 = vld [vmem:[#allocation3 + $0xc] sm:$0xf]  ;;  %v1939_v13 = vld [vmem:[#allocation3 + $0x1c] sm:$0xf]  ;;  %v8131_v18 = vld [vmem:[%s13085_s6 + $0x40] sm:$0xf] }
 0x914   :  { %v10404_v22 = vld [vmem:[#allocation3 + $0xc] sm:$0xf]  ;;  %v1993_v38 = vmul.f32 %v1939_v13, %v10362_v20  ;;  %v2016_v28 = vmul.f32 %v1939_v13, %v10358_v6  ;;  %v8139_v6 = vld [vmem:[%s13085_s6 + $0x50] sm:$0xf]  ;;  %v8888_v20 = vld [vmem:[%s13085_s6 + $0x54] sm:$0xf0]  ;;  %v8132_v31 = vor.u32 %v8886_v19, %v8131_v18 }
 0x915   :  { %v10406_v52 = vld [vmem:[#allocation3 + $0xc] sm:$0xf]  ;;  %v2022_v9 = vsel %vm55_vm0, %v2012_v32, 0.0  ;;  %v1999_v8 = vsel %vm55_vm0, %v1989_v35, 0.0  ;;  %v8140_v44 = vor.u32 %v8888_v20, %v8139_v6  ;;  %v8123_v32 = vld [vmem:[%s13085_s6 + $0x30] sm:$0xf] }
 0x916   :  { %4222 = vst.msk [vmem:[#allocation3 + $0xc] sm:$0xf] %vm55_vm0, %v13119_v55  ;;  %v2023_v48 = vadd.f32 %v2022_v9, %v2021_v40  ;;  %v2000_v15 = vadd.f32 %v1999_v8, %v1998_v54  ;;  %v2030_v3 = vsel %vm55_vm0, %v2016_v28, 0.0  ;;  %v2007_v63 = vsel %vm55_vm0, %v1993_v38, 0.0  ;;  %v8133_v58 = vld [vmem:[%s13085_s6 + $0x48] sm:$0xf0] }
 0x917   :  { %2126 = vmatpush.bf16.msra.mxu0 %v8140_v44  ;;  %v8136_v62 = vor.u32 %v8885_v7, %v8133_v58  ;;  %v8884_v35 = vld [vmem:[%s13085_s6 + $0x34] sm:$0xf0]  ;;  %v8883_v54 = vld [vmem:[%s13085_s6 + $0x34] sm:$0xf]  ;;  %v8125_v40 = vld [vmem:[%s13085_s6 + $0x38] sm:$0xf0] }
 0x918   :  { %v2025_v53 = vadd.f32 %v2024_v16, %v2023_v48  ;;  %v2002_v43 = vadd.f32 %v2001_v41, %v2000_v15  ;;  %v8124_v33 = vor.u32 %v8884_v35, %v8123_v32  ;;  %v8128_v30 = vor.u32 %v8883_v54, %v8125_v40  ;;  %v8882_v9 = vld [vmem:[%s13085_s6 + $0x24] sm:$0xf0]  ;;  %v8881_v8 = vld [vmem:[%s13085_s6 + $0x24] sm:$0xf]  ;;  %v8117_v48 = vld [vmem:[%s13085_s6 + $0x28] sm:$0xf0] }
 0x919   :  { %2140 = vmatpush.bf16.msra.mxu1 %v8136_v62  ;;  %v8116_v13 = vor.u32 %v8882_v9, %v8115_v60  ;;  %v8107_v15 = vld [vmem:[%s13085_s6 + $0x10] sm:$0xf]  ;;  %v8880_v41 = vld [vmem:[%s13085_s6 + $0x14] sm:$0xf0]  ;;  %v8120_v16 = vor.u32 %v8881_v8, %v8117_v48  ;;  %v8878_v38 = vld [vmem:[%s13085_s6 + $0x4] sm:$0xf0] }
 0x91a   :  { %v2027_v57 = vadd.f32 %v2026_v21, %v2025_v53  ;;  %v2004_v26 = vadd.f32 %v2003_v51, %v2002_v43  ;;  %v8108_v53 = vor.u32 %v8880_v41, %v8107_v15  ;;  %v8112_v43 = vor.u32 %v8879_v39, %v8109_v37  ;;  %v8099_v21 = vld [vmem:[%s13085_s6] sm:$0xf]  ;;  %v8877_v28 = vld [vmem:[%s13085_s6 + $0x4] sm:$0xf]  ;;  %v10517_v7 = vld [vmem:[%s13081_s2 + $0x28] sm:$0xff] }
 0x91b   :  { %2127 = vmatpush.bf16.msra.mxu0 %v8132_v31  ;;  %v8100_v51 = vor.u32 %v8878_v38, %v8099_v21  ;;  %v2249_v31 = vperm.slane %v10517_v7, 1  ;;  %v2256_v35 = vperm.slane %v10517_v7, 2  ;;  %v2242_v39 = vperm.slane %v10517_v7, 0  ;;  %v9083_v37 = vld [vmem:[%s13080_s1 + $0x4] ss:$0 sm:$0xff] }
 0x91c   :  { %v2029_v29 = vadd.f32 %v2028_v4, %v2027_v57  ;;  %v2006_v12 = vadd.f32 %v2005_v0, %v2004_v26  ;;  %v8101_v57 = vld [vmem:[%s13085_s6 + $0x8] sm:$0xf0]  ;;  %v8094_v0 = vld [vmem:[%s13109_s27 + $0x10] sm:$0xf]  ;;  %v2263_v38 = vperm.slane %v10517_v7, 3 }
 0x91d   :  { %2141 = vmatpush.bf16.msra.mxu1 %v8128_v30  ;;  %v8104_v26 = vor.u32 %v8877_v28, %v8101_v57  ;;  %v2270_v57 = vperm.slane %v10517_v7, 4 }
 0x91e   :  { %v2031_v56 = vadd.f32 %v2030_v3, %v2029_v29  ;;  %v2008_v1 = vadd.f32 %v2007_v63, %v2006_v12 }
 0x91f   :  { %2128 = vmatpush.bf16.msra.mxu0 %v8124_v33 }
 0x920   :  { %2205 = vrot.lane.b32.xlu0 %v2031_v56, %s9344_s20  ;;  %2195 = vrot.lane.b32.xlu2 %v2008_v1, %s9342_s18  ;;  %v10508_v56 = vld [vmem:[%s13086_s7] sm:$0x3] }
 0x921   :  { %2142 = vmatpush.bf16.msra.mxu1 %v8120_v16  ;;  %v2057_v1 = vperm.slane %v10508_v56, 0 }
 0x923   :  { %2129 = vmatpush.bf16.msra.mxu0 %v8116_v13 }
 0x925   :  { %2143 = vmatpush.bf16.msra.mxu1 %v8112_v43 }
 0x927   :  { %2130 = vmatpush.bf16.msra.mxu0 %v8108_v53  ;;  %v8151_v53 = vld [vmem:[%s13082_s3 + $0x28] sm:$0xff] }
 0x928   :  { %v2307_v43 = vperm.slane %v8151_v53, 1  ;;  %v2300_v21 = vperm.slane %v8151_v53, 0  ;;  %v2314_v28 = vperm.slane %v8151_v53, 2 }
 0x929   :  { %2144 = vmatpush.bf16.msra.mxu1 %v8104_v26  ;;  %v2284_v26 = vperm.slane %v10517_v7, 6 }
 0x92b   :  { %2131 = vmatpush.bf16.msra.mxu0 %v8100_v51  ;;  %v2328_v51 = vperm.slane %v8151_v53, 4 }
 0x967   :  { %v2034_v4 = vpop.permute.xlu2 %2033 }
 0x968   :  { %v2040_v29 = vsel %vm311_vm1, %v8094_v0, %v2034_v4  ;;  %v2335_v0 = vperm.slane %v8151_v53, 5  ;;  %v2349_v4 = vperm.slane %v8151_v53, 7 }
 0x97a   :  { %v2196_v13 = vpop.permute.xlu2 %2195 }
 0x985   :  { %v2038_v12 = vpop.permute.xlu0 %2037 }
 0x986   :  { %v2041_v3 = vsel %vm313_vm2, %v2040_v29, %v2038_v12  ;;  %v2291_v29 = vperm.slane %v10517_v7, 7 }
 0x987   :  { %v2042_v63 = vpack.c.bf16 %v2041_v3, %v2041_v3 }
 0x989   :  { %8145 = vmatmul.msk.bf16.vlgmr.msra.gmra.mxu0 %vm394_vm3, %v2042_v63  ;;  %8146 = vmatmul.msk.bf16.vlgmr.msra.gmra.mxu1 %vm394_vm3, %v2042_v63 }
 0x992   :  { %v2206_v48 = vpop.permute.xlu0 %2205 }
 0xa06   :  { %v2133_v6 = vpop.f32.mrf.mxu0  ;;  %v10511_v20 = vpop.f32.mrf.mxu1 }
 0xa07   :  { %v2134_v17 = vadd.f32 %v2133_v6, %v2057_v1 }
 0xa09   :  { %9150 = vtanh.f32 %v2134_v17  ;;  %v8147_v44 = vmul.f32 -1.442695, %v2134_v17 }
 0xa0b   :  { %9152 = vpow2.f32 %v8147_v44 }
 0xa0e   :  { %v2135_v24 = vpop.f32.mrf.mxu0  ;;  %v2148_v18 = vpop.f32.mrf.mxu1 }
 0xa0f   :  { %v9151_v19 = vpop.eup %9150 }
 0xa10   :  { %2190 = vrot.lane.b32.xlu1 %v9151_v19, %s9343_s19  ;;  %v2321_v19 = vperm.slane %v8151_v53, 3 }
 0xa11   :  { %v9153_v14 = vpop.eup %9152 }
 0xa12   :  { %v2154_v58 = vadd.f32 1.0, %v9153_v14  ;;  %v2277_v14 = vperm.slane %v10517_v7, 5 }
 0xa14   :  { %9154 = vrcp.f32 %v2154_v58  ;;  %v2166_v40 = vand.u32 2147483648, %v2154_v58  ;;  %v2164_v30 = vand.u32 2147483647, %v2154_v58  ;;  %vm2160_vm13 = vweird.f32 %v2154_v58 }
 0xa16   :  { %v2167_v9 = vor.u32 1.1754944e-38, %v2166_v40  ;;  %vm2165_vm15 = vcmp.eq.f32.partialorder %v2164_v30, 8.507059e+37 }
 0xa18   :  { %2254 = vperm.xlu1 %9047, %v2249_v31  }
 0xa1a   :  { %v9155_v62 = vpop.eup %9154 }
 0xa1b   :  { %v2156_v32 = vmul.f32 %v9155_v62, %v2154_v58  ;;  %vm2161_vm12 = vweird.f32 %v9155_v62  ;;  %v2342_v58 = vperm.slane %v8151_v53, 6 }
 0xa1c   :  { %vm2162_vm14 = vmor %vm2160_vm13, %vm2161_vm12 }
 0xa1d   :  { %v2157_v54 = vsub.f32 1.0, %v2156_v32 }
 0xa1f   :  { %v2158_v33 = vmul.f32 %v9155_v62, %v2157_v54 }
 0xa20   :  { %2261 = vperm.xlu1 %9047, %v2256_v35  }
 0xa21   :  { %v2159_v60 = vadd.f32 %v9155_v62, %v2158_v33 }
 0xa23   :  { %v2163_v8 = vsel %vm2162_vm14, %v9155_v62, %v2159_v60  ;;  %v2058_v62 = vperm.slane %v10508_v56, 1 }
 0xa24   :  { %v2168_v15 = vsel %vm2165_vm15, %v2167_v9, %v2163_v8 }
 0xa25   :  { %v2208_v41 = vmul.f32 %v2206_v48, %v2168_v15  ;;  %v2198_v16 = vmul.f32 %v2196_v13, %v2168_v15  ;;  %v2147_v35 = vadd.f32 %v10511_v20, %v2058_v62 }
 0xa27   :  { %2210 = vrot.lane.b32.xlu0 %v2208_v41, %s9342_s18  ;;  %2200 = vrot.lane.b32.xlu2 %v2198_v16, %s9344_s20  ;;  %v8148_v54 = vmul.f32 -1.442695, %v2147_v35 }
 0xa2f   :  { %2247 = vperm.xlu0 %9046, %v2242_v39   ;;  %1806 = vperm.xlu2 %9048, %v9083_v37  }
 0xa37   :  { %2312 = vperm.xlu0 %9046, %v2307_v43   ;;  %2305 = vperm.xlu2 %9048, %v2300_v21  }
 0xa3f   :  { %2268 = vperm.xlu0 %9046, %v2263_v38   ;;  %2319 = vperm.xlu2 %9048, %v2314_v28  }
 0xa47   :  { %2333 = vperm.xlu0 %9046, %v2328_v51   ;;  %2275 = vperm.xlu2 %9048, %v2270_v57  }
 0xa4f   :  { %2289 = vperm.xlu0 %9046, %v2284_v26   ;;  %2340 = vperm.xlu2 %9048, %v2335_v0  }
 0xa57   :  { %2354 = vperm.xlu0 %9046, %v2349_v4   ;;  %2296 = vperm.xlu2 %9048, %v2291_v29  }
 0xa81   :  { %v2201_v12 = vpop.permute.xlu2 %2200 }
 0xa82   :  { %v2191_v3 = vpop.permute.xlu1 %2190 }
 0xa83   :  { %v2193_v63 = vmul.f32 %v2191_v3, %v2168_v15 }
 0xa85   :  { %v2203_v1 = vadd.f32 %v2201_v12, %v2193_v63 }
 0xa89   :  { %v1807_v44 = vpop.permute.xlu2 %1806 }
 0xa8a   :  { %v2255_v48 = vpop.permute.xlu1 %2254 }
 0xa8b   :  { %v2373_v63 = vmul.f32 %v9916_v11, %v2255_v48 }
 0xa91   :  { %v2306_v7 = vpop.permute.xlu2 %2305 }
 0xa92   :  { %v2262_v16 = vpop.permute.xlu1 %2261 }
 0xa99   :  { %v2211_v6 = vpop.permute.xlu0 %2210  ;;  %v10547_v15 = vpop.permute.xlu2 %2319 }
 0xa9a   :  { %v2213_v17 = vadd.f32 %v2211_v6, %v2203_v1  ;;  %v2419_v1 = vmul.f32 %v9886_v27, %v2255_v48  ;;  %v2395_v6 = vmul.f32 %v9667_v34, %v2306_v7 }
 0xa9c   :  { %9156 = vtanh.f32 %v2213_v17  ;;  %v2223_v24 = vmul.f32 %v2213_v17, %v1807_v44  ;;  %v2441_v17 = vmul.f32 %v9723_v59, %v2306_v7  ;;  %v2403_v7 = vsel %vm55_vm0, %v2395_v6, 0.0 }
 0xa9d   :  { %9158 = vpow2.f32 %v8148_v54  ;;  %v8900_v54 = vld [vmem:[%s13085_s6 + $0x54] sm:$0xf0] }
 0xa9e   :  { %2225 = vrot.lane.b32.xlu0 %v2223_v24, %s9344_s20  ;;  %v2374_v24 = vmul.f32 %v10188_v25, %v2262_v16 }
 0xaa1   :  { %v2248_v31 = vpop.permute.xlu0 %2247  ;;  %v10551_v21 = vpop.permute.xlu2 %2275 }
 0xaa2   :  { %v9157_v18 = vpop.eup %9156  ;;  %v2372_v0 = vmul.f32 %v9667_v34, %v2248_v31  ;;  %v8194_v34 = vld [vmem:[%s13085_s6 + $0x50] sm:$0xf] }
 0xaa3   :  { %2216 = vrot.lane.b32.xlu1 %v9157_v18, %s9344_s20  ;;  %v9159_v33 = vpop.eup %9158 }
 0xaa4   :  { %v2173_v60 = vadd.f32 1.0, %v9159_v33  ;;  %v2380_v18 = vsel %vm55_vm0, %v2372_v0, 0.0  ;;  %v8195_v33 = vor.u32 %v8900_v54, %v8194_v34 }
 0xaa6   :  { %9160 = vrcp.f32 %v2173_v60  ;;  %v2185_v37 = vand.u32 2147483648, %v2173_v60  ;;  %vm2179_vm5 = vweird.f32 %v2173_v60  ;;  %v2183_v43 = vand.u32 2147483647, %v2173_v60  ;;  %2558 = vmatpush.bf16.msra.mxu2 %v8195_v33 }
 0xaa8   :  { %v2186_v28 = vor.u32 1.1754944e-38, %v2185_v37  ;;  %vm2184_vm7 = vcmp.eq.f32.partialorder %v2183_v43, 8.507059e+37 }
 0xaa9   :  { %v10538_v32 = vpop.permute.xlu0 %2312 }
 0xaab   :  { %2326 = vperm.xlu1 %9047, %v2321_v19   ;;  %v2418_v19 = vmul.f32 %v9723_v59, %v2248_v31  ;;  %v8899_v59 = vld [vmem:[%s13085_s6 + $0x54] sm:$0xf]  ;;  %v2427_v31 = vsel %vm55_vm0, %v2419_v1, 0.0 }
 0xaac   :  { %v9161_v8 = vpop.eup %9160 }
 0xaad   :  { %v2175_v13 = vmul.f32 %v9161_v8, %v2173_v60  ;;  %vm2180_vm4 = vweird.f32 %v9161_v8  ;;  %v8196_v60 = vld [vmem:[%s13085_s6 + $0x58] sm:$0xf0] }
 0xaae   :  { %vm2181_vm6 = vmor %vm2179_vm5, %vm2180_vm4  ;;  %v8199_v48 = vor.u32 %v8899_v59, %v8196_v60 }
 0xaaf   :  { %v2176_v56 = vsub.f32 1.0, %v2175_v13 }
 0xab0   :  { %2571 = vmatpush.bf16.msra.mxu3 %v8199_v48 }
 0xab1   :  { %v10541_v40 = vpop.permute.xlu0 %2268  ;;  %v2177_v20 = vmul.f32 %v9161_v8, %v2176_v56  ;;  %v2383_v56 = vsel %vm55_vm0, %v2374_v24, 0.0 }
 0xab2   :  { %v2375_v62 = vmul.f32 %v10345_v2, %v10541_v40 }
 0xab3   :  { %2282 = vperm.xlu1 %9047, %v2277_v14   ;;  %v2178_v39 = vadd.f32 %v9161_v8, %v2177_v20  ;;  %v2396_v14 = vmul.f32 %v9916_v11, %v10538_v32  ;;  %v2381_v11 = vsel %vm55_vm0, %v2373_v63, 0.0  ;;  %v2426_v20 = vsel %vm55_vm0, %v2418_v19, 0.0  ;;  %v2369_v19 = vld [vmem:[#allocation3 + $0x14] sm:$0xf] }
 0xab4   :  { %v2382_v13 = vadd.f32 %v2381_v11, %v2380_v18  ;;  %v2385_v43 = vsel %vm55_vm0, %v2375_v62, 0.0 }
 0xab5   :  { %v2182_v38 = vsel %vm2181_vm6, %v9161_v8, %v2178_v39  ;;  %v2449_v8 = vsel %vm55_vm0, %v2441_v17, 0.0  ;;  %v2442_v39 = vmul.f32 %v9886_v27, %v10538_v32 }
 0xab6   :  { %v2187_v51 = vsel %vm2184_vm7, %v2186_v28, %v2182_v38  ;;  %v2421_v38 = vmul.f32 %v10402_v5, %v10541_v40  ;;  %v2362_v28 = vld [vmem:[#allocation2 + $0x18] sm:$0xf]  ;;  %v2384_v1 = vadd.f32 %v2383_v56, %v2382_v13 }
 0xab7   :  { %v2450_v40 = vsel %vm55_vm0, %v2442_v39, 0.0 }
 0xab8   :  { %v2451_v33 = vadd.f32 %v2450_v40, %v2449_v8 }
 0xab9   :  { %v10543_v30 = vpop.permute.xlu0 %2333 }
 0xabb   :  { %2347 = vperm.xlu1 %9047, %v2342_v58   ;;  %v2420_v58 = vmul.f32 %v10089_v23, %v2262_v16  ;;  %v2404_v16 = vsel %vm55_vm0, %v2396_v14, 0.0  ;;  %v2363_v14 = vld [vmem:[#allocation2 + $0x1c] sm:$0xf] }
 0xabc   :  { %v2405_v63 = vadd.f32 %v2404_v16, %v2403_v7 }
 0xabd   :  { %v2429_v37 = vsel %vm55_vm0, %v2420_v58, 0.0 }
 0xac1   :  { %v10545_v9 = vpop.permute.xlu0 %2289 }
 0xac2   :  { %v2378_v62 = vmul.f32 %v2362_v28, %v10545_v9 }
 0xac9   :  { %v10549_v41 = vpop.permute.xlu0 %2354 }
 0xb10   :  { %v2226_v53 = vpop.permute.xlu0 %2225 }
 0xb11   :  { %2229 = vst.msk [vmem:[#allocation3 + $0x10] sm:$0xf] %vm55_vm0, %v2226_v53  ;;  %v2397_v53 = vmul.f32 %v10188_v25, %v10547_v15  ;;  %v2443_v25 = vmul.f32 %v10089_v23, %v10547_v15  ;;  %v2386_v23 = vadd.f32 %v2385_v43, %v2384_v1  ;;  %v2431_v15 = vsel %vm55_vm0, %v2421_v38, 0.0 }
 0xb13   :  { %v2406_v18 = vsel %vm55_vm0, %v2397_v53, 0.0  ;;  %v2452_v16 = vsel %vm55_vm0, %v2443_v25, 0.0  ;;  %v2370_v53 = vld [vmem:[#allocation3 + $0x18] sm:$0xf] }
 0xb14   :  { %v2424_v1 = vmul.f32 %v2370_v53, %v10545_v9 }
 0xb15   :  { %v2217_v57 = vpop.permute.xlu1 %2216 }
 0xb16   :  { %v2219_v26 = vmul.f32 %v2217_v57, %v2187_v51 }
 0xb18   :  { %v2220_v4 = vmul.f32 %v2219_v26, %v1807_v44  ;;  %v10555_v29 = vld [vmem:[#allocation3 + $0x10] sm:$0xf]  ;;  %v10568_v44 = vpop.permute.xlu2 %2340 }
 0xb19   :  { %v10557_v12 = vld [vmem:[#allocation3 + $0x10] sm:$0xf]  ;;  %v2422_v24 = vmul.f32 %v10555_v29, %v10551_v21  ;;  %v2445_v25 = vmul.f32 %v10555_v29, %v10543_v30 }
 0xb1a   :  { %v10559_v3 = vld [vmem:[#allocation3 + $0x10] sm:$0xf]  ;;  %2222 = vst.msk [vmem:[#allocation2 + $0x10] sm:$0xf] %vm55_vm0, %v2220_v4  ;;  %v2428_v4 = vadd.f32 %v2427_v31, %v2426_v20 }
 0xb1b   :  { %4223 = vst.msk [vmem:[#allocation3 + $0x10] sm:$0xf] %vm55_vm0, %v13119_v55  ;;  %v2433_v56 = vsel %vm55_vm0, %v2422_v24, 0.0 }
 0xb1c   :  { %v2430_v60 = vadd.f32 %v2429_v37, %v2428_v4 }
 0xb1d   :  { %v2327_v35 = vpop.permute.xlu1 %2326 }
 0xb1e   :  { %v2398_v57 = vmul.f32 %v10345_v2, %v2327_v35  ;;  %v2361_v2 = vld [vmem:[#allocation2 + $0x14] sm:$0xf]  ;;  %v2444_v59 = vmul.f32 %v10402_v5, %v2327_v35  ;;  %v2432_v39 = vadd.f32 %v2431_v15, %v2430_v60  ;;  %v2391_v35 = vsel %vm55_vm0, %v2378_v62, 0.0 }
 0xb1f   :  { %v2400_v5 = vmul.f32 %v2361_v2, %v10568_v44  ;;  %v2446_v62 = vmul.f32 %v2369_v19, %v10568_v44 }
 0xb20   :  { %v2297_v58 = vpop.permute.xlu2 %2296  ;;  %v2408_v54 = vsel %vm55_vm0, %v2398_v57, 0.0  ;;  %v2454_v8 = vsel %vm55_vm0, %v2444_v59, 0.0 }
 0xb21   :  { %v2360_v51 = vld [vmem:[#allocation2 + $0x10] sm:$0xf]  ;;  %v2379_v13 = vmul.f32 %v2363_v14, %v2297_v58 }
 0xb22   :  { %v2376_v26 = vmul.f32 %v2360_v51, %v10551_v21  ;;  %v10607_v0 = vld [vmem:[#allocation2 + $0x10] sm:$0xf]  ;;  %v2399_v6 = vmul.f32 %v2360_v51, %v10543_v30  ;;  %v2407_v21 = vadd.f32 %v2406_v18, %v2405_v63  ;;  %v2453_v51 = vadd.f32 %v2452_v16, %v2451_v33  ;;  %v2371_v63 = vld [vmem:[#allocation3 + $0x1c] sm:$0xf]  ;;  %v8898_v16 = vld [vmem:[%s13085_s6 + $0x44] sm:$0xf0] }
 0xb23   :  { %v10609_v27 = vld [vmem:[#allocation2 + $0x10] sm:$0xf]  ;;  %v2393_v40 = vsel %vm55_vm0, %v2379_v13, 0.0  ;;  %v2412_v18 = vsel %vm55_vm0, %v2400_v5, 0.0  ;;  %v2456_v30 = vsel %vm55_vm0, %v2445_v25, 0.0 }
 0xb24   :  { %v10611_v32 = vld [vmem:[#allocation2 + $0x10] sm:$0xf]  ;;  %v2387_v17 = vsel %vm55_vm0, %v2376_v26, 0.0  ;;  %v2410_v48 = vsel %vm55_vm0, %v2399_v6, 0.0  ;;  %v2409_v43 = vadd.f32 %v2408_v54, %v2407_v21  ;;  %v2434_v26 = vadd.f32 %v2433_v56, %v2432_v39 }
 0xb25   :  { %4215 = vst.msk [vmem:[#allocation2 + $0x10] sm:$0xf] %vm55_vm0, %v13119_v55  ;;  %v2283_v34 = vpop.permute.xlu1 %2282  ;;  %v2388_v7 = vadd.f32 %v2387_v17, %v2386_v23  ;;  %v2455_v6 = vadd.f32 %v2454_v8, %v2453_v51  ;;  %v2402_v23 = vmul.f32 %v2363_v14, %v10549_v41  ;;  %v2437_v54 = vsel %vm55_vm0, %v2424_v1, 0.0  ;;  %v8180_v8 = vld [vmem:[%s13085_s6 + $0x38] sm:$0xf0] }
 0xb26   :  { %v2377_v11 = vmul.f32 %v2361_v2, %v2283_v34  ;;  %v2423_v31 = vmul.f32 %v2369_v19, %v2283_v34  ;;  %v2411_v57 = vadd.f32 %v2410_v48, %v2409_v43  ;;  %v2425_v34 = vmul.f32 %v2371_v63, %v2297_v58  ;;  %v8178_v43 = vld [vmem:[%s13085_s6 + $0x30] sm:$0xf]  ;;  %v8172_v1 = vld [vmem:[%s13085_s6 + $0x28] sm:$0xf0] }
 0xb27   :  { %v2416_v60 = vsel %vm55_vm0, %v2402_v23, 0.0  ;;  %v8162_v25 = vld [vmem:[%s13085_s6 + $0x10] sm:$0xf]  ;;  %v8154_v23 = vld [vmem:[%s13085_s6] sm:$0xf] }
 0xb28   :  { %v2389_v20 = vsel %vm55_vm0, %v2377_v11, 0.0  ;;  %v2435_v37 = vsel %vm55_vm0, %v2423_v31, 0.0  ;;  %v2413_v9 = vadd.f32 %v2412_v18, %v2411_v57  ;;  %v2457_v11 = vadd.f32 %v2456_v30, %v2455_v6  ;;  %v8170_v57 = vld [vmem:[%s13085_s6 + $0x20] sm:$0xf]  ;;  %v8149_v30 = vld [vmem:[%s13109_s27 + $0x14] sm:$0xf] }
 0xb29   :  { %v2390_v38 = vadd.f32 %v2389_v20, %v2388_v7  ;;  %v2436_v2 = vadd.f32 %v2435_v37, %v2434_v26  ;;  %v2439_v44 = vsel %vm55_vm0, %v2425_v34, 0.0  ;;  %v2448_v7 = vmul.f32 %v2371_v63, %v10549_v41  ;;  %v8186_v20 = vld [vmem:[%s13085_s6 + $0x40] sm:$0xf]  ;;  %v8897_v41 = vld [vmem:[%s13085_s6 + $0x44] sm:$0xf] }
 0xb2a   :  { %v8187_v39 = vor.u32 %v8898_v16, %v8186_v20  ;;  %v8894_v26 = vld [vmem:[%s13085_s6 + $0x24] sm:$0xf0] }
 0xb2b   :  { %v2392_v4 = vadd.f32 %v2391_v35, %v2390_v38  ;;  %v2438_v31 = vadd.f32 %v2437_v54, %v2436_v2  ;;  %v2462_v48 = vsel %vm55_vm0, %v2448_v7, 0.0  ;;  %v8896_v38 = vld [vmem:[%s13085_s6 + $0x34] sm:$0xf0]  ;;  %v8895_v35 = vld [vmem:[%s13085_s6 + $0x34] sm:$0xf]  ;;  %v8171_v63 = vor.u32 %v8894_v26, %v8170_v57 }
 0xb2c   :  { %2559 = vmatpush.bf16.msra.mxu2 %v8187_v39  ;;  %v8179_v37 = vor.u32 %v8896_v38, %v8178_v43  ;;  %v8183_v51 = vor.u32 %v8895_v35, %v8180_v8  ;;  %v8891_v2 = vld [vmem:[%s13085_s6 + $0x14] sm:$0xf] }
 0xb2d   :  { %v2348_v17 = vpop.permute.xlu1 %2347  ;;  %v2394_v24 = vadd.f32 %v2393_v40, %v2392_v4  ;;  %v2440_v21 = vadd.f32 %v2439_v44, %v2438_v31  ;;  %v8893_v4 = vld [vmem:[%s13085_s6 + $0x24] sm:$0xf]  ;;  %v8892_v40 = vld [vmem:[%s13085_s6 + $0x14] sm:$0xf0] }
 0xb2e   :  { %v2401_v15 = vmul.f32 %v2362_v28, %v2348_v17  ;;  %v2447_v59 = vmul.f32 %v2370_v53, %v2348_v17  ;;  %v2458_v28 = vsel %vm55_vm0, %v2446_v62, 0.0  ;;  %v8188_v53 = vld [vmem:[%s13085_s6 + $0x48] sm:$0xf0]  ;;  %v8175_v6 = vor.u32 %v8893_v4, %v8172_v1  ;;  %v8164_v17 = vld [vmem:[%s13085_s6 + $0x18] sm:$0xf0] }
 0xb2f   :  { %2465 = vrot.lane.b32.xlu1 %v2394_v24, %s9343_s19  ;;  %v2459_v58 = vadd.f32 %v2458_v28, %v2457_v11  ;;  %v8191_v5 = vor.u32 %v8897_v41, %v8188_v53  ;;  %v8163_v24 = vor.u32 %v8892_v40, %v8162_v25  ;;  %v8167_v18 = vor.u32 %v8891_v2, %v8164_v17  ;;  %v8889_v62 = vld [vmem:[%s13085_s6 + $0x4] sm:$0xf] }
 0xb30   :  { %v2414_v29 = vsel %vm55_vm0, %v2401_v15, 0.0  ;;  %v2460_v19 = vsel %vm55_vm0, %v2447_v59, 0.0  ;;  %2560 = vmatpush.bf16.msra.mxu2 %v8179_v37  ;;  %v8890_v15 = vld [vmem:[%s13085_s6 + $0x4] sm:$0xf0]  ;;  %v8206_v37 = vld [vmem:[%s13082_s3 + $0x30] sm:$0xff] }
 0xb31   :  { %v2415_v33 = vadd.f32 %v2414_v29, %v2413_v9  ;;  %v2461_v13 = vadd.f32 %v2460_v19, %v2459_v58  ;;  %2572 = vmatpush.bf16.msra.mxu3 %v8191_v5  ;;  %v8155_v34 = vor.u32 %v8890_v15, %v8154_v23  ;;  %v8156_v9 = vld [vmem:[%s13085_s6 + $0x8] sm:$0xf0]  ;;  %v2753_v1 = vperm.slane %v8206_v37, 3  ;;  %v9084_v2 = vld [vmem:[%s13080_s1 + $0x5] ss:$0 sm:$0xff] }
 0xb32   :  { %v8159_v54 = vor.u32 %v8889_v62, %v8156_v9  ;;  %v2739_v17 = vperm.slane %v8206_v37, 1  ;;  %v2746_v23 = vperm.slane %v8206_v37, 2  ;;  %v2760_v15 = vperm.slane %v8206_v37, 4 }
 0xb33   :  { %v2417_v14 = vadd.f32 %v2416_v60, %v2415_v33  ;;  %v2463_v56 = vadd.f32 %v2462_v48, %v2461_v13  ;;  %v10725_v60 = vld [vmem:[%s13086_s7] sm:$0x3]  ;;  %v2767_v9 = vperm.slane %v8206_v37, 5 }
 0xb34   :  { %2561 = vmatpush.bf16.msra.mxu2 %v8171_v63 }
 0xb35   :  { %2469 = vrot.lane.b32.xlu2 %v2417_v14, %s9342_s18  ;;  %2573 = vmatpush.bf16.msra.mxu3 %v8183_v51  ;;  %v2489_v14 = vperm.slane %v10725_v60, 0 }
 0xb37   :  { %2627 = vrot.lane.b32.xlu1 %v2440_v21, %s9342_s18 }
 0xb38   :  { %2562 = vmatpush.bf16.msra.mxu2 %v8163_v24  ;;  %v2732_v24 = vperm.slane %v8206_v37, 0 }
 0xb39   :  { %2574 = vmatpush.bf16.msra.mxu3 %v8175_v6 }
 0xb3c   :  { %2563 = vmatpush.bf16.msra.mxu2 %v8155_v34 }
 0xb3d   :  { %2637 = vrot.lane.b32.xlu2 %v2463_v56, %s9344_s20  ;;  %2575 = vmatpush.bf16.msra.mxu3 %v8167_v18  ;;  %v10734_v56 = vld [vmem:[%s13081_s2 + $0x30] sm:$0xff] }
 0xb3e   :  { %v2681_v16 = vperm.slane %v10734_v56, 1  ;;  %v2688_v53 = vperm.slane %v10734_v56, 2  ;;  %v2674_v6 = vperm.slane %v10734_v56, 0  ;;  %v2695_v18 = vperm.slane %v10734_v56, 3 }
 0xb3f   :  { %v2702_v62 = vperm.slane %v10734_v56, 4  ;;  %v2716_v34 = vperm.slane %v10734_v56, 6 }
 0xb41   :  { %2576 = vmatpush.bf16.msra.mxu3 %v8159_v54  ;;  %v2781_v54 = vperm.slane %v8206_v37, 7 }
 0xb8f   :  { %v2470_v59 = vpop.permute.xlu2 %2469 }
 0xb97   :  { %v2638_v26 = vpop.permute.xlu2 %2637 }
 0xba1   :  { %v2466_v29 = vpop.permute.xlu1 %2465 }
 0xba2   :  { %v2472_v11 = vsel %vm311_vm1, %v8149_v30, %v2466_v29  ;;  %v2723_v30 = vperm.slane %v10734_v56, 7 }
 0xba3   :  { %v2473_v31 = vsel %vm313_vm2, %v2472_v11, %v2470_v59 }
 0xba4   :  { %v2474_v33 = vpack.c.bf16 %v2473_v31, %v2473_v31 }
 0xba6   :  { %8200 = vmatmul.msk.bf16.vlgmr.msra.gmra.mxu2 %vm394_vm3, %v2474_v33  ;;  %8201 = vmatmul.msk.bf16.vlgmr.msra.gmra.mxu3 %vm394_vm3, %v2474_v33 }
 0xba9   :  { %v2628_v4 = vpop.permute.xlu1 %2627 }
 0xc29   :  { %v2565_v28 = vpop.f32.mrf.mxu2  ;;  %v10728_v44 = vpop.f32.mrf.mxu3 }
 0xc2a   :  { %v2566_v19 = vadd.f32 %v2565_v28, %v2489_v14 }
 0xc2c   :  { %9162 = vtanh.f32 %v2566_v19  ;;  %v8202_v58 = vmul.f32 -1.442695, %v2566_v19 }
 0xc2e   :  { %9164 = vpow2.f32 %v8202_v58 }
 0xc31   :  { %v2567_v21 = vpop.f32.mrf.mxu2  ;;  %v2580_v7 = vpop.f32.mrf.mxu3 }
 0xc32   :  { %v9163_v13 = vpop.eup %9162  ;;  %v2709_v21 = vperm.slane %v10734_v56, 5  ;;  %v2774_v7 = vperm.slane %v8206_v37, 6 }
 0xc33   :  { %2622 = vrot.lane.b32.xlu0 %v9163_v13, %s9343_s19 }
 0xc34   :  { %v9165_v48 = vpop.eup %9164 }
 0xc35   :  { %v2586_v20 = vadd.f32 1.0, %v9165_v48 }
 0xc37   :  { %9166 = vrcp.f32 %v2586_v20  ;;  %v2598_v38 = vand.u32 2147483648, %v2586_v20  ;;  %v2596_v35 = vand.u32 2147483647, %v2586_v20  ;;  %vm2592_vm9 = vweird.f32 %v2586_v20 }
 0xc39   :  { %v2599_v51 = vor.u32 1.1754944e-38, %v2598_v38  ;;  %vm2597_vm11 = vcmp.eq.f32.partialorder %v2596_v35, 8.507059e+37 }
 0xc3b   :  { %2686 = vperm.xlu0 %9046, %v2681_v16   ;;  %v2490_v16 = vperm.slane %v10725_v60, 1 }
 0xc3d   :  { %v9167_v41 = vpop.eup %9166 }
 0xc3e   :  { %v2588_v39 = vmul.f32 %v9167_v41, %v2586_v20  ;;  %vm2593_vm8 = vweird.f32 %v9167_v41 }
 0xc3f   :  { %vm2594_vm10 = vmor %vm2592_vm9, %vm2593_vm8 }
 0xc40   :  { %v2589_v43 = vsub.f32 1.0, %v2588_v39  ;;  %v2579_v39 = vadd.f32 %v10728_v44, %v2490_v16  ;;  %v8910_v16 = vld [vmem:[%s13085_s6 + $0x44] sm:$0xf0] }
 0xc42   :  { %v2590_v5 = vmul.f32 %v9167_v41, %v2589_v43 }
 0xc43   :  { %2693 = vperm.xlu0 %9046, %v2688_v53   ;;  %v8203_v53 = vmul.f32 -1.442695, %v2579_v39 }
 0xc44   :  { %v2591_v8 = vadd.f32 %v9167_v41, %v2590_v5 }
 0xc46   :  { %v2595_v57 = vsel %vm2594_vm10, %v9167_v41, %v2591_v8 }
 0xc47   :  { %v2600_v63 = vsel %vm2597_vm11, %v2599_v51, %v2595_v57 }
 0xc48   :  { %v2640_v25 = vmul.f32 %v2638_v26, %v2600_v63  ;;  %v2630_v40 = vmul.f32 %v2628_v4, %v2600_v63 }
 0xc4a   :  { %2642 = vrot.lane.b32.xlu2 %v2640_v25, %s9342_s18  ;;  %2632 = vrot.lane.b32.xlu1 %v2630_v40, %s9344_s20 }
 0xc4b   :  { %2758 = vperm.xlu0 %9046, %v2753_v1  }
 0xc52   :  { %2679 = vperm.xlu2 %9048, %v2674_v6   ;;  %2238 = vperm.xlu1 %9047, %v9084_v2  }
 0xc5a   :  { %2744 = vperm.xlu2 %9048, %v2739_v17   ;;  %2737 = vperm.xlu1 %9047, %v2732_v24  }
 0xc62   :  { %2700 = vperm.xlu2 %9048, %v2695_v18   ;;  %2751 = vperm.xlu1 %9047, %v2746_v23  }
 0xc6a   :  { %2765 = vperm.xlu2 %9048, %v2760_v15   ;;  %2707 = vperm.xlu1 %9047, %v2702_v62  }
 0xc72   :  { %2721 = vperm.xlu2 %9048, %v2716_v34   ;;  %2772 = vperm.xlu1 %9047, %v2767_v9  }
 0xc7a   :  { %2786 = vperm.xlu2 %9048, %v2781_v54   ;;  %2728 = vperm.xlu1 %9047, %v2723_v30  }
 0xca4   :  { %v2643_v33 = vpop.permute.xlu2 %2642 }
 0xca5   :  { %v2623_v29 = vpop.permute.xlu0 %2622 }
 0xca6   :  { %v2625_v59 = vmul.f32 %v2623_v29, %v2600_v63 }
 0xcac   :  { %v2680_v13 = vpop.permute.xlu2 %2679 }
 0xcad   :  { %v2687_v35 = vpop.permute.xlu0 %2686  ;;  %v2804_v17 = vmul.f32 %v9669_v36, %v2680_v13  ;;  %v2850_v18 = vmul.f32 %v9725_v61, %v2680_v13  ;;  %v8241_v13 = vld [vmem:[%s13085_s6 + $0x40] sm:$0xf] }
 0xcae   :  { %v2805_v23 = vmul.f32 %v9919_v42, %v2687_v35  ;;  %v2851_v34 = vmul.f32 %v9889_v10, %v2687_v35 }
 0xcaf   :  { %v2812_v62 = vsel %vm55_vm0, %v2804_v17, 0.0  ;;  %v2858_v30 = vsel %vm55_vm0, %v2850_v18, 0.0  ;;  %v8233_v18 = vld [vmem:[%s13085_s6 + $0x30] sm:$0xf] }
 0xcb0   :  { %v2813_v29 = vsel %vm55_vm0, %v2805_v23, 0.0  ;;  %v2859_v39 = vsel %vm55_vm0, %v2851_v34, 0.0  ;;  %v8908_v23 = vld [vmem:[%s13085_s6 + $0x34] sm:$0xf0] }
 0xcb4   :  { %v10757_v48 = vpop.permute.xlu2 %2744 }
 0xcb5   :  { %v2694_v57 = vpop.permute.xlu0 %2693  ;;  %v2828_v9 = vmul.f32 %v9919_v42, %v10757_v48  ;;  %v8249_v42 = vld [vmem:[%s13085_s6 + $0x50] sm:$0xf]  ;;  %v2874_v34 = vmul.f32 %v9889_v10, %v10757_v48 }
 0xcbc   :  { %v2633_v11 = vpop.permute.xlu1 %2632  ;;  %v10759_v20 = vpop.permute.xlu2 %2700 }
 0xcbd   :  { %v2635_v31 = vadd.f32 %v2633_v11, %v2625_v59  ;;  %v2759_v25 = vpop.permute.xlu0 %2758  ;;  %v2806_v59 = vmul.f32 %v10190_v50, %v2694_v57 }
 0xcbf   :  { %v2645_v14 = vadd.f32 %v2643_v33, %v2635_v31  ;;  %v2852_v31 = vmul.f32 %v10091_v49, %v2694_v57 }
 0xcc1   :  { %9168 = vtanh.f32 %v2645_v14 }
 0xcc2   :  { %9170 = vpow2.f32 %v8203_v53  ;;  %v2836_v53 = vsel %vm55_vm0, %v2828_v9, 0.0  ;;  %v8907_v9 = vld [vmem:[%s13085_s6 + $0x34] sm:$0xf] }
 0xcc4   :  { %v10751_v28 = vpop.permute.xlu1 %2238  ;;  %v10762_v41 = vpop.permute.xlu2 %2765 }
 0xcc5   :  { %v2655_v19 = vmul.f32 %v2645_v14, %v10751_v28 }
 0xcc7   :  { %v9169_v58 = vpop.eup %9168  ;;  %2657 = vrot.lane.b32.xlu2 %v2655_v19, %s9344_s20 }
 0xcc8   :  { %2648 = vrot.lane.b32.xlu0 %v9169_v58, %s9344_s20  ;;  %v9171_v38 = vpop.eup %9170  ;;  %v8912_v58 = vld [vmem:[%s13085_s6 + $0x54] sm:$0xf0] }
 0xcc9   :  { %v2605_v5 = vadd.f32 1.0, %v9171_v38  ;;  %v2807_v38 = vmul.f32 %v10350_v45, %v10759_v20 }
 0xccb   :  { %9172 = vrcp.f32 %v2605_v5  ;;  %v2615_v2 = vand.u32 2147483647, %v2605_v5  ;;  %v2617_v24 = vand.u32 2147483648, %v2605_v5  ;;  %vm2611_vm13 = vweird.f32 %v2605_v5 }
 0xccc   :  { %v10765_v43 = vpop.permute.xlu2 %2721  ;;  %v10769_v8 = vpop.permute.xlu1 %2737 }
 0xccd   :  { %vm2616_vm15 = vcmp.eq.f32.partialorder %v2615_v2, 8.507059e+37  ;;  %v2618_v54 = vor.u32 1.1754944e-38, %v2617_v24  ;;  %v2827_v11 = vmul.f32 %v9669_v36, %v10769_v8  ;;  %v2853_v2 = vmul.f32 %v10404_v22, %v10759_v20 }
 0xcce   :  { %v2873_v20 = vmul.f32 %v9725_v61, %v10769_v8 }
 0xccf   :  { %v2835_v57 = vsel %vm55_vm0, %v2827_v11, 0.0  ;;  %v8234_v11 = vor.u32 %v8908_v23, %v8233_v18  ;;  %v8903_v23 = vld [vmem:[%s13085_s6 + $0x14] sm:$0xf] }
 0xcd0   :  { %2714 = vperm.xlu0 %9046, %v2709_v21   ;;  %v8911_v21 = vld [vmem:[%s13085_s6 + $0x54] sm:$0xf]  ;;  %v2837_v10 = vadd.f32 %v2836_v53, %v2835_v57 }
 0xcd1   :  { %v9173_v60 = vpop.eup %9172 }
 0xcd2   :  { %v2607_v51 = vmul.f32 %v9173_v60, %v2605_v5  ;;  %vm2612_vm12 = vweird.f32 %v9173_v60 }
 0xcd3   :  { %vm2613_vm14 = vmor %vm2611_vm13, %vm2612_vm12 }
 0xcd4   :  { %v10767_v56 = vpop.permute.xlu2 %2786  ;;  %v10772_v26 = vpop.permute.xlu1 %2751  ;;  %v2608_v63 = vsub.f32 1.0, %v2607_v51  ;;  %v2815_v51 = vsel %vm55_vm0, %v2806_v59, 0.0  ;;  %v2817_v59 = vsel %vm55_vm0, %v2807_v38, 0.0 }
 0xcd5   :  { %v2829_v33 = vmul.f32 %v10190_v50, %v10772_v26  ;;  %v8251_v50 = vld [vmem:[%s13085_s6 + $0x58] sm:$0xf0]  ;;  %v2875_v61 = vmul.f32 %v10091_v49, %v10772_v26  ;;  %v2882_v49 = vsel %vm55_vm0, %v2874_v34, 0.0 }
 0xcd6   :  { %v2609_v1 = vmul.f32 %v9173_v60, %v2608_v63  ;;  %v8254_v35 = vor.u32 %v8911_v21, %v8251_v50  ;;  %v8227_v21 = vld [vmem:[%s13085_s6 + $0x28] sm:$0xf0]  ;;  %v2831_v50 = vmul.f32 %v10607_v0, %v10762_v41  ;;  %v2795_v34 = vld [vmem:[#allocation2 + $0x1c] sm:$0xf] }
 0xcd7   :  { %v2838_v17 = vsel %vm55_vm0, %v2829_v33, 0.0 }
 0xcd8   :  { %2779 = vperm.xlu0 %9046, %v2774_v7   ;;  %v2610_v6 = vadd.f32 %v9173_v60, %v2609_v1  ;;  %v8250_v7 = vor.u32 %v8912_v58, %v8249_v42  ;;  %v8242_v1 = vor.u32 %v8910_v16, %v8241_v13  ;;  %3003 = vmatpush.bf16.msrb.mxu1 %v8254_v35  ;;  %v2881_v42 = vsel %vm55_vm0, %v2873_v20, 0.0  ;;  %v8905_v58 = vld [vmem:[%s13085_s6 + $0x24] sm:$0xf]  ;;  %v8217_v35 = vld [vmem:[%s13085_s6 + $0x10] sm:$0xf] }
 0xcd9   :  { %v2839_v33 = vadd.f32 %v2838_v17, %v2837_v10 }
 0xcda   :  { %v2614_v15 = vsel %vm2613_vm14, %v9173_v60, %v2610_v6  ;;  %v8243_v60 = vld [vmem:[%s13085_s6 + $0x48] sm:$0xf0]  ;;  %2990 = vmatpush.bf16.msrb.mxu0 %v8250_v7  ;;  %v2861_v6 = vsel %vm55_vm0, %v2852_v31, 0.0  ;;  %v2863_v31 = vsel %vm55_vm0, %v2853_v2, 0.0  ;;  %v2877_v2 = vmul.f32 %v10557_v12, %v10762_v41 }
 0xcdb   :  { %v2619_v14 = vsel %vm2616_vm15, %v2618_v54, %v2614_v15  ;;  %v2860_v15 = vadd.f32 %v2859_v39, %v2858_v30  ;;  %v8235_v54 = vld [vmem:[%s13085_s6 + $0x38] sm:$0xf0]  ;;  %v2876_v30 = vmul.f32 %v10404_v22, %v2759_v25  ;;  %v8225_v22 = vld [vmem:[%s13085_s6 + $0x20] sm:$0xf]  ;;  %v2884_v39 = vsel %vm55_vm0, %v2875_v61, 0.0 }
 0xcdc   :  { %v10780_v40 = vpop.permute.xlu1 %2707 }
 0xcdd   :  { %v2808_v8 = vmul.f32 %v10607_v0, %v10780_v40  ;;  %v2862_v26 = vadd.f32 %v2861_v6, %v2860_v15  ;;  %v2886_v7 = vsel %vm55_vm0, %v2876_v30, 0.0  ;;  %v2854_v13 = vmul.f32 %v10557_v12, %v10780_v40  ;;  %v2802_v30 = vld [vmem:[#allocation3 + $0x18] sm:$0xf] }
 0xcde   :  { %2991 = vmatpush.bf16.msrb.mxu0 %v8242_v1  ;;  %v2842_v15 = vsel %vm55_vm0, %v2831_v50, 0.0 }
 0xcdf   :  { %v2864_v16 = vadd.f32 %v2863_v31, %v2862_v26  ;;  %v2819_v53 = vsel %vm55_vm0, %v2808_v8, 0.0  ;;  %v2865_v20 = vsel %vm55_vm0, %v2854_v13, 0.0  ;;  %v2834_v31 = vmul.f32 %v2795_v34, %v10767_v56 }
 0xce2   :  { %2992 = vmatpush.bf16.msrb.mxu0 %v8234_v11 }
 0xce4   :  { %v10819_v5 = vpop.permute.xlu1 %2772 }
 0xd21   :  { %v2658_v37 = vpop.permute.xlu2 %2657 }
 0xd22   :  { %2661 = vst.msk [vmem:[#allocation3 + $0x14] sm:$0xf] %vm55_vm0, %v2658_v37  ;;  %v8909_v37 = vld [vmem:[%s13085_s6 + $0x44] sm:$0xf] }
 0xd23   :  { %v8246_v24 = vor.u32 %v8909_v37, %v8243_v60  ;;  %v8904_v37 = vld [vmem:[%s13085_s6 + $0x14] sm:$0xf0]  ;;  %v2883_v60 = vadd.f32 %v2882_v49, %v2881_v42 }
 0xd25   :  { %3004 = vmatpush.bf16.msrb.mxu1 %v8246_v24  ;;  %v2885_v12 = vadd.f32 %v2884_v39, %v2883_v60 }
 0xd29   :  { %v10774_v44 = vld [vmem:[#allocation3 + $0x14] sm:$0xf] }
 0xd2a   :  { %v10776_v4 = vld [vmem:[#allocation3 + $0x14] sm:$0xf] }
 0xd2b   :  { %4224 = vst.msk [vmem:[#allocation3 + $0x14] sm:$0xf] %vm55_vm0, %v13119_v55 }
 0xd3a   :  { %v2649_v19 = vpop.permute.xlu0 %2648 }
 0xd3b   :  { %v2651_v36 = vmul.f32 %v2649_v19, %v2619_v14 }
 0xd3d   :  { %v2652_v63 = vmul.f32 %v2651_v36, %v10751_v28  ;;  %v2814_v28 = vadd.f32 %v2813_v29, %v2812_v62  ;;  %v2830_v62 = vmul.f32 %v10350_v45, %v2759_v25  ;;  %v10854_v29 = vld [vmem:[#allocation2 + $0x18] sm:$0xf]  ;;  %v8238_v45 = vor.u32 %v8907_v9, %v8235_v54  ;;  %v8906_v25 = vld [vmem:[%s13085_s6 + $0x24] sm:$0xf0] }
 0xd3e   :  { %v8226_v38 = vor.u32 %v8906_v25, %v8225_v22  ;;  %v2810_v0 = vmul.f32 %v10854_v29, %v10765_v43  ;;  %v2887_v22 = vadd.f32 %v2886_v7, %v2885_v12  ;;  %v2866_v25 = vadd.f32 %v2865_v20, %v2864_v16  ;;  %v2803_v7 = vld [vmem:[#allocation3 + $0x1c] sm:$0xf] }
 0xd3f   :  { %2654 = vst.msk [vmem:[#allocation2 + $0x14] sm:$0xf] %vm55_vm0, %v2652_v63  ;;  %v2816_v48 = vadd.f32 %v2815_v51, %v2814_v28  ;;  %v2840_v36 = vsel %vm55_vm0, %v2830_v62, 0.0  ;;  %v2729_v51 = vpop.permute.xlu1 %2728  ;;  %3005 = vmatpush.bf16.msrb.mxu1 %v8238_v45  ;;  %v8230_v63 = vor.u32 %v8905_v58, %v8227_v21  ;;  %v8219_v28 = vld [vmem:[%s13085_s6 + $0x18] sm:$0xf0]  ;;  %v8218_v62 = vor.u32 %v8904_v37, %v8217_v35 }
 0xd40   :  { %v2841_v40 = vadd.f32 %v2840_v36, %v2839_v33  ;;  %v2811_v9 = vmul.f32 %v2795_v34, %v2729_v51  ;;  %2993 = vmatpush.bf16.msrb.mxu0 %v8226_v38  ;;  %v2823_v10 = vsel %vm55_vm0, %v2810_v0, 0.0  ;;  %v8222_v11 = vor.u32 %v8903_v23, %v8219_v28  ;;  %v8204_v28 = vld [vmem:[%s13109_s27 + $0x18] sm:$0xf] }
 0xd41   :  { %v2818_v19 = vadd.f32 %v2817_v59, %v2816_v48  ;;  %v2878_v45 = vmul.f32 %v10774_v44, %v10819_v5  ;;  %v2880_v0 = vmul.f32 %v2803_v7, %v10767_v56  ;;  %v8901_v56 = vld [vmem:[%s13085_s6 + $0x4] sm:$0xf] }
 0xd42   :  { %v2715_v14 = vpop.permute.xlu0 %2714  ;;  %v2843_v8 = vadd.f32 %v2842_v15, %v2841_v40  ;;  %v2825_v42 = vsel %vm55_vm0, %v2811_v9, 0.0  ;;  %v10954_v9 = vld [vmem:[%s13086_s7] sm:$0x3] }
 0xd43   :  { %v2855_v24 = vmul.f32 %v10774_v44, %v2715_v14  ;;  %v2820_v41 = vadd.f32 %v2819_v53, %v2818_v19  ;;  %3006 = vmatpush.bf16.msrb.mxu1 %v8230_v63  ;;  %v2856_v19 = vmul.f32 %v2802_v30, %v10765_v43  ;;  %v2848_v44 = vsel %vm55_vm0, %v2834_v31, 0.0  ;;  %v10963_v31 = vld [vmem:[%s13081_s2 + $0x38] sm:$0xff] }
 0xd44   :  { %2994 = vmatpush.bf16.msrb.mxu0 %v8218_v62  ;;  %v2857_v53 = vmul.f32 %v2803_v7, %v2729_v51  ;;  %v2894_v63 = vsel %vm55_vm0, %v2880_v0, 0.0  ;;  %v8209_v51 = vld [vmem:[%s13085_s6] sm:$0xf]  ;;  %v3134_v0 = vperm.slane %v10963_v31, 4 }
 0xd45   :  { %v2867_v33 = vsel %vm55_vm0, %v2855_v24, 0.0  ;;  %v2869_v39 = vsel %vm55_vm0, %v2856_v19, 0.0 }
 0xd46   :  { %v2793_v57 = vld [vmem:[#allocation2 + $0x14] sm:$0xf]  ;;  %v2868_v36 = vadd.f32 %v2867_v33, %v2866_v25  ;;  %v2871_v40 = vsel %vm55_vm0, %v2857_v53, 0.0  ;;  %v3120_v25 = vperm.slane %v10963_v31, 2 }
 0xd47   :  { %v10891_v1 = vld [vmem:[#allocation2 + $0x14] sm:$0xf]  ;;  %v2809_v17 = vmul.f32 %v2793_v57, %v2715_v14  ;;  %v2832_v18 = vmul.f32 %v2793_v57, %v10819_v5  ;;  %3007 = vmatpush.bf16.msrb.mxu1 %v8222_v11  ;;  %v2890_v5 = vsel %vm55_vm0, %v2878_v45, 0.0 }
 0xd48   :  { %v10893_v6 = vld [vmem:[#allocation2 + $0x14] sm:$0xf]  ;;  %v2870_v35 = vadd.f32 %v2869_v39, %v2868_v36  ;;  %v3106_v39 = vperm.slane %v10963_v31, 0 }
 0xd49   :  { %4216 = vst.msk [vmem:[#allocation2 + $0x14] sm:$0xf] %vm55_vm0, %v13119_v55  ;;  %v2821_v54 = vsel %vm55_vm0, %v2809_v17, 0.0  ;;  %v2844_v59 = vsel %vm55_vm0, %v2832_v18, 0.0  ;;  %v8902_v17 = vld [vmem:[%s13085_s6 + $0x4] sm:$0xf0] }
 0xd4a   :  { %v2822_v48 = vadd.f32 %v2821_v54, %v2820_v41  ;;  %v2780_v61 = vpop.permute.xlu0 %2779  ;;  %v2845_v26 = vadd.f32 %v2844_v59, %v2843_v8  ;;  %v2872_v57 = vadd.f32 %v2871_v40, %v2870_v35  ;;  %v8210_v24 = vor.u32 %v8902_v17, %v8209_v51  ;;  %v8211_v18 = vld [vmem:[%s13085_s6 + $0x8] sm:$0xf0] }
 0xd4b   :  { %v2833_v14 = vmul.f32 %v10854_v29, %v2780_v61  ;;  %v2879_v21 = vmul.f32 %v2802_v30, %v2780_v61  ;;  %v2888_v29 = vsel %vm55_vm0, %v2877_v2, 0.0  ;;  %v8214_v23 = vor.u32 %v8901_v56, %v8211_v18 }
 0xd4c   :  { %v2824_v49 = vadd.f32 %v2823_v10, %v2822_v48  ;;  %v2889_v16 = vadd.f32 %v2888_v29, %v2887_v22  ;;  %2995 = vmatpush.bf16.msrb.mxu0 %v8210_v24  ;;  %v2921_v54 = vperm.slane %v10954_v9, 0 }
 0xd4d   :  { %v2846_v58 = vsel %vm55_vm0, %v2833_v14, 0.0  ;;  %v2892_v38 = vsel %vm55_vm0, %v2879_v21, 0.0  ;;  %3008 = vmatpush.bf16.msrb.mxu1 %v8214_v23  ;;  %v3113_v14 = vperm.slane %v10963_v31, 1  ;;  %v8261_v21 = vld [vmem:[%s13082_s3 + $0x38] sm:$0xff] }
 0xd4e   :  { %v2847_v50 = vadd.f32 %v2846_v58, %v2845_v26  ;;  %v2826_v13 = vadd.f32 %v2825_v42, %v2824_v49  ;;  %v2891_v37 = vadd.f32 %v2890_v5, %v2889_v16  ;;  %v3185_v5 = vperm.slane %v8261_v21, 3 }
 0xd4f   :  { %v3164_v53 = vperm.slane %v8261_v21, 0  ;;  %v3178_v35 = vperm.slane %v8261_v21, 2  ;;  %v3199_v40 = vperm.slane %v8261_v21, 5 }
 0xd50   :  { %2897 = vrot.lane.b32.xlu0 %v2826_v13, %s9343_s19  ;;  %v2849_v43 = vadd.f32 %v2848_v44, %v2847_v50  ;;  %v2893_v60 = vadd.f32 %v2892_v38, %v2891_v37  ;;  %v3171_v38 = vperm.slane %v8261_v21, 1  ;;  %v3127_v37 = vperm.slane %v10963_v31, 3 }
 0xd52   :  { %2901 = vrot.lane.b32.xlu1 %v2849_v43, %s9342_s18  ;;  %v2895_v2 = vadd.f32 %v2894_v63, %v2893_v60  ;;  %v9085_v43 = vld [vmem:[%s13080_s1 + $0x6] ss:$0 sm:$0xff]  ;;  %v3192_v60 = vperm.slane %v8261_v21, 4  ;;  %v3155_v63 = vperm.slane %v10963_v31, 7 }
 0xd58   :  { %3059 = vrot.lane.b32.xlu0 %v2872_v57, %s9342_s18  ;;  %v3148_v57 = vperm.slane %v10963_v31, 6 }
 0xd5a   :  { %3069 = vrot.lane.b32.xlu1 %v2895_v2, %s9344_s20  ;;  %v3213_v2 = vperm.slane %v8261_v21, 7 }
 0xdc2   :  { %v2898_v15 = vpop.permute.xlu0 %2897 }
 0xdc3   :  { %v2904_v34 = vsel %vm311_vm1, %v8204_v28, %v2898_v15 }
 0xdc4   :  { %v2902_v12 = vpop.permute.xlu1 %2901 }
 0xdc5   :  { %v2905_v41 = vsel %vm313_vm2, %v2904_v34, %v2902_v12  ;;  %v3141_v12 = vperm.slane %v10963_v31, 5 }
 0xdc6   :  { %v2906_v20 = vpack.c.bf16 %v2905_v41, %v2905_v41  ;;  %v3206_v41 = vperm.slane %v8261_v21, 6  ;;  %v13120_v21 = vld [vmem:[#allocation8_spill] sm:$0xff] }
 0xdc8   :  { %8255 = vmatmul.msk.bf16.vlgmr.msrb.gmra.mxu0 %vm394_vm3, %v2906_v20  ;;  %8256 = vmatmul.msk.bf16.vlgmr.msrb.gmra.mxu1 %vm394_vm3, %v2906_v20  ;;  %v2922_v20 = vperm.slane %v10954_v9, 1 }
 0xdca   :  { %v3060_v13 = vpop.permute.xlu0 %3059 }
 0xdcc   :  { %v3070_v29 = vpop.permute.xlu1 %3069 }
 0xe45   :  { %v2997_v59 = vpop.f32.mrf.mxu0  ;;  %v10957_v62 = vpop.f32.mrf.mxu1 }
 0xe46   :  { %v2998_v30 = vadd.f32 %v2997_v59, %v2921_v54  ;;  %v3011_v54 = vadd.f32 %v10957_v62, %v2922_v20 }
 0xe48   :  { %9174 = vtanh.f32 %v2998_v30  ;;  %v8257_v10 = vmul.f32 -1.442695, %v2998_v30  ;;  %v8258_v59 = vmul.f32 -1.442695, %v3011_v54 }
 0xe4a   :  { %9176 = vpow2.f32 %v8257_v10 }
 0xe4d   :  { %v2999_v48 = vpop.f32.mrf.mxu0  ;;  %v3012_v61 = vpop.f32.mrf.mxu1 }
 0xe4e   :  { %v9175_v8 = vpop.eup %9174 }
 0xe4f   :  { %3054 = vrot.lane.b32.xlu2 %v9175_v8, %s9343_s19 }
 0xe50   :  { %v9177_v11 = vpop.eup %9176 }
 0xe51   :  { %v3018_v33 = vadd.f32 1.0, %v9177_v11 }
 0xe53   :  { %9178 = vrcp.f32 %v3018_v33  ;;  %v3030_v26 = vand.u32 2147483648, %v3018_v33  ;;  %v3028_v42 = vand.u32 2147483647, %v3018_v33  ;;  %vm3024_vm5 = vweird.f32 %v3018_v33 }
 0xe55   :  { %v3031_v36 = vor.u32 1.1754944e-38, %v3030_v26  ;;  %vm3029_vm7 = vcmp.eq.f32.partialorder %v3028_v42, 8.507059e+37 }
 0xe57   :  { %3118 = vperm.xlu2 %9048, %v3113_v14  }
 0xe59   :  { %v9179_v45 = vpop.eup %9178 }
 0xe5a   :  { %v3020_v22 = vmul.f32 %v9179_v45, %v3018_v33  ;;  %vm3025_vm4 = vweird.f32 %v9179_v45 }
 0xe5b   :  { %vm3026_vm6 = vmor %vm3024_vm5, %vm3025_vm4 }
 0xe5c   :  { %v3021_v49 = vsub.f32 1.0, %v3020_v22 }
 0xe5e   :  { %v3022_v19 = vmul.f32 %v9179_v45, %v3021_v49 }
 0xe5f   :  { %3125 = vperm.xlu2 %9048, %v3120_v25  }
 0xe60   :  { %v3023_v58 = vadd.f32 %v9179_v45, %v3022_v19 }
 0xe62   :  { %v3027_v50 = vsel %vm3026_vm6, %v9179_v45, %v3023_v58 }
 0xe63   :  { %v3032_v44 = vsel %vm3029_vm7, %v3031_v36, %v3027_v50 }
 0xe64   :  { %v3062_v7 = vmul.f32 %v3060_v13, %v3032_v44  ;;  %v3072_v16 = vmul.f32 %v3070_v29, %v3032_v44  ;;  %v13121_v13 = vld [vmem:[#allocation12_spill] sm:$0xff] }
 0xe66   :  { %3064 = vrot.lane.b32.xlu0 %v3062_v7, %s9344_s20  ;;  %3074 = vrot.lane.b32.xlu1 %v3072_v16, %s9342_s18 }
 0xe67   :  { %3190 = vperm.xlu2 %9048, %v3185_v5  }
 0xe6e   :  { %2670 = vperm.xlu0 %9046, %v9085_v43   ;;  %3111 = vperm.xlu1 %9047, %v3106_v39  }
 0xe76   :  { %3169 = vperm.xlu0 %9046, %v3164_v53   ;;  %3176 = vperm.xlu1 %9047, %v3171_v38  }
 0xe7e   :  { %3183 = vperm.xlu0 %9046, %v3178_v35   ;;  %3132 = vperm.xlu1 %9047, %v3127_v37   ;;  %v13122_v37 = vld [vmem:[#allocation15_spill] sm:$0xff] }
 0xe86   :  { %3139 = vperm.xlu0 %9046, %v3134_v0   ;;  %3197 = vperm.xlu1 %9047, %v3192_v60  }
 0xe8e   :  { %3204 = vperm.xlu0 %9046, %v3199_v40   ;;  %3153 = vperm.xlu1 %9047, %v3148_v57  }
 0xe96   :  { %3160 = vperm.xlu0 %9046, %v3155_v63   ;;  %3218 = vperm.xlu1 %9047, %v3213_v2  }
 0xea9   :  { %v3055_v51 = vpop.permute.xlu2 %3054 }
 0xeaa   :  { %v3057_v17 = vmul.f32 %v3055_v51, %v3032_v44 }
 0xeb1   :  { %v10989_v8 = vpop.permute.xlu2 %3118 }
 0xeb2   :  { %v3237_v29 = vmul.f32 %v13121_v13, %v10989_v8 }
 0xeb4   :  { %v3245_v35 = vsel %vm55_vm0, %v3237_v29, 0.0 }
 0xeb9   :  { %v10995_v9 = vpop.permute.xlu2 %3125 }
 0xeba   :  { %v3238_v0 = vmul.f32 %v13122_v37, %v10995_v9 }
 0xec1   :  { %v11001_v49 = vpop.permute.xlu2 %3190 }
 0xed8   :  { %v3065_v56 = vpop.permute.xlu0 %3064  ;;  %v3075_v18 = vpop.permute.xlu1 %3074 }
 0xed9   :  { %v3067_v24 = vadd.f32 %v3065_v56, %v3057_v17 }
 0xedb   :  { %v3077_v23 = vadd.f32 %v3075_v18, %v3067_v24  ;;  %v3247_v24 = vsel %vm55_vm0, %v3238_v0, 0.0 }
 0xedd   :  { %9180 = vtanh.f32 %v3077_v23 }
 0xede   :  { %9182 = vpow2.f32 %v8258_v59 }
 0xee0   :  { %v2671_v28 = vpop.permute.xlu0 %2670  ;;  %v10985_v30 = vpop.permute.xlu1 %3111 }
 0xee1   :  { %v3087_v15 = vmul.f32 %v3077_v23, %v2671_v28  ;;  %v3236_v36 = vmul.f32 %v13120_v21, %v10985_v30 }
 0xee3   :  { %v9181_v34 = vpop.eup %9180  ;;  %3089 = vrot.lane.b32.xlu1 %v3087_v15, %s9344_s20  ;;  %v3244_v43 = vsel %vm55_vm0, %v3236_v36, 0.0 }
 0xee4   :  { %3080 = vrot.lane.b32.xlu2 %v9181_v34, %s9344_s20  ;;  %v9183_v10 = vpop.eup %9182  ;;  %v3246_v63 = vadd.f32 %v3245_v35, %v3244_v43  ;;  %v13124_v43 = vld [vmem:[#allocation11_spill] sm:$0xff] }
 0xee5   :  { %v3037_v48 = vadd.f32 1.0, %v9183_v10 }
 0xee7   :  { %9184 = vrcp.f32 %v3037_v48  ;;  %v3049_v42 = vand.u32 2147483648, %v3037_v48  ;;  %vm3043_vm9 = vweird.f32 %v3037_v48  ;;  %v3047_v58 = vand.u32 2147483647, %v3037_v48 }
 0xee8   :  { %v10987_v61 = vpop.permute.xlu0 %3169  ;;  %v10991_v11 = vpop.permute.xlu1 %3176 }
 0xee9   :  { %v3050_v44 = vor.u32 1.1754944e-38, %v3049_v42  ;;  %vm3048_vm11 = vcmp.eq.f32.partialorder %v3047_v58, 8.507059e+37  ;;  %v3259_v39 = vmul.f32 %v13120_v21, %v10987_v61  ;;  %v3260_v53 = vmul.f32 %v13121_v13, %v10991_v11  ;;  %v13123_v13 = vld [vmem:[#allocation10_spill] sm:$0xff] }
 0xeea   :  { %v3282_v29 = vmul.f32 %v13123_v13, %v10985_v30 }
 0xeeb   :  { %v3267_v51 = vsel %vm55_vm0, %v3259_v39, 0.0  ;;  %v3268_v17 = vsel %vm55_vm0, %v3260_v53, 0.0  ;;  %v3306_v39 = vmul.f32 %v13124_v43, %v10991_v11 }
 0xeec   :  { %3146 = vperm.xlu2 %9048, %v3141_v12   ;;  %v3269_v15 = vadd.f32 %v3268_v17, %v3267_v51  ;;  %v3262_v12 = vmul.f32 %v10352_v47, %v11001_v49  ;;  %v3290_v17 = vsel %vm55_vm0, %v3282_v29, 0.0 }
 0xeed   :  { %v9185_v31 = vpop.eup %9184 }
 0xeee   :  { %v3039_v14 = vmul.f32 %v9185_v31, %v3037_v48  ;;  %vm3044_vm8 = vweird.f32 %v9185_v31  ;;  %v3227_v48 = vld [vmem:[#allocation2 + $0x1c] sm:$0xf]  ;;  %v3272_v42 = vsel %vm55_vm0, %v3262_v12, 0.0 }
 0xeef   :  { %vm3045_vm10 = vmor %vm3043_vm9, %vm3044_vm8  ;;  %vm3535_vm8 = vcmask 1047556   ;;  %vm3833_vm9 = vcmask 1043456  }
 0xef0   :  { %v10993_v33 = vpop.permute.xlu0 %3183  ;;  %v10997_v62 = vpop.permute.xlu1 %3132  ;;  %v3040_v45 = vsub.f32 1.0, %v3039_v14 }
 0xef1   :  { %v3261_v60 = vmul.f32 %v13122_v37, %v10993_v33  ;;  %v3239_v40 = vmul.f32 %v10352_v47, %v10997_v62  ;;  %v3283_v37 = vmul.f32 %v13124_v43, %v10989_v8 }
 0xef2   :  { %v3041_v22 = vmul.f32 %v9185_v31, %v3040_v45 }
 0xef3   :  { %v3270_v18 = vsel %vm55_vm0, %v3261_v60, 0.0  ;;  %v3249_v23 = vsel %vm55_vm0, %v3239_v40, 0.0  ;;  %v13125_v40 = vld [vmem:[#allocation14_spill] sm:$0xff]  ;;  %v3291_v8 = vsel %vm55_vm0, %v3283_v37, 0.0 }
 0xef4   :  { %3211 = vperm.xlu2 %9048, %v3206_v41   ;;  %v3042_v26 = vadd.f32 %v9185_v31, %v3041_v22  ;;  %v3271_v59 = vadd.f32 %v3270_v18, %v3269_v15  ;;  %v3285_v15 = vmul.f32 %v10406_v52, %v10997_v62  ;;  %v3292_v12 = vadd.f32 %v3291_v8, %v3290_v17  ;;  %v8288_v17 = vld [vmem:[%s13085_s6 + $0x30] sm:$0xf] }
 0xef6   :  { %v3046_v50 = vsel %vm3045_vm10, %v9185_v31, %v3042_v26  ;;  %v3273_v36 = vadd.f32 %v3272_v42, %v3271_v59  ;;  %vm3711_vm10 = vcmask 64512  }
 0xef7   :  { %v3051_v7 = vsel %vm3048_vm11, %v3050_v44, %v3046_v50 }
 0xef8   :  { %v10999_v25 = vpop.permute.xlu0 %3139  ;;  %v11003_v19 = vpop.permute.xlu1 %3197 }
 0xef9   :  { %v3240_v56 = vmul.f32 %v10609_v27, %v10999_v25  ;;  %v3263_v20 = vmul.f32 %v10609_v27, %v11003_v19  ;;  %v3286_v59 = vmul.f32 %v10559_v3, %v10999_v25 }
 0xefb   :  { %v3251_v41 = vsel %vm55_vm0, %v3240_v56, 0.0  ;;  %v3274_v27 = vsel %vm55_vm0, %v3263_v20, 0.0  ;;  %v3314_v56 = vsel %vm55_vm0, %v3306_v39, 0.0 }
 0xefc   :  { %v3275_v53 = vadd.f32 %v3274_v27, %v3273_v36 }
 0xf00   :  { %v11009_v5 = vpop.permute.xlu0 %3204  ;;  %v11023_v2 = vpop.permute.xlu1 %3153 }
 0xf01   :  { %v3264_v14 = vmul.f32 %v10891_v1, %v11009_v5 }
 0xf03   :  { %v3276_v44 = vsel %vm55_vm0, %v3264_v14, 0.0  ;;  %v3310_v14 = vmul.f32 %v10776_v4, %v11009_v5 }
 0xf05   :  { %v3322_v42 = vsel %vm55_vm0, %v3310_v14, 0.0  ;;  %v8914_v14 = vld [vmem:[%s13085_s6 + $0x4] sm:$0xf0] }
 0xf08   :  { %v11039_v31 = vpop.permute.xlu0 %3160  ;;  %v3219_v50 = vpop.permute.xlu1 %3218 }
 0xf09   :  { %v3243_v58 = vmul.f32 %v3227_v48, %v11039_v31  ;;  %v3266_v60 = vmul.f32 %v3227_v48, %v3219_v50  ;;  %v3295_v48 = vsel %vm55_vm0, %v3285_v15, 0.0  ;;  %v8917_v15 = vld [vmem:[%s13085_s6 + $0x24] sm:$0xf] }
 0xf0b   :  { %v3257_v0 = vsel %vm55_vm0, %v3243_v58, 0.0  ;;  %v3280_v18 = vsel %vm55_vm0, %v3266_v60, 0.0  ;;  %v8296_v60 = vld [vmem:[%s13085_s6 + $0x40] sm:$0xf] }
 0xf3e   :  { %v3081_v16 = vpop.permute.xlu2 %3080 }
 0xf3f   :  { %v3083_v38 = vmul.f32 %v3081_v16, %v3051_v7  ;;  %v3305_v16 = vmul.f32 %v13123_v13, %v10987_v61 }
 0xf41   :  { %v3084_v57 = vmul.f32 %v3083_v38, %v2671_v28  ;;  %v3248_v28 = vadd.f32 %v3247_v24, %v3246_v63  ;;  %v3277_v63 = vadd.f32 %v3276_v44, %v3275_v53  ;;  %v3313_v11 = vsel %vm55_vm0, %v3305_v16, 0.0 }
 0xf43   :  { %3086 = vst.msk [vmem:[#allocation2 + $0x18] sm:$0xf] %vm55_vm0, %v3084_v57  ;;  %v3250_v10 = vadd.f32 %v3249_v23, %v3248_v28  ;;  %v3307_v57 = vmul.f32 %v13125_v40, %v10993_v33  ;;  %v3284_v33 = vmul.f32 %v13125_v40, %v10995_v9 }
 0xf45   :  { %v3252_v22 = vadd.f32 %v3251_v41, %v3250_v10  ;;  %v3316_v23 = vsel %vm55_vm0, %v3307_v57, 0.0  ;;  %v3315_v41 = vadd.f32 %v3314_v56, %v3313_v11  ;;  %v3309_v10 = vmul.f32 %v10559_v3, %v11003_v19  ;;  %v8921_v57 = vld [vmem:[%s13085_s6 + $0x44] sm:$0xf]  ;;  %v8920_v11 = vld [vmem:[%s13085_s6 + $0x34] sm:$0xf0] }
 0xf46   :  { %v3147_v34 = vpop.permute.xlu2 %3146  ;;  %v3293_v62 = vsel %vm55_vm0, %v3284_v33, 0.0  ;;  %v8919_v56 = vld [vmem:[%s13085_s6 + $0x34] sm:$0xf]  ;;  %v8289_v8 = vor.u32 %v8920_v11, %v8288_v17  ;;  %v8280_v33 = vld [vmem:[%s13085_s6 + $0x20] sm:$0xf] }
 0xf47   :  { %v3241_v54 = vmul.f32 %v10891_v1, %v3147_v34  ;;  %v3317_v9 = vadd.f32 %v3316_v23, %v3315_v41  ;;  %v3320_v3 = vsel %vm55_vm0, %v3309_v10, 0.0  ;;  %v8918_v23 = vld [vmem:[%s13085_s6 + $0x24] sm:$0xf0]  ;;  %v8272_v41 = vld [vmem:[%s13085_s6 + $0x10] sm:$0xf] }
 0xf48   :  { %v8274_v10 = vld [vmem:[%s13085_s6 + $0x18] sm:$0xf0] }
 0xf49   :  { %v3253_v45 = vsel %vm55_vm0, %v3241_v54, 0.0  ;;  %v3308_v54 = vmul.f32 %v10406_v52, %v11001_v49  ;;  %v3287_v52 = vmul.f32 %v10776_v4, %v3147_v34  ;;  %v3294_v49 = vadd.f32 %v3293_v62, %v3292_v12  ;;  %v8282_v12 = vld [vmem:[%s13085_s6 + $0x28] sm:$0xf0] }
 0xf4a   :  { %v3226_v26 = vld [vmem:[#allocation2 + $0x18] sm:$0xf]  ;;  %v3254_v1 = vadd.f32 %v3253_v45, %v3252_v22  ;;  %v3297_v45 = vsel %vm55_vm0, %v3286_v59, 0.0  ;;  %v8915_v59 = vld [vmem:[%s13085_s6 + $0x14] sm:$0xf] }
 0xf4b   :  { %v11044_v47 = vld [vmem:[#allocation2 + $0x18] sm:$0xf]  ;;  %v3242_v21 = vmul.f32 %v3226_v26, %v11023_v2  ;;  %v3318_v25 = vsel %vm55_vm0, %v3308_v54, 0.0  ;;  %v3296_v19 = vadd.f32 %v3295_v48, %v3294_v49  ;;  %v3299_v27 = vsel %vm55_vm0, %v3287_v52, 0.0  ;;  %v8264_v48 = vld [vmem:[%s13085_s6] sm:$0xf] }
 0xf4c   :  { %4217 = vst.msk [vmem:[#allocation2 + $0x18] sm:$0xf] %vm55_vm0, %v13119_v55  ;;  %v3319_v22 = vadd.f32 %v3318_v25, %v3317_v9  ;;  %v8285_v54 = vor.u32 %v8917_v15, %v8282_v12  ;;  %v8277_v62 = vor.u32 %v8915_v59, %v8274_v10  ;;  %v8913_v52 = vld [vmem:[%s13085_s6 + $0x4] sm:$0xf]  ;;  %v8265_v49 = vor.u32 %v8914_v14, %v8264_v48  ;;  %v8266_v25 = vld [vmem:[%s13085_s6 + $0x8] sm:$0xf0] }
 0xf4d   :  { %v3255_v7 = vsel %vm55_vm0, %v3242_v21, 0.0  ;;  %v3298_v58 = vadd.f32 %v3297_v45, %v3296_v19  ;;  %v8269_v45 = vor.u32 %v8913_v52, %v8266_v25  ;;  %v8315_v48 = vrot.slane %v10354_v46, 6 }
 0xf4e   :  { %v3212_v38 = vpop.permute.xlu2 %3211  ;;  %v3256_v35 = vadd.f32 %v3255_v7, %v3254_v1  ;;  %v3321_v21 = vadd.f32 %v3320_v3, %v3319_v22  ;;  %v8259_v3 = vld [vmem:[%s13109_s27 + $0x1c] sm:$0xf]  ;;  %v3541_v14 = vrot.slane %v10354_v46, 4  ;;  %v9345_v25 = vmov 1983009808   ;;  %v13127_v46 = vld [vmem:[#allocation16_spill] sm:$0xff] }
 0xf4f   :  { %v3265_v30 = vmul.f32 %v3226_v26, %v3212_v38  ;;  %v3235_v26 = vld [vmem:[#allocation3 + $0x1c] sm:$0xf]  ;;  %v3300_v29 = vadd.f32 %v3299_v27, %v3298_v58  ;;  %v3351_v58 = vld [vmem:[%s13086_s7] sm:$0x3] }
 0xf50   :  { %v3258_v51 = vadd.f32 %v3257_v0, %v3256_v35  ;;  %v3289_v5 = vmul.f32 %v3235_v26, %v11039_v31  ;;  %v3312_v4 = vmul.f32 %v3235_v26, %v3219_v50  ;;  %v3323_v13 = vadd.f32 %v3322_v42, %v3321_v21  ;;  %v8923_v35 = vld [vmem:[%s13085_s6 + $0x54] sm:$0xf]  ;;  %v8306_v0 = vld [vmem:[%s13085_s6 + $0x58] sm:$0xf0] }
 0xf51   :  { %v3278_v61 = vsel %vm55_vm0, %v3265_v30, 0.0  ;;  %v8922_v30 = vld [vmem:[%s13085_s6 + $0x44] sm:$0xf0]  ;;  %v8309_v40 = vor.u32 %v8923_v35, %v8306_v0  ;;  %v3353_v21 = vperm.slane %v3351_v58, 0 }
 0xf52   :  { %v3279_v24 = vadd.f32 %v3278_v61, %v3277_v63  ;;  %3329 = vrot.lane.b32.xlu2 %v3258_v51, %s9343_s19  ;;  %v3303_v39 = vsel %vm55_vm0, %v3289_v5, 0.0  ;;  %v3326_v53 = vsel %vm55_vm0, %v3312_v4, 0.0  ;;  %v8298_v63 = vld [vmem:[%s13085_s6 + $0x48] sm:$0xf0]  ;;  %v8297_v51 = vor.u32 %v8922_v30, %v8296_v60 }
 0xf53   :  { %3435 = vmatpush.bf16.msrb.mxu3 %v8309_v40  ;;  %v8301_v61 = vor.u32 %v8921_v57, %v8298_v63  ;;  %v9086_v57 = vld [vmem:[%s13080_s1 + $0x7] ss:$0 sm:$0xff] }
 0xf54   :  { %v3281_v28 = vadd.f32 %v3280_v18, %v3279_v24  ;;  %v8290_v24 = vld [vmem:[%s13085_s6 + $0x38] sm:$0xf0] }
 0xf55   :  { %v3090_v20 = vpop.permute.xlu1 %3089  ;;  %v8293_v18 = vor.u32 %v8919_v56, %v8290_v24 }
 0xf56   :  { %3093 = vst.msk [vmem:[#allocation3 + $0x18] sm:$0xf] %vm55_vm0, %v3090_v20  ;;  %3333 = vrot.lane.b32.xlu0 %v3281_v28, %s9342_s18  ;;  %v8281_v28 = vor.u32 %v8918_v23, %v8280_v33  ;;  %v8916_v20 = vld [vmem:[%s13085_s6 + $0x14] sm:$0xf0] }
 0xf57   :  { %3436 = vmatpush.bf16.msrb.mxu3 %v8301_v61  ;;  %v8273_v9 = vor.u32 %v8916_v20, %v8272_v41 }
 0xf5b   :  { %3437 = vmatpush.bf16.msrb.mxu3 %v8293_v18 }
 0xf5d   :  { %v3234_v36 = vld [vmem:[#allocation3 + $0x18] sm:$0xf] }
 0xf5e   :  { %v3311_v34 = vmul.f32 %v3234_v36, %v3212_v38  ;;  %4225 = vst.msk [vmem:[#allocation3 + $0x18] sm:$0xf] %vm55_vm0, %v13119_v55  ;;  %v3288_v1 = vmul.f32 %v3234_v36, %v11023_v2  ;;  %v8304_v2 = vld [vmem:[%s13085_s6 + $0x50] sm:$0xf]  ;;  %v8924_v38 = vld [vmem:[%s13085_s6 + $0x54] sm:$0xf0] }
 0xf5f   :  { %v8305_v37 = vor.u32 %v8924_v38, %v8304_v2  ;;  %3438 = vmatpush.bf16.msrb.mxu3 %v8285_v54 }
 0xf60   :  { %v3324_v44 = vsel %vm55_vm0, %v3311_v34, 0.0  ;;  %v3301_v7 = vsel %vm55_vm0, %v3288_v1, 0.0 }
 0xf61   :  { %v3325_v16 = vadd.f32 %v3324_v44, %v3323_v13  ;;  %v3302_v43 = vadd.f32 %v3301_v7, %v3300_v29  ;;  %3422 = vmatpush.bf16.msrb.mxu2 %v8305_v37 }
 0xf63   :  { %v3327_v31 = vadd.f32 %v3326_v53, %v3325_v16  ;;  %v3304_v50 = vadd.f32 %v3303_v39, %v3302_v43  ;;  %3439 = vmatpush.bf16.msrb.mxu3 %v8277_v62 }
 0xf65   :  { %3501 = vrot.lane.b32.xlu0 %v3327_v31, %s9344_s20  ;;  %3491 = vrot.lane.b32.xlu2 %v3304_v50, %s9342_s18 }
 0xf66   :  { %3423 = vmatpush.bf16.msrb.mxu2 %v8297_v51 }
 0xf67   :  { %3440 = vmatpush.bf16.msrb.mxu3 %v8269_v45  ;;  %v3538_v45 = vunpack.c.l.s4 %v9345_v25 }
 0xf6a   :  { %3424 = vmatpush.bf16.msrb.mxu2 %v8289_v8  ;;  %v3354_v8 = vperm.slane %v3351_v58, 1 }
 0xf6e   :  { %3425 = vmatpush.bf16.msrb.mxu2 %v8281_v28 }
 0xf72   :  { %3426 = vmatpush.bf16.msrb.mxu2 %v8273_v9 }
 0xf76   :  { %3427 = vmatpush.bf16.msrb.mxu2 %v8265_v49 }
 0xfac   :  { %v3330_v19 = vpop.permute.xlu2 %3329 }
 0xfad   :  { %v3336_v22 = vsel %vm311_vm1, %v8259_v3, %v3330_v19  ;;  %v13126_v19 = vld [vmem:[#allocation13_spill] sm:$0xff] }
 0xfae   :  { %v3542_v58 = vsel %vm3535_vm8, %v3541_v14, %v13126_v19 }
 0xfbf   :  { %v3492_v37 = vpop.permute.xlu2 %3491 }
 0xfc8   :  { %v3334_v26 = vpop.permute.xlu0 %3333 }
 0xfc9   :  { %v3337_v42 = vsel %vm313_vm2, %v3336_v22, %v3334_v26  ;;  %v3584_v22 = vrot.slane %v13126_v19, 2 }
 0xfca   :  { %v3338_v27 = vpack.c.bf16 %v3337_v42, %v3337_v42 }
 0xfcc   :  { %8310 = vmatmul.msk.bf16.vlgmr.msrb.gmra.mxu2 %vm394_vm3, %v3338_v27  ;;  %8311 = vmatmul.msk.bf16.vlgmr.msrb.gmra.mxu3 %vm394_vm3, %v3338_v27  ;;  %v3606_v27 = vsel %vm3535_vm8, %v8315_v48, %v3584_v22 }
 0xfd7   :  { %v3502_v0 = vpop.permute.xlu0 %3501 }
0x104f   :  { %v3429_v36 = vpop.f32.mrf.mxu2  ;;  %v3442_v5 = vpop.f32.mrf.mxu3 }
0x1050   :  { %v3430_v4 = vadd.f32 %v3429_v36, %v3353_v21  ;;  %v3443_v18 = vadd.f32 %v3442_v5, %v3354_v8  ;;  %v11206_v21 = vunpack.c.0.s8 %v3538_v45  ;;  %v8314_v36 = vrot.slane %v13127_v46, 6 }
0x1051   :  { %v3534_v5 = vrot.slane %v13127_v46, 4 }
0x1052   :  { %9186 = vtanh.f32 %v3430_v4  ;;  %v8312_v34 = vmul.f32 -1.442695, %v3430_v4  ;;  %v8313_v33 = vmul.f32 -1.442695, %v3443_v18  ;;  %v3610_v4 = vperm.slane %v3606_v27, %v11206_v21 }
0x1054   :  { %9188 = vpow2.f32 %v8312_v34  ;;  %v3546_v34 = vperm.slane %v3542_v58, %v11206_v21 }
0x1057   :  { %v3431_v1 = vpop.f32.mrf.mxu2  ;;  %v3444_v13 = vpop.f32.mrf.mxu3 }
0x1058   :  { %v9187_v29 = vpop.eup %9186  ;;  %v13128_v1 = vld [vmem:[#allocation9_spill] sm:$0xff] }
0x1059   :  { %3486 = vrot.lane.b32.xlu1 %v9187_v29, %s9343_s19  ;;  %v3583_v13 = vrot.slane %v13128_v1, 2  ;;  %v9346_v29 = vmov 1934713408  }
0x105a   :  { %v9189_v44 = vpop.eup %9188 }
0x105b   :  { %v3450_v7 = vadd.f32 1.0, %v9189_v44  ;;  %v3562_v44 = vunpack.c.l.s4 %v9346_v29 }
0x105d   :  { %9190 = vrcp.f32 %v3450_v7  ;;  %v3462_v53 = vand.u32 2147483648, %v3450_v7  ;;  %v3460_v50 = vand.u32 2147483647, %v3450_v7  ;;  %vm3456_vm13 = vweird.f32 %v3450_v7 }
0x105f   :  { %v3463_v38 = vor.u32 1.1754944e-38, %v3462_v53  ;;  %vm3461_vm15 = vcmp.eq.f32.partialorder %v3460_v50, 8.507059e+37  ;;  %v8316_v53 = vrot.slane %v11044_v47, 6 }
0x1063   :  { %v9191_v16 = vpop.eup %9190 }
0x1064   :  { %v3452_v43 = vmul.f32 %v9191_v16, %v3450_v7  ;;  %vm3457_vm12 = vweird.f32 %v9191_v16  ;;  %v3600_v7 = vsel %vm3535_vm8, %v8314_v36, %v3583_v13 }
0x1065   :  { %vm3458_vm14 = vmor %vm3456_vm13, %vm3457_vm12 }
0x1066   :  { %v3453_v39 = vsub.f32 1.0, %v3452_v43  ;;  %v3623_v43 = vrot.slane %v3610_v4, 4 }
0x1068   :  { %v3454_v31 = vmul.f32 %v9191_v16, %v3453_v39  ;;  %v3559_v39 = vrot.slane %v3546_v34, 4 }
0x106a   :  { %v3455_v2 = vadd.f32 %v9191_v16, %v3454_v31  ;;  %v3547_v31 = vrot.slane %v11044_v47, 4 }
0x106c   :  { %v3459_v35 = vsel %vm3458_vm14, %v9191_v16, %v3455_v2  ;;  %v3536_v16 = vsel %vm3535_vm8, %v3534_v5, %v13128_v1  ;;  %v11219_v2 = vunpack.c.0.s8 %v3562_v44 }
0x106d   :  { %v3464_v60 = vsel %vm3461_vm15, %v3463_v38, %v3459_v35  ;;  %v3604_v38 = vperm.slane %v3600_v7, %v11206_v21  ;;  %v3540_v35 = vperm.slane %v3536_v16, %v11206_v21 }
0x106e   :  { %v3504_v30 = vmul.f32 %v3502_v0, %v3464_v60  ;;  %v3494_v40 = vmul.f32 %v3492_v37, %v3464_v60  ;;  %v3587_v37 = vrot.slane %v10611_v32, 2  ;;  %v3588_v0 = vrot.slane %v10893_v6, 2 }
0x106f   :  { %v3560_v47 = vsel %vm3535_vm8, %v3559_v39, %v3540_v35 }
0x1070   :  { %3506 = vrot.lane.b32.xlu0 %v3504_v30, %s9342_s18  ;;  %3496 = vrot.lane.b32.xlu2 %v3494_v40, %s9344_s20  ;;  %v3624_v40 = vsel %vm3535_vm8, %v3623_v43, %v3604_v38  ;;  %v3564_v8 = vperm.slane %v3560_v47, %v11219_v2  ;;  %v9088_v47 = vld [vmem:[%s13084_s5] ss:$0 sm:$0xff] }
0x1078   :  { %3102 = vperm.xlu2 %9048, %v9086_v57   ;;  %v3612_v57 = vsel %vm3535_vm8, %v8316_v53, %v3587_v37 }
0x1079   :  { %v3616_v18 = vperm.slane %v3612_v57, %v11206_v21 }
0x10ca   :  { %v3497_v61 = vpop.permute.xlu2 %3496 }
0x10cb   :  { %v3487_v63 = vpop.permute.xlu1 %3486 }
0x10cc   :  { %v3489_v51 = vmul.f32 %v3487_v63, %v3464_v60 }
0x10ce   :  { %v3499_v17 = vadd.f32 %v3497_v61, %v3489_v51  ;;  %v3548_v51 = vsel %vm3535_vm8, %v3547_v31, %v10611_v32 }
0x10d2   :  { %v11200_v26 = vpop.permute.xlu2 %3102 }
0x10e2   :  { %v3507_v11 = vpop.permute.xlu0 %3506 }
0x10e3   :  { %v11193_v56 = vadd.f32 %v3507_v11, %v3499_v17 }
0x10e5   :  { %9192 = vtanh.f32 %v11193_v56 }
0x10e6   :  { %9194 = vpow2.f32 %v8313_v33 }
0x10eb   :  { %v9193_v24 = vpop.eup %9192 }
0x10ec   :  { %3512 = vrot.lane.b32.xlu1 %v9193_v24, %s9344_s20  ;;  %v9195_v23 = vpop.eup %9194  ;;  %v3628_v24 = vperm.slane %v3624_v40, %v11219_v2 }
0x10ed   :  { %v3469_v15 = vadd.f32 1.0, %v9195_v23  ;;  %v3552_v23 = vperm.slane %v3548_v51, %v11206_v21 }
0x10ef   :  { %9196 = vrcp.f32 %v3469_v15  ;;  %v3481_v59 = vand.u32 2147483648, %v3469_v15  ;;  %vm3475_vm5 = vweird.f32 %v3469_v15  ;;  %v3479_v10 = vand.u32 2147483647, %v3469_v15 }
0x10f1   :  { %v3482_v62 = vor.u32 1.1754944e-38, %v3481_v59  ;;  %vm3480_vm7 = vcmp.eq.f32.partialorder %v3479_v10, 8.507059e+37 }
0x10f5   :  { %v9197_v28 = vpop.eup %9196 }
0x10f6   :  { %v3471_v12 = vmul.f32 %v9197_v28, %v3469_v15  ;;  %vm3476_vm4 = vweird.f32 %v9197_v28 }
0x10f7   :  { %vm3477_vm6 = vmor %vm3475_vm5, %vm3476_vm4 }
0x10f8   :  { %v3472_v41 = vsub.f32 1.0, %v3471_v12  ;;  %v3637_v12 = vrot.slane %v3628_v24, 4 }
0x10fa   :  { %v3473_v20 = vmul.f32 %v9197_v28, %v3472_v41 }
0x10fc   :  { %v3474_v54 = vadd.f32 %v9197_v28, %v3473_v20  ;;  %v3573_v20 = vrot.slane %v3564_v8, 4 }
0x10fe   :  { %v3478_v9 = vsel %vm3477_vm6, %v9197_v28, %v3474_v54 }
0x10ff   :  { %v3483_v52 = vsel %vm3480_vm7, %v3482_v62, %v3478_v9 }
0x115e   :  { %v3513_v49 = vpop.permute.xlu1 %3512 }
0x115f   :  { %v3515_v3 = vmul.f32 %v3513_v49, %v3483_v52 }
0x1161   :  { %v3516_v42 = vmul.f32 %v3515_v3, %v11200_v26 }
0x1163   :  { %3518 = vst.msk [vmem:[#allocation2 + $0x1c] sm:$0xf] %vm55_vm0, %v3516_v42 }
0x116a   :  { %v3533_v50 = vld [vmem:[#allocation2 + $0x1c] sm:$0xf] }
0x116b   :  { %v8317_v60 = vrot.slane %v3533_v50, 6  ;;  %4218 = vst.msk [vmem:[#allocation2 + $0x1c] sm:$0xf] %vm55_vm0, %v13119_v55  ;;  %v3553_v30 = vrot.slane %v3533_v50, 4 }
0x116d   :  { %v3618_v63 = vsel %vm3535_vm8, %v8317_v60, %v3588_v0  ;;  %v3554_v61 = vsel %vm3535_vm8, %v3553_v30, %v10893_v6  ;;  %v9087_v0 = vld [vmem:[%s13084_s5 + $0x1] ss:$0 sm:$0xff] }
0x116e   :  { %v3622_v17 = vperm.slane %v3618_v63, %v11206_v21  ;;  %v3558_v11 = vperm.slane %v3554_v61, %v11206_v21 }
0x1170   :  { %v3629_v33 = vrot.slane %v3622_v17, 4  ;;  %v3565_v15 = vrot.slane %v3558_v11, 4 }
0x1172   :  { %v3630_v28 = vsel %vm3535_vm8, %v3629_v33, %v3616_v18  ;;  %v3566_v32 = vsel %vm3535_vm8, %v3565_v15, %v3552_v23 }
0x1173   :  { %v3634_v6 = vperm.slane %v3630_v28, %v11219_v2  ;;  %v3570_v41 = vperm.slane %v3566_v32, %v11219_v2  ;;  %v9090_v32 = vld [vmem:[%s13083_s4 + $0x1] ss:$0 sm:$0xff] }
0x1175   :  { %v11246_v54 = vsel %vm3535_vm8, %v3634_v6, %v3637_v12  ;;  %v11249_v59 = vsel %vm3535_vm8, %v3570_v41, %v3573_v20  ;;  %v3635_v10 = vrot.slane %v3634_v6, 4  ;;  %v3571_v9 = vrot.slane %v3570_v41, 4 }
0x1176   :  { %v3642_v62 = vpack.c.bf16 %v11246_v54, %v11246_v54  ;;  %v3640_v48 = vpack.c.bf16 %v11249_v59, %v11249_v59 }
0x1177   :  { %v11256_v14 = vsel %vm3535_vm8, %v3635_v10, %v3628_v24  ;;  %v11259_v52 = vsel %vm3535_vm8, %v3571_v9, %v3564_v8  ;;  %v9089_v8 = vld [vmem:[%s13083_s4] ss:$0 sm:$0xff] }
0x1178   :  { %v3670_v49 = vsel %vm311_vm1, %v3642_v62, 0  ;;  %v3667_v25 = vsel %vm311_vm1, %v3640_v48, 0  ;;  %v3852_v45 = vsel %vm3833_vm9, %v3642_v62, 0  ;;  %v3890_v3 = vsel %vm3833_vm9, %v3640_v48, 0 }
0x1179   :  { %3679 = vmatpush.bf16.xpose.msra.mxu1 %v3670_v49  ;;  %3705 = vmatpush.bf16.xpose.msra.mxu3 %v3667_v25  ;;  %v3641_v19 = vpack.c.bf16 %v11256_v14, %v11256_v14  ;;  %v3639_v22 = vpack.c.bf16 %v11259_v52, %v11259_v52 }
0x117b   :  { %v3651_v42 = vsel %vm311_vm1, %v3641_v19, 0  ;;  %v3648_v27 = vsel %vm311_vm1, %v3639_v22, 0  ;;  %v3834_v58 = vsel %vm3833_vm9, %v3641_v19, 0  ;;  %v3872_v46 = vsel %vm3833_vm9, %v3639_v22, 0 }
0x117c   :  { %3660 = vmatpush.bf16.xpose.msra.mxu0 %v3651_v42  ;;  %3692 = vmatpush.bf16.xpose.msra.mxu2 %v3648_v27 }
0x1180   :  { %8319 = vmatmul.msk.bf16.vlgmr.msra.gmra.mxu1 %vm311_vm1, %v3640_v48  ;;  %8321 = vmatmul.msk.bf16.vlgmr.msra.gmra.mxu3 %vm311_vm1, %v3642_v62 }
0x1181   :  { %3861 = vmatpush.bf16.msrb.mxu1 %v3852_v45  ;;  %3899 = vmatpush.bf16.msrb.mxu3 %v3890_v3 }
0x1183   :  { %8318 = vmatmul.msk.bf16.vlgmr.msra.gmra.mxu0 %vm311_vm1, %v3639_v22  ;;  %8320 = vmatmul.msk.bf16.vlgmr.msra.gmra.mxu2 %vm311_vm1, %v3641_v19 }
0x1184   :  { %3843 = vmatpush.bf16.msrb.mxu0 %v3834_v58  ;;  %3881 = vmatpush.bf16.msrb.mxu2 %v3872_v46 }
0x11fd   :  { %v3681_v36 = vpop.f32.mrf.mxu1 }
0x11fe   :  { %v3715_v5 = vsel %vm3711_vm10, %v3681_v36, -inf }
0x11ff   :  { %3716 = vmax.xlane.f32.xlu1 %v3715_v5 }
0x1200   :  { %v3662_v4 = vpop.f32.mrf.mxu0 }
0x1201   :  { %v3712_v34 = vsel %vm3711_vm10, %v3662_v4, -inf }
0x1202   :  { %3713 = vmax.xlane.f32.xlu0 %v3712_v34 }
0x1203   :  { %v3707_v1 = vpop.f32.mrf.mxu3 }
0x1204   :  { %v3735_v39 = vsel %vm3711_vm10, %v3707_v1, -inf }
0x1205   :  { %v3683_v13 = vpop.f32.mrf.mxu1 }
0x1206   :  { %v3694_v29 = vpop.f32.mrf.mxu2 }
0x1207   :  { %v3732_v44 = vsel %vm3711_vm10, %v3694_v29, -inf }
0x1208   :  { %v3664_v7 = vpop.f32.mrf.mxu0  ;;  %3733 = vmax.xlane.f32.xlu2 %v3732_v44 }
0x120b   :  { %v3709_v16 = vpop.f32.mrf.mxu3 }
0x120e   :  { %v3696_v43 = vpop.f32.mrf.mxu2 }
0x1210   :  { %3736 = vmax.xlane.f32.xlu2 %v3735_v39 }
0x1272   :  { %v3717_v53 = vpop.xlane.xlu1 %3716 }
0x1273   :  { %v3719_v31 = vsub.f32 %v3681_v36, %v3717_v53 }
0x1275   :  { %v3722_v50 = vmul.f32 1.442695, %v3719_v31  ;;  %v3714_v38 = vpop.xlane.xlu0 %3713 }
0x1276   :  { %v3718_v35 = vsub.f32 %v3662_v4, %v3714_v38 }
0x1277   :  { %9198 = vpow2.f32 %v3722_v50 }
0x1278   :  { %v3720_v37 = vmul.f32 1.442695, %v3718_v35 }
0x127a   :  { %9200 = vpow2.f32 %v3720_v37 }
0x127b   :  { %v3734_v60 = vpop.xlane.xlu2 %3733 }
0x127c   :  { %v3738_v30 = vsub.f32 %v3694_v29, %v3734_v60 }
0x127d   :  { %v9199_v40 = vpop.eup %9198 }
0x127e   :  { %v3740_v57 = vmul.f32 1.442695, %v3738_v30  ;;  %v11287_v63 = vmul.f32 %v9199_v40, %v9087_v0 }
0x1280   :  { %v9201_v51 = vpop.eup %9200  ;;  %9202 = vpow2.f32 %v3740_v57  ;;  %v3755_v61 = vsel %vm3711_vm10, %v11287_v63, 0.0 }
0x1281   :  { %3756 = vadd.xlane.f32.xlu1 %v3755_v61  ;;  %v11291_v17 = vmul.f32 %v9201_v51, %v9088_v47 }
0x1283   :  { %v3737_v11 = vpop.xlane.xlu2 %3736  ;;  %v3752_v24 = vsel %vm3711_vm10, %v11291_v17, 0.0 }
0x1284   :  { %v3739_v18 = vsub.f32 %v3707_v1, %v3737_v11  ;;  %3753 = vadd.xlane.f32.xlu0 %v3752_v24 }
0x1286   :  { %v9203_v33 = vpop.eup %9202  ;;  %v3742_v23 = vmul.f32 1.442695, %v3739_v18 }
0x1287   :  { %v11298_v15 = vmul.f32 %v9203_v33, %v9089_v8 }
0x1288   :  { %9204 = vpow2.f32 %v3742_v23 }
0x1289   :  { %v3790_v28 = vsel %vm3711_vm10, %v11298_v15, 0.0 }
0x128a   :  { %3791 = vadd.xlane.f32.xlu2 %v3790_v28 }
0x128e   :  { %v9205_v6 = vpop.eup %9204 }
0x128f   :  { %v11305_v12 = vmul.f32 %v9205_v6, %v9090_v32 }
0x1291   :  { %v3793_v41 = vsel %vm3711_vm10, %v11305_v12, 0.0 }
0x1292   :  { %3794 = vadd.xlane.f32.xlu0 %v3793_v41 }
0x12f4   :  { %v3757_v20 = vpop.xlane.xlu1 %3756 }
0x12f5   :  { %v3759_v10 = vmax.f32 %v3757_v20, 1e-30 }
0x12f7   :  { %9206 = vrcp.f32 %v3759_v10  ;;  %v3754_v9 = vpop.xlane.xlu0 %3753  ;;  %v3786_v22 = vand.u32 2147483648, %v3759_v10  ;;  %v3784_v58 = vand.u32 2147483647, %v3759_v10  ;;  %vm3780_vm12 = vweird.f32 %v3759_v10 }
0x12f8   :  { %v3758_v62 = vmax.f32 %v3754_v9, 1e-30 }
0x12f9   :  { %v3787_v4 = vor.u32 1.1754944e-38, %v3786_v22  ;;  %vm3785_vm15 = vcmp.eq.f32.partialorder %v3784_v58, 8.507059e+37 }
0x12fa   :  { %9208 = vrcp.f32 %v3758_v62  ;;  %v3771_v5 = vand.u32 2147483648, %v3758_v62  ;;  %v3769_v1 = vand.u32 2147483647, %v3758_v62  ;;  %vm3765_vm4 = vweird.f32 %v3758_v62 }
0x12fc   :  { %v3772_v53 = vor.u32 1.1754944e-38, %v3771_v5  ;;  %vm3770_vm6 = vcmp.eq.f32.partialorder %v3769_v1, 8.507059e+37 }
0x12fd   :  { %v9207_v48 = vpop.eup %9206  ;;  %v3792_v49 = vpop.xlane.xlu2 %3791 }
0x12fe   :  { %v3776_v25 = vmul.f32 %v9207_v48, %v3759_v10  ;;  %v3796_v45 = vmax.f32 %v3792_v49, 1e-30  ;;  %vm3781_vm11 = vweird.f32 %v9207_v48 }
0x12ff   :  { %vm3782_vm13 = vmor %vm3780_vm12, %vm3781_vm11 }
0x1300   :  { %v9209_v3 = vpop.eup %9208  ;;  %v3777_v19 = vsub.f32 1.0, %v3776_v25  ;;  %9210 = vrcp.f32 %v3796_v45  ;;  %v3807_v35 = vand.u32 2147483647, %v3796_v45  ;;  %v3809_v37 = vand.u32 2147483648, %v3796_v45 }
0x1301   :  { %v3761_v42 = vmul.f32 %v9209_v3, %v3758_v62  ;;  %vm3766_vm14 = vweird.f32 %v9209_v3  ;;  %vm3803_vm9 = vweird.f32 %v3796_v45 }
0x1302   :  { %v3778_v27 = vmul.f32 %v9207_v48, %v3777_v19  ;;  %vm3767_vm5 = vmor %vm3765_vm4, %vm3766_vm14  ;;  %v3810_v61 = vor.u32 1.1754944e-38, %v3809_v37  ;;  %vm3808_vm12 = vcmp.eq.f32.partialorder %v3807_v35, 8.507059e+37 }
0x1303   :  { %v3762_v46 = vsub.f32 1.0, %v3761_v42 }
0x1304   :  { %v3779_v36 = vadd.f32 %v9207_v48, %v3778_v27 }
0x1305   :  { %v3763_v34 = vmul.f32 %v9209_v3, %v3762_v46  ;;  %v3795_v13 = vpop.xlane.xlu0 %3794 }
0x1306   :  { %v9211_v29 = vpop.eup %9210  ;;  %v3797_v44 = vmax.f32 %v3795_v13, 1e-30  ;;  %v3783_v7 = vsel %vm3782_vm13, %v9207_v48, %v3779_v36 }
0x1307   :  { %v3764_v16 = vadd.f32 %v9209_v3, %v3763_v34  ;;  %v3799_v43 = vmul.f32 %v9211_v29, %v3796_v45  ;;  %v3788_v39 = vsel %vm3785_vm15, %v3787_v4, %v3783_v7  ;;  %vm3804_vm7 = vweird.f32 %v9211_v29  ;;  %v4293_v7 = vld [vmem:[%s13082_s3] sm:$0xff] }
0x1308   :  { %9212 = vrcp.f32 %v3797_v44  ;;  %v3789_v50 = vmul.f32 %v3788_v39, %v11287_v63  ;;  %vm3805_vm11 = vmor %vm3803_vm9, %vm3804_vm7  ;;  %v3824_v33 = vand.u32 2147483648, %v3797_v44  ;;  %vm3818_vm14 = vweird.f32 %v3797_v44 }
0x1309   :  { %v3800_v31 = vsub.f32 1.0, %v3799_v43  ;;  %v3768_v38 = vsel %vm3767_vm5, %v9209_v3, %v3764_v16  ;;  %v4294_v39 = vperm.slane %v4293_v7, 0 }
0x130a   :  { %v3773_v0 = vsel %vm3770_vm6, %v3772_v53, %v3768_v38  ;;  %v3829_v30 = vpack.c.bf16 %v3789_v50, %v3789_v50  ;;  %v3825_v6 = vor.u32 1.1754944e-38, %v3824_v33  ;;  %v4308_v50 = vperm.slane %v4293_v7, 2 }
0x130b   :  { %v3801_v60 = vmul.f32 %v9211_v29, %v3800_v31  ;;  %v3774_v40 = vmul.f32 %v3773_v0, %v11291_v17  ;;  %v3822_v17 = vand.u32 2147483647, %v3797_v44  ;;  %v4301_v31 = vperm.slane %v4293_v7, 1 }
0x130c   :  { %8323 = vmatmul.msk.bf16.vlgmr.msrb.gmra.mxu1 %vm3711_vm10, %v3829_v30  ;;  %v4315_v0 = vperm.slane %v4293_v7, 3  ;;  %v4322_v30 = vperm.slane %v4293_v7, 4  ;;  %v3519_v33 = vmul.f32 %v11193_v56, %v11200_v26 }
0x130d   :  { %v3802_v47 = vadd.f32 %v9211_v29, %v3801_v60  ;;  %v3828_v57 = vpack.c.bf16 %v3774_v40, %v3774_v40  ;;  %vm3823_vm4 = vcmp.eq.f32.partialorder %v3822_v17, 8.507059e+37  ;;  %v8932_v60 = vld [vmem:[%s13087_s8 + $0x38] sm:$0xff]  ;;  %v4329_v40 = vperm.slane %v4293_v7, 5  ;;  %v8926_v17 = vld [vmem:[%s13087_s8 + $0x8] sm:$0xff] }
0x130e   :  { %v9213_v51 = vpop.eup %9212  ;;  %4043 = vmatpush.bf16.msra.mxu0 %v8932_v60 }
0x130f   :  { %v3814_v11 = vmul.f32 %v9213_v51, %v3797_v44  ;;  %8322 = vmatmul.msk.bf16.vlgmr.msrb.gmra.mxu0 %vm3711_vm10, %v3828_v57  ;;  %v3806_v63 = vsel %vm3805_vm11, %v9211_v29, %v3802_v47  ;;  %vm3819_vm13 = vweird.f32 %v9213_v51  ;;  %v4236_v44 = vld [vmem:[%s13081_s2] sm:$0xff] }
0x1310   :  { %v3811_v24 = vsel %vm3808_vm12, %v3810_v61, %v3806_v63  ;;  %vm3820_vm15 = vmor %vm3818_vm14, %vm3819_vm13  ;;  %v4237_v16 = vperm.slane %v4236_v44, 0  ;;  %v4244_v53 = vperm.slane %v4236_v44, 1  ;;  %v4251_v38 = vperm.slane %v4236_v44, 2  ;;  %v8930_v63 = vld [vmem:[%s13087_s8 + $0x28] sm:$0xff] }
0x1311   :  { %v3815_v8 = vsub.f32 1.0, %v3814_v11  ;;  %v3812_v18 = vmul.f32 %v3811_v24, %v11298_v15  ;;  %v4258_v35 = vperm.slane %v4236_v44, 3  ;;  %v4265_v37 = vperm.slane %v4236_v44, 4  ;;  %v8931_v11 = vld [vmem:[%s13087_s8 + $0x30] sm:$0xff] }
0x1312   :  { %v4272_v47 = vperm.slane %v4236_v44, 5  ;;  %v4279_v57 = vperm.slane %v4236_v44, 6  ;;  %v4336_v61 = vperm.slane %v4293_v7, 6  ;;  %4044 = vmatpush.bf16.msra.mxu0 %v8931_v11  ;;  %v4343_v24 = vperm.slane %v4293_v7, 7 }
0x1313   :  { %v3816_v23 = vmul.f32 %v9213_v51, %v3815_v8  ;;  %v3867_v28 = vpack.c.bf16 %v3812_v18, %v3812_v18  ;;  %v8929_v8 = vld [vmem:[%s13087_s8 + $0x20] sm:$0xff]  ;;  %v8928_v18 = vld [vmem:[%s13087_s8 + $0x18] sm:$0xff] }
0x1315   :  { %v3817_v32 = vadd.f32 %v9213_v51, %v3816_v23  ;;  %8324 = vmatmul.msk.bf16.vlgmr.msrb.gmra.mxu2 %vm3711_vm10, %v3867_v28  ;;  %v8927_v23 = vld [vmem:[%s13087_s8 + $0x10] sm:$0xff]  ;;  %v8925_v28 = vld [vmem:[%s13087_s8] sm:$0xff] }
0x1316   :  { %4045 = vmatpush.bf16.msra.mxu0 %v8930_v63 }
0x1317   :  { %v3821_v41 = vsel %vm3820_vm15, %v9213_v51, %v3817_v32  ;;  %v4286_v51 = vperm.slane %v4236_v44, 7 }
0x1318   :  { %v3826_v20 = vsel %vm3823_vm4, %v3825_v6, %v3821_v41 }
0x1319   :  { %v3827_v10 = vmul.f32 %v3826_v20, %v11305_v12 }
0x131a   :  { %4046 = vmatpush.bf16.msra.mxu0 %v8929_v8  ;;  %v4354_v8 = vld [vmem:[#allocation2 + $0x10] sm:$0xf] }
0x131b   :  { %v3868_v9 = vpack.c.bf16 %v3827_v10, %v3827_v10 }
0x131d   :  { %8325 = vmatmul.msk.bf16.vlgmr.msrb.gmra.mxu3 %vm3711_vm10, %v3868_v9  ;;  %vm4194_vm10 = vcmask 1041408  }
0x131e   :  { %4047 = vmatpush.bf16.msra.mxu0 %v8928_v18 }
0x1322   :  { %4048 = vmatpush.bf16.msra.mxu0 %v8927_v23 }
0x1326   :  { %4049 = vmatpush.bf16.msra.mxu0 %v8926_v17 }
0x132a   :  { %4050 = vmatpush.bf16.msra.mxu0 %v8925_v28 }
0x1389   :  { %v3863_v15 = vpop.f32.mrf.mxu1 }
0x138a   :  { %v3906_v62 = vmul.f32 %v3863_v15, %v11249_v59  ;;  %v3908_v49 = vsub.f32 %v11249_v59, %v3863_v15 }
0x138c   :  { %v3845_v48 = vpop.f32.mrf.mxu0 }
0x138d   :  { %v9049_v25 = vpack.i.bf16 %v3863_v15, %v3845_v48  ;;  %v3907_v45 = vsub.f32 %v11259_v52, %v3845_v48  ;;  %v3905_v3 = vmul.f32 %v3845_v48, %v11259_v52 }
0x138f   :  { %v9059_v19 = vpack.i.bf16 %v3908_v49, %v3907_v45  ;;  %v9054_v22 = vpack.i.bf16 %v3906_v62, %v3905_v3  ;;  %9050 = vrot.lane.b32.xlu1 %v9049_v25, %s9343_s19 }
0x1391   :  { %9055 = vrot.lane.b32.xlu2 %v9054_v22, %s9342_s18  ;;  %9060 = vrot.lane.b32.xlu0 %v9059_v19, %s9344_s20  ;;  %v3865_v12 = vpop.f32.mrf.mxu1 }
0x1394   :  { %v3847_v42 = vpop.f32.mrf.mxu0 }
0x1398   :  { %v3883_v27 = vpop.f32.mrf.mxu2 }
0x1399   :  { %v3939_v58 = vmul.f32 %v3883_v27, %v11256_v14  ;;  %v3941_v5 = vsub.f32 %v11256_v14, %v3883_v27 }
0x13a0   :  { %v3885_v46 = vpop.f32.mrf.mxu2  ;;  %v3901_v36 = vpop.f32.mrf.mxu3 }
0x13a1   :  { %v3940_v4 = vmul.f32 %v3901_v36, %v11246_v54  ;;  %v3942_v34 = vsub.f32 %v11246_v54, %v3901_v36  ;;  %v9064_v1 = vpack.i.bf16 %v3901_v36, %v3883_v27 }
0x13a3   :  { %v9074_v13 = vpack.i.bf16 %v3942_v34, %v3941_v5  ;;  %v9069_v29 = vpack.i.bf16 %v3940_v4, %v3939_v58  ;;  %9065 = vrot.lane.b32.xlu1 %v9064_v1, %s9343_s19 }
0x13a5   :  { %9075 = vrot.lane.b32.xlu2 %v9074_v13, %s9344_s20  ;;  %9070 = vrot.lane.b32.xlu0 %v9069_v29, %s9342_s18 }
0x13a8   :  { %v3903_v43 = vpop.f32.mrf.mxu3 }
0x13ab   :  { %4242 = vperm.xlu1 %9047, %v4237_v16  }
0x13ad   :  { %4299 = vperm.xlu2 %9048, %v4294_v39   ;;  %4249 = vperm.xlu0 %9046, %v4244_v53  }
0x13b3   :  { %4306 = vperm.xlu1 %9047, %v4301_v31   ;;  %v4351_v31 = vld [vmem:[#allocation2 + $0x4] sm:$0xf] }
0x13b5   :  { %4313 = vperm.xlu2 %9048, %v4308_v50   ;;  %4256 = vperm.xlu0 %9046, %v4251_v38  }
0x13bb   :  { %4263 = vperm.xlu1 %9047, %v4258_v35   ;;  %v4350_v35 = vld [vmem:[#allocation2] sm:$0xf] }
0x13bd   :  { %4270 = vperm.xlu2 %9048, %v4265_v37   ;;  %4320 = vperm.xlu0 %9046, %v4315_v0   ;;  %v4352_v37 = vld [vmem:[#allocation2 + $0x8] sm:$0xf]  ;;  %v4353_v0 = vld [vmem:[#allocation2 + $0xc] sm:$0xf] }
0x13c3   :  { %4327 = vperm.xlu1 %9047, %v4322_v30  }
0x13c5   :  { %4334 = vperm.xlu2 %9048, %v4329_v40   ;;  %4277 = vperm.xlu0 %9046, %v4272_v47  }
0x13cb   :  { %4284 = vperm.xlu1 %9047, %v4279_v57  }
0x13cd   :  { %4291 = vperm.xlu2 %9048, %v4286_v51   ;;  %4341 = vperm.xlu0 %9046, %v4336_v61  }
0x13d3   :  { %4348 = vperm.xlu1 %9047, %v4343_v24  }
0x13db   :  { %3521 = vrot.lane.b32.xlu1 %v3519_v33, %s9344_s20 }
0x13eb   :  { %v9056_v32 = vpop.permute.xlu2 %9055 }
0x13ec   :  { %v9058_v41 = vunpack.i.h.bf16 %v9056_v32  ;;  %v9057_v20 = vunpack.i.l.bf16 %v9056_v32  ;;  %v4355_v32 = vld [vmem:[#allocation2 + $0x14] sm:$0xf] }
0x13ff   :  { %v9076_v22 = vpop.permute.xlu2 %9075 }
0x1400   :  { %v9078_v36 = vunpack.i.h.bf16 %v9076_v22  ;;  %v9077_v5 = vunpack.i.l.bf16 %v9076_v22 }
0x1401   :  { %v9051_v56 = vpop.permute.xlu1 %9050 }
0x1402   :  { %v9053_v26 = vunpack.i.h.bf16 %v9051_v56  ;;  %v9052_v6 = vunpack.i.l.bf16 %v9051_v56 }
0x1403   :  { %v9061_v10 = vpop.permute.xlu0 %9060 }
0x1404   :  { %v3934_v9 = vsel %vm311_vm1, %v11249_v59, %v9053_v26  ;;  %v3933_v15 = vsel %vm311_vm1, %v11259_v52, %v9052_v6  ;;  %v9063_v62 = vunpack.i.h.bf16 %v9061_v10  ;;  %v9062_v48 = vunpack.i.l.bf16 %v9061_v10 }
0x1405   :  { %v3935_v49 = vsel %vm313_vm2, %v3933_v15, %v9057_v20  ;;  %v3936_v25 = vsel %vm313_vm2, %v3934_v9, %v9058_v41 }
0x1406   :  { %v3937_v45 = vsel %vm394_vm3, %v3935_v49, %v9062_v48  ;;  %v3938_v3 = vsel %vm394_vm3, %v3936_v25, %v9063_v62  ;;  %v4357_v48 = vld [vmem:[#allocation2 + $0x1c] sm:$0xf]  ;;  %v4356_v25 = vld [vmem:[#allocation2 + $0x18] sm:$0xf] }
0x1407   :  { %v3973_v19 = vpack.c.bf16 %v3938_v3, %v3937_v45  ;;  %v11372_v12 = vpop.permute.xlu2 %4299 }
0x1408   :  { %v4389_v11 = vmul.f32 %v4350_v35, %v11372_v12 }
0x1409   :  { %4051 = vmatmul.bf16.vlgmr.msra.gmra.mxu0 %v3973_v19 }
0x140a   :  { %v4397_v28 = vsel %vm55_vm0, %v4389_v11, 0.0 }
0x140f   :  { %v11382_v16 = vpop.permute.xlu2 %4313 }
0x1410   :  { %v4391_v6 = vmul.f32 %v4352_v37, %v11382_v16 }
0x1412   :  { %v4400_v45 = vsel %vm55_vm0, %v4391_v6, 0.0 }
0x1415   :  { %v9066_v42 = vpop.permute.xlu1 %9065 }
0x1416   :  { %v9068_v59 = vunpack.i.h.bf16 %v9066_v42  ;;  %v9067_v27 = vunpack.i.l.bf16 %v9066_v42 }
0x1417   :  { %v9071_v58 = vpop.permute.xlu0 %9070  ;;  %v11388_v53 = vpop.permute.xlu2 %4270 }
0x1418   :  { %v9073_v52 = vunpack.i.h.bf16 %v9071_v58  ;;  %v9072_v46 = vunpack.i.l.bf16 %v9071_v58  ;;  %v3967_v4 = vsel %vm311_vm1, %v11256_v14, %v9067_v27  ;;  %v3968_v34 = vsel %vm311_vm1, %v11246_v54, %v9068_v59 }
0x1419   :  { %v4370_v41 = vmul.f32 %v4354_v8, %v11388_v53 }
0x141a   :  { %v3969_v1 = vsel %vm313_vm2, %v3967_v4, %v9072_v46  ;;  %v3970_v13 = vsel %vm313_vm2, %v3968_v34, %v9073_v52 }
0x141b   :  { %v3971_v29 = vsel %vm394_vm3, %v3969_v1, %v9077_v5  ;;  %v3972_v44 = vsel %vm394_vm3, %v3970_v13, %v9078_v36  ;;  %v4381_v3 = vsel %vm55_vm0, %v4370_v41, 0.0  ;;  %v4362_v41 = vld [vmem:[#allocation3 + $0x10] sm:$0xf] }
0x141c   :  { %v3974_v7 = vpack.c.bf16 %v3972_v44, %v3971_v29  ;;  %v4358_v29 = vld [vmem:[#allocation3] sm:$0xf] }
0x141d   :  { %v11384_v43 = vpop.permute.xlu1 %4242 }
0x141e   :  { %4056 = vmatmul.bf16.gmra.mxu0 %v3974_v7  ;;  %v4366_v30 = vmul.f32 %v4350_v35, %v11384_v43 }
0x141f   :  { %v11386_v39 = vpop.permute.xlu0 %4249  ;;  %v11399_v47 = vpop.permute.xlu2 %4334 }
0x1420   :  { %v4367_v38 = vmul.f32 %v4351_v31, %v11386_v39  ;;  %v4374_v63 = vsel %vm55_vm0, %v4366_v30, 0.0  ;;  %v4394_v34 = vmul.f32 %v4355_v32, %v11399_v47 }
0x1422   :  { %v4375_v57 = vsel %vm55_vm0, %v4367_v38, 0.0  ;;  %v4406_v30 = vsel %vm55_vm0, %v4394_v34, 0.0 }
0x1423   :  { %v4376_v18 = vadd.f32 %v4375_v57, %v4374_v63  ;;  %v4360_v57 = vld [vmem:[#allocation3 + $0x8] sm:$0xf]  ;;  %v4361_v63 = vld [vmem:[#allocation3 + $0xc] sm:$0xf] }
0x1425   :  { %v4307_v14 = vpop.permute.xlu1 %4306 }
0x1426   :  { %v4390_v51 = vmul.f32 %v4351_v31, %v4307_v14  ;;  %v4359_v31 = vld [vmem:[#allocation3 + $0x4] sm:$0xf] }
0x1427   :  { %v11390_v54 = vpop.permute.xlu0 %4256  ;;  %v11418_v49 = vpop.permute.xlu2 %4291  ;;  %v4436_v35 = vmul.f32 %v4359_v31, %v4307_v14 }
0x1428   :  { %v4368_v40 = vmul.f32 %v4352_v37, %v11390_v54  ;;  %v4398_v23 = vsel %vm55_vm0, %v4390_v51, 0.0  ;;  %v4373_v58 = vmul.f32 %v4357_v48, %v11418_v49  ;;  %v4413_v51 = vmul.f32 %v4359_v31, %v11386_v39 }
0x1429   :  { %v4399_v9 = vadd.f32 %v4398_v23, %v4397_v28  ;;  %v4444_v14 = vsel %vm55_vm0, %v4436_v35, 0.0 }
0x142a   :  { %v4377_v24 = vsel %vm55_vm0, %v4368_v40, 0.0  ;;  %v4387_v38 = vsel %vm55_vm0, %v4373_v58, 0.0  ;;  %v4421_v39 = vsel %vm55_vm0, %v4413_v51, 0.0 }
0x142b   :  { %v4378_v56 = vadd.f32 %v4377_v24, %v4376_v18  ;;  %v4401_v42 = vadd.f32 %v4400_v45, %v4399_v9  ;;  %v4414_v18 = vmul.f32 %v4360_v57, %v11390_v54  ;;  %v4364_v45 = vld [vmem:[#allocation3 + $0x18] sm:$0xf] }
0x142d   :  { %v11392_v50 = vpop.permute.xlu1 %4263  ;;  %v4423_v54 = vsel %vm55_vm0, %v4414_v18, 0.0 }
0x142e   :  { %v4369_v61 = vmul.f32 %v4353_v0, %v11392_v50 }
0x142f   :  { %v11395_v60 = vpop.permute.xlu0 %4320 }
0x1430   :  { %v4379_v17 = vsel %vm55_vm0, %v4369_v61, 0.0  ;;  %v4392_v20 = vmul.f32 %v4353_v0, %v11395_v60  ;;  %v4435_v0 = vmul.f32 %v4358_v29, %v11372_v12 }
0x1431   :  { %v4380_v15 = vadd.f32 %v4379_v17, %v4378_v56  ;;  %v4437_v17 = vmul.f32 %v4360_v57, %v11382_v16  ;;  %v4438_v56 = vmul.f32 %v4361_v63, %v11395_v60  ;;  %v4363_v60 = vld [vmem:[#allocation3 + $0x14] sm:$0xf]  ;;  %v8402_v57 = vld [vmem:[%s13089_s10 + $0x58] sm:$0xf0] }
0x1432   :  { %v4402_v19 = vsel %vm55_vm0, %v4392_v20, 0.0  ;;  %v4443_v23 = vsel %vm55_vm0, %v4435_v0, 0.0  ;;  %v8400_v0 = vld [vmem:[%s13089_s10 + $0x50] sm:$0xf] }
0x1433   :  { %v4382_v59 = vadd.f32 %v4381_v3, %v4380_v15  ;;  %v4403_v36 = vadd.f32 %v4402_v19, %v4401_v42  ;;  %v4446_v9 = vsel %vm55_vm0, %v4437_v17, 0.0  ;;  %v4416_v3 = vmul.f32 %v4362_v41, %v11388_v53  ;;  %v8940_v17 = vld [vmem:[%s13089_s10 + $0x34] sm:$0xf0] }
0x1435   :  { %v11406_v33 = vpop.permute.xlu1 %4327 }
0x1436   :  { %v4393_v62 = vmul.f32 %v4354_v8, %v11406_v33  ;;  %v4412_v8 = vmul.f32 %v4358_v29, %v11384_v43  ;;  %v4445_v43 = vadd.f32 %v4444_v14, %v4443_v23  ;;  %v9091_v14 = vld [vmem:[%s13088_s9] ss:$0 sm:$0xff]  ;;  %v8384_v23 = vld [vmem:[%s13089_s10 + $0x30] sm:$0xf] }
0x1437   :  { %v11411_v26 = vpop.permute.xlu0 %4277 }
0x1438   :  { %v4371_v10 = vmul.f32 %v4355_v32, %v11411_v26  ;;  %v4404_v52 = vsel %vm55_vm0, %v4393_v62, 0.0  ;;  %v4415_v32 = vmul.f32 %v4361_v63, %v11392_v50  ;;  %v4420_v20 = vsel %vm55_vm0, %v4412_v8, 0.0  ;;  %v8941_v63 = vld [vmem:[%s13089_s10 + $0x44] sm:$0xf]  ;;  %v8394_v8 = vld [vmem:[%s13089_s10 + $0x48] sm:$0xf0] }
0x1439   :  { %v4405_v44 = vadd.f32 %v4404_v52, %v4403_v36  ;;  %v4422_v16 = vadd.f32 %v4421_v39, %v4420_v20  ;;  %v4448_v50 = vsel %vm55_vm0, %v4438_v56, 0.0  ;;  %v4417_v19 = vmul.f32 %v4363_v60, %v11411_v26  ;;  %v8939_v39 = vld [vmem:[%s13089_s10 + $0x34] sm:$0xf]  ;;  %v8938_v20 = vld [vmem:[%s13089_s10 + $0x24] sm:$0xf0] }
0x143a   :  { %v4383_v22 = vsel %vm55_vm0, %v4371_v10, 0.0  ;;  %v4439_v10 = vmul.f32 %v4362_v41, %v11406_v33  ;;  %v4425_v15 = vsel %vm55_vm0, %v4415_v32, 0.0  ;;  %v4427_v36 = vsel %vm55_vm0, %v4416_v3, 0.0  ;;  %v8386_v32 = vld [vmem:[%s13089_s10 + $0x38] sm:$0xf0] }
0x143b   :  { %v4384_v5 = vadd.f32 %v4383_v22, %v4382_v59  ;;  %v4407_v61 = vadd.f32 %v4406_v30, %v4405_v44  ;;  %v4440_v59 = vmul.f32 %v4363_v60, %v11399_v47  ;;  %v8943_v30 = vld [vmem:[%s13089_s10 + $0x54] sm:$0xf]  ;;  %v8397_v18 = vor.u32 %v8941_v63, %v8394_v8  ;;  %v8936_v60 = vld [vmem:[%s13089_s10 + $0x14] sm:$0xf0] }
0x143c   :  { %v4450_v33 = vsel %vm55_vm0, %v4439_v10, 0.0  ;;  %v8405_v51 = vor.u32 %v8943_v30, %v8402_v57  ;;  %v8389_v41 = vor.u32 %v8939_v39, %v8386_v32 }
0x143d   :  { %v4285_v27 = vpop.permute.xlu1 %4284  ;;  %v4452_v53 = vsel %vm55_vm0, %v4440_v59, 0.0 }
0x143e   :  { %v4372_v46 = vmul.f32 %v4356_v25, %v4285_v27  ;;  %v4418_v58 = vmul.f32 %v4364_v45, %v4285_v27  ;;  %4565 = vmatpush.bf16.msra.mxu2 %v8405_v51 }
0x143f   :  { %v4342_v4 = vpop.permute.xlu0 %4341 }
0x1440   :  { %v4385_v1 = vsel %vm55_vm0, %v4372_v46, 0.0  ;;  %v4395_v13 = vmul.f32 %v4356_v25, %v4342_v4  ;;  %v4447_v25 = vadd.f32 %v4446_v9, %v4445_v43  ;;  %v4441_v52 = vmul.f32 %v4364_v45, %v4342_v4  ;;  %v8376_v43 = vld [vmem:[%s13089_s10 + $0x20] sm:$0xf]  ;;  %v8370_v45 = vld [vmem:[%s13089_s10 + $0x18] sm:$0xf0] }
0x1441   :  { %v4386_v7 = vadd.f32 %v4385_v1, %v4384_v5  ;;  %v4429_v5 = vsel %vm55_vm0, %v4417_v19, 0.0  ;;  %v4431_v1 = vsel %vm55_vm0, %v4418_v58, 0.0  ;;  %v8377_v10 = vor.u32 %v8938_v20, %v8376_v43  ;;  %v8360_v58 = vld [vmem:[%s13089_s10] sm:$0xf] }
0x1442   :  { %v4408_v40 = vsel %vm55_vm0, %v4395_v13, 0.0  ;;  %v4449_v42 = vadd.f32 %v4448_v50, %v4447_v25  ;;  %v4454_v26 = vsel %vm55_vm0, %v4441_v52, 0.0  ;;  %4566 = vmatpush.bf16.msra.mxu2 %v8397_v18  ;;  %v8935_v25 = vld [vmem:[%s13089_s10 + $0x14] sm:$0xf]  ;;  %v8934_v52 = vld [vmem:[%s13089_s10 + $0x4] sm:$0xf0] }
0x1443   :  { %v4388_v37 = vadd.f32 %v4387_v38, %v4386_v7  ;;  %v4409_v12 = vadd.f32 %v4408_v40, %v4407_v61  ;;  %v8392_v61 = vld [vmem:[%s13089_s10 + $0x40] sm:$0xf]  ;;  %v8373_v19 = vor.u32 %v8935_v25, %v8370_v45 }
0x1444   :  { %v4451_v46 = vadd.f32 %v4450_v33, %v4449_v42 }
0x1445   :  { %v4349_v11 = vpop.permute.xlu1 %4348  ;;  %4459 = vrot.lane.b32.xlu0 %v4388_v37, %s9343_s19 }
0x1446   :  { %v4396_v24 = vmul.f32 %v4357_v48, %v4349_v11  ;;  %v4424_v48 = vadd.f32 %v4423_v54, %v4422_v16  ;;  %4567 = vmatpush.bf16.msra.mxu2 %v8389_v41  ;;  %v8937_v54 = vld [vmem:[%s13089_s10 + $0x24] sm:$0xf]  ;;  %v8378_v16 = vld [vmem:[%s13089_s10 + $0x28] sm:$0xf0] }
0x1447   :  { %v8381_v50 = vor.u32 %v8937_v54, %v8378_v16 }
0x1448   :  { %v4410_v28 = vsel %vm55_vm0, %v4396_v24, 0.0  ;;  %v4426_v22 = vadd.f32 %v4425_v15, %v4424_v48 }
0x1449   :  { %v4411_v6 = vadd.f32 %v4410_v28, %v4409_v12  ;;  %v8385_v28 = vor.u32 %v8940_v17, %v8384_v23 }
0x144a   :  { %v4428_v34 = vadd.f32 %v4427_v36, %v4426_v22  ;;  %4568 = vmatpush.bf16.msra.mxu2 %v8381_v50  ;;  %v8361_v36 = vor.u32 %v8934_v52, %v8360_v58 }
0x144b   :  { %4463 = vrot.lane.b32.xlu2 %v4411_v6, %s9342_s18 }
0x144c   :  { %v4430_v13 = vadd.f32 %v4429_v5, %v4428_v34  ;;  %v8933_v5 = vld [vmem:[%s13089_s10 + $0x4] sm:$0xf]  ;;  %v8362_v34 = vld [vmem:[%s13089_s10 + $0x8] sm:$0xf0] }
0x144d   :  { %v3522_v62 = vpop.permute.xlu1 %3521 }
0x144e   :  { %3525 = vst.msk [vmem:[#allocation3 + $0x1c] sm:$0xf] %vm55_vm0, %v3522_v62  ;;  %v4432_v27 = vadd.f32 %v4431_v1, %v4430_v13  ;;  %v8368_v62 = vld [vmem:[%s13089_s10 + $0x10] sm:$0xf]  ;;  %4569 = vmatpush.bf16.msra.mxu2 %v8373_v19  ;;  %v8365_v13 = vor.u32 %v8933_v5, %v8362_v34 }
0x144f   :  { %4226 = vst.msk [vmem:[#allocation3 + $0x1c] sm:$0xf] %vm55_vm0, %v13119_v55  ;;  %v4453_v55 = vadd.f32 %v4452_v53, %v4451_v46  ;;  %v8369_v48 = vor.u32 %v8936_v60, %v8368_v62 }
0x1451   :  { %v4455_v4 = vadd.f32 %v4454_v26, %v4453_v55 }
0x1452   :  { %4570 = vmatpush.bf16.msra.mxu2 %v8365_v13 }
0x1456   :  { %v4365_v29 = vld [vmem:[#allocation3 + $0x1c] sm:$0xf] }
0x1457   :  { %v4419_v44 = vmul.f32 %v4365_v29, %v11418_v49  ;;  %v4442_v47 = vmul.f32 %v4365_v29, %v4349_v11  ;;  %v8944_v49 = vld [vmem:[%s13089_s10 + $0x54] sm:$0xf0]  ;;  %v8942_v11 = vld [vmem:[%s13089_s10 + $0x44] sm:$0xf0] }
0x1458   :  { %v8401_v40 = vor.u32 %v8944_v49, %v8400_v0  ;;  %v8393_v24 = vor.u32 %v8942_v11, %v8392_v61 }
0x1459   :  { %v4433_v7 = vsel %vm55_vm0, %v4419_v44, 0.0  ;;  %v4456_v31 = vsel %vm55_vm0, %v4442_v47, 0.0 }
0x145a   :  { %v4434_v38 = vadd.f32 %v4433_v7, %v4432_v27  ;;  %v4457_v35 = vadd.f32 %v4456_v31, %v4455_v4  ;;  %4552 = vmatpush.bf16.msra.mxu1 %v8401_v40 }
0x145c   :  { %4621 = vrot.lane.b32.xlu0 %v4434_v38, %s9342_s18  ;;  %4631 = vrot.lane.b32.xlu2 %v4457_v35, %s9344_s20 }
0x145e   :  { %4553 = vmatpush.bf16.msra.mxu1 %v8393_v24 }
0x1462   :  { %4554 = vmatpush.bf16.msra.mxu1 %v8385_v28 }
0x1466   :  { %4555 = vmatpush.bf16.msra.mxu1 %v8377_v10 }
0x146a   :  { %4556 = vmatpush.bf16.msra.mxu1 %v8369_v48 }
0x146e   :  { %4557 = vmatpush.bf16.msra.mxu1 %v8361_v36 }
0x1486   :  { %v4052_v37 = vpop.f32.mrf.mxu0 }
0x1487   :  { %v4053_v56 = vadd.f32 %v9091_v14, %v4052_v37 }
0x1489   :  { %v4062_v9 = vmax.f32 %v4053_v56, 0.0 }
0x148b   :  { %v4066_v3 = vrot.slane %v4062_v9, 4  ;;  %v4071_v42 = vperm.slane %v4062_v9, %v11206_v21 }
0x148d   :  { %v4067_v53 = vsel %vm3535_vm8, 0.0, %v4066_v3  ;;  %v4088_v55 = vrot.slane %v4071_v42, 4 }
0x148e   :  { %v4054_v12 = vpop.f32.mrf.mxu0  ;;  %v4075_v44 = vperm.slane %v4067_v53, %v11206_v21 }
0x148f   :  { %v4055_v6 = vadd.f32 %v9091_v14, %v4054_v12 }
0x1490   :  { %v4100_v37 = vrot.slane %v4075_v44, 4 }
0x1491   :  { %v4063_v15 = vmax.f32 %v4055_v6, 0.0 }
0x1493   :  { %v4076_v33 = vrot.slane %v4063_v15, 4  ;;  %v4081_v46 = vperm.slane %v4063_v15, %v11206_v21 }
0x1495   :  { %v4077_v1 = vsel %vm3535_vm8, 0.0, %v4076_v33  ;;  %v4086_v27 = vrot.slane %v4081_v46, 4  ;;  %v4089_v4 = vsel %vm3535_vm8, %v4081_v46, %v4088_v55 }
0x1496   :  { %v4085_v47 = vperm.slane %v4077_v1, %v11206_v21  ;;  %v4097_v49 = vperm.slane %v4089_v4, %v11219_v2 }
0x1497   :  { %v4087_v0 = vsel %vm3535_vm8, %v4086_v27, %v4071_v42 }
0x1498   :  { %v4098_v30 = vrot.slane %v4085_v47, 4  ;;  %v4101_v57 = vsel %vm3535_vm8, %v4085_v47, %v4100_v37  ;;  %v4093_v61 = vperm.slane %v4087_v0, %v11219_v2  ;;  %v11601_v0 = vld [vmem:[%s13090_s11] sm:$0x3] }
0x1499   :  { %v4109_v18 = vperm.slane %v4101_v57, %v11219_v2 }
0x149a   :  { %v4099_v8 = vsel %vm3535_vm8, %v4098_v30, %v4075_v44  ;;  %v4110_v6 = vrot.slane %v4093_v61, 4 }
0x149b   :  { %v4057_v22 = vpop.f32.mrf.mxu0  ;;  %v4105_v56 = vperm.slane %v4099_v8, %v11219_v2  ;;  %v4116_v9 = vrot.slane %v4109_v18, 4 }
0x149c   :  { %v4058_v59 = vadd.f32 %v9091_v14, %v4057_v22  ;;  %v4111_v5 = vsel %vm3535_vm8, 0.0, %v4110_v6 }
0x149d   :  { %v4114_v19 = vrot.slane %v4105_v56, 4  ;;  %v4117_v55 = vsel %vm3535_vm8, 0.0, %v4116_v9 }
0x149e   :  { %v4064_v26 = vmax.f32 %v4058_v59, 0.0 }
0x149f   :  { %v4115_v44 = vsel %vm3535_vm8, 0.0, %v4114_v19 }
0x14a0   :  { %v4118_v29 = vrot.slane %v4064_v26, 4  ;;  %v4123_v38 = vperm.slane %v4064_v26, %v11206_v21 }
0x14a2   :  { %v4119_v31 = vsel %vm3535_vm8, 0.0, %v4118_v29  ;;  %v4140_v11 = vrot.slane %v4123_v38, 4 }
0x14a3   :  { %v4059_v7 = vpop.f32.mrf.mxu0  ;;  %v4127_v51 = vperm.slane %v4119_v31, %v11206_v21 }
0x14a4   :  { %v4060_v35 = vadd.f32 %v9091_v14, %v4059_v7  ;;  %v4112_v14 = vrot.slane %v4097_v49, 4 }
0x14a5   :  { %v4152_v28 = vrot.slane %v4127_v51, 4  ;;  %v4464_v31 = vpop.permute.xlu2 %4463 }
0x14a6   :  { %v4065_v40 = vmax.f32 %v4060_v35, 0.0  ;;  %v4113_v16 = vsel %vm3535_vm8, 0.0, %v4112_v14 }
0x14a8   :  { %v4128_v63 = vrot.slane %v4065_v40, 4  ;;  %v4133_v24 = vperm.slane %v4065_v40, %v11206_v21 }
0x14aa   :  { %v4129_v12 = vsel %vm3535_vm8, 0.0, %v4128_v63  ;;  %v4138_v23 = vrot.slane %v4133_v24, 4  ;;  %v4141_v17 = vsel %vm3535_vm8, %v4133_v24, %v4140_v11  ;;  %v11610_v24 = vld [vmem:[%s13081_s2 + $0x8] sm:$0xff] }
0x14ab   :  { %v4137_v39 = vperm.slane %v4129_v12, %v11206_v21  ;;  %v4149_v32 = vperm.slane %v4141_v17, %v11219_v2  ;;  %v4679_v17 = vperm.slane %v11610_v24, 2 }
0x14ac   :  { %v4139_v41 = vsel %vm3535_vm8, %v4138_v23, %v4123_v38 }
0x14ad   :  { %v4145_v43 = vperm.slane %v4139_v41, %v11219_v2  ;;  %v4150_v20 = vrot.slane %v4137_v39, 4  ;;  %v4153_v54 = vsel %vm3535_vm8, %v4137_v39, %v4152_v28  ;;  %v4164_v10 = vrot.slane %v4149_v32, 4 }
0x14ae   :  { %v4161_v15 = vperm.slane %v4153_v54, %v11219_v2  ;;  %v4180_v21 = vrot.slane %v4149_v32, 6 }
0x14af   :  { %v4151_v50 = vsel %vm3535_vm8, %v4150_v20, %v4127_v51  ;;  %v4162_v62 = vrot.slane %v4145_v43, 4  ;;  %v4165_v60 = vsel %vm3535_vm8, 0.0, %v4164_v10  ;;  %v4178_v48 = vrot.slane %v4145_v43, 6 }
0x14b0   :  { %v4157_v25 = vperm.slane %v4151_v50, %v11219_v2  ;;  %v4168_v45 = vrot.slane %v4161_v15, 4  ;;  %v4181_v3 = vrot.slane %v4165_v60, 6  ;;  %v4184_v33 = vrot.slane %v4161_v15, 6  ;;  %v8411_v50 = vld [vmem:[%s13082_s3 + $0x8] sm:$0xff] }
0x14b1   :  { %v4163_v22 = vsel %vm3535_vm8, 0.0, %v4162_v62  ;;  %v4195_v42 = vsel %vm4194_vm10, %v4093_v61, %v4178_v48  ;;  %v4197_v59 = vsel %vm4194_vm10, %v4097_v49, %v4180_v21  ;;  %v4483_v49 = vperm.slane %v11601_v0, 0  ;;  %v9092_v21 = vld [vmem:[%s13080_s1] ss:$0 sm:$0xff] }
0x14b2   :  { %v4166_v58 = vrot.slane %v4157_v25, 4  ;;  %v4169_v52 = vsel %vm3535_vm8, 0.0, %v4168_v45  ;;  %v4179_v46 = vrot.slane %v4163_v22, 6  ;;  %v4182_v36 = vrot.slane %v4157_v25, 6  ;;  %4203 = vst.msk [vmem:[#allocation4] sm:$0xf] %vm55_vm0, %v4195_v42 }
0x14b3   :  { %v4185_v2 = vrot.slane %v4169_v52, 6  ;;  %v4198_v34 = vsel %vm4194_vm10, %v4113_v16, %v4181_v3  ;;  %4205 = vst.msk [vmem:[#allocation4 + $0x8] sm:$0xf] %vm55_vm0, %v4197_v59  ;;  %v4201_v13 = vsel %vm4194_vm10, %v4109_v18, %v4184_v33  ;;  %v4672_v18 = vperm.slane %v11610_v24, 1 }
0x14b4   :  { %v4167_v53 = vsel %vm3535_vm8, 0.0, %v4166_v58  ;;  %v4196_v1 = vsel %vm4194_vm10, %v4111_v5, %v4179_v46  ;;  %v4199_v26 = vsel %vm4194_vm10, %v4105_v56, %v4182_v36  ;;  %4206 = vst.msk [vmem:[#allocation4 + $0xc] sm:$0xf] %vm55_vm0, %v4198_v34  ;;  %v4665_v15 = vperm.slane %v11610_v24, 0 }
0x14b5   :  { %v4183_v29 = vrot.slane %v4167_v53, 6  ;;  %4204 = vst.msk [vmem:[#allocation4 + $0x4] sm:$0xf] %vm55_vm0, %v4196_v1  ;;  %v4202_v47 = vsel %vm4194_vm10, %v4117_v55, %v4185_v2  ;;  %v4729_v62 = vperm.slane %v8411_v50, 1  ;;  %v4722_v60 = vperm.slane %v8411_v50, 0 }
0x14b6   :  { %4207 = vst.msk [vmem:[#allocation4 + $0x10] sm:$0xf] %vm55_vm0, %v4199_v26  ;;  %v4632_v20 = vpop.permute.xlu2 %4631  ;;  %v4686_v48 = vperm.slane %v11610_v24, 3  ;;  %v4736_v25 = vperm.slane %v8411_v50, 2  ;;  %v4750_v45 = vperm.slane %v8411_v50, 4  ;;  %v4693_v3 = vperm.slane %v11610_v24, 4 }
0x14b7   :  { %v4200_v27 = vsel %vm4194_vm10, %v4115_v44, %v4183_v29  ;;  %4209 = vst.msk [vmem:[#allocation4 + $0x18] sm:$0xf] %vm55_vm0, %v4201_v13  ;;  %v4460_v4 = vpop.permute.xlu0 %4459  ;;  %v4707_v33 = vperm.slane %v11610_v24, 6  ;;  %v4757_v19 = vperm.slane %v8411_v50, 5  ;;  %v4771_v22 = vperm.slane %v8411_v50, 7 }
0x14b8   :  { %4208 = vst.msk [vmem:[#allocation4 + $0x14] sm:$0xf] %vm55_vm0, %v4200_v27  ;;  %v4714_v42 = vperm.slane %v11610_v24, 7  ;;  %v4743_v1 = vperm.slane %v8411_v50, 3  ;;  %v4700_v26 = vperm.slane %v11610_v24, 5  ;;  %v4764_v13 = vperm.slane %v8411_v50, 6 }
0x14b9   :  { %4210 = vst.msk [vmem:[#allocation4 + $0x1c] sm:$0xf] %vm55_vm0, %v4202_v47  ;;  %v4227_v7 = vld [vmem:[#allocation4] sm:$0xf]  ;;  %v4484_v47 = vperm.slane %v11601_v0, 1 }
0x14ba   :  { %v4466_v38 = vsel %vm311_vm1, %v4227_v7, %v4460_v4 }
0x14bb   :  { %v4467_v35 = vsel %vm313_vm2, %v4466_v38, %v4464_v31 }
0x14bc   :  { %v4468_v37 = vpack.c.bf16 %v4467_v35, %v4467_v35 }
0x14be   :  { %8406 = vmatmul.msk.bf16.vlgmr.msra.gmra.mxu1 %vm394_vm3, %v4468_v37  ;;  %8407 = vmatmul.msk.bf16.vlgmr.msra.gmra.mxu2 %vm394_vm3, %v4468_v37 }
0x14ce   :  { %v4622_v54 = vpop.permute.xlu0 %4621 }
0x153b   :  { %v4559_v30 = vpop.f32.mrf.mxu1 }
0x153c   :  { %v4560_v40 = vadd.f32 %v4559_v30, %v4483_v49 }
0x153e   :  { %9214 = vtanh.f32 %v4560_v40  ;;  %v8408_v57 = vmul.f32 -1.442695, %v4560_v40 }
0x1540   :  { %9216 = vpow2.f32 %v8408_v57 }
0x1541   :  { %v11604_v51 = vpop.f32.mrf.mxu2 }
0x1542   :  { %v4573_v4 = vadd.f32 %v11604_v51, %v4484_v47  ;;  %v8448_v47 = vld [vmem:[%s13089_s10 + $0x48] sm:$0xf0] }
0x1543   :  { %v4561_v61 = vpop.f32.mrf.mxu1 }
0x1544   :  { %v9215_v11 = vpop.eup %9214  ;;  %v8409_v7 = vmul.f32 -1.442695, %v4573_v4 }
0x1545   :  { %4616 = vrot.lane.b32.xlu1 %v9215_v11, %s9343_s19 }
0x1546   :  { %v9217_v63 = vpop.eup %9216 }
0x1547   :  { %v4580_v8 = vadd.f32 1.0, %v9217_v63 }
0x1549   :  { %9218 = vrcp.f32 %v4580_v8  ;;  %v4574_v14 = vpop.f32.mrf.mxu2  ;;  %v4592_v39 = vand.u32 2147483648, %v4580_v8  ;;  %v4590_v56 = vand.u32 2147483647, %v4580_v8  ;;  %vm4586_vm5 = vweird.f32 %v4580_v8 }
0x154b   :  { %v4593_v41 = vor.u32 1.1754944e-38, %v4592_v39  ;;  %vm4591_vm7 = vcmp.eq.f32.partialorder %v4590_v56, 8.507059e+37 }
0x154d   :  { %4677 = vperm.xlu1 %9047, %v4672_v18  }
0x154f   :  { %v9219_v12 = vpop.eup %9218 }
0x1550   :  { %v4582_v23 = vmul.f32 %v9219_v12, %v4580_v8  ;;  %vm4587_vm8 = vweird.f32 %v9219_v12 }
0x1551   :  { %vm4588_vm6 = vmor %vm4586_vm5, %vm4587_vm8 }
0x1552   :  { %v4583_v28 = vsub.f32 1.0, %v4582_v23  ;;  %v4779_v23 = vld [vmem:[#allocation2 + $0x4] sm:$0xf] }
0x1554   :  { %v4584_v32 = vmul.f32 %v9219_v12, %v4583_v28 }
0x1555   :  { %4684 = vperm.xlu1 %9047, %v4679_v17   ;;  %v4787_v17 = vld [vmem:[#allocation3 + $0x4] sm:$0xf] }
0x1556   :  { %v4585_v6 = vadd.f32 %v9219_v12, %v4584_v32 }
0x1558   :  { %v4589_v43 = vsel %vm4588_vm6, %v9219_v12, %v4585_v6 }
0x1559   :  { %v4594_v10 = vsel %vm4591_vm7, %v4593_v41, %v4589_v43 }
0x155a   :  { %v4634_v16 = vmul.f32 %v4632_v20, %v4594_v10  ;;  %v4624_v9 = vmul.f32 %v4622_v54, %v4594_v10  ;;  %v4780_v54 = vld [vmem:[#allocation2 + $0x8] sm:$0xf] }
0x155c   :  { %4636 = vrot.lane.b32.xlu2 %v4634_v16, %s9342_s18  ;;  %4626 = vrot.lane.b32.xlu0 %v4624_v9, %s9344_s20  ;;  %v4781_v9 = vld [vmem:[#allocation2 + $0xc] sm:$0xf] }
0x1564   :  { %4670 = vperm.xlu2 %9048, %v4665_v15   ;;  %4234 = vperm.xlu0 %9046, %v9092_v21  }
0x156c   :  { %4734 = vperm.xlu2 %9048, %v4729_v62   ;;  %4727 = vperm.xlu0 %9046, %v4722_v60  }
0x1574   :  { %4691 = vperm.xlu2 %9048, %v4686_v48   ;;  %4741 = vperm.xlu0 %9046, %v4736_v25   ;;  %v4789_v48 = vld [vmem:[#allocation3 + $0xc] sm:$0xf] }
0x157c   :  { %4755 = vperm.xlu2 %9048, %v4750_v45   ;;  %4698 = vperm.xlu0 %9046, %v4693_v3  }
0x1584   :  { %4712 = vperm.xlu2 %9048, %v4707_v33   ;;  %4762 = vperm.xlu0 %9046, %v4757_v19   ;;  %v4782_v33 = vld [vmem:[#allocation2 + $0x10] sm:$0xf] }
0x1585   :  { %v11654_v19 = vld [vmem:[#allocation3 + $0x10] sm:$0xf] }
0x158c   :  { %4776 = vperm.xlu2 %9048, %v4771_v22   ;;  %4719 = vperm.xlu0 %9046, %v4714_v42  }
0x15b6   :  { %v4637_v36 = vpop.permute.xlu2 %4636 }
0x15b7   :  { %v4617_v59 = vpop.permute.xlu1 %4616 }
0x15b8   :  { %v4619_v58 = vmul.f32 %v4617_v59, %v4594_v10  ;;  %v4788_v10 = vld [vmem:[#allocation3 + $0x8] sm:$0xf]  ;;  %v8454_v59 = vld [vmem:[%s13089_s10 + $0x50] sm:$0xf] }
0x15be   :  { %v11630_v55 = vpop.permute.xlu2 %4670 }
0x15bf   :  { %v4678_v57 = vpop.permute.xlu1 %4677 }
0x15c0   :  { %v4795_v6 = vmul.f32 %v4779_v23, %v4678_v57  ;;  %v4841_v41 = vmul.f32 %v4787_v17, %v4678_v57  ;;  %v8438_v57 = vld [vmem:[%s13089_s10 + $0x30] sm:$0xf] }
0x15c2   :  { %v4803_v21 = vsel %vm55_vm0, %v4795_v6, 0.0  ;;  %v4849_v50 = vsel %vm55_vm0, %v4841_v41, 0.0 }
0x15c6   :  { %v4735_v29 = vpop.permute.xlu2 %4734 }
0x15c7   :  { %v4685_v63 = vpop.permute.xlu1 %4684  ;;  %v4818_v43 = vmul.f32 %v4779_v23, %v4735_v29  ;;  %v4864_v20 = vmul.f32 %v4787_v17, %v4735_v29 }
0x15c8   :  { %v4796_v62 = vmul.f32 %v4780_v54, %v4685_v63  ;;  %v4842_v60 = vmul.f32 %v4788_v10, %v4685_v63 }
0x15c9   :  { %v4826_v25 = vsel %vm55_vm0, %v4818_v43, 0.0  ;;  %v11652_v45 = vsel %vm55_vm0, %v4864_v20, 0.0 }
0x15ca   :  { %v4851_v4 = vsel %vm55_vm0, %v4842_v60, 0.0  ;;  %v4783_v60 = vld [vmem:[#allocation2 + $0x14] sm:$0xf] }
0x15ce   :  { %v4627_v52 = vpop.permute.xlu0 %4626  ;;  %v4692_v44 = vpop.permute.xlu2 %4691 }
0x15cf   :  { %v4629_v46 = vadd.f32 %v4627_v52, %v4619_v58  ;;  %v4797_v3 = vmul.f32 %v4781_v9, %v4692_v44  ;;  %v8956_v58 = vld [vmem:[%s13089_s10 + $0x54] sm:$0xf0]  ;;  %v8955_v52 = vld [vmem:[%s13089_s10 + $0x54] sm:$0xf] }
0x15d1   :  { %v4639_v5 = vadd.f32 %v4637_v36, %v4629_v46  ;;  %v4843_v46 = vmul.f32 %v4789_v48, %v4692_v44  ;;  %v8455_v36 = vor.u32 %v8956_v58, %v8454_v59  ;;  %v8953_v44 = vld [vmem:[%s13089_s10 + $0x44] sm:$0xf]  ;;  %v4785_v58 = vld [vmem:[#allocation2 + $0x1c] sm:$0xf] }
0x15d3   :  { %9220 = vtanh.f32 %v4639_v5  ;;  %4980 = vmatpush.bf16.msra.mxu3 %v8455_v36  ;;  %v4791_v36 = vld [vmem:[#allocation3 + $0x14] sm:$0xf] }
0x15d4   :  { %9222 = vpow2.f32 %v8409_v7  ;;  %v4807_v7 = vsel %vm55_vm0, %v4797_v3, 0.0 }
0x15d6   :  { %v4235_v2 = vpop.permute.xlu0 %4234  ;;  %v11633_v27 = vpop.permute.xlu2 %4755 }
0x15d7   :  { %v4648_v34 = vmul.f32 %v4639_v5, %v4235_v2  ;;  %v8456_v5 = vld [vmem:[%s13089_s10 + $0x58] sm:$0xf0] }
0x15d8   :  { %v8459_v29 = vor.u32 %v8955_v52, %v8456_v5 }
0x15d9   :  { %v9221_v53 = vpop.eup %9220  ;;  %4650 = vrot.lane.b32.xlu2 %v4648_v34, %s9344_s20  ;;  %v8954_v34 = vld [vmem:[%s13089_s10 + $0x44] sm:$0xf0] }
0x15da   :  { %4642 = vrot.lane.b32.xlu1 %v9221_v53, %s9344_s20  ;;  %v9223_v38 = vpop.eup %9222  ;;  %v4805_v53 = vsel %vm55_vm0, %v4796_v62, 0.0  ;;  %4993 = vmatpush.bf16.msrb.mxu1 %v8459_v29  ;;  %v8432_v62 = vld [vmem:[%s13089_s10 + $0x28] sm:$0xf0] }
0x15db   :  { %v4599_v37 = vadd.f32 1.0, %v9223_v38 }
0x15dd   :  { %9224 = vrcp.f32 %v4599_v37  ;;  %v4611_v8 = vand.u32 2147483648, %v4599_v37  ;;  %vm4605_vm11 = vweird.f32 %v4599_v37  ;;  %v4609_v14 = vand.u32 2147483647, %v4599_v37 }
0x15de   :  { %v11636_v31 = vpop.permute.xlu2 %4712  ;;  %v11641_v40 = vpop.permute.xlu0 %4727 }
0x15df   :  { %v4612_v12 = vor.u32 1.1754944e-38, %v4611_v8  ;;  %vm4610_vm13 = vcmp.eq.f32.partialorder %v4609_v14, 8.507059e+37  ;;  %v8440_v14 = vld [vmem:[%s13089_s10 + $0x38] sm:$0xf0] }
0x15e2   :  { %4748 = vperm.xlu1 %9047, %v4743_v1   ;;  %v4821_v1 = vmul.f32 %v4782_v33, %v11633_v27 }
0x15e3   :  { %v9225_v30 = vpop.eup %9224 }
0x15e4   :  { %v4601_v0 = vmul.f32 %v9225_v30, %v4599_v37  ;;  %vm4606_vm9 = vweird.f32 %v9225_v30 }
0x15e5   :  { %vm4607_vm12 = vmor %vm4605_vm11, %vm4606_vm9  ;;  %vm7658_vm9 = vcmask 254976  }
0x15e6   :  { %v11638_v35 = vpop.permute.xlu2 %4776  ;;  %v4602_v61 = vsub.f32 1.0, %v4601_v0  ;;  %v11643_v51 = vpop.permute.xlu0 %4741  ;;  %v8451_v0 = vor.u32 %v8953_v44, %v8448_v47  ;;  %v8947_v44 = vld [vmem:[%s13089_s10 + $0x14] sm:$0xf]  ;;  %v8424_v47 = vld [vmem:[%s13089_s10 + $0x18] sm:$0xf0] }
0x15e7   :  { %v4819_v63 = vmul.f32 %v4780_v54, %v11643_v51  ;;  %v4865_v23 = vmul.f32 %v4788_v10, %v11643_v51  ;;  %v8430_v51 = vld [vmem:[%s13089_s10 + $0x20] sm:$0xf]  ;;  %v8950_v10 = vld [vmem:[%s13089_s10 + $0x24] sm:$0xf0] }
0x15e8   :  { %v4603_v11 = vmul.f32 %v9225_v30, %v4602_v61  ;;  %v8952_v61 = vld [vmem:[%s13089_s10 + $0x34] sm:$0xf0]  ;;  %4994 = vmatpush.bf16.msrb.mxu1 %v8451_v0 }
0x15e9   :  { %v4874_v52 = vsel %vm55_vm0, %v4865_v23, 0.0 }
0x15ea   :  { %4705 = vperm.xlu1 %9047, %v4700_v26   ;;  %v4604_v24 = vadd.f32 %v9225_v30, %v4603_v11  ;;  %v4853_v11 = vsel %vm55_vm0, %v4843_v46, 0.0 }
0x15ec   :  { %v4608_v18 = vsel %vm4607_vm12, %v9225_v30, %v4604_v24 }
0x15ed   :  { %v4613_v32 = vsel %vm4610_vm13, %v4612_v12, %v4608_v18  ;;  %v4832_v18 = vsel %vm55_vm0, %v4821_v1, 0.0  ;;  %v11708_v12 = vld [vmem:[#allocation2 + $0x18] sm:$0xf] }
0x15ee   :  { %v11645_v28 = vpop.permute.xlu0 %4698  ;;  %v8948_v1 = vld [vmem:[%s13089_s10 + $0x14] sm:$0xf0] }
0x15ef   :  { %v4844_v46 = vmul.f32 %v11654_v19, %v11645_v28 }
0x15f1   :  { %v4855_v23 = vsel %vm55_vm0, %v4844_v46, 0.0 }
0x15f2   :  { %4769 = vperm.xlu1 %9047, %v4764_v13  }
0x15f6   :  { %v11677_v26 = vpop.permute.xlu0 %4762 }
0x15f7   :  { %v4822_v29 = vmul.f32 %v4783_v60, %v11677_v26 }
0x15fe   :  { %v4720_v5 = vpop.permute.xlu0 %4719 }
0x15ff   :  { %v4801_v0 = vmul.f32 %v4785_v58, %v4720_v5 }
0x1633   :  { %v4651_v49 = vpop.permute.xlu2 %4650 }
0x1634   :  { %4653 = vst.msk [vmem:[#allocation3] sm:$0xf] %vm55_vm0, %v4651_v49  ;;  %v4867_v49 = vmul.f32 %v11654_v19, %v11633_v27  ;;  %v8951_v27 = vld [vmem:[%s13089_s10 + $0x34] sm:$0xf] }
0x1635   :  { %v8443_v54 = vor.u32 %v8951_v27, %v8440_v14  ;;  %v8427_v14 = vor.u32 %v8947_v44, %v8424_v47 }
0x1636   :  { %v11715_v6 = vsel %vm55_vm0, %v4867_v49, 0.0  ;;  %v4792_v49 = vld [vmem:[#allocation3 + $0x18] sm:$0xf] }
0x1637   :  { %4995 = vmatpush.bf16.msrb.mxu1 %v8443_v54 }
0x163b   :  { %v4786_v15 = vld [vmem:[#allocation3] sm:$0xf] }
0x163c   :  { %v4840_v22 = vmul.f32 %v4786_v15, %v11630_v55  ;;  %v4863_v13 = vmul.f32 %v4786_v15, %v11641_v40  ;;  %v4798_v15 = vmul.f32 %v4782_v33, %v11645_v28 }
0x163e   :  { %v4848_v38 = vsel %vm55_vm0, %v4840_v22, 0.0  ;;  %v4871_v17 = vsel %vm55_vm0, %v4863_v13, 0.0  ;;  %v4809_v13 = vsel %vm55_vm0, %v4798_v15, 0.0 }
0x164c   :  { %v4643_v39 = vpop.permute.xlu1 %4642 }
0x164d   :  { %v4645_v56 = vmul.f32 %v4643_v39, %v4613_v32  ;;  %v4850_v39 = vadd.f32 %v4849_v50, %v4848_v38 }
0x164f   :  { %v4646_v16 = vmul.f32 %v4645_v56, %v4235_v2  ;;  %v8446_v2 = vld [vmem:[%s13089_s10 + $0x40] sm:$0xf]  ;;  %v8439_v56 = vor.u32 %v8952_v61, %v8438_v57  ;;  %v4852_v22 = vadd.f32 %v4851_v4, %v4850_v39  ;;  %v4846_v39 = vmul.f32 %v4792_v49, %v11636_v31 }
0x1650   :  { %v8447_v37 = vor.u32 %v8954_v34, %v8446_v2 }
0x1651   :  { %4647 = vst.msk [vmem:[#allocation2] sm:$0xf] %vm55_vm0, %v4646_v16  ;;  %v4800_v16 = vmul.f32 %v11708_v12, %v11636_v31  ;;  %v4854_v38 = vadd.f32 %v4853_v11, %v4852_v22  ;;  %v4834_v11 = vsel %vm55_vm0, %v4822_v29, 0.0  ;;  %v4793_v31 = vld [vmem:[#allocation3 + $0x1c] sm:$0xf] }
0x1652   :  { %4981 = vmatpush.bf16.msra.mxu3 %v8447_v37 }
0x1654   :  { %v4749_v42 = vpop.permute.xlu1 %4748 }
0x1655   :  { %v4866_v50 = vmul.f32 %v4789_v48, %v4749_v42 }
0x1656   :  { %4982 = vmatpush.bf16.msra.mxu3 %v8439_v56  ;;  %v4868_v56 = vmul.f32 %v4791_v36, %v11677_v26  ;;  %v4859_v26 = vsel %vm55_vm0, %v4846_v39, 0.0 }
0x1657   :  { %v4876_v28 = vsel %vm55_vm0, %v4866_v50, 0.0  ;;  %v4847_v50 = vmul.f32 %v4793_v31, %v4720_v5 }
0x1658   :  { %v4778_v30 = vld [vmem:[#allocation2] sm:$0xf]  ;;  %v4880_v15 = vsel %vm55_vm0, %v4868_v56, 0.0 }
0x1659   :  { %v4794_v24 = vmul.f32 %v4778_v30, %v11630_v55  ;;  %v4817_v8 = vmul.f32 %v4778_v30, %v11641_v40  ;;  %v4820_v55 = vmul.f32 %v4781_v9, %v4749_v42  ;;  %v4828_v9 = vsel %vm55_vm0, %v4819_v63, 0.0  ;;  %v9093_v56 = vld [vmem:[%s13080_s1 + $0x1] ss:$0 sm:$0xff] }
0x165a   :  { %v8431_v42 = vor.u32 %v8950_v10, %v8430_v51  ;;  %v4813_v30 = vsel %vm55_vm0, %v4800_v16, 0.0  ;;  %v4824_v63 = vmul.f32 %v4785_v58, %v11638_v35 }
0x165b   :  { %v4825_v40 = vsel %vm55_vm0, %v4817_v8, 0.0  ;;  %v4802_v32 = vsel %vm55_vm0, %v4794_v24, 0.0  ;;  %v4830_v33 = vsel %vm55_vm0, %v4820_v55, 0.0  ;;  %v4856_v55 = vadd.f32 %v4855_v23, %v4854_v38 }
0x165c   :  { %v4827_v41 = vadd.f32 %v4826_v25, %v4825_v40  ;;  %v4706_v43 = vpop.permute.xlu1 %4705  ;;  %v4804_v20 = vadd.f32 %v4803_v21, %v4802_v32  ;;  %v8949_v21 = vld [vmem:[%s13089_s10 + $0x24] sm:$0xf]  ;;  %v4873_v25 = vadd.f32 %v11652_v45, %v4871_v17  ;;  %4983 = vmatpush.bf16.msra.mxu3 %v8431_v42  ;;  %v8416_v42 = vld [vmem:[%s13089_s10 + $0x8] sm:$0xf0] }
0x165d   :  { %v4799_v48 = vmul.f32 %v4783_v60, %v4706_v43  ;;  %v8435_v45 = vor.u32 %v8949_v21, %v8432_v62  ;;  %v4845_v19 = vmul.f32 %v4791_v36, %v4706_v43  ;;  %v4655_v36 = vld [vmem:[#allocation4 + $0x4] sm:$0xf] }
0x165e   :  { %v4829_v3 = vadd.f32 %v4828_v9, %v4827_v41  ;;  %v4806_v59 = vadd.f32 %v4805_v53, %v4804_v20  ;;  %v8422_v53 = vld [vmem:[%s13089_s10 + $0x10] sm:$0xf]  ;;  %v4875_v4 = vadd.f32 %v4874_v52, %v4873_v25  ;;  %v4815_v41 = vsel %vm55_vm0, %v4801_v0, 0.0  ;;  %v8414_v52 = vld [vmem:[%s13089_s10] sm:$0xf] }
0x165f   :  { %v4811_v57 = vsel %vm55_vm0, %v4799_v48, 0.0  ;;  %v8423_v61 = vor.u32 %v8948_v1, %v8422_v53  ;;  %4996 = vmatpush.bf16.msrb.mxu1 %v8435_v45 }
0x1660   :  { %v4831_v2 = vadd.f32 %v4830_v33, %v4829_v3  ;;  %v4808_v34 = vadd.f32 %v4807_v7, %v4806_v59  ;;  %v4877_v24 = vadd.f32 %v4876_v28, %v4875_v4  ;;  %v4861_v3 = vsel %vm55_vm0, %v4847_v50, 0.0  ;;  %v8946_v33 = vld [vmem:[%s13089_s10 + $0x4] sm:$0xf0] }
0x1661   :  { %4984 = vmatpush.bf16.msra.mxu3 %v8423_v61  ;;  %v8415_v48 = vor.u32 %v8946_v33, %v8414_v52 }
0x1662   :  { %v4833_v7 = vadd.f32 %v4832_v18, %v4831_v2  ;;  %v4810_v37 = vadd.f32 %v4809_v13, %v4808_v34  ;;  %v4857_v18 = vsel %vm55_vm0, %v4845_v19, 0.0  ;;  %v4879_v54 = vadd.f32 %v11715_v6, %v4877_v24  ;;  %v11797_v13 = vld [vmem:[%s13090_s11] sm:$0x3] }
0x1663   :  { %v4858_v51 = vadd.f32 %v4857_v18, %v4856_v55  ;;  %4997 = vmatpush.bf16.msrb.mxu1 %v8427_v14  ;;  %v4870_v6 = vmul.f32 %v4793_v31, %v11638_v35  ;;  %v8945_v35 = vld [vmem:[%s13089_s10 + $0x4] sm:$0xf]  ;;  %v4911_v29 = vperm.slane %v11797_v13, 0  ;;  %v4912_v33 = vperm.slane %v11797_v13, 1 }
0x1664   :  { %v4812_v8 = vadd.f32 %v4811_v57, %v4810_v37  ;;  %v4770_v27 = vpop.permute.xlu1 %4769  ;;  %v4835_v32 = vadd.f32 %v4834_v11, %v4833_v7  ;;  %v4881_v60 = vadd.f32 %v4880_v15, %v4879_v54  ;;  %v8419_v46 = vor.u32 %v8945_v35, %v8416_v42  ;;  %v11804_v37 = vld [vmem:[%s13081_s2 + $0x10] sm:$0xff] }
0x1665   :  { %v4823_v17 = vmul.f32 %v11708_v12, %v4770_v27  ;;  %v4869_v20 = vmul.f32 %v4792_v49, %v4770_v27  ;;  %v4838_v12 = vsel %vm55_vm0, %v4824_v63, 0.0  ;;  %v4860_v62 = vadd.f32 %v4859_v26, %v4858_v51  ;;  %4985 = vmatpush.bf16.msra.mxu3 %v8415_v48 }
0x1666   :  { %v4814_v40 = vadd.f32 %v4813_v30, %v4812_v8  ;;  %v4884_v59 = vsel %vm55_vm0, %v4870_v6, 0.0  ;;  %v5100_v30 = vperm.slane %v11804_v37, 1  ;;  %v5107_v61 = vperm.slane %v11804_v37, 2 }
0x1667   :  { %v4836_v43 = vsel %vm55_vm0, %v4823_v17, 0.0  ;;  %v4882_v21 = vsel %vm55_vm0, %v4869_v20, 0.0  ;;  %v4862_v22 = vadd.f32 %v4861_v3, %v4860_v62  ;;  %4998 = vmatpush.bf16.msrb.mxu1 %v8419_v46  ;;  %v5114_v54 = vperm.slane %v11804_v37, 3 }
0x1668   :  { %v4837_v10 = vadd.f32 %v4836_v43, %v4835_v32  ;;  %v4816_v16 = vadd.f32 %v4815_v41, %v4814_v40  ;;  %v4883_v25 = vadd.f32 %v4882_v21, %v4881_v60  ;;  %v5093_v32 = vperm.slane %v11804_v37, 0  ;;  %v8465_v41 = vld [vmem:[%s13082_s3 + $0x10] sm:$0xff] }
0x1669   :  { %v5157_v43 = vperm.slane %v8465_v41, 1  ;;  %v5150_v20 = vperm.slane %v8465_v41, 0  ;;  %v5164_v51 = vperm.slane %v8465_v41, 2  ;;  %v5185_v31 = vperm.slane %v8465_v41, 5 }
0x166a   :  { %4887 = vrot.lane.b32.xlu1 %v4816_v16, %s9343_s19  ;;  %v4839_v9 = vadd.f32 %v4838_v12, %v4837_v10  ;;  %v4885_v58 = vadd.f32 %v4884_v59, %v4883_v25  ;;  %v5178_v10 = vperm.slane %v8465_v41, 4  ;;  %v5121_v16 = vperm.slane %v11804_v37, 4 }
0x166b   :  { %v5135_v12 = vperm.slane %v11804_v37, 6  ;;  %v5142_v26 = vperm.slane %v11804_v37, 7  ;;  %v5171_v59 = vperm.slane %v8465_v41, 3  ;;  %v5192_v52 = vperm.slane %v8465_v41, 6 }
0x166c   :  { %4891 = vrot.lane.b32.xlu0 %v4839_v9, %s9342_s18  ;;  %v5199_v9 = vperm.slane %v8465_v41, 7 }
0x1672   :  { %5049 = vrot.lane.b32.xlu1 %v4862_v22, %s9342_s18 }
0x1674   :  { %5059 = vrot.lane.b32.xlu0 %v4885_v58, %s9344_s20  ;;  %v5128_v58 = vperm.slane %v11804_v37, 5 }
0x16dc   :  { %v4888_v5 = vpop.permute.xlu1 %4887 }
0x16dd   :  { %v4894_v2 = vsel %vm311_vm1, %v4655_v36, %v4888_v5 }
0x16de   :  { %v4892_v34 = vpop.permute.xlu0 %4891 }
0x16df   :  { %v4895_v45 = vsel %vm313_vm2, %v4894_v2, %v4892_v34 }
0x16e0   :  { %v4896_v53 = vpack.c.bf16 %v4895_v45, %v4895_v45 }
0x16e2   :  { %8460 = vmatmul.msk.bf16.vlgmr.msra.gmra.mxu3 %vm394_vm3, %v4896_v53  ;;  %8461 = vmatmul.msk.bf16.vlgmr.msrb.gmra.mxu1 %vm394_vm3, %v4896_v53 }
0x16e4   :  { %v5050_v18 = vpop.permute.xlu1 %5049 }
0x16e6   :  { %v5060_v17 = vpop.permute.xlu0 %5059 }
0x175f   :  { %v11792_v1 = vpop.f32.mrf.mxu1 }
0x1760   :  { %v5001_v35 = vadd.f32 %v11792_v1, %v4912_v33 }
0x1762   :  { %v8463_v48 = vmul.f32 -1.442695, %v5001_v35 }
0x1765   :  { %v4987_v28 = vpop.f32.mrf.mxu3 }
0x1766   :  { %v4988_v19 = vadd.f32 %v4987_v28, %v4911_v29 }
0x1767   :  { %v5002_v44 = vpop.f32.mrf.mxu1 }
0x1768   :  { %9226 = vtanh.f32 %v4988_v19  ;;  %v8462_v47 = vmul.f32 -1.442695, %v4988_v19 }
0x176a   :  { %9228 = vpow2.f32 %v8462_v47 }
0x176d   :  { %v4989_v4 = vpop.f32.mrf.mxu3 }
0x176e   :  { %v9227_v7 = vpop.eup %9226 }
0x176f   :  { %5044 = vrot.lane.b32.xlu2 %v9227_v7, %s9343_s19 }
0x1770   :  { %v9229_v38 = vpop.eup %9228 }
0x1771   :  { %v5008_v49 = vadd.f32 1.0, %v9229_v38 }
0x1773   :  { %9230 = vrcp.f32 %v5008_v49  ;;  %v5020_v24 = vand.u32 2147483648, %v5008_v49  ;;  %v5018_v27 = vand.u32 2147483647, %v5008_v49  ;;  %vm5014_vm15 = vweird.f32 %v5008_v49 }
0x1775   :  { %v5021_v23 = vor.u32 1.1754944e-38, %v5020_v24  ;;  %vm5019_vm10 = vcmp.eq.f32.partialorder %v5018_v27, 8.507059e+37  ;;  %v5206_v27 = vld [vmem:[#allocation2] sm:$0xf] }
0x1777   :  { %5105 = vperm.xlu2 %9048, %v5100_v30  }
0x1779   :  { %v9231_v0 = vpop.eup %9230 }
0x177a   :  { %v5010_v57 = vmul.f32 %v9231_v0, %v5008_v49  ;;  %vm5015_vm14 = vweird.f32 %v9231_v0 }
0x177b   :  { %vm5016_vm4 = vmor %vm5014_vm15, %vm5015_vm14 }
0x177c   :  { %v5011_v63 = vsub.f32 1.0, %v5010_v57 }
0x177e   :  { %v5012_v8 = vmul.f32 %v9231_v0, %v5011_v63 }
0x177f   :  { %5112 = vperm.xlu2 %9048, %v5107_v61  }
0x1780   :  { %v5013_v14 = vadd.f32 %v9231_v0, %v5012_v8  ;;  %v5208_v8 = vld [vmem:[#allocation2 + $0x8] sm:$0xf] }
0x1782   :  { %v5017_v11 = vsel %vm5016_vm4, %v9231_v0, %v5013_v14 }
0x1783   :  { %v5022_v39 = vsel %vm5019_vm10, %v5021_v23, %v5017_v11 }
0x1784   :  { %v5062_v55 = vmul.f32 %v5060_v17, %v5022_v39  ;;  %v5052_v40 = vmul.f32 %v5050_v18, %v5022_v39  ;;  %v5209_v17 = vld [vmem:[#allocation2 + $0xc] sm:$0xf] }
0x1786   :  { %5064 = vrot.lane.b32.xlu0 %v5062_v55, %s9342_s18  ;;  %5054 = vrot.lane.b32.xlu1 %v5052_v40, %s9344_s20 }
0x178e   :  { %5098 = vperm.xlu0 %9046, %v5093_v32   ;;  %4662 = vperm.xlu1 %9047, %v9093_v56   ;;  %v7650_v56 = vld [vmem:[#allocation2] sm:$0xf] }
0x1796   :  { %5162 = vperm.xlu0 %9046, %v5157_v43   ;;  %5155 = vperm.xlu1 %9047, %v5150_v20   ;;  %v5210_v20 = vld [vmem:[#allocation2 + $0x10] sm:$0xf] }
0x179e   :  { %5119 = vperm.xlu0 %9046, %v5114_v54   ;;  %5169 = vperm.xlu1 %9047, %v5164_v51  }
0x17a6   :  { %5183 = vperm.xlu0 %9046, %v5178_v10   ;;  %5126 = vperm.xlu1 %9047, %v5121_v16  }
0x17ae   :  { %5140 = vperm.xlu0 %9046, %v5135_v12   ;;  %5190 = vperm.xlu1 %9047, %v5185_v31  }
0x17b6   :  { %5204 = vperm.xlu0 %9046, %v5199_v9   ;;  %5147 = vperm.xlu1 %9047, %v5142_v26  }
0x17c9   :  { %v5045_v15 = vpop.permute.xlu2 %5044 }
0x17ca   :  { %v5047_v50 = vmul.f32 %v5045_v15, %v5022_v39 }
0x17d1   :  { %v11832_v53 = vpop.permute.xlu2 %5105 }
0x17d9   :  { %v11838_v19 = vpop.permute.xlu2 %5112 }
0x17da   :  { %v5224_v18 = vmul.f32 %v5208_v8, %v11838_v19 }
0x17dc   :  { %v5233_v9 = vsel %vm55_vm0, %v5224_v18, 0.0 }
0x17f8   :  { %v5055_v21 = vpop.permute.xlu1 %5054  ;;  %v5065_v60 = vpop.permute.xlu0 %5064 }
0x17f9   :  { %v5057_v62 = vadd.f32 %v5055_v21, %v5047_v50  ;;  %v7659_v21 = vsel %vm7658_vm9, %v7650_v56, 0.0 }
0x17fb   :  { %v5067_v6 = vadd.f32 %v5065_v60, %v5057_v62 }
0x17fd   :  { %9232 = vtanh.f32 %v5067_v6 }
0x17fe   :  { %9234 = vpow2.f32 %v8463_v48 }
0x1800   :  { %v4663_v25 = vpop.permute.xlu1 %4662  ;;  %v11826_v46 = vpop.permute.xlu0 %5098 }
0x1801   :  { %v5076_v3 = vmul.f32 %v5067_v6, %v4663_v25  ;;  %v5222_v14 = vmul.f32 %v5206_v27, %v11826_v46 }
0x1803   :  { %v9233_v22 = vpop.eup %9232  ;;  %5078 = vrot.lane.b32.xlu0 %v5076_v3, %s9344_s20  ;;  %v5230_v41 = vsel %vm55_vm0, %v5222_v14, 0.0  ;;  %v5212_v3 = vld [vmem:[#allocation2 + $0x18] sm:$0xf] }
0x1804   :  { %5070 = vrot.lane.b32.xlu2 %v9233_v22, %s9344_s20  ;;  %v9235_v42 = vpop.eup %9234  ;;  %v5211_v22 = vld [vmem:[#allocation2 + $0x14] sm:$0xf] }
0x1805   :  { %v5027_v36 = vadd.f32 1.0, %v9235_v42  ;;  %v5213_v42 = vld [vmem:[#allocation2 + $0x1c] sm:$0xf] }
0x1807   :  { %9236 = vrcp.f32 %v5027_v36  ;;  %v5039_v47 = vand.u32 2147483648, %v5027_v36  ;;  %vm5033_vm5 = vweird.f32 %v5027_v36  ;;  %v5037_v7 = vand.u32 2147483647, %v5027_v36 }
0x1808   :  { %v11828_v5 = vpop.permute.xlu0 %5162  ;;  %v11830_v34 = vpop.permute.xlu1 %5155 }
0x1809   :  { %v5040_v37 = vor.u32 1.1754944e-38, %v5039_v47  ;;  %vm5038_vm7 = vcmp.eq.f32.partialorder %v5037_v7, 8.507059e+37  ;;  %v5245_v23 = vmul.f32 %v5206_v27, %v11830_v34 }
0x180b   :  { %v5253_v43 = vsel %vm55_vm0, %v5245_v23, 0.0 }
0x180c   :  { %5176 = vperm.xlu2 %9048, %v5171_v59  }
0x180d   :  { %v9237_v2 = vpop.eup %9236 }
0x180e   :  { %v5029_v45 = vmul.f32 %v9237_v2, %v5027_v36  ;;  %vm5034_vm8 = vweird.f32 %v9237_v2 }
0x180f   :  { %vm5035_vm6 = vmor %vm5033_vm5, %vm5034_vm8 }
0x1810   :  { %v11834_v29 = vpop.permute.xlu0 %5119  ;;  %v5030_v13 = vsub.f32 1.0, %v5029_v45  ;;  %v11836_v1 = vpop.permute.xlu1 %5169 }
0x1811   :  { %v5247_v55 = vmul.f32 %v5208_v8, %v11836_v1  ;;  %v5225_v51 = vmul.f32 %v5209_v17, %v11834_v29 }
0x1812   :  { %v5031_v28 = vmul.f32 %v9237_v2, %v5030_v13 }
0x1813   :  { %v5256_v62 = vsel %vm55_vm0, %v5247_v55, 0.0  ;;  %v5235_v33 = vsel %vm55_vm0, %v5225_v51, 0.0 }
0x1814   :  { %5133 = vperm.xlu2 %9048, %v5128_v58   ;;  %v5032_v44 = vadd.f32 %v9237_v2, %v5031_v28 }
0x1816   :  { %v5036_v38 = vsel %vm5035_vm6, %v9237_v2, %v5032_v44 }
0x1817   :  { %v5041_v30 = vsel %vm5038_vm7, %v5040_v37, %v5036_v38 }
0x1818   :  { %v11840_v4 = vpop.permute.xlu0 %5183  ;;  %v11842_v49 = vpop.permute.xlu1 %5126 }
0x1819   :  { %v5249_v60 = vmul.f32 %v5210_v20, %v11840_v4  ;;  %v5226_v6 = vmul.f32 %v5210_v20, %v11842_v49 }
0x181b   :  { %v5260_v13 = vsel %vm55_vm0, %v5249_v60, 0.0  ;;  %v5237_v28 = vsel %vm55_vm0, %v5226_v6, 0.0 }
0x181c   :  { %5197 = vperm.xlu2 %9048, %v5192_v52  }
0x1820   :  { %v11844_v63 = vpop.permute.xlu0 %5140  ;;  %v11851_v11 = vpop.permute.xlu1 %5190 }
0x1821   :  { %v5228_v44 = vmul.f32 %v5212_v3, %v11844_v63  ;;  %v5250_v47 = vmul.f32 %v5211_v22, %v11851_v11 }
0x1823   :  { %v5241_v8 = vsel %vm55_vm0, %v5228_v44, 0.0  ;;  %v5262_v27 = vsel %vm55_vm0, %v5250_v47, 0.0 }
0x1828   :  { %v11860_v10 = vpop.permute.xlu0 %5204  ;;  %v11878_v36 = vpop.permute.xlu1 %5147 }
0x1829   :  { %v5229_v37 = vmul.f32 %v5213_v42, %v11878_v36  ;;  %v5252_v14 = vmul.f32 %v5213_v42, %v11860_v10 }
0x185e   :  { %v5071_v0 = vpop.permute.xlu2 %5070 }
0x185f   :  { %v5073_v57 = vmul.f32 %v5071_v0, %v5041_v30 }
0x1861   :  { %v5074_v61 = vmul.f32 %v5073_v57, %v4663_v25 }
0x1863   :  { %5075 = vst.msk [vmem:[#allocation2 + $0x4] sm:$0xf] %vm55_vm0, %v5074_v61 }
0x1866   :  { %v11847_v24 = vpop.permute.xlu2 %5176 }
0x1867   :  { %v5248_v16 = vmul.f32 %v5209_v17, %v11847_v24 }
0x1869   :  { %v5258_v35 = vsel %vm55_vm0, %v5248_v16, 0.0  ;;  %v5217_v16 = vld [vmem:[#allocation3 + $0xc] sm:$0xf] }
0x186a   :  { %v5207_v39 = vld [vmem:[#allocation2 + $0x4] sm:$0xf]  ;;  %v5294_v60 = vmul.f32 %v5217_v16, %v11847_v24 }
0x186b   :  { %v5223_v40 = vmul.f32 %v5207_v39, %v11832_v53  ;;  %v5246_v32 = vmul.f32 %v5207_v39, %v11828_v5  ;;  %v7651_v54 = vld [vmem:[#allocation2 + $0x4] sm:$0xf]  ;;  %v5243_v39 = vsel %vm55_vm0, %v5229_v37, 0.0 }
0x186c   :  { %v7660_v25 = vsel %vm7658_vm9, %v7651_v54, 0.0  ;;  %v5266_v54 = vsel %vm55_vm0, %v5252_v14, 0.0 }
0x186d   :  { %v5254_v12 = vsel %vm55_vm0, %v5246_v32, 0.0  ;;  %v5231_v31 = vsel %vm55_vm0, %v5223_v40, 0.0  ;;  %v11873_v52 = vadd.f32 %v7660_v25, %v7659_v21  ;;  %v5214_v40 = vld [vmem:[#allocation3] sm:$0xf]  ;;  %v5218_v21 = vld [vmem:[#allocation3 + $0x10] sm:$0xf] }
0x186e   :  { %v5255_v26 = vadd.f32 %v5254_v12, %v5253_v43  ;;  %v11866_v15 = vpop.permute.xlu2 %5133  ;;  %v5232_v50 = vadd.f32 %v5231_v31, %v5230_v41  ;;  %v5216_v41 = vld [vmem:[#allocation3 + $0x8] sm:$0xf]  ;;  %v5268_v43 = vmul.f32 %v5214_v40, %v11826_v46  ;;  %v5291_v20 = vmul.f32 %v5214_v40, %v11830_v34  ;;  %v8500_v40 = vld [vmem:[%s13089_s10 + $0x40] sm:$0xf] }
0x186f   :  { %v5227_v48 = vmul.f32 %v5211_v22, %v11866_v15  ;;  %v5270_v31 = vmul.f32 %v5216_v41, %v11838_v19  ;;  %v5295_v22 = vmul.f32 %v5218_v21, %v11840_v4 }
0x1870   :  { %v5257_v59 = vadd.f32 %v5256_v62, %v5255_v26  ;;  %v5234_v58 = vadd.f32 %v5233_v9, %v5232_v50  ;;  %v5293_v9 = vmul.f32 %v5216_v41, %v11836_v1  ;;  %v5276_v46 = vsel %vm55_vm0, %v5268_v43, 0.0  ;;  %v5219_v1 = vld [vmem:[#allocation3 + $0x14] sm:$0xf]  ;;  %v8965_v41 = vld [vmem:[%s13089_s10 + $0x44] sm:$0xf] }
0x1871   :  { %v5239_v30 = vsel %vm55_vm0, %v5227_v48, 0.0  ;;  %v5299_v34 = vsel %vm55_vm0, %v5291_v20, 0.0  ;;  %v5271_v62 = vmul.f32 %v5217_v16, %v11834_v29  ;;  %v5304_v48 = vsel %vm55_vm0, %v5294_v60, 0.0  ;;  %v8502_v43 = vld [vmem:[%s13089_s10 + $0x48] sm:$0xf0] }
0x1872   :  { %v5259_v2 = vadd.f32 %v5258_v35, %v5257_v59  ;;  %v5236_v45 = vadd.f32 %v5235_v33, %v5234_v58  ;;  %v5272_v59 = vmul.f32 %v5218_v21, %v11842_v49  ;;  %v5220_v58 = vld [vmem:[#allocation3 + $0x18] sm:$0xf]  ;;  %v5296_v35 = vmul.f32 %v5219_v1, %v11851_v11  ;;  %v8486_v21 = vld [vmem:[%s13089_s10 + $0x28] sm:$0xf0] }
0x1873   :  { %v5281_v24 = vsel %vm55_vm0, %v5271_v62, 0.0  ;;  %v5273_v42 = vmul.f32 %v5219_v1, %v11866_v15  ;;  %v5274_v49 = vmul.f32 %v5220_v58, %v11844_v63  ;;  %v8964_v16 = vld [vmem:[%s13089_s10 + $0x34] sm:$0xf0]  ;;  %v8959_v1 = vld [vmem:[%s13089_s10 + $0x14] sm:$0xf] }
0x1874   :  { %v5261_v7 = vadd.f32 %v5260_v13, %v5259_v2  ;;  %v5238_v38 = vadd.f32 %v5237_v28, %v5236_v45  ;;  %v5221_v2 = vld [vmem:[#allocation3 + $0x1c] sm:$0xf]  ;;  %v5306_v28 = vsel %vm55_vm0, %v5295_v22, 0.0  ;;  %v5283_v4 = vsel %vm55_vm0, %v5272_v59, 0.0  ;;  %v8958_v22 = vld [vmem:[%s13089_s10 + $0x4] sm:$0xf0] }
0x1875   :  { %v5079_v0 = vpop.permute.xlu0 %5078  ;;  %v5298_v11 = vmul.f32 %v5221_v2, %v11860_v10  ;;  %v5275_v37 = vmul.f32 %v5221_v2, %v11878_v36  ;;  %v5285_v15 = vsel %vm55_vm0, %v5273_v42, 0.0  ;;  %v8508_v10 = vld [vmem:[%s13089_s10 + $0x50] sm:$0xf]  ;;  %v8968_v36 = vld [vmem:[%s13089_s10 + $0x54] sm:$0xf0] }
0x1876   :  { %v5240_v57 = vadd.f32 %v5239_v30, %v5238_v38  ;;  %5081 = vst.msk [vmem:[#allocation3 + $0x4] sm:$0xf] %vm55_vm0, %v5079_v0  ;;  %v5198_v61 = vpop.permute.xlu2 %5197  ;;  %v5263_v17 = vadd.f32 %v5262_v27, %v5261_v7  ;;  %v5308_v38 = vsel %vm55_vm0, %v5296_v35, 0.0  ;;  %v8957_v59 = vld [vmem:[%s13089_s10 + $0x4] sm:$0xf] }
0x1877   :  { %v5251_v23 = vmul.f32 %v5212_v3, %v5198_v61  ;;  %v5302_v3 = vsel %vm55_vm0, %v5293_v9, 0.0  ;;  %v5297_v44 = vmul.f32 %v5220_v58, %v5198_v61  ;;  %v5312_v63 = vsel %vm55_vm0, %v5298_v11, 0.0  ;;  %v5083_v35 = vld [vmem:[#allocation4 + $0x8] sm:$0xf] }
0x1878   :  { %v5242_v18 = vadd.f32 %v5241_v8, %v5240_v57  ;;  %v5287_v57 = vsel %vm55_vm0, %v5274_v49, 0.0  ;;  %v5289_v61 = vsel %vm55_vm0, %v5275_v37, 0.0 }
0x1879   :  { %v5264_v55 = vsel %vm55_vm0, %v5251_v23, 0.0  ;;  %v5310_v8 = vsel %vm55_vm0, %v5297_v44, 0.0 }
0x187a   :  { %v5265_v32 = vadd.f32 %v5264_v55, %v5263_v17  ;;  %v5244_v56 = vadd.f32 %v5243_v39, %v5242_v18  ;;  %v8967_v17 = vld [vmem:[%s13089_s10 + $0x54] sm:$0xf]  ;;  %v8509_v39 = vor.u32 %v8968_v36, %v8508_v10  ;;  %v8510_v55 = vld [vmem:[%s13089_s10 + $0x58] sm:$0xf0] }
0x187c   :  { %v5267_v51 = vadd.f32 %v5266_v54, %v5265_v32  ;;  %5315 = vrot.lane.b32.xlu2 %v5244_v56, %s9343_s19  ;;  %v8966_v32 = vld [vmem:[%s13089_s10 + $0x44] sm:$0xf0]  ;;  %v8513_v56 = vor.u32 %v8967_v17, %v8510_v55  ;;  %5408 = vmatpush.bf16.msrb.mxu2 %v8509_v39  ;;  %v8505_v54 = vor.u32 %v8965_v41, %v8502_v43  ;;  %v8519_v43 = vld [vmem:[%s13082_s3 + $0x18] sm:$0xff] }
0x187d   :  { %v5215_v12 = vld [vmem:[#allocation3 + $0x4] sm:$0xf]  ;;  %v8501_v20 = vor.u32 %v8966_v32, %v8500_v40 }
0x187e   :  { %v5269_v26 = vmul.f32 %v5215_v12, %v11832_v53  ;;  %v5292_v50 = vmul.f32 %v5215_v12, %v11828_v5  ;;  %5319 = vrot.lane.b32.xlu1 %v5267_v51, %s9342_s18  ;;  %v5279_v5 = vsel %vm55_vm0, %v5270_v31, 0.0  ;;  %5421 = vmatpush.bf16.msrb.mxu3 %v8513_v56  ;;  %v8492_v51 = vld [vmem:[%s13089_s10 + $0x30] sm:$0xf]  ;;  %v8963_v12 = vld [vmem:[%s13089_s10 + $0x34] sm:$0xf] }
0x187f   :  { %v8494_v31 = vld [vmem:[%s13089_s10 + $0x38] sm:$0xf0]  ;;  %v8493_v9 = vor.u32 %v8964_v16, %v8492_v51  ;;  %v9094_v56 = vld [vmem:[%s13080_s1 + $0x2] ss:$0 sm:$0xff]  ;;  %v5592_v51 = vperm.slane %v8519_v43, 2 }
0x1880   :  { %v5300_v6 = vsel %vm55_vm0, %v5292_v50, 0.0  ;;  %v5277_v19 = vsel %vm55_vm0, %v5269_v26, 0.0  ;;  %5409 = vmatpush.bf16.msrb.mxu2 %v8501_v20  ;;  %v8497_v26 = vor.u32 %v8963_v12, %v8494_v31  ;;  %v8484_v50 = vld [vmem:[%s13089_s10 + $0x20] sm:$0xf]  ;;  %v5578_v20 = vperm.slane %v8519_v43, 0 }
0x1881   :  { %v5301_v25 = vadd.f32 %v5300_v6, %v5299_v34  ;;  %v5278_v53 = vadd.f32 %v5277_v19, %v5276_v46  ;;  %v8962_v46 = vld [vmem:[%s13089_s10 + $0x24] sm:$0xf0]  ;;  %v8961_v34 = vld [vmem:[%s13089_s10 + $0x24] sm:$0xf]  ;;  %v8476_v6 = vld [vmem:[%s13089_s10 + $0x10] sm:$0xf] }
0x1882   :  { %5422 = vmatpush.bf16.msrb.mxu3 %v8505_v54  ;;  %v8485_v62 = vor.u32 %v8962_v46, %v8484_v50  ;;  %v8489_v60 = vor.u32 %v8961_v34, %v8486_v21  ;;  %v8960_v19 = vld [vmem:[%s13089_s10 + $0x14] sm:$0xf0]  ;;  %v5585_v54 = vperm.slane %v8519_v43, 1  ;;  %v5606_v31 = vperm.slane %v8519_v43, 4 }
0x1883   :  { %v5303_v33 = vadd.f32 %v5302_v3, %v5301_v25  ;;  %v5280_v29 = vadd.f32 %v5279_v5, %v5278_v53  ;;  %v8477_v25 = vor.u32 %v8960_v19, %v8476_v6  ;;  %v8478_v53 = vld [vmem:[%s13089_s10 + $0x18] sm:$0xf0]  ;;  %v8468_v3 = vld [vmem:[%s13089_s10] sm:$0xf]  ;;  %v5627_v46 = vperm.slane %v8519_v43, 7 }
0x1884   :  { %5410 = vmatpush.bf16.msrb.mxu2 %v8493_v9  ;;  %v8481_v5 = vor.u32 %v8959_v1, %v8478_v53  ;;  %v8469_v58 = vor.u32 %v8958_v22, %v8468_v3  ;;  %v5613_v9 = vperm.slane %v8519_v43, 5  ;;  %v5620_v22 = vperm.slane %v8519_v43, 6 }
0x1885   :  { %v5305_v45 = vadd.f32 %v5304_v48, %v5303_v33  ;;  %v5282_v13 = vadd.f32 %v5281_v24, %v5280_v29  ;;  %v8470_v33 = vld [vmem:[%s13089_s10 + $0x8] sm:$0xf0] }
0x1886   :  { %5423 = vmatpush.bf16.msrb.mxu3 %v8497_v26  ;;  %v8473_v29 = vor.u32 %v8957_v59, %v8470_v33 }
0x1887   :  { %v5307_v47 = vadd.f32 %v5306_v28, %v5305_v45  ;;  %v5284_v7 = vadd.f32 %v5283_v4, %v5282_v13  ;;  %v12007_v13 = vld [vmem:[%s13090_s11] sm:$0x3] }
0x1888   :  { %5411 = vmatpush.bf16.msrb.mxu2 %v8485_v62  ;;  %v5339_v28 = vperm.slane %v12007_v13, 0 }
0x1889   :  { %v5309_v30 = vadd.f32 %v5308_v38, %v5307_v47  ;;  %v5286_v0 = vadd.f32 %v5285_v15, %v5284_v7  ;;  %v12016_v15 = vld [vmem:[%s13081_s2 + $0x18] sm:$0xff] }
0x188a   :  { %5424 = vmatpush.bf16.msrb.mxu3 %v8489_v60  ;;  %v5521_v41 = vperm.slane %v12016_v15, 0  ;;  %v5542_v16 = vperm.slane %v12016_v15, 3  ;;  %v5549_v12 = vperm.slane %v12016_v15, 4  ;;  %v5563_v26 = vperm.slane %v12016_v15, 6 }
0x188b   :  { %v5311_v27 = vadd.f32 %v5310_v8, %v5309_v30  ;;  %v5288_v14 = vadd.f32 %v5287_v57, %v5286_v0  ;;  %v5528_v0 = vperm.slane %v12016_v15, 1  ;;  %v5570_v50 = vperm.slane %v12016_v15, 7 }
0x188c   :  { %5412 = vmatpush.bf16.msrb.mxu2 %v8477_v25  ;;  %v5556_v3 = vperm.slane %v12016_v15, 5 }
0x188d   :  { %v5313_v23 = vadd.f32 %v5312_v63, %v5311_v27  ;;  %v5290_v18 = vadd.f32 %v5289_v61, %v5288_v14  ;;  %v5535_v27 = vperm.slane %v12016_v15, 2 }
0x188e   :  { %5425 = vmatpush.bf16.msrb.mxu3 %v8481_v5  ;;  %v5599_v5 = vperm.slane %v8519_v43, 3 }
0x188f   :  { %5487 = vrot.lane.b32.xlu1 %v5313_v23, %s9344_s20  ;;  %5477 = vrot.lane.b32.xlu2 %v5290_v18, %s9342_s18 }
0x1890   :  { %5413 = vmatpush.bf16.msrb.mxu2 %v8469_v58  ;;  %v5340_v58 = vperm.slane %v12007_v13, 1 }
0x1892   :  { %5426 = vmatpush.bf16.msrb.mxu3 %v8473_v29 }
0x18d6   :  { %v5316_v24 = vpop.permute.xlu2 %5315 }
0x18d7   :  { %v5322_v48 = vsel %vm311_vm1, %v5083_v35, %v5316_v24 }
0x18e9   :  { %v5478_v17 = vpop.permute.xlu2 %5477 }
0x18f0   :  { %v5320_v42 = vpop.permute.xlu1 %5319 }
0x18f1   :  { %v5323_v2 = vsel %vm313_vm2, %v5322_v48, %v5320_v42 }
0x18f2   :  { %v5324_v45 = vpack.c.bf16 %v5323_v2, %v5323_v2 }
0x18f4   :  { %8514 = vmatmul.msk.bf16.vlgmr.msrb.gmra.mxu2 %vm394_vm3, %v5324_v45  ;;  %8515 = vmatmul.msk.bf16.vlgmr.msrb.gmra.mxu3 %vm394_vm3, %v5324_v45 }
0x1901   :  { %v5488_v39 = vpop.permute.xlu1 %5487 }
0x1977   :  { %v5415_v4 = vpop.f32.mrf.mxu2  ;;  %v12010_v49 = vpop.f32.mrf.mxu3 }
0x1978   :  { %v5416_v44 = vadd.f32 %v5415_v4, %v5339_v28  ;;  %v5429_v29 = vadd.f32 %v12010_v49, %v5340_v58 }
0x197a   :  { %9238 = vtanh.f32 %v5416_v44  ;;  %v8516_v47 = vmul.f32 -1.442695, %v5416_v44  ;;  %v8517_v24 = vmul.f32 -1.442695, %v5429_v29 }
0x197c   :  { %9240 = vpow2.f32 %v8516_v47 }
0x197f   :  { %v5417_v7 = vpop.f32.mrf.mxu2  ;;  %v5430_v38 = vpop.f32.mrf.mxu3 }
0x1980   :  { %v9239_v11 = vpop.eup %9238 }
0x1981   :  { %5472 = vrot.lane.b32.xlu0 %v9239_v11, %s9343_s19 }
0x1982   :  { %v9241_v37 = vpop.eup %9240 }
0x1983   :  { %v5436_v30 = vadd.f32 1.0, %v9241_v37 }
0x1985   :  { %9242 = vrcp.f32 %v5436_v30  ;;  %v5448_v63 = vand.u32 2147483648, %v5436_v30  ;;  %v5446_v23 = vand.u32 2147483647, %v5436_v30  ;;  %vm5442_vm12 = vweird.f32 %v5436_v30 }
0x1987   :  { %v5449_v10 = vor.u32 1.1754944e-38, %v5448_v63  ;;  %vm5447_vm14 = vcmp.eq.f32.partialorder %v5446_v23, 8.507059e+37 }
0x1989   :  { %5533 = vperm.xlu0 %9046, %v5528_v0  }
0x198b   :  { %v9243_v57 = vpop.eup %9242 }
0x198c   :  { %v5438_v8 = vmul.f32 %v9243_v57, %v5436_v30  ;;  %vm5443_vm11 = vweird.f32 %v9243_v57 }
0x198d   :  { %vm5444_vm13 = vmor %vm5442_vm12, %vm5443_vm11 }
0x198e   :  { %v5439_v14 = vsub.f32 1.0, %v5438_v8 }
0x1990   :  { %v5440_v61 = vmul.f32 %v9243_v57, %v5439_v14 }
0x1991   :  { %5540 = vperm.xlu0 %9046, %v5535_v27  }
0x1992   :  { %v5441_v18 = vadd.f32 %v9243_v57, %v5440_v61 }
0x1994   :  { %v5445_v36 = vsel %vm5444_vm13, %v9243_v57, %v5441_v18  ;;  %v5634_v18 = vld [vmem:[#allocation2] sm:$0xf] }
0x1995   :  { %v5450_v55 = vsel %vm5447_vm14, %v5449_v10, %v5445_v36  ;;  %v5642_v10 = vld [vmem:[#allocation3] sm:$0xf] }
0x1996   :  { %v5480_v40 = vmul.f32 %v5478_v17, %v5450_v55  ;;  %v5490_v32 = vmul.f32 %v5488_v39, %v5450_v55  ;;  %v5635_v39 = vld [vmem:[#allocation2 + $0x4] sm:$0xf] }
0x1998   :  { %5482 = vrot.lane.b32.xlu2 %v5480_v40, %s9344_s20  ;;  %5492 = vrot.lane.b32.xlu1 %v5490_v32, %s9342_s18 }
0x19a0   :  { %5090 = vperm.xlu2 %9048, %v9094_v56   ;;  %5526 = vperm.xlu1 %9047, %v5521_v41  }
0x19a8   :  { %5583 = vperm.xlu2 %9048, %v5578_v20   ;;  %5590 = vperm.xlu1 %9047, %v5585_v54   ;;  %v5637_v20 = vld [vmem:[#allocation2 + $0xc] sm:$0xf] }
0x19b0   :  { %5597 = vperm.xlu2 %9048, %v5592_v51   ;;  %5547 = vperm.xlu1 %9047, %v5542_v16  }
0x19b8   :  { %5554 = vperm.xlu2 %9048, %v5549_v12   ;;  %5611 = vperm.xlu1 %9047, %v5606_v31   ;;  %v5638_v12 = vld [vmem:[#allocation2 + $0x10] sm:$0xf] }
0x19c0   :  { %5618 = vperm.xlu2 %9048, %v5613_v9   ;;  %5568 = vperm.xlu1 %9047, %v5563_v26  }
0x19c8   :  { %5575 = vperm.xlu2 %9048, %v5570_v50   ;;  %5632 = vperm.xlu1 %9047, %v5627_v46  }
0x19f2   :  { %v5483_v34 = vpop.permute.xlu2 %5482 }
0x19f3   :  { %v5473_v21 = vpop.permute.xlu0 %5472 }
0x19f4   :  { %v5475_v62 = vmul.f32 %v5473_v21, %v5450_v55  ;;  %v5643_v55 = vld [vmem:[#allocation3 + $0x4] sm:$0xf] }
0x19f6   :  { %v5485_v60 = vadd.f32 %v5483_v34, %v5475_v62 }
0x19fa   :  { %v5091_v1 = vpop.permute.xlu2 %5090 }
0x19fb   :  { %v5534_v47 = vpop.permute.xlu0 %5533 }
0x19fc   :  { %v5651_v32 = vmul.f32 %v5635_v39, %v5534_v47  ;;  %v5697_v56 = vmul.f32 %v5643_v55, %v5534_v47 }
0x19fe   :  { %v5659_v34 = vsel %vm55_vm0, %v5651_v32, 0.0  ;;  %v5705_v21 = vsel %vm55_vm0, %v5697_v56, 0.0 }
0x1a02   :  { %v5584_v4 = vpop.permute.xlu2 %5583 }
0x1a03   :  { %v5541_v11 = vpop.permute.xlu0 %5540  ;;  %v5673_v41 = vmul.f32 %v5634_v18, %v5584_v4  ;;  %v5719_v54 = vmul.f32 %v5642_v10, %v5584_v4 }
0x1a05   :  { %v5681_v62 = vsel %vm55_vm0, %v5673_v41, 0.0 }
0x1a0a   :  { %v5493_v6 = vpop.permute.xlu1 %5492  ;;  %v5598_v38 = vpop.permute.xlu2 %5597 }
0x1a0b   :  { %v5495_v19 = vadd.f32 %v5493_v6, %v5485_v60  ;;  %v5645_v6 = vld [vmem:[#allocation3 + $0xc] sm:$0xf] }
0x1a0d   :  { %9244 = vtanh.f32 %v5495_v19  ;;  %v5504_v25 = vmul.f32 %v5495_v19, %v5091_v1  ;;  %v5727_v19 = vsel %vm55_vm0, %v5719_v54, 0.0 }
0x1a0e   :  { %9246 = vpow2.f32 %v8517_v24 }
0x1a0f   :  { %5506 = vrot.lane.b32.xlu1 %v5504_v25, %s9344_s20 }
0x1a12   :  { %v5527_v59 = vpop.permute.xlu1 %5526  ;;  %v12047_v8 = vpop.permute.xlu2 %5554 }
0x1a13   :  { %v9245_v53 = vpop.eup %9244  ;;  %v5650_v36 = vmul.f32 %v5634_v18, %v5527_v59  ;;  %v5696_v17 = vmul.f32 %v5642_v10, %v5527_v59  ;;  %v5641_v18 = vld [vmem:[#allocation2 + $0x1c] sm:$0xf] }
0x1a14   :  { %5498 = vrot.lane.b32.xlu0 %v9245_v53, %s9344_s20  ;;  %v9247_v48 = vpop.eup %9246 }
0x1a15   :  { %v5455_v2 = vadd.f32 1.0, %v9247_v48  ;;  %v5658_v31 = vsel %vm55_vm0, %v5650_v36, 0.0  ;;  %v5704_v9 = vsel %vm55_vm0, %v5696_v17, 0.0 }
0x1a16   :  { %v5660_v25 = vadd.f32 %v5659_v34, %v5658_v31  ;;  %v5706_v53 = vadd.f32 %v5705_v21, %v5704_v9 }
0x1a17   :  { %9248 = vrcp.f32 %v5455_v2  ;;  %v5467_v15 = vand.u32 2147483648, %v5455_v2  ;;  %vm5461_vm4 = vweird.f32 %v5455_v2  ;;  %v5465_v0 = vand.u32 2147483647, %v5455_v2 }
0x1a19   :  { %v5468_v27 = vor.u32 1.1754944e-38, %v5467_v15  ;;  %vm5466_vm8 = vcmp.eq.f32.partialorder %v5465_v0, 8.507059e+37 }
0x1a1a   :  { %v5591_v33 = vpop.permute.xlu1 %5590  ;;  %v12050_v51 = vpop.permute.xlu2 %5618 }
0x1a1b   :  { %v5674_v43 = vmul.f32 %v5635_v39, %v5591_v33  ;;  %v5720_v50 = vmul.f32 %v5643_v55, %v5591_v33 }
0x1a1c   :  { %5604 = vperm.xlu0 %9046, %v5599_v5  }
0x1a1d   :  { %v9249_v28 = vpop.eup %9248  ;;  %v5682_v60 = vsel %vm55_vm0, %v5674_v43, 0.0  ;;  %v5728_v24 = vsel %vm55_vm0, %v5720_v50, 0.0 }
0x1a1e   :  { %v5457_v44 = vmul.f32 %v9249_v28, %v5455_v2  ;;  %vm5462_vm15 = vweird.f32 %v9249_v28  ;;  %v5683_v29 = vadd.f32 %v5682_v60, %v5681_v62  ;;  %v5729_v56 = vadd.f32 %v5728_v24, %v5727_v19 }
0x1a1f   :  { %vm5463_vm10 = vmor %vm5461_vm4, %vm5462_vm15 }
0x1a20   :  { %v5458_v7 = vsub.f32 1.0, %v5457_v44 }
0x1a22   :  { %v12038_v35 = vpop.permute.xlu1 %5547  ;;  %v5459_v49 = vmul.f32 %v9249_v28, %v5458_v7  ;;  %v5576_v10 = vpop.permute.xlu2 %5575 }
0x1a23   :  { %v5653_v46 = vmul.f32 %v5637_v20, %v12038_v35  ;;  %v5699_v2 = vmul.f32 %v5645_v6, %v12038_v35 }
0x1a24   :  { %5561 = vperm.xlu0 %9046, %v5556_v3   ;;  %v5460_v37 = vadd.f32 %v9249_v28, %v5459_v49  ;;  %v5639_v49 = vld [vmem:[#allocation2 + $0x14] sm:$0xf] }
0x1a25   :  { %v5663_v48 = vsel %vm55_vm0, %v5653_v46, 0.0  ;;  %v5709_v39 = vsel %vm55_vm0, %v5699_v2, 0.0  ;;  %v5678_v32 = vmul.f32 %v5639_v49, %v12050_v51 }
0x1a26   :  { %v5464_v57 = vsel %vm5463_vm10, %v9249_v28, %v5460_v37  ;;  %v5646_v28 = vld [vmem:[#allocation3 + $0x10] sm:$0xf] }
0x1a27   :  { %v5469_v14 = vsel %vm5466_vm8, %v5468_v27, %v5464_v57  ;;  %v5690_v62 = vsel %vm55_vm0, %v5678_v32, 0.0  ;;  %v8975_v32 = vld [vmem:[%s13089_s10 + $0x34] sm:$0xf] }
0x1a2a   :  { %v12040_v42 = vpop.permute.xlu1 %5611 }
0x1a2b   :  { %v5677_v27 = vmul.f32 %v5638_v12, %v12040_v42  ;;  %v5723_v46 = vmul.f32 %v5646_v28, %v12040_v42 }
0x1a2c   :  { %5625 = vperm.xlu0 %9046, %v5620_v22  }
0x1a32   :  { %v12042_v45 = vpop.permute.xlu1 %5568 }
0x1a3a   :  { %v12044_v13 = vpop.permute.xlu1 %5632 }
0x1a81   :  { %v5507_v30 = vpop.permute.xlu1 %5506 }
0x1a82   :  { %5509 = vst.msk [vmem:[#allocation3 + $0x8] sm:$0xf] %vm55_vm0, %v5507_v30 }
0x1a86   :  { %v5499_v63 = vpop.permute.xlu0 %5498 }
0x1a87   :  { %v5501_v61 = vmul.f32 %v5499_v63, %v5469_v14 }
0x1a89   :  { %v5502_v23 = vmul.f32 %v5501_v61, %v5091_v1  ;;  %v5644_v40 = vld [vmem:[#allocation3 + $0x8] sm:$0xf]  ;;  %v5654_v1 = vmul.f32 %v5638_v12, %v12047_v8  ;;  %v5700_v61 = vmul.f32 %v5646_v28, %v12047_v8  ;;  %v5688_v8 = vsel %vm55_vm0, %v5677_v27, 0.0  ;;  %v5648_v12 = vld [vmem:[#allocation3 + $0x18] sm:$0xf] }
0x1a8a   :  { %v5698_v26 = vmul.f32 %v5644_v40, %v5541_v11  ;;  %v5721_v44 = vmul.f32 %v5644_v40, %v5598_v38 }
0x1a8b   :  { %5503 = vst.msk [vmem:[#allocation2 + $0x8] sm:$0xf] %vm55_vm0, %v5502_v23  ;;  %v5647_v23 = vld [vmem:[#allocation3 + $0x14] sm:$0xf]  ;;  %v5711_v50 = vsel %vm55_vm0, %v5700_v61, 0.0 }
0x1a8c   :  { %v5707_v58 = vsel %vm55_vm0, %v5698_v26, 0.0  ;;  %v5730_v55 = vsel %vm55_vm0, %v5721_v44, 0.0  ;;  %v8564_v61 = vld [vmem:[%s13089_s10 + $0x58] sm:$0xf0] }
0x1a8d   :  { %v5708_v0 = vadd.f32 %v5707_v58, %v5706_v53  ;;  %v5731_v9 = vadd.f32 %v5730_v55, %v5729_v56  ;;  %v5702_v53 = vmul.f32 %v5648_v12, %v12042_v45  ;;  %v8546_v55 = vld [vmem:[%s13089_s10 + $0x30] sm:$0xf] }
0x1a8e   :  { %v5605_v16 = vpop.permute.xlu0 %5604 }
0x1a8f   :  { %v5676_v59 = vmul.f32 %v5637_v20, %v5605_v16  ;;  %v5722_v14 = vmul.f32 %v5645_v6, %v5605_v16  ;;  %v5710_v43 = vadd.f32 %v5709_v39, %v5708_v0  ;;  %v5657_v20 = vmul.f32 %v5641_v18, %v5576_v10 }
0x1a91   :  { %v5686_v35 = vsel %vm55_vm0, %v5676_v59, 0.0  ;;  %v5732_v54 = vsel %vm55_vm0, %v5722_v14, 0.0  ;;  %v5712_v19 = vadd.f32 %v5711_v50, %v5710_v43  ;;  %v8562_v14 = vld [vmem:[%s13089_s10 + $0x50] sm:$0xf]  ;;  %v8538_v43 = vld [vmem:[%s13089_s10 + $0x20] sm:$0xf] }
0x1a92   :  { %v5636_v5 = vld [vmem:[#allocation2 + $0x8] sm:$0xf]  ;;  %v5733_v60 = vadd.f32 %v5732_v54, %v5731_v9  ;;  %v8973_v54 = vld [vmem:[%s13089_s10 + $0x24] sm:$0xf]  ;;  %v8530_v9 = vld [vmem:[%s13089_s10 + $0x10] sm:$0xf] }
0x1a93   :  { %v5652_v3 = vmul.f32 %v5636_v5, %v5541_v11  ;;  %v5675_v22 = vmul.f32 %v5636_v5, %v5598_v38  ;;  %v7652_v33 = vld [vmem:[#allocation2 + $0x8] sm:$0xf]  ;;  %v5640_v11 = vld [vmem:[#allocation2 + $0x18] sm:$0xf]  ;;  %v5665_v38 = vsel %vm55_vm0, %v5654_v1, 0.0  ;;  %v5680_v5 = vmul.f32 %v5641_v18, %v12044_v13 }
0x1a94   :  { %v7662_v7 = vsel %vm7658_vm9, %v7652_v33, 0.0  ;;  %v5724_v33 = vmul.f32 %v5647_v23, %v12050_v51  ;;  %v8978_v18 = vld [vmem:[%s13089_s10 + $0x44] sm:$0xf0]  ;;  %v8971_v50 = vld [vmem:[%s13089_s10 + $0x14] sm:$0xf] }
0x1a95   :  { %v5684_v4 = vsel %vm55_vm0, %v5675_v22, 0.0  ;;  %v5661_v47 = vsel %vm55_vm0, %v5652_v3, 0.0  ;;  %v12069_v57 = vadd.f32 %v7662_v7, %v11873_v52  ;;  %v5656_v52 = vmul.f32 %v5640_v11, %v12042_v45  ;;  %v5649_v22 = vld [vmem:[#allocation3 + $0x1c] sm:$0xf] }
0x1a96   :  { %v5685_v37 = vadd.f32 %v5684_v4, %v5683_v29  ;;  %v5562_v15 = vpop.permute.xlu0 %5561  ;;  %v5662_v30 = vadd.f32 %v5661_v47, %v5660_v25  ;;  %v5671_v25 = vsel %vm55_vm0, %v5657_v20, 0.0  ;;  %v5734_v29 = vsel %vm55_vm0, %v5723_v46, 0.0  ;;  %v8974_v20 = vld [vmem:[%s13089_s10 + $0x24] sm:$0xf0]  ;;  %v8532_v46 = vld [vmem:[%s13089_s10 + $0x18] sm:$0xf0] }
0x1a97   :  { %v5655_v63 = vmul.f32 %v5639_v49, %v5562_v15  ;;  %v5701_v40 = vmul.f32 %v5647_v23, %v5562_v15  ;;  %v5669_v34 = vsel %vm55_vm0, %v5656_v52, 0.0  ;;  %v5735_v2 = vadd.f32 %v5734_v29, %v5733_v60  ;;  %v8554_v23 = vld [vmem:[%s13089_s10 + $0x40] sm:$0xf]  ;;  %v8970_v60 = vld [vmem:[%s13089_s10 + $0x4] sm:$0xf0] }
0x1a98   :  { %v5687_v36 = vadd.f32 %v5686_v35, %v5685_v37  ;;  %v5664_v17 = vadd.f32 %v5663_v48, %v5662_v30  ;;  %v5703_v4 = vmul.f32 %v5649_v22, %v5576_v10  ;;  %v5715_v45 = vsel %vm55_vm0, %v5702_v53, 0.0  ;;  %v5511_v53 = vld [vmem:[#allocation4 + $0xc] sm:$0xf] }
0x1a99   :  { %v5667_v16 = vsel %vm55_vm0, %v5655_v63, 0.0  ;;  %v5713_v21 = vsel %vm55_vm0, %v5701_v40, 0.0  ;;  %v5694_v44 = vsel %vm55_vm0, %v5680_v5, 0.0  ;;  %v5736_v49 = vsel %vm55_vm0, %v5724_v33, 0.0  ;;  %v8980_v63 = vld [vmem:[%s13089_s10 + $0x54] sm:$0xf0] }
0x1a9a   :  { %v5666_v41 = vadd.f32 %v5665_v38, %v5664_v17  ;;  %v5689_v31 = vadd.f32 %v5688_v8, %v5687_v36  ;;  %v5714_v59 = vadd.f32 %v5713_v21, %v5712_v19  ;;  %v5717_v37 = vsel %vm55_vm0, %v5703_v4, 0.0  ;;  %v8977_v36 = vld [vmem:[%s13089_s10 + $0x44] sm:$0xf]  ;;  %v8556_v17 = vld [vmem:[%s13089_s10 + $0x48] sm:$0xf0] }
0x1a9b   :  { %v5726_v15 = vmul.f32 %v5649_v22, %v12044_v13  ;;  %v8979_v13 = vld [vmem:[%s13089_s10 + $0x54] sm:$0xf]  ;;  %v8563_v38 = vor.u32 %v8980_v63, %v8562_v14  ;;  %v8555_v39 = vor.u32 %v8978_v18, %v8554_v23  ;;  %v8559_v52 = vor.u32 %v8977_v36, %v8556_v17  ;;  %v8976_v40 = vld [vmem:[%s13089_s10 + $0x34] sm:$0xf0]  ;;  %v9095_v36 = vld [vmem:[%s13080_s1 + $0x3] ss:$0 sm:$0xff] }
0x1a9c   :  { %v5668_v26 = vadd.f32 %v5667_v16, %v5666_v41  ;;  %v5691_v42 = vadd.f32 %v5690_v62, %v5689_v31  ;;  %v5716_v47 = vadd.f32 %v5715_v45, %v5714_v59  ;;  %v8567_v10 = vor.u32 %v8979_v13, %v8564_v61  ;;  %v8548_v41 = vld [vmem:[%s13089_s10 + $0x38] sm:$0xf0]  ;;  %v8540_v16 = vld [vmem:[%s13089_s10 + $0x28] sm:$0xf0]  ;;  %v8522_v62 = vld [vmem:[%s13089_s10] sm:$0xf] }
0x1a9d   :  { %v5740_v27 = vsel %vm55_vm0, %v5726_v15, 0.0  ;;  %5836 = vmatpush.bf16.msrb.mxu0 %v8563_v38  ;;  %v8547_v56 = vor.u32 %v8976_v40, %v8546_v55  ;;  %v8551_v8 = vor.u32 %v8975_v32, %v8548_v41  ;;  %v8543_v31 = vor.u32 %v8973_v54, %v8540_v16  ;;  %v8573_v17 = vld [vmem:[%s13082_s3 + $0x20] sm:$0xff] }
0x1a9e   :  { %v5670_v6 = vadd.f32 %v5669_v34, %v5668_v26  ;;  %v5626_v1 = vpop.permute.xlu0 %5625  ;;  %v5718_v0 = vadd.f32 %v5717_v37, %v5716_v47  ;;  %5849 = vmatpush.bf16.msra.mxu1 %v8567_v10  ;;  %v8972_v26 = vld [vmem:[%s13089_s10 + $0x14] sm:$0xf0]  ;;  %v8535_v21 = vor.u32 %v8971_v50, %v8532_v46  ;;  %v8523_v19 = vor.u32 %v8970_v60, %v8522_v62  ;;  %v12192_v47 = vld [vmem:[%s13081_s2 + $0x20] sm:$0xff] }
0x1a9f   :  { %v5679_v3 = vmul.f32 %v5640_v11, %v5626_v1  ;;  %v5725_v48 = vmul.f32 %v5648_v12, %v5626_v1  ;;  %v5737_v11 = vadd.f32 %v5736_v49, %v5735_v2  ;;  %v8539_v12 = vor.u32 %v8974_v20, %v8538_v43  ;;  %v8524_v1 = vld [vmem:[%s13089_s10 + $0x8] sm:$0xf0] }
0x1aa0   :  { %v5672_v58 = vadd.f32 %v5671_v25, %v5670_v6  ;;  %v8531_v34 = vor.u32 %v8972_v26, %v8530_v9  ;;  %v8969_v6 = vld [vmem:[%s13089_s10 + $0x4] sm:$0xf]  ;;  %v5956_v49 = vperm.slane %v12192_v47, 1  ;;  %v5963_v37 = vperm.slane %v12192_v47, 2 }
0x1aa1   :  { %v5692_v24 = vsel %vm55_vm0, %v5679_v3, 0.0  ;;  %v5738_v51 = vsel %vm55_vm0, %v5725_v48, 0.0  ;;  %5837 = vmatpush.bf16.msrb.mxu0 %v8555_v39  ;;  %v8527_v25 = vor.u32 %v8969_v6, %v8524_v1  ;;  %v5949_v10 = vperm.slane %v12192_v47, 0 }
0x1aa2   :  { %v5693_v28 = vadd.f32 %v5692_v24, %v5691_v42  ;;  %5743 = vrot.lane.b32.xlu0 %v5672_v58, %s9343_s19  ;;  %v5739_v30 = vadd.f32 %v5738_v51, %v5737_v11  ;;  %5850 = vmatpush.bf16.msra.mxu1 %v8559_v52  ;;  %v12183_v58 = vld [vmem:[%s13090_s11] sm:$0x3]  ;;  %v6013_v39 = vperm.slane %v8573_v17, 1  ;;  %v6006_v52 = vperm.slane %v8573_v17, 0 }
0x1aa3   :  { %v5767_v33 = vperm.slane %v12183_v58, 0  ;;  %v5970_v55 = vperm.slane %v12192_v47, 3  ;;  %v6020_v40 = vperm.slane %v8573_v17, 2  ;;  %v6034_v32 = vperm.slane %v8573_v17, 4 }
0x1aa4   :  { %v5695_v7 = vadd.f32 %v5694_v44, %v5693_v28  ;;  %v5741_v35 = vadd.f32 %v5740_v27, %v5739_v30  ;;  %v5991_v41 = vperm.slane %v12192_v47, 6  ;;  %v6041_v43 = vperm.slane %v8573_v17, 5 }
0x1aa5   :  { %5838 = vmatpush.bf16.msrb.mxu0 %v8547_v56  ;;  %v5977_v56 = vperm.slane %v12192_v47, 4  ;;  %v6055_v20 = vperm.slane %v8573_v17, 7  ;;  %v5984_v62 = vperm.slane %v12192_v47, 5  ;;  %v6048_v60 = vperm.slane %v8573_v17, 6 }
0x1aa6   :  { %5747 = vrot.lane.b32.xlu2 %v5695_v7, %s9342_s18  ;;  %5851 = vmatpush.bf16.msra.mxu1 %v8551_v8  ;;  %v5998_v8 = vperm.slane %v12192_v47, 7 }
0x1aa9   :  { %5839 = vmatpush.bf16.msrb.mxu0 %v8539_v12 }
0x1aaa   :  { %5905 = vrot.lane.b32.xlu0 %v5718_v0, %s9342_s18  ;;  %5852 = vmatpush.bf16.msra.mxu1 %v8543_v31 }
0x1aad   :  { %5840 = vmatpush.bf16.msrb.mxu0 %v8531_v34 }
0x1aae   :  { %5915 = vrot.lane.b32.xlu2 %v5741_v35, %s9344_s20  ;;  %5853 = vmatpush.bf16.msra.mxu1 %v8535_v21  ;;  %v6027_v21 = vperm.slane %v8573_v17, 3 }
0x1ab1   :  { %5841 = vmatpush.bf16.msrb.mxu0 %v8523_v19 }
0x1ab2   :  { %5854 = vmatpush.bf16.msra.mxu1 %v8527_v25  ;;  %v5768_v25 = vperm.slane %v12183_v58, 1 }
0x1b00   :  { %v5748_v3 = vpop.permute.xlu2 %5747 }
0x1b08   :  { %v5916_v13 = vpop.permute.xlu2 %5915 }
0x1b14   :  { %v5744_v5 = vpop.permute.xlu0 %5743 }
0x1b15   :  { %v5750_v22 = vsel %vm311_vm1, %v5511_v53, %v5744_v5 }
0x1b16   :  { %v5751_v59 = vsel %vm313_vm2, %v5750_v22, %v5748_v3 }
0x1b17   :  { %v5752_v42 = vpack.c.bf16 %v5751_v59, %v5751_v59 }
0x1b19   :  { %8568 = vmatmul.msk.bf16.vlgmr.msrb.gmra.mxu0 %vm394_vm3, %v5752_v42  ;;  %8569 = vmatmul.msk.bf16.vlgmr.msra.gmra.mxu1 %vm394_vm3, %v5752_v42 }
0x1b1c   :  { %v5906_v38 = vpop.permute.xlu0 %5905 }
0x1b96   :  { %v5843_v29 = vpop.f32.mrf.mxu0  ;;  %v12186_v24 = vpop.f32.mrf.mxu1 }
0x1b97   :  { %v5844_v48 = vadd.f32 %v5843_v29, %v5767_v33  ;;  %v5857_v5 = vadd.f32 %v12186_v24, %v5768_v25 }
0x1b99   :  { %9250 = vtanh.f32 %v5844_v48  ;;  %v8570_v2 = vmul.f32 -1.442695, %v5844_v48  ;;  %v8571_v3 = vmul.f32 -1.442695, %v5857_v5 }
0x1b9b   :  { %9252 = vpow2.f32 %v8570_v2 }
0x1b9e   :  { %v5845_v28 = vpop.f32.mrf.mxu0  ;;  %v5858_v4 = vpop.f32.mrf.mxu1 }
0x1b9f   :  { %v9251_v45 = vpop.eup %9250 }
0x1ba0   :  { %5900 = vrot.lane.b32.xlu1 %v9251_v45, %s9343_s19 }
0x1ba1   :  { %v9253_v44 = vpop.eup %9252 }
0x1ba2   :  { %v5864_v7 = vadd.f32 1.0, %v9253_v44 }
0x1ba4   :  { %9254 = vrcp.f32 %v5864_v7  ;;  %v5876_v30 = vand.u32 2147483648, %v5864_v7  ;;  %v5874_v27 = vand.u32 2147483647, %v5864_v7  ;;  %vm5870_vm6 = vweird.f32 %v5864_v7 }
0x1ba6   :  { %v5877_v14 = vor.u32 1.1754944e-38, %v5876_v30  ;;  %vm5875_vm11 = vcmp.eq.f32.partialorder %v5874_v27, 8.507059e+37 }
0x1ba8   :  { %5961 = vperm.xlu1 %9047, %v5956_v49  }
0x1baa   :  { %v9255_v51 = vpop.eup %9254 }
0x1bab   :  { %v5866_v11 = vmul.f32 %v9255_v51, %v5864_v7  ;;  %vm5871_vm5 = vweird.f32 %v9255_v51 }
0x1bac   :  { %vm5872_vm7 = vmor %vm5870_vm6, %vm5871_vm5 }
0x1bad   :  { %v5867_v15 = vsub.f32 1.0, %v5866_v11  ;;  %v6062_v11 = vld [vmem:[#allocation2] sm:$0xf] }
0x1baf   :  { %v5868_v0 = vmul.f32 %v9255_v51, %v5867_v15  ;;  %v6063_v15 = vld [vmem:[#allocation2 + $0x4] sm:$0xf] }
0x1bb0   :  { %5968 = vperm.xlu1 %9047, %v5963_v37  }
0x1bb1   :  { %v5869_v35 = vadd.f32 %v9255_v51, %v5868_v0 }
0x1bb3   :  { %v5873_v63 = vsel %vm5872_vm7, %v9255_v51, %v5869_v35  ;;  %v6070_v35 = vld [vmem:[#allocation3] sm:$0xf] }
0x1bb4   :  { %v5878_v61 = vsel %vm5875_vm11, %v5877_v14, %v5873_v63  ;;  %v6071_v14 = vld [vmem:[#allocation3 + $0x4] sm:$0xf] }
0x1bb5   :  { %v5918_v23 = vmul.f32 %v5916_v13, %v5878_v61  ;;  %v5908_v18 = vmul.f32 %v5906_v38, %v5878_v61 }
0x1bb7   :  { %5920 = vrot.lane.b32.xlu2 %v5918_v23, %s9342_s18  ;;  %5910 = vrot.lane.b32.xlu0 %v5908_v18, %s9344_s20 }
0x1bbf   :  { %5954 = vperm.xlu2 %9048, %v5949_v10   ;;  %5518 = vperm.xlu0 %9046, %v9095_v36   ;;  %v6064_v10 = vld [vmem:[#allocation2 + $0x8] sm:$0xf] }
0x1bc0   :  { %v6072_v36 = vld [vmem:[#allocation3 + $0x8] sm:$0xf] }
0x1bc7   :  { %6018 = vperm.xlu2 %9048, %v6013_v39   ;;  %6011 = vperm.xlu0 %9046, %v6006_v52  }
0x1bcf   :  { %5975 = vperm.xlu2 %9048, %v5970_v55   ;;  %6025 = vperm.xlu0 %9046, %v6020_v40  }
0x1bd7   :  { %6039 = vperm.xlu2 %9048, %v6034_v32   ;;  %5982 = vperm.xlu0 %9046, %v5977_v56   ;;  %v6066_v56 = vld [vmem:[#allocation2 + $0x10] sm:$0xf] }
0x1bdf   :  { %5996 = vperm.xlu2 %9048, %v5991_v41   ;;  %6046 = vperm.xlu0 %9046, %v6041_v43  }
0x1be7   :  { %6060 = vperm.xlu2 %9048, %v6055_v20   ;;  %6003 = vperm.xlu0 %9046, %v5998_v8  }
0x1c11   :  { %v5921_v9 = vpop.permute.xlu2 %5920 }
0x1c12   :  { %v5901_v54 = vpop.permute.xlu1 %5900 }
0x1c13   :  { %v5903_v16 = vmul.f32 %v5901_v54, %v5878_v61 }
0x1c19   :  { %v5955_v6 = vpop.permute.xlu2 %5954 }
0x1c1a   :  { %v5962_v58 = vpop.permute.xlu1 %5961  ;;  %v6078_v37 = vmul.f32 %v6062_v11, %v5955_v6  ;;  %v6124_v63 = vmul.f32 %v6070_v35, %v5955_v6 }
0x1c1b   :  { %v6079_v0 = vmul.f32 %v6063_v15, %v5962_v58  ;;  %v6125_v13 = vmul.f32 %v6071_v14, %v5962_v58  ;;  %v12255_v58 = vld [vmem:[#allocation2 + $0x18] sm:$0xf] }
0x1c1c   :  { %v6086_v23 = vsel %vm55_vm0, %v6078_v37, 0.0  ;;  %v6132_v8 = vsel %vm55_vm0, %v6124_v63, 0.0  ;;  %v8989_v37 = vld [vmem:[%s13089_s10 + $0x44] sm:$0xf] }
0x1c1d   :  { %v6087_v52 = vsel %vm55_vm0, %v6079_v0, 0.0 }
0x1c21   :  { %v6019_v19 = vpop.permute.xlu2 %6018 }
0x1c22   :  { %v5969_v24 = vpop.permute.xlu1 %5968  ;;  %v6102_v18 = vmul.f32 %v6063_v15, %v6019_v19  ;;  %v6148_v55 = vmul.f32 %v6071_v14, %v6019_v19  ;;  %v8610_v15 = vld [vmem:[%s13089_s10 + $0x48] sm:$0xf0] }
0x1c23   :  { %v6080_v40 = vmul.f32 %v6064_v10, %v5969_v24  ;;  %v6126_v32 = vmul.f32 %v6072_v36, %v5969_v24  ;;  %v8608_v24 = vld [vmem:[%s13089_s10 + $0x40] sm:$0xf] }
0x1c29   :  { %v5911_v12 = vpop.permute.xlu0 %5910  ;;  %v12215_v1 = vpop.permute.xlu2 %5975 }
0x1c2a   :  { %v5913_v31 = vadd.f32 %v5911_v12, %v5903_v16  ;;  %v6088_v12 = vadd.f32 %v6087_v52, %v6086_v23  ;;  %v8613_v23 = vor.u32 %v8989_v37, %v8610_v15 }
0x1c2c   :  { %v5923_v26 = vadd.f32 %v5921_v9, %v5913_v31  ;;  %v6133_v31 = vsel %vm55_vm0, %v6125_v13, 0.0  ;;  %v6110_v9 = vsel %vm55_vm0, %v6102_v18, 0.0  ;;  %v8600_v18 = vld [vmem:[%s13089_s10 + $0x30] sm:$0xf] }
0x1c2d   :  { %v6134_v5 = vadd.f32 %v6133_v31, %v6132_v8 }
0x1c2e   :  { %9256 = vtanh.f32 %v5923_v26 }
0x1c2f   :  { %9258 = vpow2.f32 %v8571_v3 }
0x1c31   :  { %v12209_v50 = vpop.permute.xlu0 %5518  ;;  %v12218_v53 = vpop.permute.xlu2 %6039 }
0x1c32   :  { %v5932_v46 = vmul.f32 %v5923_v26, %v12209_v50 }
0x1c34   :  { %v9257_v34 = vpop.eup %9256  ;;  %5934 = vrot.lane.b32.xlu2 %v5932_v46, %s9344_s20  ;;  %v6156_v46 = vsel %vm55_vm0, %v6148_v55, 0.0  ;;  %v8987_v55 = vld [vmem:[%s13089_s10 + $0x34] sm:$0xf] }
0x1c35   :  { %5926 = vrot.lane.b32.xlu1 %v9257_v34, %s9344_s20  ;;  %v9259_v59 = vpop.eup %9258  ;;  %v6089_v34 = vsel %vm55_vm0, %v6080_v40, 0.0  ;;  %v8602_v40 = vld [vmem:[%s13089_s10 + $0x38] sm:$0xf0] }
0x1c36   :  { %v5883_v33 = vadd.f32 1.0, %v9259_v59 }
0x1c38   :  { %9260 = vrcp.f32 %v5883_v33  ;;  %v5895_v49 = vand.u32 2147483648, %v5883_v33  ;;  %vm5889_vm13 = vweird.f32 %v5883_v33  ;;  %v5893_v51 = vand.u32 2147483647, %v5883_v33 }
0x1c39   :  { %v12221_v22 = vpop.permute.xlu2 %5996  ;;  %v6012_v29 = vpop.permute.xlu0 %6011 }
0x1c3a   :  { %v5896_v27 = vor.u32 1.1754944e-38, %v5895_v49  ;;  %vm5894_vm15 = vcmp.eq.f32.partialorder %v5893_v51, 8.507059e+37  ;;  %v6147_v17 = vmul.f32 %v6070_v35, %v6012_v29  ;;  %v6101_v41 = vmul.f32 %v6062_v11, %v6012_v29  ;;  %v8992_v29 = vld [vmem:[%s13089_s10 + $0x54] sm:$0xf0] }
0x1c3c   :  { %v6155_v26 = vsel %vm55_vm0, %v6147_v17, 0.0 }
0x1c3d   :  { %6032 = vperm.xlu1 %9047, %v6027_v21   ;;  %v6074_v21 = vld [vmem:[#allocation3 + $0x10] sm:$0xf]  ;;  %v6157_v3 = vadd.f32 %v6156_v46, %v6155_v26 }
0x1c3e   :  { %v9261_v2 = vpop.eup %9260 }
0x1c3f   :  { %v5885_v28 = vmul.f32 %v9261_v2, %v5883_v33  ;;  %vm5890_vm12 = vweird.f32 %v9261_v2  ;;  %v8616_v33 = vld [vmem:[%s13089_s10 + $0x50] sm:$0xf] }
0x1c40   :  { %vm5891_vm14 = vmor %vm5889_vm13, %vm5890_vm12 }
0x1c41   :  { %v12223_v42 = vpop.permute.xlu2 %6060  ;;  %v6026_v4 = vpop.permute.xlu0 %6025  ;;  %v5886_v45 = vsub.f32 1.0, %v5885_v28  ;;  %v6151_v28 = vmul.f32 %v6074_v21, %v12218_v53 }
0x1c42   :  { %v6149_v43 = vmul.f32 %v6072_v36, %v6026_v4  ;;  %v6103_v6 = vmul.f32 %v6064_v10, %v6026_v4  ;;  %v8988_v10 = vld [vmem:[%s13089_s10 + $0x34] sm:$0xf0] }
0x1c43   :  { %v5887_v44 = vmul.f32 %v9261_v2, %v5886_v45  ;;  %v8617_v45 = vor.u32 %v8992_v29, %v8616_v33  ;;  %v6162_v36 = vsel %vm55_vm0, %v6151_v28, 0.0 }
0x1c44   :  { %v6158_v19 = vsel %vm55_vm0, %v6149_v43, 0.0  ;;  %v6112_v0 = vsel %vm55_vm0, %v6103_v6, 0.0  ;;  %v6067_v43 = vld [vmem:[#allocation2 + $0x14] sm:$0xf] }
0x1c45   :  { %5989 = vperm.xlu1 %9047, %v5984_v62   ;;  %v5888_v47 = vadd.f32 %v9261_v2, %v5887_v44  ;;  %v6105_v62 = vmul.f32 %v6066_v56, %v12218_v53  ;;  %v8618_v44 = vld [vmem:[%s13089_s10 + $0x58] sm:$0xf0]  ;;  %v6159_v53 = vadd.f32 %v6158_v19, %v6157_v3  ;;  %6264 = vmatpush.bf16.msra.mxu2 %v8617_v45  ;;  %v8985_v3 = vld [vmem:[%s13089_s10 + $0x24] sm:$0xf] }
0x1c47   :  { %v5892_v30 = vsel %vm5891_vm14, %v9261_v2, %v5888_v47  ;;  %v6090_v2 = vadd.f32 %v6089_v34, %v6088_v12  ;;  %v8990_v47 = vld [vmem:[%s13089_s10 + $0x44] sm:$0xf0]  ;;  %v6116_v51 = vsel %vm55_vm0, %v6105_v62, 0.0  ;;  %v8605_v62 = vor.u32 %v8987_v55, %v8602_v40 }
0x1c48   :  { %v5897_v38 = vsel %vm5894_vm15, %v5896_v27, %v5892_v30  ;;  %v12273_v30 = vld [vmem:[#allocation3 + $0x18] sm:$0xf]  ;;  %v8609_v14 = vor.u32 %v8990_v47, %v8608_v24 }
0x1c49   :  { %v12226_v7 = vpop.permute.xlu0 %5982 }
0x1c4a   :  { %v6082_v13 = vmul.f32 %v6066_v56, %v12226_v7  ;;  %v6128_v17 = vmul.f32 %v6074_v21, %v12226_v7  ;;  %v6069_v56 = vld [vmem:[#allocation2 + $0x1c] sm:$0xf]  ;;  %6265 = vmatpush.bf16.msra.mxu2 %v8609_v14 }
0x1c4c   :  { %v6093_v46 = vsel %vm55_vm0, %v6082_v13, 0.0  ;;  %v6139_v6 = vsel %vm55_vm0, %v6128_v17, 0.0 }
0x1c4d   :  { %6053 = vperm.xlu1 %9047, %v6048_v60   ;;  %v6109_v60 = vsel %vm55_vm0, %v6101_v41, 0.0 }
0x1c4e   :  { %v6111_v63 = vadd.f32 %v6110_v9, %v6109_v60  ;;  %v8601_v9 = vor.u32 %v8988_v10, %v8600_v18  ;;  %v8592_v60 = vld [vmem:[%s13089_s10 + $0x20] sm:$0xf] }
0x1c50   :  { %v6113_v41 = vadd.f32 %v6112_v0, %v6111_v63  ;;  %6266 = vmatpush.bf16.msra.mxu2 %v8601_v9 }
0x1c51   :  { %v12232_v54 = vpop.permute.xlu0 %6046 }
0x1c52   :  { %v6106_v37 = vmul.f32 %v6067_v43, %v12232_v54 }
0x1c8e   :  { %v5935_v48 = vpop.permute.xlu2 %5934 }
0x1c8f   :  { %5937 = vst.msk [vmem:[#allocation3 + $0xc] sm:$0xf] %vm55_vm0, %v5935_v48  ;;  %v8991_v48 = vld [vmem:[%s13089_s10 + $0x54] sm:$0xf] }
0x1c90   :  { %v8621_v11 = vor.u32 %v8991_v48, %v8618_v44 }
0x1c92   :  { %6277 = vmatpush.bf16.msra.mxu3 %v8621_v11  ;;  %v6077_v11 = vld [vmem:[#allocation3 + $0x1c] sm:$0xf] }
0x1c93   :  { %v6154_v14 = vmul.f32 %v6077_v11, %v12223_v42 }
0x1c95   :  { %v6168_v40 = vsel %vm55_vm0, %v6154_v14, 0.0 }
0x1c96   :  { %v6073_v16 = vld [vmem:[#allocation3 + $0xc] sm:$0xf]  ;;  %6278 = vmatpush.bf16.msra.mxu3 %v8613_v23 }
0x1c97   :  { %v6127_v25 = vmul.f32 %v6073_v16, %v12215_v1 }
0x1c99   :  { %v6137_v27 = vsel %vm55_vm0, %v6127_v25, 0.0 }
0x1c9a   :  { %6279 = vmatpush.bf16.msra.mxu3 %v8605_v62 }
0x1ca7   :  { %v5927_v61 = vpop.permute.xlu1 %5926 }
0x1ca8   :  { %v5929_v39 = vmul.f32 %v5927_v61, %v5897_v38 }
0x1caa   :  { %v5930_v20 = vmul.f32 %v5929_v39, %v12209_v50  ;;  %v6135_v50 = vsel %vm55_vm0, %v6126_v32, 0.0  ;;  %v6084_v32 = vmul.f32 %v12255_v58, %v12221_v22 }
0x1cab   :  { %v6136_v49 = vadd.f32 %v6135_v50, %v6134_v5 }
0x1cac   :  { %5931 = vst.msk [vmem:[#allocation2 + $0xc] sm:$0xf] %vm55_vm0, %v5930_v20  ;;  %v6004_v20 = vpop.permute.xlu0 %6003 }
0x1cad   :  { %v6138_v8 = vadd.f32 %v6137_v27, %v6136_v49  ;;  %v6085_v19 = vmul.f32 %v6069_v56, %v6004_v20 }
0x1caf   :  { %v6033_v59 = vpop.permute.xlu1 %6032  ;;  %v6140_v48 = vadd.f32 %v6139_v6, %v6138_v8  ;;  %v12371_v6 = vld [vmem:[%s13090_s11] sm:$0x3] }
0x1cb0   :  { %v6150_v4 = vmul.f32 %v6073_v16, %v6033_v59  ;;  %v6075_v16 = vld [vmem:[#allocation3 + $0x14] sm:$0xf] }
0x1cb1   :  { %v6152_v15 = vmul.f32 %v6075_v16, %v12232_v54 }
0x1cb2   :  { %v6160_v35 = vsel %vm55_vm0, %v6150_v4, 0.0 }
0x1cb3   :  { %v6065_v38 = vld [vmem:[#allocation2 + $0xc] sm:$0xf]  ;;  %v6161_v61 = vadd.f32 %v6160_v35, %v6159_v53  ;;  %v6097_v53 = vsel %vm55_vm0, %v6084_v32, 0.0  ;;  %v6099_v35 = vsel %vm55_vm0, %v6085_v19, 0.0  ;;  %v6195_v19 = vperm.slane %v12371_v6, 0 }
0x1cb4   :  { %v6081_v39 = vmul.f32 %v6065_v38, %v12215_v1  ;;  %v6104_v52 = vmul.f32 %v6065_v38, %v6033_v59  ;;  %v6130_v1 = vmul.f32 %v12273_v30, %v12221_v22  ;;  %v7653_v26 = vld [vmem:[#allocation2 + $0xc] sm:$0xf]  ;;  %v8986_v22 = vld [vmem:[%s13089_s10 + $0x24] sm:$0xf0]  ;;  %v6118_v38 = vsel %vm55_vm0, %v6106_v37, 0.0 }
0x1cb5   :  { %v6163_v7 = vadd.f32 %v6162_v36, %v6161_v61  ;;  %v8594_v59 = vld [vmem:[%s13089_s10 + $0x28] sm:$0xf0]  ;;  %v8593_v45 = vor.u32 %v8986_v22, %v8592_v60  ;;  %v6164_v61 = vsel %vm55_vm0, %v6152_v15, 0.0  ;;  %v6131_v36 = vmul.f32 %v6077_v11, %v6004_v20  ;;  %v8983_v20 = vld [vmem:[%s13089_s10 + $0x14] sm:$0xf] }
0x1cb6   :  { %v6091_v12 = vsel %vm55_vm0, %v6081_v39, 0.0  ;;  %v6114_v31 = vsel %vm55_vm0, %v6104_v52, 0.0  ;;  %v8597_v49 = vor.u32 %v8985_v3, %v8594_v59 }
0x1cb7   :  { %v6092_v34 = vadd.f32 %v6091_v12, %v6090_v2  ;;  %v6115_v50 = vadd.f32 %v6114_v31, %v6113_v41  ;;  %v5990_v21 = vpop.permute.xlu1 %5989  ;;  %v7664_v2 = vsel %vm7658_vm9, %v7653_v26, 0.0  ;;  %6267 = vmatpush.bf16.msra.mxu2 %v8593_v45  ;;  %v6165_v10 = vadd.f32 %v6164_v61, %v6163_v7  ;;  %v8584_v41 = vld [vmem:[%s13089_s10 + $0x10] sm:$0xf]  ;;  %v8586_v7 = vld [vmem:[%s13089_s10 + $0x18] sm:$0xf0] }
0x1cb8   :  { %v6083_v25 = vmul.f32 %v6067_v43, %v5990_v21  ;;  %v6129_v5 = vmul.f32 %v6075_v16, %v5990_v21  ;;  %v12318_v44 = vadd.f32 %v7664_v2, %v12069_v57  ;;  %v6108_v57 = vmul.f32 %v6069_v56, %v12223_v42  ;;  %6280 = vmatpush.bf16.msra.mxu3 %v8597_v49  ;;  %v8984_v43 = vld [vmem:[%s13089_s10 + $0x14] sm:$0xf0]  ;;  %v8576_v16 = vld [vmem:[%s13089_s10] sm:$0xf]  ;;  %v8982_v12 = vld [vmem:[%s13089_s10 + $0x4] sm:$0xf0] }
0x1cb9   :  { %v6117_v33 = vadd.f32 %v6116_v51, %v6115_v50  ;;  %v6094_v29 = vadd.f32 %v6093_v46, %v6092_v34  ;;  %v6143_v51 = vsel %vm55_vm0, %v6130_v1, 0.0  ;;  %v8585_v8 = vor.u32 %v8984_v43, %v8584_v41  ;;  %v8981_v31 = vld [vmem:[%s13089_s10 + $0x4] sm:$0xf]  ;;  %v8578_v26 = vld [vmem:[%s13089_s10 + $0x8] sm:$0xf0] }
0x1cba   :  { %v6095_v28 = vsel %vm55_vm0, %v6083_v25, 0.0  ;;  %v6141_v4 = vsel %vm55_vm0, %v6129_v5, 0.0  ;;  %v6122_v55 = vsel %vm55_vm0, %v6108_v57, 0.0  ;;  %v8589_v1 = vor.u32 %v8983_v20, %v8586_v7  ;;  %v5939_v50 = vld [vmem:[#allocation4 + $0x10] sm:$0xf] }
0x1cbb   :  { %v6096_v24 = vadd.f32 %v6095_v28, %v6094_v29  ;;  %v6142_v47 = vadd.f32 %v6141_v4, %v6140_v48  ;;  %v6119_v18 = vadd.f32 %v6118_v38, %v6117_v33  ;;  %6268 = vmatpush.bf16.msra.mxu2 %v8585_v8  ;;  %v8577_v9 = vor.u32 %v8982_v12, %v8576_v16  ;;  %v12380_v28 = vld [vmem:[%s13081_s2 + $0x28] sm:$0xff]  ;;  %v9096_v61 = vld [vmem:[%s13080_s1 + $0x4] ss:$0 sm:$0xff] }
0x1cbc   :  { %6281 = vmatpush.bf16.msra.mxu3 %v8589_v1  ;;  %v8581_v46 = vor.u32 %v8981_v31, %v8578_v26  ;;  %v6384_v45 = vperm.slane %v12380_v28, 1  ;;  %v6391_v49 = vperm.slane %v12380_v28, 2  ;;  %v6377_v38 = vperm.slane %v12380_v28, 0 }
0x1cbd   :  { %v6098_v0 = vadd.f32 %v6097_v53, %v6096_v24  ;;  %v6144_v27 = vadd.f32 %v6143_v51, %v6142_v47  ;;  %v6412_v16 = vperm.slane %v12380_v28, 5  ;;  %v6196_v31 = vperm.slane %v12371_v6, 1 }
0x1cbf   :  { %v6054_v63 = vpop.permute.xlu1 %6053  ;;  %v6100_v13 = vadd.f32 %v6099_v35, %v6098_v0  ;;  %6269 = vmatpush.bf16.msra.mxu2 %v8577_v9 }
0x1cc0   :  { %v6107_v23 = vmul.f32 %v12255_v58, %v6054_v63  ;;  %v6153_v54 = vmul.f32 %v12273_v30, %v6054_v63  ;;  %v6145_v58 = vsel %vm55_vm0, %v6131_v36, 0.0  ;;  %6282 = vmatpush.bf16.msra.mxu3 %v8581_v46 }
0x1cc1   :  { %6171 = vrot.lane.b32.xlu1 %v6100_v13, %s9343_s19  ;;  %v6146_v30 = vadd.f32 %v6145_v58, %v6144_v27 }
0x1cc2   :  { %v6120_v17 = vsel %vm55_vm0, %v6107_v23, 0.0  ;;  %v6166_v42 = vsel %vm55_vm0, %v6153_v54, 0.0  ;;  %v8627_v23 = vld [vmem:[%s13082_s3 + $0x28] sm:$0xff] }
0x1cc3   :  { %v6121_v39 = vadd.f32 %v6120_v17, %v6119_v18  ;;  %v6167_v52 = vadd.f32 %v6166_v42, %v6165_v10  ;;  %v6441_v54 = vperm.slane %v8627_v23, 1  ;;  %v6434_v18 = vperm.slane %v8627_v23, 0 }
0x1cc4   :  { %v6398_v10 = vperm.slane %v12380_v28, 3  ;;  %v6448_v36 = vperm.slane %v8627_v23, 2  ;;  %v6462_v17 = vperm.slane %v8627_v23, 4  ;;  %v6405_v42 = vperm.slane %v12380_v28, 4 }
0x1cc5   :  { %v6123_v32 = vadd.f32 %v6122_v55, %v6121_v39  ;;  %v6169_v56 = vadd.f32 %v6168_v40, %v6167_v52  ;;  %v6419_v39 = vperm.slane %v12380_v28, 6  ;;  %v6469_v52 = vperm.slane %v8627_v23, 5 }
0x1cc6   :  { %v6483_v55 = vperm.slane %v8627_v23, 7  ;;  %v6426_v40 = vperm.slane %v12380_v28, 7  ;;  %v6455_v1 = vperm.slane %v8627_v23, 3  ;;  %v6476_v12 = vperm.slane %v8627_v23, 6 }
0x1cc7   :  { %6175 = vrot.lane.b32.xlu0 %v6123_v32, %s9342_s18 }
0x1cc9   :  { %6333 = vrot.lane.b32.xlu1 %v6146_v30, %s9342_s18 }
0x1ccf   :  { %6343 = vrot.lane.b32.xlu0 %v6169_v56, %s9344_s20 }
0x1d33   :  { %v6172_v34 = vpop.permute.xlu1 %6171 }
0x1d34   :  { %v6178_v21 = vsel %vm311_vm1, %v5939_v50, %v6172_v34 }
0x1d39   :  { %v6176_v62 = vpop.permute.xlu0 %6175 }
0x1d3a   :  { %v6179_v60 = vsel %vm313_vm2, %v6178_v21, %v6176_v62 }
0x1d3b   :  { %v6180_v22 = vpack.c.bf16 %v6179_v60, %v6179_v60  ;;  %v6334_v35 = vpop.permute.xlu1 %6333 }
0x1d3d   :  { %8622 = vmatmul.msk.bf16.vlgmr.msra.gmra.mxu2 %vm394_vm3, %v6180_v22  ;;  %8623 = vmatmul.msk.bf16.vlgmr.msra.gmra.mxu3 %vm394_vm3, %v6180_v22 }
0x1d41   :  { %v6344_v57 = vpop.permute.xlu0 %6343 }
0x1dc0   :  { %v6271_v25 = vpop.f32.mrf.mxu2  ;;  %v12374_v5 = vpop.f32.mrf.mxu3 }
0x1dc1   :  { %v6272_v3 = vadd.f32 %v6271_v25, %v6195_v19  ;;  %v6285_v9 = vadd.f32 %v12374_v5, %v6196_v31 }
0x1dc3   :  { %9262 = vtanh.f32 %v6272_v3  ;;  %v8624_v59 = vmul.f32 -1.442695, %v6272_v3  ;;  %v8625_v26 = vmul.f32 -1.442695, %v6285_v9 }
0x1dc5   :  { %9264 = vpow2.f32 %v8624_v59 }
0x1dc8   :  { %v6273_v33 = vpop.f32.mrf.mxu2  ;;  %v6286_v29 = vpop.f32.mrf.mxu3 }
0x1dc9   :  { %v9263_v48 = vpop.eup %9262 }
0x1dca   :  { %6328 = vrot.lane.b32.xlu2 %v9263_v48, %s9343_s19 }
0x1dcb   :  { %v9265_v2 = vpop.eup %9264 }
0x1dcc   :  { %v6292_v4 = vadd.f32 1.0, %v9265_v2 }
0x1dce   :  { %9266 = vrcp.f32 %v6292_v4  ;;  %v6304_v51 = vand.u32 2147483648, %v6292_v4  ;;  %v6302_v37 = vand.u32 2147483647, %v6292_v4  ;;  %vm6298_vm10 = vweird.f32 %v6292_v4 }
0x1dd0   :  { %v6305_v0 = vor.u32 1.1754944e-38, %v6304_v51  ;;  %vm6303_vm5 = vcmp.eq.f32.partialorder %v6302_v37, 8.507059e+37  ;;  %v6491_v37 = vld [vmem:[#allocation2 + $0x4] sm:$0xf] }
0x1dd2   :  { %6389 = vperm.xlu2 %9048, %v6384_v45  }
0x1dd4   :  { %v9267_v24 = vpop.eup %9266 }
0x1dd5   :  { %v6294_v47 = vmul.f32 %v9267_v24, %v6292_v4  ;;  %vm6299_vm4 = vweird.f32 %v9267_v24 }
0x1dd6   :  { %vm6300_vm8 = vmor %vm6298_vm10, %vm6299_vm4 }
0x1dd7   :  { %v6295_v53 = vsub.f32 1.0, %v6294_v47 }
0x1dd9   :  { %v6296_v11 = vmul.f32 %v9267_v24, %v6295_v53  ;;  %v6490_v53 = vld [vmem:[#allocation2] sm:$0xf] }
0x1dda   :  { %6396 = vperm.xlu2 %9048, %v6391_v49  }
0x1ddb   :  { %v6297_v15 = vadd.f32 %v9267_v24, %v6296_v11 }
0x1ddd   :  { %v6301_v27 = vsel %vm6300_vm8, %v9267_v24, %v6297_v15 }
0x1dde   :  { %v6306_v14 = vsel %vm6303_vm5, %v6305_v0, %v6301_v27 }
0x1ddf   :  { %v6346_v63 = vmul.f32 %v6344_v57, %v6306_v14  ;;  %v6336_v13 = vmul.f32 %v6334_v35, %v6306_v14  ;;  %v6492_v35 = vld [vmem:[#allocation2 + $0x8] sm:$0xf] }
0x1de1   :  { %6348 = vrot.lane.b32.xlu0 %v6346_v63, %s9342_s18  ;;  %6338 = vrot.lane.b32.xlu1 %v6336_v13, %s9344_s20  ;;  %v6493_v13 = vld [vmem:[#allocation2 + $0xc] sm:$0xf] }
0x1de9   :  { %6382 = vperm.xlu0 %9046, %v6377_v38   ;;  %5946 = vperm.xlu1 %9047, %v9096_v61  }
0x1df1   :  { %6446 = vperm.xlu0 %9046, %v6441_v54   ;;  %6439 = vperm.xlu1 %9047, %v6434_v18  }
0x1df9   :  { %6403 = vperm.xlu0 %9046, %v6398_v10   ;;  %6453 = vperm.xlu1 %9047, %v6448_v36  }
0x1e01   :  { %6467 = vperm.xlu0 %9046, %v6462_v17   ;;  %6410 = vperm.xlu1 %9047, %v6405_v42  }
0x1e09   :  { %6424 = vperm.xlu0 %9046, %v6419_v39   ;;  %6474 = vperm.xlu1 %9047, %v6469_v52  }
0x1e11   :  { %6488 = vperm.xlu0 %9046, %v6483_v55   ;;  %6431 = vperm.xlu1 %9047, %v6426_v40  }
0x1e24   :  { %v6329_v32 = vpop.permute.xlu2 %6328 }
0x1e25   :  { %v6331_v56 = vmul.f32 %v6329_v32, %v6306_v14 }
0x1e2c   :  { %v12408_v19 = vpop.permute.xlu2 %6389 }
0x1e2d   :  { %v6507_v15 = vmul.f32 %v6491_v37, %v12408_v19 }
0x1e2f   :  { %v6515_v61 = vsel %vm55_vm0, %v6507_v15, 0.0 }
0x1e34   :  { %v12414_v59 = vpop.permute.xlu2 %6396 }
0x1e35   :  { %v6508_v14 = vmul.f32 %v6492_v35, %v12414_v59 }
0x1e37   :  { %v6517_v36 = vsel %vm55_vm0, %v6508_v14, 0.0 }
0x1e53   :  { %v6339_v58 = vpop.permute.xlu1 %6338  ;;  %v6349_v41 = vpop.permute.xlu0 %6348 }
0x1e54   :  { %v6341_v30 = vadd.f32 %v6339_v58, %v6331_v56  ;;  %v6496_v58 = vld [vmem:[#allocation2 + $0x18] sm:$0xf] }
0x1e56   :  { %v6351_v43 = vadd.f32 %v6349_v41, %v6341_v30 }
0x1e58   :  { %9268 = vtanh.f32 %v6351_v43 }
0x1e59   :  { %9270 = vpow2.f32 %v8625_v26 }
0x1e5b   :  { %v5947_v20 = vpop.permute.xlu1 %5946  ;;  %v12402_v34 = vpop.permute.xlu0 %6382 }
0x1e5c   :  { %v6360_v8 = vmul.f32 %v6351_v43, %v5947_v20  ;;  %v6506_v51 = vmul.f32 %v6490_v53, %v12402_v34 }
0x1e5e   :  { %v9269_v7 = vpop.eup %9268  ;;  %6362 = vrot.lane.b32.xlu0 %v6360_v8, %s9344_s20  ;;  %v6514_v57 = vsel %vm55_vm0, %v6506_v51, 0.0 }
0x1e5f   :  { %6354 = vrot.lane.b32.xlu2 %v9269_v7, %s9344_s20  ;;  %v9271_v46 = vpop.eup %9270  ;;  %v6516_v18 = vadd.f32 %v6515_v61, %v6514_v57 }
0x1e60   :  { %v6311_v50 = vadd.f32 1.0, %v9271_v46 }
0x1e61   :  { %v6518_v56 = vadd.f32 %v6517_v36, %v6516_v18 }
0x1e62   :  { %9272 = vrcp.f32 %v6311_v50  ;;  %v6323_v29 = vand.u32 2147483648, %v6311_v50  ;;  %vm6317_vm7 = vweird.f32 %v6311_v50  ;;  %v6321_v2 = vand.u32 2147483647, %v6311_v50 }
0x1e63   :  { %v12404_v21 = vpop.permute.xlu0 %6446  ;;  %v12406_v62 = vpop.permute.xlu1 %6439 }
0x1e64   :  { %v6324_v45 = vor.u32 1.1754944e-38, %v6323_v29  ;;  %vm6322_vm12 = vcmp.eq.f32.partialorder %v6321_v2, 8.507059e+37  ;;  %v6530_v63 = vmul.f32 %v6491_v37, %v12404_v21  ;;  %v6529_v23 = vmul.f32 %v6490_v53, %v12406_v62  ;;  %v6498_v29 = vld [vmem:[#allocation3] sm:$0xf] }
0x1e66   :  { %v6538_v17 = vsel %vm55_vm0, %v6530_v63, 0.0  ;;  %v6537_v39 = vsel %vm55_vm0, %v6529_v23, 0.0  ;;  %v6501_v23 = vld [vmem:[#allocation3 + $0xc] sm:$0xf] }
0x1e67   :  { %6460 = vperm.xlu2 %9048, %v6455_v1   ;;  %v6539_v7 = vadd.f32 %v6538_v17, %v6537_v39 }
0x1e68   :  { %v9273_v60 = vpop.eup %9272 }
0x1e69   :  { %v6313_v22 = vmul.f32 %v9273_v60, %v6311_v50  ;;  %vm6318_vm6 = vweird.f32 %v9273_v60 }
0x1e6a   :  { %vm6319_vm11 = vmor %vm6317_vm7, %vm6318_vm6 }
0x1e6b   :  { %v12410_v25 = vpop.permute.xlu0 %6403  ;;  %v6314_v6 = vsub.f32 1.0, %v6313_v22  ;;  %v12412_v3 = vpop.permute.xlu1 %6453  ;;  %v6499_v22 = vld [vmem:[#allocation3 + $0x4] sm:$0xf] }
0x1e6c   :  { %v6509_v54 = vmul.f32 %v6493_v13, %v12410_v25  ;;  %v6531_v10 = vmul.f32 %v6492_v35, %v12412_v3  ;;  %v6500_v35 = vld [vmem:[#allocation3 + $0x8] sm:$0xf] }
0x1e6d   :  { %v6315_v5 = vmul.f32 %v9273_v60, %v6314_v6 }
0x1e6e   :  { %v6519_v52 = vsel %vm55_vm0, %v6509_v54, 0.0  ;;  %v6540_v41 = vsel %vm55_vm0, %v6531_v10, 0.0 }
0x1e6f   :  { %6417 = vperm.xlu2 %9048, %v6412_v16   ;;  %v6316_v33 = vadd.f32 %v9273_v60, %v6315_v5  ;;  %v6520_v1 = vadd.f32 %v6519_v52, %v6518_v56  ;;  %v6495_v16 = vld [vmem:[#allocation2 + $0x14] sm:$0xf]  ;;  %v6541_v6 = vadd.f32 %v6540_v41, %v6539_v7 }
0x1e71   :  { %v6320_v4 = vsel %vm6319_vm11, %v9273_v60, %v6316_v33  ;;  %v6553_v33 = vmul.f32 %v6499_v22, %v12408_v19 }
0x1e72   :  { %v6325_v24 = vsel %vm6322_vm12, %v6324_v45, %v6320_v4 }
0x1e73   :  { %v12416_v48 = vpop.permute.xlu0 %6467  ;;  %v12418_v28 = vpop.permute.xlu1 %6410  ;;  %v6561_v15 = vsel %vm55_vm0, %v6553_v33, 0.0 }
0x1e77   :  { %6481 = vperm.xlu2 %9048, %v6476_v12   ;;  %v6497_v12 = vld [vmem:[#allocation2 + $0x1c] sm:$0xf] }
0x1e7b   :  { %v12422_v0 = vpop.permute.xlu0 %6424  ;;  %v12425_v27 = vpop.permute.xlu1 %6474 }
0x1e7c   :  { %v6512_v46 = vmul.f32 %v6496_v58, %v12422_v0  ;;  %v6534_v51 = vmul.f32 %v6495_v16, %v12425_v27 }
0x1e7e   :  { %v6525_v53 = vsel %vm55_vm0, %v6512_v46, 0.0  ;;  %v6546_v54 = vsel %vm55_vm0, %v6534_v51, 0.0 }
0x1e83   :  { %v12444_v43 = vpop.permute.xlu0 %6488  ;;  %v12448_v31 = vpop.permute.xlu1 %6431 }
0x1e84   :  { %v6513_v2 = vmul.f32 %v6497_v12, %v12448_v31  ;;  %v6536_v18 = vmul.f32 %v6497_v12, %v12444_v43 }
0x1e86   :  { %v6527_v57 = vsel %vm55_vm0, %v6513_v2, 0.0  ;;  %v6550_v56 = vsel %vm55_vm0, %v6536_v18, 0.0 }
0x1eb9   :  { %v6355_v47 = vpop.permute.xlu2 %6354 }
0x1eba   :  { %v6357_v49 = vmul.f32 %v6355_v47, %v6325_v24 }
0x1ebc   :  { %v6358_v11 = vmul.f32 %v6357_v49, %v5947_v20  ;;  %v6576_v49 = vmul.f32 %v6499_v22, %v12404_v21  ;;  %v6577_v21 = vmul.f32 %v6500_v35, %v12412_v3 }
0x1ebe   :  { %6359 = vst.msk [vmem:[#allocation2 + $0x10] sm:$0xf] %vm55_vm0, %v6358_v11  ;;  %v6575_v11 = vmul.f32 %v6498_v29, %v12406_v62  ;;  %v6584_v62 = vsel %vm55_vm0, %v6576_v49, 0.0  ;;  %v6586_v52 = vsel %vm55_vm0, %v6577_v21, 0.0  ;;  %v8664_v21 = vld [vmem:[%s13089_s10 + $0x48] sm:$0xf0] }
0x1ec0   :  { %v6583_v36 = vsel %vm55_vm0, %v6575_v11, 0.0 }
0x1ec1   :  { %v12430_v38 = vpop.permute.xlu2 %6460 }
0x1ec2   :  { %v6532_v55 = vmul.f32 %v6493_v13, %v12430_v38  ;;  %v6578_v17 = vmul.f32 %v6501_v23, %v12430_v38 }
0x1ec4   :  { %v6542_v50 = vsel %vm55_vm0, %v6532_v55, 0.0 }
0x1ec5   :  { %v6494_v42 = vld [vmem:[#allocation2 + $0x10] sm:$0xf]  ;;  %v6543_v24 = vadd.f32 %v6542_v50, %v6541_v6 }
0x1ec6   :  { %v6510_v40 = vmul.f32 %v6494_v42, %v12418_v28  ;;  %v7654_v32 = vld [vmem:[#allocation2 + $0x10] sm:$0xf]  ;;  %v6533_v20 = vmul.f32 %v6494_v42, %v12416_v48 }
0x1ec7   :  { %v7666_v30 = vsel %vm7658_vm9, %v7654_v32, 0.0  ;;  %v6503_v32 = vld [vmem:[#allocation3 + $0x14] sm:$0xf] }
0x1ec8   :  { %v6521_v8 = vsel %vm55_vm0, %v6510_v40, 0.0  ;;  %v12451_v26 = vadd.f32 %v7666_v30, %v12318_v44  ;;  %v6544_v4 = vsel %vm55_vm0, %v6533_v20, 0.0  ;;  %v6552_v44 = vmul.f32 %v6498_v29, %v12402_v34 }
0x1ec9   :  { %v6418_v9 = vpop.permute.xlu2 %6417  ;;  %v6522_v5 = vadd.f32 %v6521_v8, %v6520_v1  ;;  %v6545_v19 = vadd.f32 %v6544_v4, %v6543_v24  ;;  %v6554_v34 = vmul.f32 %v6500_v35, %v12414_v59  ;;  %v6555_v59 = vmul.f32 %v6501_v23, %v12410_v25  ;;  %v6504_v8 = vld [vmem:[#allocation3 + $0x18] sm:$0xf]  ;;  %v8672_v35 = vld [vmem:[%s13089_s10 + $0x58] sm:$0xf0] }
0x1eca   :  { %v6511_v60 = vmul.f32 %v6495_v16, %v6418_v9  ;;  %v6560_v63 = vsel %vm55_vm0, %v6552_v44, 0.0  ;;  %v6585_v40 = vadd.f32 %v6584_v62, %v6583_v36  ;;  %v6588_v25 = vsel %vm55_vm0, %v6578_v17, 0.0  ;;  %v8654_v62 = vld [vmem:[%s13089_s10 + $0x30] sm:$0xf]  ;;  %v9000_v23 = vld [vmem:[%s13089_s10 + $0x34] sm:$0xf0] }
0x1ecb   :  { %v6547_v42 = vadd.f32 %v6546_v54, %v6545_v19  ;;  %v6562_v3 = vadd.f32 %v6561_v15, %v6560_v63  ;;  %v6565_v30 = vsel %vm55_vm0, %v6555_v59, 0.0  ;;  %v6580_v1 = vmul.f32 %v6503_v32, %v12425_v27  ;;  %v9001_v63 = vld [vmem:[%s13089_s10 + $0x44] sm:$0xf]  ;;  %v8999_v54 = vld [vmem:[%s13089_s10 + $0x34] sm:$0xf] }
0x1ecc   :  { %v6523_v45 = vsel %vm55_vm0, %v6511_v60, 0.0  ;;  %v6587_v20 = vadd.f32 %v6586_v52, %v6585_v40  ;;  %v6557_v16 = vmul.f32 %v6503_v32, %v6418_v9  ;;  %v6505_v60 = vld [vmem:[#allocation3 + $0x1c] sm:$0xf]  ;;  %v6558_v6 = vmul.f32 %v6504_v8, %v12422_v0  ;;  %v8646_v36 = vld [vmem:[%s13089_s10 + $0x20] sm:$0xf] }
0x1ecd   :  { %v6524_v47 = vadd.f32 %v6523_v45, %v6522_v5  ;;  %v6592_v27 = vsel %vm55_vm0, %v6580_v1, 0.0  ;;  %v8655_v18 = vor.u32 %v9000_v23, %v8654_v62  ;;  %v8998_v59 = vld [vmem:[%s13089_s10 + $0x24] sm:$0xf0]  ;;  %v8996_v40 = vld [vmem:[%s13089_s10 + $0x14] sm:$0xf0] }
0x1ece   :  { %v6589_v22 = vadd.f32 %v6588_v25, %v6587_v20  ;;  %v6569_v9 = vsel %vm55_vm0, %v6557_v16, 0.0  ;;  %v6571_v24 = vsel %vm55_vm0, %v6558_v6, 0.0  ;;  %v8995_v32 = vld [vmem:[%s13089_s10 + $0x14] sm:$0xf]  ;;  %v8630_v25 = vld [vmem:[%s13089_s10] sm:$0xf] }
0x1ecf   :  { %v6526_v37 = vadd.f32 %v6525_v53, %v6524_v47  ;;  %v6367_v16 = vld [vmem:[#allocation4 + $0x14] sm:$0xf] }
0x1ed0   :  { %v6363_v14 = vpop.permute.xlu0 %6362 }
0x1ed1   :  { %6365 = vst.msk [vmem:[#allocation3 + $0x10] sm:$0xf] %vm55_vm0, %v6363_v14  ;;  %v6482_v13 = vpop.permute.xlu2 %6481  ;;  %v6528_v61 = vadd.f32 %v6527_v57, %v6526_v37  ;;  %v9003_v37 = vld [vmem:[%s13089_s10 + $0x54] sm:$0xf]  ;;  %v8662_v57 = vld [vmem:[%s13089_s10 + $0x40] sm:$0xf] }
0x1ed2   :  { %v6535_v10 = vmul.f32 %v6496_v58, %v6482_v13  ;;  %v6563_v58 = vsel %vm55_vm0, %v6554_v34, 0.0  ;;  %v6581_v5 = vmul.f32 %v6504_v8, %v6482_v13  ;;  %v9002_v14 = vld [vmem:[%s13089_s10 + $0x44] sm:$0xf0]  ;;  %v8675_v34 = vor.u32 %v9003_v37, %v8672_v35  ;;  %v8632_v8 = vld [vmem:[%s13089_s10 + $0x8] sm:$0xf0] }
0x1ed3   :  { %6599 = vrot.lane.b32.xlu2 %v6528_v61, %s9343_s19  ;;  %v6564_v41 = vadd.f32 %v6563_v58, %v6562_v3  ;;  %v8663_v13 = vor.u32 %v9002_v14, %v8662_v57  ;;  %v8667_v61 = vor.u32 %v9001_v63, %v8664_v21  ;;  %v8648_v3 = vld [vmem:[%s13089_s10 + $0x28] sm:$0xf0]  ;;  %v9097_v21 = vld [vmem:[%s13080_s1 + $0x5] ss:$0 sm:$0xff] }
0x1ed4   :  { %v6548_v39 = vsel %vm55_vm0, %v6535_v10, 0.0  ;;  %v6594_v0 = vsel %vm55_vm0, %v6581_v5, 0.0  ;;  %6705 = vmatpush.bf16.msrb.mxu1 %v8675_v34  ;;  %v8656_v10 = vld [vmem:[%s13089_s10 + $0x38] sm:$0xf0] }
0x1ed5   :  { %v6549_v55 = vadd.f32 %v6548_v39, %v6547_v42  ;;  %v6566_v50 = vadd.f32 %v6565_v30, %v6564_v41  ;;  %v8659_v17 = vor.u32 %v8999_v54, %v8656_v10  ;;  %v8997_v42 = vld [vmem:[%s13089_s10 + $0x24] sm:$0xf]  ;;  %v8647_v39 = vor.u32 %v8998_v59, %v8646_v36 }
0x1ed6   :  { %v8651_v52 = vor.u32 %v8997_v42, %v8648_v3  ;;  %v8993_v41 = vld [vmem:[%s13089_s10 + $0x4] sm:$0xf] }
0x1ed7   :  { %v6551_v38 = vadd.f32 %v6550_v56, %v6549_v55  ;;  %v8638_v55 = vld [vmem:[%s13089_s10 + $0x10] sm:$0xf]  ;;  %v8640_v56 = vld [vmem:[%s13089_s10 + $0x18] sm:$0xf0] }
0x1ed8   :  { %v6502_v7 = vld [vmem:[#allocation3 + $0x10] sm:$0xf]  ;;  %6706 = vmatpush.bf16.msrb.mxu1 %v8667_v61  ;;  %v8639_v58 = vor.u32 %v8996_v40, %v8638_v55  ;;  %v8643_v30 = vor.u32 %v8995_v32, %v8640_v56 }
0x1ed9   :  { %v6556_v12 = vmul.f32 %v6502_v7, %v12418_v28  ;;  %v6579_v46 = vmul.f32 %v6502_v7, %v12416_v48  ;;  %6603 = vrot.lane.b32.xlu1 %v6551_v38, %s9342_s18  ;;  %v6582_v28 = vmul.f32 %v6505_v60, %v12444_v43  ;;  %v6559_v48 = vmul.f32 %v6505_v60, %v12448_v31  ;;  %v8670_v43 = vld [vmem:[%s13089_s10 + $0x50] sm:$0xf]  ;;  %v9004_v31 = vld [vmem:[%s13089_s10 + $0x54] sm:$0xf0]  ;;  %v8994_v38 = vld [vmem:[%s13089_s10 + $0x4] sm:$0xf0] }
0x1eda   :  { %v8671_v15 = vor.u32 %v9004_v31, %v8670_v43  ;;  %v8631_v20 = vor.u32 %v8994_v38, %v8630_v25  ;;  %v8635_v7 = vor.u32 %v8993_v41, %v8632_v8  ;;  %v8681_v43 = vld [vmem:[%s13082_s3 + $0x30] sm:$0xff] }
0x1edb   :  { %v6590_v33 = vsel %vm55_vm0, %v6579_v46, 0.0  ;;  %v6567_v29 = vsel %vm55_vm0, %v6556_v12, 0.0  ;;  %v6596_v53 = vsel %vm55_vm0, %v6582_v28, 0.0  ;;  %v6573_v51 = vsel %vm55_vm0, %v6559_v48, 0.0 }
0x1edc   :  { %v6591_v2 = vadd.f32 %v6590_v33, %v6589_v22  ;;  %v6568_v4 = vadd.f32 %v6567_v29, %v6566_v50  ;;  %6692 = vmatpush.bf16.msra.mxu0 %v8671_v15  ;;  %6707 = vmatpush.bf16.msrb.mxu1 %v8659_v17  ;;  %v12579_v22 = vld [vmem:[%s13090_s11] sm:$0x3]  ;;  %v6883_v14 = vperm.slane %v8681_v43, 3  ;;  %v6862_v61 = vperm.slane %v8681_v43, 0 }
0x1edd   :  { %v6623_v6 = vperm.slane %v12579_v22, 0  ;;  %v6869_v62 = vperm.slane %v8681_v43, 1  ;;  %v6876_v23 = vperm.slane %v8681_v43, 2  ;;  %v6890_v10 = vperm.slane %v8681_v43, 4 }
0x1ede   :  { %v6593_v45 = vadd.f32 %v6592_v27, %v6591_v2  ;;  %v6570_v44 = vadd.f32 %v6569_v9, %v6568_v4  ;;  %v12588_v9 = vld [vmem:[%s13081_s2 + $0x30] sm:$0xff]  ;;  %v6897_v36 = vperm.slane %v8681_v43, 5  ;;  %v6911_v42 = vperm.slane %v8681_v43, 7 }
0x1edf   :  { %v6826_v54 = vperm.slane %v12588_v9, 3  ;;  %v6847_v59 = vperm.slane %v12588_v9, 6  ;;  %v6854_v17 = vperm.slane %v12588_v9, 7  ;;  %v6840_v25 = vperm.slane %v12588_v9, 5 }
0x1ee0   :  { %v6595_v47 = vadd.f32 %v6594_v0, %v6593_v45  ;;  %v6572_v49 = vadd.f32 %v6571_v24, %v6570_v44  ;;  %6693 = vmatpush.bf16.msra.mxu0 %v8663_v13  ;;  %6708 = vmatpush.bf16.msrb.mxu1 %v8651_v52  ;;  %v6812_v44 = vperm.slane %v12588_v9, 1  ;;  %v6805_v13 = vperm.slane %v12588_v9, 0 }
0x1ee1   :  { %v6904_v38 = vperm.slane %v8681_v43, 6 }
0x1ee2   :  { %v6597_v11 = vadd.f32 %v6596_v53, %v6595_v47  ;;  %v6574_v19 = vadd.f32 %v6573_v51, %v6572_v49  ;;  %v6819_v47 = vperm.slane %v12588_v9, 2 }
0x1ee4   :  { %6771 = vrot.lane.b32.xlu1 %v6597_v11, %s9344_s20  ;;  %6761 = vrot.lane.b32.xlu2 %v6574_v19, %s9342_s18 }
0x1ee5   :  { %6694 = vmatpush.bf16.msra.mxu0 %v8655_v18  ;;  %6709 = vmatpush.bf16.msrb.mxu1 %v8643_v30  ;;  %v6833_v18 = vperm.slane %v12588_v9, 4 }
0x1ee9   :  { %6695 = vmatpush.bf16.msra.mxu0 %v8647_v39  ;;  %6710 = vmatpush.bf16.msrb.mxu1 %v8635_v7 }
0x1eed   :  { %6696 = vmatpush.bf16.msra.mxu0 %v8639_v58 }
0x1ef1   :  { %6697 = vmatpush.bf16.msra.mxu0 %v8631_v20  ;;  %v6624_v20 = vperm.slane %v12579_v22, 1 }
0x1f2d   :  { %v6600_v1 = vpop.permute.xlu2 %6599 }
0x1f2e   :  { %v6606_v12 = vsel %vm311_vm1, %v6367_v16, %v6600_v1 }
0x1f3e   :  { %v6762_v15 = vpop.permute.xlu2 %6761 }
0x1f4b   :  { %v6604_v46 = vpop.permute.xlu1 %6603 }
0x1f4c   :  { %v6607_v50 = vsel %vm313_vm2, %v6606_v12, %v6604_v46 }
0x1f4d   :  { %v6608_v60 = vpack.c.bf16 %v6607_v50, %v6607_v50 }
0x1f4f   :  { %8676 = vmatmul.msk.bf16.vlgmr.msra.gmra.mxu0 %vm394_vm3, %v6608_v60  ;;  %8677 = vmatmul.msk.bf16.vlgmr.msrb.gmra.mxu1 %vm394_vm3, %v6608_v60 }
0x1f56   :  { %v6772_v35 = vpop.permute.xlu1 %6771 }
0x1fcc   :  { %v6699_v5 = vpop.f32.mrf.mxu0  ;;  %v12582_v33 = vpop.f32.mrf.mxu1 }
0x1fcd   :  { %v6700_v29 = vadd.f32 %v6699_v5, %v6623_v6  ;;  %v6713_v7 = vadd.f32 %v12582_v33, %v6624_v20 }
0x1fcf   :  { %9274 = vtanh.f32 %v6700_v29  ;;  %v8678_v2 = vmul.f32 -1.442695, %v6700_v29  ;;  %v8679_v1 = vmul.f32 -1.442695, %v6713_v7 }
0x1fd1   :  { %9276 = vpow2.f32 %v8678_v2 }
0x1fd4   :  { %v6701_v4 = vpop.f32.mrf.mxu0  ;;  %v6714_v27 = vpop.f32.mrf.mxu1 }
0x1fd5   :  { %v9275_v28 = vpop.eup %9274 }
0x1fd6   :  { %6756 = vrot.lane.b32.xlu0 %v9275_v28, %s9343_s19 }
0x1fd7   :  { %v9277_v48 = vpop.eup %9276 }
0x1fd8   :  { %v6720_v45 = vadd.f32 1.0, %v9277_v48 }
0x1fda   :  { %9278 = vrcp.f32 %v6720_v45  ;;  %v6732_v53 = vand.u32 2147483648, %v6720_v45  ;;  %v6730_v11 = vand.u32 2147483647, %v6720_v45  ;;  %vm6726_vm14 = vweird.f32 %v6720_v45 }
0x1fdc   :  { %v6733_v31 = vor.u32 1.1754944e-38, %v6732_v53  ;;  %vm6731_vm4 = vcmp.eq.f32.partialorder %v6730_v11, 8.507059e+37  ;;  %v6919_v53 = vld [vmem:[#allocation2 + $0x4] sm:$0xf] }
0x1fde   :  { %6817 = vperm.xlu0 %9046, %v6812_v44  }
0x1fe0   :  { %v9279_v24 = vpop.eup %9278 }
0x1fe1   :  { %v6722_v0 = vmul.f32 %v9279_v24, %v6720_v45  ;;  %vm6727_vm13 = vweird.f32 %v9279_v24 }
0x1fe2   :  { %vm6728_vm15 = vmor %vm6726_vm14, %vm6727_vm13 }
0x1fe3   :  { %v6723_v49 = vsub.f32 1.0, %v6722_v0 }
0x1fe5   :  { %v6724_v51 = vmul.f32 %v9279_v24, %v6723_v49 }
0x1fe6   :  { %6824 = vperm.xlu0 %9046, %v6819_v47   ;;  %v6918_v47 = vld [vmem:[#allocation2] sm:$0xf] }
0x1fe7   :  { %v6725_v19 = vadd.f32 %v9279_v24, %v6724_v51 }
0x1fe9   :  { %v6729_v37 = vsel %vm6728_vm15, %v9279_v24, %v6725_v19  ;;  %v6927_v19 = vld [vmem:[#allocation3 + $0x4] sm:$0xf] }
0x1fea   :  { %v6734_v57 = vsel %vm6731_vm4, %v6733_v31, %v6729_v37 }
0x1feb   :  { %v6764_v34 = vmul.f32 %v6762_v15, %v6734_v57  ;;  %v6774_v63 = vmul.f32 %v6772_v35, %v6734_v57  ;;  %v6926_v15 = vld [vmem:[#allocation3] sm:$0xf]  ;;  %v6920_v35 = vld [vmem:[#allocation2 + $0x8] sm:$0xf] }
0x1fed   :  { %6766 = vrot.lane.b32.xlu2 %v6764_v34, %s9344_s20  ;;  %6776 = vrot.lane.b32.xlu1 %v6774_v63, %s9342_s18 }
0x1fee   :  { %6888 = vperm.xlu0 %9046, %v6883_v14  }
0x1ff5   :  { %6374 = vperm.xlu2 %9048, %v9097_v21   ;;  %6810 = vperm.xlu1 %9047, %v6805_v13  }
0x1ffd   :  { %6867 = vperm.xlu2 %9048, %v6862_v61   ;;  %6874 = vperm.xlu1 %9047, %v6869_v62  }
0x2005   :  { %6881 = vperm.xlu2 %9048, %v6876_v23   ;;  %6831 = vperm.xlu1 %9047, %v6826_v54  }
0x200d   :  { %6838 = vperm.xlu2 %9048, %v6833_v18   ;;  %6895 = vperm.xlu1 %9047, %v6890_v10  }
0x2015   :  { %6902 = vperm.xlu2 %9048, %v6897_v36   ;;  %6852 = vperm.xlu1 %9047, %v6847_v59   ;;  %v6921_v36 = vld [vmem:[#allocation2 + $0xc] sm:$0xf] }
0x201d   :  { %6859 = vperm.xlu2 %9048, %v6854_v17   ;;  %6916 = vperm.xlu1 %9047, %v6911_v42   ;;  %v6928_v17 = vld [vmem:[#allocation3 + $0x8] sm:$0xf] }
0x2047   :  { %v6767_v3 = vpop.permute.xlu2 %6766 }
0x2048   :  { %v6757_v39 = vpop.permute.xlu0 %6756 }
0x2049   :  { %v6759_v52 = vmul.f32 %v6757_v39, %v6734_v57 }
0x204b   :  { %v6769_v55 = vadd.f32 %v6767_v3, %v6759_v52 }
0x204f   :  { %v12605_v56 = vpop.permute.xlu2 %6374 }
0x2050   :  { %v6818_v6 = vpop.permute.xlu0 %6817 }
0x2051   :  { %v6935_v43 = vmul.f32 %v6919_v53, %v6818_v6  ;;  %v6981_v37 = vmul.f32 %v6927_v19, %v6818_v6 }
0x2053   :  { %v6943_v10 = vsel %vm55_vm0, %v6935_v43, 0.0  ;;  %v6989_v59 = vsel %vm55_vm0, %v6981_v37, 0.0 }
0x2057   :  { %v6868_v60 = vpop.permute.xlu2 %6867 }
0x2058   :  { %v6825_v22 = vpop.permute.xlu0 %6824  ;;  %v6957_v14 = vmul.f32 %v6918_v47, %v6868_v60  ;;  %v7003_v34 = vmul.f32 %v6926_v15, %v6868_v60 }
0x2059   :  { %v6936_v63 = vmul.f32 %v6920_v35, %v6825_v22 }
0x205a   :  { %v6965_v52 = vsel %vm55_vm0, %v6957_v14, 0.0 }
0x205f   :  { %v6777_v40 = vpop.permute.xlu1 %6776  ;;  %v6882_v2 = vpop.permute.xlu2 %6881 }
0x2060   :  { %v6779_v32 = vadd.f32 %v6777_v40, %v6769_v55  ;;  %v6889_v9 = vpop.permute.xlu0 %6888  ;;  %v7011_v55 = vsel %vm55_vm0, %v7003_v34, 0.0  ;;  %v6982_v40 = vmul.f32 %v6928_v17, %v6825_v22  ;;  %v7005_v20 = vmul.f32 %v6928_v17, %v6882_v2 }
0x2062   :  { %9280 = vtanh.f32 %v6779_v32  ;;  %v6788_v58 = vmul.f32 %v6779_v32, %v12605_v56  ;;  %v6929_v32 = vld [vmem:[#allocation3 + $0xc] sm:$0xf] }
0x2063   :  { %9282 = vpow2.f32 %v8679_v1  ;;  %v7006_v7 = vmul.f32 %v6929_v32, %v6889_v9  ;;  %v6930_v1 = vld [vmem:[#allocation3 + $0x10] sm:$0xf] }
0x2064   :  { %6790 = vrot.lane.b32.xlu1 %v6788_v58, %s9344_s20 }
0x2065   :  { %v7016_v49 = vsel %vm55_vm0, %v7006_v7, 0.0 }
0x2067   :  { %v6811_v41 = vpop.permute.xlu1 %6810  ;;  %v6839_v48 = vpop.permute.xlu2 %6838 }
0x2068   :  { %v9281_v30 = vpop.eup %9280  ;;  %v6934_v51 = vmul.f32 %v6918_v47, %v6811_v41  ;;  %v6980_v62 = vmul.f32 %v6926_v15, %v6811_v41  ;;  %v6984_v60 = vmul.f32 %v6930_v1, %v6839_v48 }
0x2069   :  { %6782 = vrot.lane.b32.xlu0 %v9281_v30, %s9344_s20  ;;  %v9283_v12 = vpop.eup %9282  ;;  %v6945_v30 = vsel %vm55_vm0, %v6936_v63, 0.0 }
0x206a   :  { %v6739_v50 = vadd.f32 1.0, %v9283_v12  ;;  %v6942_v61 = vsel %vm55_vm0, %v6934_v51, 0.0  ;;  %v6925_v51 = vld [vmem:[#allocation2 + $0x1c] sm:$0xf] }
0x206b   :  { %v6944_v58 = vadd.f32 %v6943_v10, %v6942_v61 }
0x206c   :  { %9284 = vrcp.f32 %v6739_v50  ;;  %v6751_v44 = vand.u32 2147483648, %v6739_v50  ;;  %vm6745_vm8 = vweird.f32 %v6739_v50  ;;  %v6749_v0 = vand.u32 2147483647, %v6739_v50 }
0x206e   :  { %v6752_v31 = vor.u32 1.1754944e-38, %v6751_v44  ;;  %vm6750_vm6 = vcmp.eq.f32.partialorder %v6749_v0, 8.507059e+37 }
0x206f   :  { %v6875_v8 = vpop.permute.xlu1 %6874  ;;  %v12629_v23 = vpop.permute.xlu2 %6902 }
0x2070   :  { %v6958_v57 = vmul.f32 %v6919_v53, %v6875_v8  ;;  %v7004_v54 = vmul.f32 %v6927_v19, %v6875_v8  ;;  %v6960_v8 = vmul.f32 %v6921_v36, %v6889_v9  ;;  %v6924_v9 = vld [vmem:[#allocation2 + $0x18] sm:$0xf]  ;;  %v6995_v53 = vsel %vm55_vm0, %v6984_v60, 0.0 }
0x2071   :  { %6845 = vperm.xlu0 %9046, %v6840_v25   ;;  %v6959_v25 = vmul.f32 %v6920_v35, %v6882_v2 }
0x2072   :  { %v9285_v29 = vpop.eup %9284  ;;  %v6966_v42 = vsel %vm55_vm0, %v6958_v57, 0.0  ;;  %v7012_v41 = vsel %vm55_vm0, %v7004_v54, 0.0  ;;  %v6970_v0 = vsel %vm55_vm0, %v6960_v8, 0.0 }
0x2073   :  { %v6741_v4 = vmul.f32 %v9285_v29, %v6739_v50  ;;  %vm6746_vm10 = vweird.f32 %v9285_v29  ;;  %v6967_v12 = vadd.f32 %v6966_v42, %v6965_v52  ;;  %v7013_v22 = vadd.f32 %v7012_v41, %v7011_v55  ;;  %v6932_v42 = vld [vmem:[#allocation3 + $0x18] sm:$0xf] }
0x2074   :  { %vm12622_vm5 = vmor %vm6745_vm8, %vm6746_vm10  ;;  %v6968_v44 = vsel %vm55_vm0, %v6959_v25, 0.0 }
0x2075   :  { %v6742_v27 = vsub.f32 1.0, %v6741_v4 }
0x2077   :  { %v12613_v16 = vpop.permute.xlu1 %6831  ;;  %v6743_v33 = vmul.f32 %v9285_v29, %v6742_v27  ;;  %v6946_v27 = vadd.f32 %v6945_v30, %v6944_v58 }
0x2078   :  { %v6937_v3 = vmul.f32 %v6921_v36, %v12613_v16 }
0x2079   :  { %6909 = vperm.xlu0 %9046, %v6904_v38   ;;  %v6744_v45 = vadd.f32 %v9285_v29, %v6743_v33  ;;  %v6988_v38 = vsel %vm55_vm0, %v6980_v62, 0.0 }
0x207a   :  { %v6947_v6 = vsel %vm55_vm0, %v6937_v3, 0.0  ;;  %v6990_v4 = vadd.f32 %v6989_v59, %v6988_v38 }
0x207b   :  { %v6748_v11 = vsel %vm12622_vm5, %v9285_v29, %v6744_v45  ;;  %v6983_v29 = vmul.f32 %v6929_v32, %v12613_v16  ;;  %v6991_v45 = vsel %vm55_vm0, %v6982_v40, 0.0  ;;  %v6948_v47 = vadd.f32 %v6947_v6, %v6946_v27 }
0x207c   :  { %v6753_v21 = vsel %vm6750_vm6, %v6752_v31, %v6748_v11  ;;  %v6860_v11 = vpop.permute.xlu2 %6859  ;;  %v6992_v31 = vadd.f32 %v6991_v45, %v6990_v4 }
0x207d   :  { %v6993_v19 = vsel %vm55_vm0, %v6983_v29, 0.0 }
0x207e   :  { %v6994_v61 = vadd.f32 %v6993_v19, %v6992_v31  ;;  %v8718_v31 = vld [vmem:[%s13089_s10 + $0x48] sm:$0xf0] }
0x207f   :  { %v12615_v46 = vpop.permute.xlu1 %6895 }
0x2080   :  { %v6996_v38 = vadd.f32 %v6995_v53, %v6994_v61  ;;  %v8726_v53 = vld [vmem:[%s13089_s10 + $0x58] sm:$0xf0]  ;;  %v9010_v61 = vld [vmem:[%s13089_s10 + $0x24] sm:$0xf0] }
0x2087   :  { %v12617_v5 = vpop.permute.xlu1 %6852 }
0x2088   :  { %v6940_v37 = vmul.f32 %v6924_v9, %v12617_v5  ;;  %v6986_v8 = vmul.f32 %v6932_v42, %v12617_v5 }
0x208a   :  { %v6953_v3 = vsel %vm55_vm0, %v6940_v37, 0.0  ;;  %v6999_v27 = vsel %vm55_vm0, %v6986_v8, 0.0 }
0x208f   :  { %v12619_v28 = vpop.permute.xlu1 %6916 }
0x20d6   :  { %v6791_v24 = vpop.permute.xlu1 %6790 }
0x20d7   :  { %6793 = vst.msk [vmem:[#allocation3 + $0x14] sm:$0xf] %vm55_vm0, %v6791_v24  ;;  %v7014_v24 = vsel %vm55_vm0, %v7005_v20, 0.0 }
0x20d8   :  { %v7015_v43 = vadd.f32 %v7014_v24, %v7013_v22 }
0x20db   :  { %v6783_v13 = vpop.permute.xlu0 %6782 }
0x20dc   :  { %v6785_v18 = vmul.f32 %v6783_v13, %v6753_v21  ;;  %v6941_v13 = vmul.f32 %v6925_v51, %v6860_v11 }
0x20de   :  { %v6786_v39 = vmul.f32 %v6785_v18, %v12605_v56  ;;  %v6922_v56 = vld [vmem:[#allocation2 + $0x10] sm:$0xf]  ;;  %v6931_v35 = vld [vmem:[#allocation3 + $0x14] sm:$0xf]  ;;  %v7007_v18 = vmul.f32 %v6930_v1, %v12615_v46  ;;  %v6955_v30 = vsel %vm55_vm0, %v6941_v13, 0.0 }
0x20df   :  { %v6938_v50 = vmul.f32 %v6922_v56, %v6839_v48  ;;  %v6961_v2 = vmul.f32 %v6922_v56, %v12615_v46  ;;  %v6969_v48 = vadd.f32 %v6968_v44, %v6967_v12  ;;  %v7008_v32 = vmul.f32 %v6931_v35, %v12629_v23  ;;  %v6933_v1 = vld [vmem:[#allocation3 + $0x1c] sm:$0xf]  ;;  %v8700_v13 = vld [vmem:[%s13089_s10 + $0x20] sm:$0xf] }
0x20e0   :  { %6787 = vst.msk [vmem:[#allocation2 + $0x14] sm:$0xf] %vm55_vm0, %v6786_v39  ;;  %v6964_v39 = vmul.f32 %v6925_v51, %v12619_v28  ;;  %v7018_v20 = vsel %vm55_vm0, %v7007_v18, 0.0  ;;  %v7017_v12 = vadd.f32 %v7016_v49, %v7015_v43  ;;  %v6987_v22 = vmul.f32 %v6933_v1, %v6860_v11  ;;  %v9016_v49 = vld [vmem:[%s13089_s10 + $0x54] sm:$0xf0] }
0x20e1   :  { %v6949_v16 = vsel %vm55_vm0, %v6938_v50, 0.0  ;;  %v6972_v14 = vsel %vm55_vm0, %v6961_v2, 0.0  ;;  %v6971_v62 = vadd.f32 %v6970_v0, %v6969_v48  ;;  %v7020_v6 = vsel %vm55_vm0, %v7008_v32, 0.0  ;;  %v8716_v51 = vld [vmem:[%s13089_s10 + $0x40] sm:$0xf] }
0x20e2   :  { %v6950_v54 = vadd.f32 %v6949_v16, %v6948_v47  ;;  %v7019_v29 = vadd.f32 %v7018_v20, %v7017_v12  ;;  %v7010_v44 = vmul.f32 %v6933_v1, %v12619_v28  ;;  %v8724_v47 = vld [vmem:[%s13089_s10 + $0x50] sm:$0xf]  ;;  %v9015_v28 = vld [vmem:[%s13089_s10 + $0x54] sm:$0xf]  ;;  %v9014_v11 = vld [vmem:[%s13089_s10 + $0x44] sm:$0xf0] }
0x20e3   :  { %v6846_v33 = vpop.permute.xlu0 %6845  ;;  %v6973_v17 = vadd.f32 %v6972_v14, %v6971_v62  ;;  %v8725_v16 = vor.u32 %v9016_v49, %v8724_v47  ;;  %v8729_v19 = vor.u32 %v9015_v28, %v8726_v53  ;;  %v9013_v43 = vld [vmem:[%s13089_s10 + $0x44] sm:$0xf]  ;;  %v8717_v37 = vor.u32 %v9014_v11, %v8716_v51  ;;  %v9012_v14 = vld [vmem:[%s13089_s10 + $0x34] sm:$0xf0]  ;;  %v8702_v18 = vld [vmem:[%s13089_s10 + $0x28] sm:$0xf0] }
0x20e4   :  { %v6985_v21 = vmul.f32 %v6931_v35, %v6846_v33  ;;  %v7021_v45 = vadd.f32 %v7020_v6, %v7019_v29  ;;  %v7024_v0 = vsel %vm55_vm0, %v7010_v44, 0.0  ;;  %v8708_v35 = vld [vmem:[%s13089_s10 + $0x30] sm:$0xf]  ;;  %v9005_v32 = vld [vmem:[%s13089_s10 + $0x4] sm:$0xf]  ;;  %v12780_v49 = vld [vmem:[%s13082_s3 + $0x38] sm:$0xff] }
0x20e5   :  { %7120 = vmatpush.bf16.msrb.mxu2 %v8725_v16  ;;  %7133 = vmatpush.bf16.msrb.mxu3 %v8729_v19  ;;  %v12764_v1 = vld [vmem:[%s13090_s11] sm:$0x3]  ;;  %v7311_v19 = vperm.slane %v12780_v49, 3 }
0x20e6   :  { %v6997_v40 = vsel %vm55_vm0, %v6985_v21, 0.0  ;;  %v8710_v21 = vld [vmem:[%s13089_s10 + $0x38] sm:$0xf0]  ;;  %v7051_v12 = vperm.slane %v12764_v1, 0 }
0x20e7   :  { %v6923_v15 = vld [vmem:[#allocation2 + $0x14] sm:$0xf]  ;;  %v6998_v50 = vadd.f32 %v6997_v40, %v6996_v38  ;;  %v9006_v40 = vld [vmem:[%s13089_s10 + $0x4] sm:$0xf0]  ;;  %v6795_v38 = vld [vmem:[#allocation4 + $0x18] sm:$0xf] }
0x20e8   :  { %v12654_v57 = vld [vmem:[#allocation2 + $0x14] sm:$0xf]  ;;  %v6962_v34 = vmul.f32 %v6923_v15, %v12629_v23  ;;  %v6939_v63 = vmul.f32 %v6923_v15, %v6846_v33  ;;  %v8721_v15 = vor.u32 %v9013_v43, %v8718_v31 }
0x20e9   :  { %v7668_v59 = vsel %vm7658_vm9, %v12654_v57, 0.0  ;;  %v7000_v33 = vadd.f32 %v6999_v27, %v6998_v50  ;;  %7121 = vmatpush.bf16.msrb.mxu2 %v8717_v37  ;;  %v12773_v27 = vld [vmem:[%s13081_s2 + $0x38] sm:$0xff] }
0x20ea   :  { %v6974_v10 = vsel %vm55_vm0, %v6962_v34, 0.0  ;;  %v6951_v36 = vsel %vm55_vm0, %v6939_v63, 0.0  ;;  %v12668_v58 = vadd.f32 %v7668_v59, %v12451_v26  ;;  %v6978_v26 = vsel %vm55_vm0, %v6964_v39, 0.0  ;;  %7134 = vmatpush.bf16.msrb.mxu3 %v8721_v15  ;;  %v9011_v34 = vld [vmem:[%s13089_s10 + $0x34] sm:$0xf] }
0x20eb   :  { %v6952_v52 = vadd.f32 %v6951_v36, %v6950_v54  ;;  %v6910_v55 = vpop.permute.xlu0 %6909  ;;  %v6975_v41 = vadd.f32 %v6974_v10, %v6973_v17  ;;  %v8709_v63 = vor.u32 %v9012_v14, %v8708_v35  ;;  %v8713_v62 = vor.u32 %v9011_v34, %v8710_v21  ;;  %v9009_v54 = vld [vmem:[%s13089_s10 + $0x24] sm:$0xf]  ;;  %v8692_v59 = vld [vmem:[%s13089_s10 + $0x10] sm:$0xf]  ;;  %v9008_v17 = vld [vmem:[%s13089_s10 + $0x14] sm:$0xf0] }
0x20ec   :  { %v6963_v46 = vmul.f32 %v6924_v9, %v6910_v55  ;;  %v7009_v56 = vmul.f32 %v6932_v42, %v6910_v55  ;;  %v7001_v9 = vsel %vm55_vm0, %v6987_v22, 0.0  ;;  %v8701_v10 = vor.u32 %v9010_v61, %v8700_v13  ;;  %v9007_v42 = vld [vmem:[%s13089_s10 + $0x14] sm:$0xf]  ;;  %v8684_v55 = vld [vmem:[%s13089_s10] sm:$0xf] }
0x20ed   :  { %v6954_v25 = vadd.f32 %v6953_v3, %v6952_v52  ;;  %v7002_v24 = vadd.f32 %v7001_v9, %v7000_v33  ;;  %7122 = vmatpush.bf16.msrb.mxu2 %v8709_v63  ;;  %v8705_v36 = vor.u32 %v9009_v54, %v8702_v18  ;;  %v8694_v3 = vld [vmem:[%s13089_s10 + $0x18] sm:$0xf0]  ;;  %v8693_v39 = vor.u32 %v9008_v17, %v8692_v59  ;;  %v9098_v15 = vld [vmem:[%s13080_s1 + $0x6] ss:$0 sm:$0xff] }
0x20ee   :  { %v6976_v7 = vsel %vm55_vm0, %v6963_v46, 0.0  ;;  %v7022_v5 = vsel %vm55_vm0, %v7009_v56, 0.0  ;;  %7135 = vmatpush.bf16.msrb.mxu3 %v8713_v62  ;;  %v8697_v52 = vor.u32 %v9007_v42, %v8694_v3  ;;  %v8685_v46 = vor.u32 %v9006_v40, %v8684_v55  ;;  %v7354_v42 = vld [vmem:[#allocation3] sm:$0xf]  ;;  %v7355_v3 = vld [vmem:[#allocation3 + $0x4] sm:$0xf] }
0x20ef   :  { %v6977_v23 = vadd.f32 %v6976_v7, %v6975_v41  ;;  %v6956_v60 = vadd.f32 %v6955_v30, %v6954_v25  ;;  %v7023_v2 = vadd.f32 %v7022_v5, %v7021_v45  ;;  %v8686_v30 = vld [vmem:[%s13089_s10 + $0x8] sm:$0xf0]  ;;  %v7240_v33 = vperm.slane %v12773_v27, 1 }
0x20f0   :  { %v8689_v25 = vor.u32 %v9005_v32, %v8686_v30  ;;  %v7233_v37 = vperm.slane %v12773_v27, 0  ;;  %v7297_v35 = vperm.slane %v12780_v49, 1  ;;  %v7290_v14 = vperm.slane %v12780_v49, 0  ;;  %v7356_v32 = vld [vmem:[#allocation3 + $0x8] sm:$0xf] }
0x20f1   :  { %v6979_v4 = vadd.f32 %v6978_v26, %v6977_v23  ;;  %7027 = vrot.lane.b32.xlu0 %v6956_v60, %s9343_s19  ;;  %v7025_v48 = vadd.f32 %v7024_v0, %v7023_v2  ;;  %7123 = vmatpush.bf16.msrb.mxu2 %v8701_v10  ;;  %v7247_v2 = vperm.slane %v12773_v27, 2  ;;  %v7254_v34 = vperm.slane %v12773_v27, 3 }
0x20f2   :  { %7136 = vmatpush.bf16.msrb.mxu3 %v8705_v36  ;;  %v7304_v63 = vperm.slane %v12780_v49, 2  ;;  %v7318_v21 = vperm.slane %v12780_v49, 4  ;;  %v7261_v13 = vperm.slane %v12773_v27, 4  ;;  %v7275_v61 = vperm.slane %v12773_v27, 6 }
0x20f3   :  { %7031 = vrot.lane.b32.xlu2 %v6979_v4, %s9342_s18  ;;  %v7325_v62 = vperm.slane %v12780_v49, 5  ;;  %v7339_v54 = vperm.slane %v12780_v49, 7  ;;  %v7282_v18 = vperm.slane %v12773_v27, 7 }
0x20f5   :  { %7124 = vmatpush.bf16.msrb.mxu2 %v8693_v39 }
0x20f6   :  { %7137 = vmatpush.bf16.msrb.mxu3 %v8697_v52 }
0x20f9   :  { %7189 = vrot.lane.b32.xlu0 %v7002_v24, %s9342_s18  ;;  %7125 = vmatpush.bf16.msrb.mxu2 %v8685_v46 }
0x20fa   :  { %7138 = vmatpush.bf16.msrb.mxu3 %v8689_v25 }
0x20fb   :  { %7199 = vrot.lane.b32.xlu2 %v7025_v48, %s9344_s20 }
0x214d   :  { %v7032_v20 = vpop.permute.xlu2 %7031 }
0x2155   :  { %v7200_v53 = vpop.permute.xlu2 %7199 }
0x2163   :  { %v7028_v41 = vpop.permute.xlu0 %7027 }
0x2164   :  { %v7034_v8 = vsel %vm311_vm1, %v6795_v38, %v7028_v41 }
0x2165   :  { %v7035_v7 = vsel %vm313_vm2, %v7034_v8, %v7032_v20  ;;  %v7357_v8 = vld [vmem:[#allocation3 + $0xc] sm:$0xf] }
0x2166   :  { %v7036_v56 = vpack.c.bf16 %v7035_v7, %v7035_v7 }
0x2168   :  { %8730 = vmatmul.msk.bf16.vlgmr.msrb.gmra.mxu2 %vm394_vm3, %v7036_v56  ;;  %8731 = vmatmul.msk.bf16.vlgmr.msrb.gmra.mxu3 %vm394_vm3, %v7036_v56 }
0x216b   :  { %v7190_v51 = vpop.permute.xlu0 %7189 }
0x21eb   :  { %v7127_v50 = vpop.f32.mrf.mxu2  ;;  %v12767_v23 = vpop.f32.mrf.mxu3 }
0x21ec   :  { %v7128_v60 = vadd.f32 %v7127_v50, %v7051_v12 }
0x21ee   :  { %9286 = vtanh.f32 %v7128_v60  ;;  %v8732_v26 = vmul.f32 -1.442695, %v7128_v60 }
0x21f0   :  { %9288 = vpow2.f32 %v8732_v26 }
0x21f3   :  { %v7129_v6 = vpop.f32.mrf.mxu2  ;;  %v7142_v29 = vpop.f32.mrf.mxu3 }
0x21f4   :  { %v9287_v4 = vpop.eup %9286 }
0x21f5   :  { %7184 = vrot.lane.b32.xlu1 %v9287_v4, %s9343_s19 }
0x21f6   :  { %v9289_v22 = vpop.eup %9288 }
0x21f7   :  { %v7148_v5 = vadd.f32 1.0, %v9289_v22 }
0x21f9   :  { %9290 = vrcp.f32 %v7148_v5  ;;  %v7160_v24 = vand.u32 2147483648, %v7148_v5  ;;  %v7158_v48 = vand.u32 2147483647, %v7148_v5  ;;  %vm7154_vm11 = vweird.f32 %v7148_v5 }
0x21fb   :  { %v7161_v28 = vor.u32 1.1754944e-38, %v7160_v24  ;;  %vm7159_vm13 = vcmp.eq.f32.partialorder %v7158_v48, 8.507059e+37 }
0x21fd   :  { %7245 = vperm.xlu1 %9047, %v7240_v33  }
0x21ff   :  { %v9291_v45 = vpop.eup %9290 }
0x2200   :  { %v7150_v44 = vmul.f32 %v9291_v45, %v7148_v5  ;;  %vm7155_vm7 = vweird.f32 %v9291_v45 }
0x2201   :  { %vm7156_vm12 = vmor %vm7154_vm11, %vm7155_vm7 }
0x2202   :  { %v7151_v9 = vsub.f32 1.0, %v7150_v44 }
0x2204   :  { %v7152_v0 = vmul.f32 %v9291_v45, %v7151_v9 }
0x2205   :  { %7252 = vperm.xlu1 %9047, %v7247_v2  }
0x2206   :  { %v7153_v47 = vadd.f32 %v9291_v45, %v7152_v0 }
0x2208   :  { %v7157_v16 = vsel %vm7156_vm12, %v9291_v45, %v7153_v47  ;;  %v7268_v45 = vperm.slane %v12773_v27, 5  ;;  %v7332_v47 = vperm.slane %v12780_v49, 6 }
0x2209   :  { %v7162_v11 = vsel %vm7159_vm13, %v7161_v28, %v7157_v16 }
0x220a   :  { %v7202_v43 = vmul.f32 %v7200_v53, %v7162_v11  ;;  %v7192_v31 = vmul.f32 %v7190_v51, %v7162_v11  ;;  %v12834_v51 = vld [vmem:[#allocation3 + $0x10] sm:$0xf] }
0x220c   :  { %7204 = vrot.lane.b32.xlu2 %v7202_v43, %s9342_s18  ;;  %7194 = vrot.lane.b32.xlu0 %v7192_v31, %s9344_s20 }
0x220d   :  { %7316 = vperm.xlu1 %9047, %v7311_v19  }
0x2214   :  { %7238 = vperm.xlu2 %9048, %v7233_v37   ;;  %6802 = vperm.xlu0 %9046, %v9098_v15  }
0x221c   :  { %7302 = vperm.xlu2 %9048, %v7297_v35   ;;  %7295 = vperm.xlu0 %9046, %v7290_v14   ;;  %v7052_v35 = vperm.slane %v12764_v1, 1 }
0x221e   :  { %v7141_v14 = vadd.f32 %v12767_v23, %v7052_v35  ;;  %v7346_v23 = vld [vmem:[#allocation2] sm:$0xf]  ;;  %v8764_v35 = vld [vmem:[%s13089_s10 + $0x38] sm:$0xf0] }
0x2224   :  { %7259 = vperm.xlu2 %9048, %v7254_v34   ;;  %7309 = vperm.xlu0 %9046, %v7304_v63   ;;  %v8733_v34 = vmul.f32 -1.442695, %v7141_v14 }
0x222c   :  { %7323 = vperm.xlu2 %9048, %v7318_v21   ;;  %7266 = vperm.xlu0 %9046, %v7261_v13  }
0x2234   :  { %7280 = vperm.xlu2 %9048, %v7275_v61   ;;  %7330 = vperm.xlu0 %9046, %v7325_v62  }
0x223c   :  { %7344 = vperm.xlu2 %9048, %v7339_v54   ;;  %7287 = vperm.xlu0 %9046, %v7282_v18  }
0x2266   :  { %v7205_v10 = vpop.permute.xlu2 %7204 }
0x2267   :  { %v7185_v36 = vpop.permute.xlu1 %7184 }
0x2268   :  { %v7187_v38 = vmul.f32 %v7185_v36, %v7162_v11 }
0x226e   :  { %v12799_v59 = vpop.permute.xlu2 %7238 }
0x226f   :  { %v12801_v17 = vpop.permute.xlu1 %7245  ;;  %v7408_v52 = vmul.f32 %v7354_v42, %v12799_v59 }
0x2270   :  { %v7409_v55 = vmul.f32 %v7355_v3, %v12801_v17 }
0x2271   :  { %v7416_v30 = vsel %vm55_vm0, %v7408_v52, 0.0  ;;  %v7362_v52 = vmul.f32 %v7346_v23, %v12799_v59 }
0x2272   :  { %v7417_v25 = vsel %vm55_vm0, %v7409_v55, 0.0 }
0x2273   :  { %v7418_v20 = vadd.f32 %v7417_v25, %v7416_v30 }
0x2276   :  { %v12803_v39 = vpop.permute.xlu2 %7302 }
0x2277   :  { %v12807_v40 = vpop.permute.xlu1 %7252  ;;  %v7432_v2 = vmul.f32 %v7355_v3, %v12803_v39 }
0x2278   :  { %v7410_v46 = vmul.f32 %v7356_v32, %v12807_v40 }
0x2279   :  { %v7440_v28 = vsel %vm55_vm0, %v7432_v2, 0.0 }
0x227a   :  { %v7419_v41 = vsel %vm55_vm0, %v7410_v46, 0.0 }
0x227b   :  { %v7420_v60 = vadd.f32 %v7419_v41, %v7418_v20  ;;  %v7370_v41 = vsel %vm55_vm0, %v7362_v52, 0.0  ;;  %v7348_v20 = vld [vmem:[#allocation2 + $0x8] sm:$0xf] }
0x227e   :  { %v12813_v7 = vpop.permute.xlu2 %7259  ;;  %v7195_v56 = vpop.permute.xlu0 %7194 }
0x227f   :  { %v7411_v12 = vmul.f32 %v7357_v8, %v12813_v7  ;;  %v7197_v50 = vadd.f32 %v7195_v56, %v7187_v38  ;;  %v12826_v9 = vpop.permute.xlu1 %7316  ;;  %v7364_v56 = vmul.f32 %v7348_v20, %v12807_v40 }
0x2280   :  { %v7434_v16 = vmul.f32 %v7357_v8, %v12826_v9 }
0x2281   :  { %v7421_v26 = vsel %vm55_vm0, %v7411_v12, 0.0  ;;  %v7207_v6 = vadd.f32 %v7205_v10, %v7197_v50  ;;  %v7349_v12 = vld [vmem:[#allocation2 + $0xc] sm:$0xf] }
0x2282   :  { %v12817_v29 = vadd.f32 %v7421_v26, %v7420_v60  ;;  %v7444_v31 = vsel %vm55_vm0, %v7434_v16, 0.0  ;;  %v7350_v16 = vld [vmem:[#allocation2 + $0x10] sm:$0xf] }
0x2283   :  { %9292 = vtanh.f32 %v7207_v6 }
0x2284   :  { %9294 = vpow2.f32 %v8733_v34  ;;  %v7388_v34 = vmul.f32 %v7349_v12, %v12826_v9 }
0x2286   :  { %v12819_v4 = vpop.permute.xlu0 %6802  ;;  %v12829_v0 = vpop.permute.xlu2 %7323 }
0x2287   :  { %v7216_v22 = vmul.f32 %v7207_v6, %v12819_v4  ;;  %v7435_v11 = vmul.f32 %v12834_v51, %v12829_v0  ;;  %v9027_v6 = vld [vmem:[%s13089_s10 + $0x54] sm:$0xf] }
0x2289   :  { %v9293_v5 = vpop.eup %9292  ;;  %7218 = vrot.lane.b32.xlu2 %v7216_v22, %s9344_s20  ;;  %v7446_v49 = vsel %vm55_vm0, %v7435_v11, 0.0 }
0x228a   :  { %7210 = vrot.lane.b32.xlu1 %v9293_v5, %s9344_s20  ;;  %v9295_v21 = vpop.eup %9294  ;;  %v8780_v5 = vld [vmem:[%s13089_s10 + $0x58] sm:$0xf0] }
0x228b   :  { %v7167_v61 = vadd.f32 1.0, %v9295_v21 }
0x228d   :  { %9296 = vrcp.f32 %v7167_v61  ;;  %v7179_v3 = vand.u32 2147483648, %v7167_v61  ;;  %vm7173_vm15 = vweird.f32 %v7167_v61  ;;  %v7177_v55 = vand.u32 2147483647, %v7167_v61 }
0x228e   :  { %v7296_v33 = vpop.permute.xlu0 %7295  ;;  %v12845_v63 = vpop.permute.xlu2 %7280 }
0x228f   :  { %v7431_v44 = vmul.f32 %v7354_v42, %v7296_v33  ;;  %v7180_v38 = vor.u32 1.1754944e-38, %v7179_v3  ;;  %v7385_v8 = vmul.f32 %v7346_v23, %v7296_v33  ;;  %vm7178_vm10 = vcmp.eq.f32.partialorder %v7177_v55, 8.507059e+37  ;;  %v8770_v33 = vld [vmem:[%s13089_s10 + $0x40] sm:$0xf]  ;;  %v9022_v3 = vld [vmem:[%s13089_s10 + $0x24] sm:$0xf0] }
0x2290   :  { %v8754_v23 = vld [vmem:[%s13089_s10 + $0x20] sm:$0xf] }
0x2291   :  { %v7439_v24 = vsel %vm55_vm0, %v7431_v44, 0.0 }
0x2292   :  { %7273 = vperm.xlu1 %9047, %v7268_v45   ;;  %v7441_v27 = vadd.f32 %v7440_v28, %v7439_v24  ;;  %v9026_v45 = vld [vmem:[%s13089_s10 + $0x44] sm:$0xf0]  ;;  %v8783_v24 = vor.u32 %v9027_v6, %v8780_v5  ;;  %v7365_v28 = vmul.f32 %v7349_v12, %v12813_v7  ;;  %v9024_v7 = vld [vmem:[%s13089_s10 + $0x34] sm:$0xf0]  ;;  %v8755_v12 = vor.u32 %v9022_v3, %v8754_v23 }
0x2293   :  { %v9297_v54 = vpop.eup %9296  ;;  %v8771_v11 = vor.u32 %v9026_v45, %v8770_v33 }
0x2294   :  { %v7169_v18 = vmul.f32 %v9297_v54, %v7167_v61  ;;  %vm7174_vm14 = vweird.f32 %v9297_v54  ;;  %7561 = vmatpush.bf16.msra.mxu1 %v8783_v24  ;;  %v7375_v61 = vsel %vm55_vm0, %v7365_v28, 0.0 }
0x2295   :  { %vm7175_vm4 = vmor %vm7173_vm15, %vm7174_vm14  ;;  %vm7690_vm14 = vcmask 257026  }
0x2296   :  { %v7310_v48 = vpop.permute.xlu0 %7309  ;;  %v12847_v13 = vpop.permute.xlu2 %7344  ;;  %v7170_v10 = vsub.f32 1.0, %v7169_v18 }
0x2297   :  { %v7433_v53 = vmul.f32 %v7356_v32, %v7310_v48  ;;  %v7347_v32 = vld [vmem:[#allocation2 + $0x4] sm:$0xf]  ;;  %v7387_v50 = vmul.f32 %v7348_v20, %v7310_v48 }
0x2298   :  { %v7171_v36 = vmul.f32 %v9297_v54, %v7170_v10  ;;  %v7363_v30 = vmul.f32 %v7347_v32, %v12801_v17  ;;  %v7386_v25 = vmul.f32 %v7347_v32, %v12803_v39  ;;  %v8778_v17 = vld [vmem:[%s13089_s10 + $0x50] sm:$0xf]  ;;  %v9028_v39 = vld [vmem:[%s13089_s10 + $0x54] sm:$0xf0]  ;;  %v9025_v48 = vld [vmem:[%s13089_s10 + $0x44] sm:$0xf] }
0x2299   :  { %v7442_v19 = vsel %vm55_vm0, %v7433_v53, 0.0  ;;  %v8779_v40 = vor.u32 %v9028_v39, %v8778_v17  ;;  %v7393_v53 = vsel %vm55_vm0, %v7385_v8, 0.0  ;;  %v7351_v10 = vld [vmem:[#allocation2 + $0x14] sm:$0xf]  ;;  %v9021_v32 = vld [vmem:[%s13089_s10 + $0x24] sm:$0xf] }
0x229a   :  { %v7443_v43 = vadd.f32 %v7442_v19, %v7441_v27  ;;  %7337 = vperm.xlu1 %9047, %v7332_v47   ;;  %v7172_v1 = vadd.f32 %v9297_v54, %v7171_v36  ;;  %v7371_v44 = vsel %vm55_vm0, %v7363_v30, 0.0  ;;  %v7394_v2 = vsel %vm55_vm0, %v7386_v25, 0.0  ;;  %v8772_v47 = vld [vmem:[%s13089_s10 + $0x48] sm:$0xf0]  ;;  %v7353_v8 = vld [vmem:[#allocation2 + $0x1c] sm:$0xf] }
0x229b   :  { %7548 = vmatpush.bf16.msrb.mxu0 %v8779_v40  ;;  %v7373_v19 = vsel %vm55_vm0, %v7364_v56, 0.0  ;;  %v7372_v14 = vadd.f32 %v7371_v44, %v7370_v41  ;;  %v7395_v21 = vadd.f32 %v7394_v2, %v7393_v53  ;;  %v7398_v25 = vsel %vm55_vm0, %v7388_v34, 0.0  ;;  %v7359_v41 = vld [vmem:[#allocation3 + $0x14] sm:$0xf] }
0x229c   :  { %v7445_v37 = vadd.f32 %v7444_v31, %v7443_v43  ;;  %v7176_v46 = vsel %vm7175_vm4, %v9297_v54, %v7172_v1  ;;  %v7396_v43 = vsel %vm55_vm0, %v7387_v50, 0.0  ;;  %v8775_v31 = vor.u32 %v9025_v48, %v8772_v47 }
0x229d   :  { %v7181_v60 = vsel %vm7178_vm10, %v7180_v38, %v7176_v46  ;;  %v7374_v54 = vadd.f32 %v7373_v19, %v7372_v14  ;;  %v7397_v18 = vadd.f32 %v7396_v43, %v7395_v21  ;;  %v8756_v46 = vld [vmem:[%s13089_s10 + $0x28] sm:$0xf0]  ;;  %v7389_v38 = vmul.f32 %v7350_v16, %v12829_v0 }
0x229e   :  { %v12841_v15 = vadd.f32 %v7446_v49, %v7445_v37  ;;  %v12850_v42 = vpop.permute.xlu0 %7266  ;;  %v8762_v37 = vld [vmem:[%s13089_s10 + $0x30] sm:$0xf]  ;;  %7562 = vmatpush.bf16.msra.mxu1 %v8775_v31  ;;  %v8759_v17 = vor.u32 %v9021_v32, %v8756_v46  ;;  %v7392_v5 = vmul.f32 %v7353_v8, %v12847_v13  ;;  %v8738_v46 = vld [vmem:[%s13089_s10] sm:$0xf] }
0x229f   :  { %v7366_v49 = vmul.f32 %v7350_v16, %v12850_v42  ;;  %7549 = vmatpush.bf16.msrb.mxu0 %v8771_v11  ;;  %v7412_v52 = vmul.f32 %v12834_v51, %v12850_v42  ;;  %v7376_v30 = vadd.f32 %v7375_v61, %v7374_v54  ;;  %v7399_v50 = vadd.f32 %v7398_v25, %v7397_v18  ;;  %v9017_v25 = vld [vmem:[%s13089_s10 + $0x4] sm:$0xf] }
0x22a0   :  { %v7400_v40 = vsel %vm55_vm0, %v7389_v38, 0.0 }
0x22a1   :  { %v7377_v9 = vsel %vm55_vm0, %v7366_v49, 0.0  ;;  %v7423_v6 = vsel %vm55_vm0, %v7412_v52, 0.0  ;;  %v7401_v28 = vadd.f32 %v7400_v40, %v7399_v50 }
0x22a2   :  { %v7424_v47 = vadd.f32 %v7423_v6, %v12817_v29 }
0x22a6   :  { %v12857_v59 = vpop.permute.xlu0 %7330 }
0x22a7   :  { %v7390_v56 = vmul.f32 %v7351_v10, %v12857_v59  ;;  %v7436_v11 = vmul.f32 %v7359_v41, %v12857_v59 }
0x22a9   :  { %v7402_v44 = vsel %vm55_vm0, %v7390_v56, 0.0  ;;  %v7448_v34 = vsel %vm55_vm0, %v7436_v11, 0.0  ;;  %v7223_v56 = vld [vmem:[#allocation4 + $0x1c] sm:$0xf] }
0x22aa   :  { %v7449_v54 = vadd.f32 %v7448_v34, %v12841_v15  ;;  %v9020_v15 = vld [vmem:[%s13089_s10 + $0x14] sm:$0xf0] }
0x22ae   :  { %v7288_v20 = vpop.permute.xlu0 %7287 }
0x22af   :  { %v7369_v0 = vmul.f32 %v7353_v8, %v7288_v20 }
0x22b1   :  { %v7383_v19 = vsel %vm55_vm0, %v7369_v0, 0.0 }
0x22e3   :  { %v7219_v62 = vpop.permute.xlu2 %7218 }
0x22e4   :  { %7221 = vst.msk [vmem:[#allocation3 + $0x18] sm:$0xf] %vm55_vm0, %v7219_v62  ;;  %v8763_v62 = vor.u32 %v9024_v7, %v8762_v37  ;;  %v7403_v37 = vadd.f32 %v7402_v44, %v7401_v28 }
0x22e6   :  { %7550 = vmatpush.bf16.msrb.mxu0 %v8763_v62 }
0x22ea   :  { %7551 = vmatpush.bf16.msrb.mxu0 %v8755_v12 }
0x22eb   :  { %v7360_v45 = vld [vmem:[#allocation3 + $0x18] sm:$0xf] }
0x22ec   :  { %v7414_v43 = vmul.f32 %v7360_v45, %v12845_v63 }
0x22ee   :  { %v7427_v21 = vsel %vm55_vm0, %v7414_v43, 0.0 }
0x22fc   :  { %v7211_v26 = vpop.permute.xlu1 %7210 }
0x22fd   :  { %v7213_v22 = vmul.f32 %v7211_v26, %v7181_v60  ;;  %v7378_v60 = vadd.f32 %v7377_v9, %v7376_v30  ;;  %v8746_v9 = vld [vmem:[%s13089_s10 + $0x10] sm:$0xf]  ;;  %v9018_v30 = vld [vmem:[%s13089_s10 + $0x4] sm:$0xf0] }
0x22fe   :  { %v8747_v52 = vor.u32 %v9020_v15, %v8746_v9  ;;  %v8739_v38 = vor.u32 %v9018_v30, %v8738_v46 }
0x22ff   :  { %v7214_v27 = vmul.f32 %v7213_v22, %v12819_v4  ;;  %v9023_v4 = vld [vmem:[%s13089_s10 + $0x34] sm:$0xf] }
0x2300   :  { %v8767_v1 = vor.u32 %v9023_v4, %v8764_v35  ;;  %v7361_v35 = vld [vmem:[#allocation3 + $0x1c] sm:$0xf]  ;;  %7552 = vmatpush.bf16.msrb.mxu0 %v8747_v52 }
0x2301   :  { %7215 = vst.msk [vmem:[#allocation2 + $0x18] sm:$0xf] %vm55_vm0, %v7214_v27  ;;  %v7415_v59 = vmul.f32 %v7361_v35, %v7288_v20  ;;  %v7438_v18 = vmul.f32 %v7361_v35, %v12847_v13  ;;  %v9019_v13 = vld [vmem:[%s13089_s10 + $0x14] sm:$0xf] }
0x2302   :  { %7563 = vmatpush.bf16.msra.mxu1 %v8767_v1 }
0x2303   :  { %v7452_v23 = vsel %vm55_vm0, %v7438_v18, 0.0 }
0x2304   :  { %v7274_v36 = vpop.permute.xlu1 %7273  ;;  %7553 = vmatpush.bf16.msrb.mxu0 %v8739_v38 }
0x2305   :  { %v7367_v55 = vmul.f32 %v7351_v10, %v7274_v36  ;;  %v7413_v42 = vmul.f32 %v7359_v41, %v7274_v36  ;;  %v7429_v10 = vsel %vm55_vm0, %v7415_v59, 0.0  ;;  %v8740_v41 = vld [vmem:[%s13089_s10 + $0x8] sm:$0xf0] }
0x2306   :  { %7564 = vmatpush.bf16.msra.mxu1 %v8759_v17  ;;  %v8743_v20 = vor.u32 %v9017_v25, %v8740_v41  ;;  %v9311_v41 = vld [vmem:[#allocation2] sm:$0xf] }
0x2307   :  { %v7379_v51 = vsel %vm55_vm0, %v7367_v55, 0.0  ;;  %v7425_v2 = vsel %vm55_vm0, %v7413_v42, 0.0  ;;  %v8748_v55 = vld [vmem:[%s13089_s10 + $0x18] sm:$0xf0]  ;;  %s7866_s10 = sshll.u32 %s9347_s29, 4  ;;  %s7867_s10 = int_to_ptr.vmem [resolvable:$true] %s7866_s10 }
0x2308   :  { %v7352_v26 = vld [vmem:[#allocation2 + $0x18] sm:$0xf]  ;;  %v7380_v33 = vadd.f32 %v7379_v51, %v7378_v60  ;;  %v7426_v7 = vadd.f32 %v7425_v2, %v7424_v47  ;;  %v8751_v32 = vor.u32 %v9019_v13, %v8748_v55  ;;  %v7477_v60 = vld [vmem:[%s13090_s11] sm:$0x3] }
0x2309   :  { %v12925_v39 = vld [vmem:[#allocation2 + $0x18] sm:$0xf]  ;;  %v7368_v22 = vmul.f32 %v7352_v26, %v12845_v63 }
0x230a   :  { %v7670_v48 = vsel %vm7658_vm9, %v12925_v39, 0.0  ;;  %v7428_v61 = vadd.f32 %v7427_v21, %v7426_v7  ;;  %7565 = vmatpush.bf16.msra.mxu1 %v8751_v32  ;;  %v9036_v13 = vld [vmem:[%s13091_s12 + $0x38] sm:$0xff]  ;;  %v9310_v32 = vld [vmem:[#allocation2 + $0x4] sm:$0xf] }
0x230b   :  { %v7381_v24 = vsel %vm55_vm0, %v7368_v22, 0.0  ;;  %v12938_v27 = vadd.f32 %v7670_v48, %v12668_v58  ;;  %v7406_v58 = vsel %vm55_vm0, %v7392_v5, 0.0  ;;  %7808 = vmatpush.bf16.msra.mxu2 %v9036_v13  ;;  %v7692_v46 = vsel %vm7690_vm14, %v9310_v32, 0.0 }
0x230c   :  { %v7382_v16 = vadd.f32 %v7381_v24, %v7380_v33  ;;  %v7338_v53 = vpop.permute.xlu1 %7337  ;;  %v7430_v1 = vadd.f32 %v7429_v10, %v7428_v61  ;;  %v7480_v61 = vperm.slane %v7477_v60, 1 }
0x230d   :  { %v7391_v31 = vmul.f32 %v7352_v26, %v7338_v53  ;;  %v7437_v29 = vmul.f32 %v7360_v45, %v7338_v53  ;;  %v7479_v26 = vperm.slane %v7477_v60, 0 }
0x230e   :  { %v7384_v49 = vadd.f32 %v7383_v19, %v7382_v16  ;;  %7566 = vmatpush.bf16.msra.mxu1 %v8743_v20  ;;  %v7691_v20 = vsel %vm7690_vm14, %v9311_v41, 0.0 }
0x230f   :  { %v7404_v4 = vsel %vm55_vm0, %v7391_v31, 0.0  ;;  %v7450_v62 = vsel %vm55_vm0, %v7437_v29, 0.0 }
0x2310   :  { %v7405_v14 = vadd.f32 %v7404_v4, %v7403_v37  ;;  %7455 = vrot.lane.b32.xlu1 %v7384_v49, %s9343_s19  ;;  %v7451_v36 = vadd.f32 %v7450_v62, %v7449_v54  ;;  %v9099_v4 = vld [vmem:[%s13080_s1 + $0x7] ss:$0 sm:$0xff]  ;;  %s7868_s1 = sshll.u32 %s13095_s16, 4  ;;  %s7869_s1 = int_to_ptr.hbm [resolvable:$true] %s7868_s1 }
0x2312   :  { %v7407_v63 = vadd.f32 %v7406_v58, %v7405_v14  ;;  %v7453_v3 = vadd.f32 %v7452_v23, %v7451_v36 }
0x2314   :  { %7459 = vrot.lane.b32.xlu0 %v7407_v63, %s9342_s18 }
0x2318   :  { %7617 = vrot.lane.b32.xlu1 %v7430_v1, %s9342_s18 }
0x231c   :  { %7627 = vrot.lane.b32.xlu0 %v7453_v3, %s9344_s20 }
0x2382   :  { %v7456_v8 = vpop.permute.xlu1 %7455 }
0x2383   :  { %v7462_v51 = vsel %vm311_vm1, %v7223_v56, %v7456_v8  ;;  %v9312_v8 = vld [vmem:[#allocation2 + $0x8] sm:$0xf] }
0x2384   :  { %v7694_v56 = vsel %vm7690_vm14, %v9312_v8, 0.0 }
0x2386   :  { %v7460_v42 = vpop.permute.xlu0 %7459 }
0x2387   :  { %v7463_v12 = vsel %vm313_vm2, %v7462_v51, %v7460_v42  ;;  %v7693_v42 = vadd.f32 %v7692_v46, %v7691_v20  ;;  %v9033_v46 = vld [vmem:[%s13091_s12 + $0x20] sm:$0xff] }
0x2388   :  { %v7464_v50 = vpack.c.bf16 %v7463_v12, %v7463_v12 }
0x238a   :  { %8784 = vmatmul.msk.bf16.vlgmr.msrb.gmra.mxu0 %vm394_vm3, %v7464_v50  ;;  %8785 = vmatmul.msk.bf16.vlgmr.msra.gmra.mxu1 %vm394_vm3, %v7464_v50  ;;  %v7618_v43 = vpop.permute.xlu1 %7617  ;;  %v9313_v50 = vld [vmem:[#allocation2 + $0xc] sm:$0xf] }
0x238b   :  { %v7696_v60 = vsel %vm7690_vm14, %v9313_v50, 0.0 }
0x238e   :  { %v7628_v31 = vpop.permute.xlu0 %7627 }
0x2407   :  { %v7555_v17 = vpop.f32.mrf.mxu0  ;;  %v7568_v6 = vpop.f32.mrf.mxu1 }
0x2408   :  { %v7556_v0 = vadd.f32 %v7555_v17, %v7479_v26  ;;  %v7569_v63 = vadd.f32 %v7568_v6, %v7480_v61  ;;  %v7695_v26 = vadd.f32 %v7694_v56, %v7693_v42  ;;  %v9314_v17 = vld [vmem:[#allocation2 + $0x10] sm:$0xf] }
0x2409   :  { %v7698_v6 = vsel %vm7690_vm14, %v9314_v17, 0.0 }
0x240a   :  { %9298 = vtanh.f32 %v7556_v0  ;;  %v8786_v22 = vmul.f32 -1.442695, %v7556_v0  ;;  %v8787_v62 = vmul.f32 -1.442695, %v7569_v63  ;;  %v7697_v0 = vadd.f32 %v7696_v60, %v7695_v26  ;;  %v9038_v26 = vld [vmem:[%s13093_s14 + $0x8] sm:$0xff] }
0x240b   :  { %7852 = vmatpush.bf16.msra.mxu3 %v9038_v26 }
0x240c   :  { %9300 = vpow2.f32 %v8786_v22  ;;  %v7675_v22 = vsel %vm7658_vm9, %v9311_v41, -inf }
0x240f   :  { %v7557_v40 = vpop.f32.mrf.mxu0  ;;  %v7570_v5 = vpop.f32.mrf.mxu1 }
0x2410   :  { %v9299_v33 = vpop.eup %9298  ;;  %v7700_v40 = vsel %vm7690_vm14, %v12654_v57, 0.0  ;;  %v7676_v5 = vsel %vm7658_vm9, %v9310_v32, -inf }
0x2411   :  { %7612 = vrot.lane.b32.xlu2 %v9299_v33, %s9343_s19  ;;  %v7707_v33 = vsel %vm7690_vm14, %v9311_v41, -inf }
0x2412   :  { %v9301_v45 = vpop.eup %9300 }
0x2413   :  { %v7576_v44 = vadd.f32 1.0, %v9301_v45  ;;  %v7708_v45 = vsel %vm7690_vm14, %v9310_v32, -inf  ;;  %v9034_v32 = vld [vmem:[%s13091_s12 + $0x28] sm:$0xff] }
0x2415   :  { %9302 = vrcp.f32 %v7576_v44  ;;  %v7588_v47 = vand.u32 2147483648, %v7576_v44  ;;  %v7586_v16 = vand.u32 2147483647, %v7576_v44  ;;  %vm7582_vm5 = vweird.f32 %v7576_v44 }
0x2417   :  { %v7589_v11 = vor.u32 1.1754944e-38, %v7588_v47  ;;  %vm7587_vm7 = vcmp.eq.f32.partialorder %v7586_v16, 8.507059e+37  ;;  %v7702_v47 = vsel %vm7690_vm14, %v12925_v39, 0.0  ;;  %v7713_v16 = vsel %vm7690_vm14, %v12654_v57, -inf }
0x241b   :  { %v9303_v2 = vpop.eup %9302 }
0x241c   :  { %v7578_v24 = vmul.f32 %v9303_v2, %v7576_v44  ;;  %vm7583_vm8 = vweird.f32 %v9303_v2  ;;  %v7699_v44 = vadd.f32 %v7698_v6, %v7697_v0  ;;  %v9100_v6 = vld [vmem:[%s13092_s13] ss:$0 sm:$0xff] }
0x241d   :  { %vm7584_vm6 = vmor %vm7582_vm5, %vm7583_vm8 }
0x241e   :  { %v7579_v48 = vsub.f32 1.0, %v7578_v24  ;;  %v7681_v24 = vsel %vm7658_vm9, %v12654_v57, -inf }
0x2420   :  { %v7580_v28 = vmul.f32 %v9303_v2, %v7579_v48  ;;  %v7711_v48 = vsel %vm7690_vm14, %v9314_v17, -inf }
0x2422   :  { %v7581_v53 = vadd.f32 %v9303_v2, %v7580_v28  ;;  %v7683_v28 = vsel %vm7658_vm9, %v12925_v39, -inf }
0x2424   :  { %v7585_v19 = vsel %vm7584_vm6, %v9303_v2, %v7581_v53  ;;  %v7679_v2 = vsel %vm7658_vm9, %v9314_v17, -inf  ;;  %v7715_v53 = vsel %vm7690_vm14, %v12925_v39, -inf  ;;  %v9037_v17 = vld [vmem:[%s13093_s14] sm:$0xff] }
0x2425   :  { %v7590_v37 = vsel %vm7587_vm7, %v7589_v11, %v7585_v19  ;;  %v7701_v11 = vadd.f32 %v7700_v40, %v7699_v44  ;;  %v7677_v19 = vsel %vm7658_vm9, %v9312_v8, -inf  ;;  %7853 = vmatpush.bf16.msra.mxu3 %v9037_v17 }
0x2426   :  { %v7630_v7 = vmul.f32 %v7628_v31, %v7590_v37  ;;  %v7620_v49 = vmul.f32 %v7618_v43, %v7590_v37  ;;  %v7678_v43 = vsel %vm7658_vm9, %v9313_v50, -inf  ;;  %v7709_v31 = vsel %vm7690_vm14, %v9312_v8, -inf }
0x2427   :  { %v7716_v57 = vmax.f32 %v7709_v31, %v7715_v53 }
0x2428   :  { %7632 = vrot.lane.b32.xlu0 %v7630_v7, %s9342_s18  ;;  %7622 = vrot.lane.b32.xlu1 %v7620_v49, %s9344_s20  ;;  %v7682_v7 = vmax.f32 %v7676_v5, %v7681_v24  ;;  %v7710_v49 = vsel %vm7690_vm14, %v9313_v50, -inf }
0x2430   :  { %7230 = vperm.xlu1 %9047, %v9099_v4   ;;  %v7712_v4 = vmax.f32 %v7707_v33, %v7711_v48 }
0x246b   :  { %v7613_v29 = vpop.permute.xlu2 %7612 }
0x246c   :  { %v7615_v35 = vmul.f32 %v7613_v29, %v7590_v37  ;;  %v7680_v37 = vmax.f32 %v7675_v22, %v7679_v2 }
0x249a   :  { %v7623_v14 = vpop.permute.xlu1 %7622  ;;  %v7633_v34 = vpop.permute.xlu0 %7632 }
0x249b   :  { %v7625_v58 = vadd.f32 %v7623_v14, %v7615_v35  ;;  %v7703_v35 = vadd.f32 %v7702_v47, %v7701_v11  ;;  %v7684_v14 = vmax.f32 %v7677_v19, %v7683_v28 }
0x249d   :  { %v12993_v59 = vadd.f32 %v7633_v34, %v7625_v58  ;;  %v7714_v58 = vmax.f32 %v7708_v45, %v7713_v16  ;;  %v9101_v45 = vld [vmem:[%s13094_s15] ss:$0 sm:$0xff] }
0x249f   :  { %9304 = vtanh.f32 %v12993_v59 }
0x24a0   :  { %9306 = vpow2.f32 %v8787_v62 }
0x24a2   :  { %v7231_v51 = vpop.permute.xlu1 %7230 }
0x24a5   :  { %v9305_v21 = vpop.eup %9304 }
0x24a6   :  { %7638 = vrot.lane.b32.xlu2 %v9305_v21, %s9344_s20  ;;  %v9307_v54 = vpop.eup %9306 }
0x24a7   :  { %v7595_v18 = vadd.f32 1.0, %v9307_v54 }
0x24a9   :  { %9308 = vrcp.f32 %v7595_v18  ;;  %v7607_v9 = vand.u32 2147483648, %v7595_v18  ;;  %vm7601_vm12 = vweird.f32 %v7595_v18  ;;  %v7605_v15 = vand.u32 2147483647, %v7595_v18 }
0x24ab   :  { %v7608_v55 = vor.u32 1.1754944e-38, %v7607_v9  ;;  %vm7606_vm15 = vcmp.eq.f32.partialorder %v7605_v15, 8.507059e+37 }
0x24af   :  { %v9309_v10 = vpop.eup %9308 }
0x24b0   :  { %v7597_v36 = vmul.f32 %v9309_v10, %v7595_v18  ;;  %vm7602_vm11 = vweird.f32 %v9309_v10 }
0x24b1   :  { %vm7603_vm13 = vmor %vm7601_vm12, %vm7602_vm11 }
0x24b2   :  { %v7598_v1 = vsub.f32 1.0, %v7597_v36 }
0x24b4   :  { %v7599_v23 = vmul.f32 %v9309_v10, %v7598_v1 }
0x24b6   :  { %v7600_v3 = vadd.f32 %v9309_v10, %v7599_v23  ;;  %v7719_v23 = vmax.f32 %v7712_v4, %v7714_v58 }
0x24b8   :  { %v7604_v52 = vsel %vm7603_vm13, %v9309_v10, %v7600_v3  ;;  %v7687_v10 = vmax.f32 %v7680_v37, %v7682_v7 }
0x24b9   :  { %v7609_v30 = vsel %vm7606_vm15, %v7608_v55, %v7604_v52  ;;  %v7644_v55 = vmul.f32 %v12993_v59, %v7231_v51  ;;  %v9032_v59 = vld [vmem:[%s13091_s12 + $0x18] sm:$0xff] }
0x2500   :  { %v7639_v25 = vpop.permute.xlu2 %7638 }
0x2501   :  { %v7641_v38 = vmul.f32 %v7639_v25, %v7609_v30  ;;  %v9031_v30 = vld [vmem:[%s13091_s12 + $0x10] sm:$0xff]  ;;  %v9030_v25 = vld [vmem:[%s13091_s12 + $0x8] sm:$0xff] }
0x2503   :  { %v7642_v12 = vmul.f32 %v7641_v38, %v7231_v51  ;;  %v9029_v38 = vld [vmem:[%s13091_s12] sm:$0xff] }
0x2505   :  { %7643 = vst.msk [vmem:[#allocation2 + $0x1c] sm:$0xf] %vm55_vm0, %v7642_v12 }
0x250c   :  { %v7657_v29 = vld [vmem:[#allocation2 + $0x1c] sm:$0xf] }
0x250d   :  { %v7704_v34 = vsel %vm7690_vm14, %v7657_v29, 0.0  ;;  %v7685_v39 = vsel %vm7658_vm9, %v7657_v29, -inf  ;;  %v7717_v21 = vsel %vm7690_vm14, %v7657_v29, -inf  ;;  %v7672_v61 = vsel %vm7658_vm9, %v7657_v29, 0.0 }
0x250e   :  { %v7705_v63 = vadd.f32 %v7704_v34, %v7703_v35  ;;  %v7686_v62 = vmax.f32 %v7678_v43, %v7685_v39  ;;  %v7718_v54 = vmax.f32 %v7710_v49, %v7717_v21  ;;  %v7673_v18 = vadd.f32 %v7672_v61, %v12938_v27  ;;  %v9035_v27 = vld [vmem:[%s13091_s12 + $0x30] sm:$0xff] }
0x250f   :  { %7809 = vmatpush.bf16.msra.mxu2 %v9035_v27 }
0x2510   :  { %v7706_v36 = vmul.f32 0.125, %v7705_v63  ;;  %v7688_v1 = vmax.f32 %v7684_v14, %v7686_v62  ;;  %v7720_v3 = vmax.f32 %v7716_v57, %v7718_v54  ;;  %v7674_v41 = vmul.f32 0.125, %v7673_v18 }
0x2512   :  { %v7727_v9 = vrot.slane %v7706_v36, 2  ;;  %v7689_v15 = vmax.f32 %v7687_v10, %v7688_v1  ;;  %v7721_v13 = vmax.f32 %v7719_v23, %v7720_v3 }
0x2513   :  { %7810 = vmatpush.bf16.msra.mxu2 %v9034_v32 }
0x2514   :  { %7728 = vrot.lane.b32.xlu2 %v7727_v9, %s9342_s18  ;;  %7723 = vrot.lane.b32.xlu0 %v7689_v15, %s9343_s19  ;;  %v7732_v52 = vrot.slane %v7721_v13, 2 }
0x2516   :  { %7733 = vrot.lane.b32.xlu1 %v7732_v52, %s9344_s20 }
0x2517   :  { %7811 = vmatpush.bf16.msra.mxu2 %v9033_v46 }
0x251b   :  { %7812 = vmatpush.bf16.msra.mxu2 %v9032_v59 }
0x251c   :  { %7646 = vrot.lane.b32.xlu0 %v7644_v55, %s9344_s20 }
0x251f   :  { %7813 = vmatpush.bf16.msra.mxu2 %v9031_v30 }
0x2523   :  { %7814 = vmatpush.bf16.msra.mxu2 %v9030_v25 }
0x2527   :  { %7815 = vmatpush.bf16.msra.mxu2 %v9029_v38 }
0x256e   :  { %v7729_v8 = vpop.permute.xlu2 %7728 }
0x2586   :  { %v7724_v20 = vpop.permute.xlu0 %7723 }
0x2587   :  { %v7736_v56 = vsel %vm311_vm1, %v7674_v41, %v7724_v20 }
0x2588   :  { %v7734_v51 = vpop.permute.xlu1 %7733  ;;  %v7737_v42 = vsel %vm313_vm2, %v7736_v56, %v7729_v8 }
0x2589   :  { %v7738_v12 = vsel %vm394_vm3, %v7737_v42, %v7734_v51 }
0x258a   :  { %v7739_v50 = vpack.c.bf16 %v7738_v12, %v7738_v12 }
0x258c   :  { %7816 = vmatmul.bf16.vlgmr.msra.gmra.mxu2 %v7739_v50 }
0x258e   :  { %v7647_v60 = vpop.permute.xlu0 %7646 }
0x258f   :  { %7649 = vst.msk [vmem:[#allocation3 + $0x1c] sm:$0xf] %vm55_vm0, %v7647_v60  ;;  %vm7859_vm0 = vcmask 17408  }
0x260f   :  { %v7817_v0 = vpop.f32.mrf.mxu2 }
0x2610   :  { %v7818_v22 = vadd.f32 %v9100_v6, %v7817_v0 }
0x2612   :  { %v7821_v40 = vmax.f32 %v7818_v22, 0.0 }
0x2614   :  { %v7822_v5 = vpack.c.bf16 %v7821_v40, %v7821_v40 }
0x2616   :  { %8828 = vmatmul.msk.bf16.vlgmr.msra.gmra.mxu3 %vm311_vm1, %v7822_v5 }
0x2617   :  { %v7819_v33 = vpop.f32.mrf.mxu2 }
0x2699   :  { %v7855_v44 = vpop.f32.mrf.mxu3 }
0x269a   :  { %v7856_v2 = vadd.f32 %v9101_v45, %v7855_v44 }
0x269c   :  { %7860 = vst.msk [vmem:[#allocation5] sm:$0x3] %vm7859_vm0, %v7856_v2 }
0x269d   :  { %7871 = dma.vmem_to_hbm [thread:$0]  %s7867_s10, 32, %s7869_s1, [#allocation6]  }
0x26a1   :  { %v7857_v24 = vpop.f32.mrf.mxu3 }
0x26a2   :  { %9339 = dma.done.wait [#allocation6], 32  }
0x26a3   :  { %9340 = vsyncadd [#allocation6], 4294967264 }
0x26a4   :  { %7876 = vsyncpa [#allocation6], 1 }

</bundles_post_ra>
